<compile_context>
chip_gen: v7x
topology: tpu7x:2x2x1
jax: 0.10.0
libtpu: 0.0.40
codegen_flags: <defaults>
</compile_context>

<pallas_src>
import jax
import jax.numpy as jnp
from jax.experimental import pallas as pl
from jax.experimental.pallas import tpu as pltpu


INPUT_DIM = 32 * 32 * 3           # 3072
HIDDEN1, HIDDEN2, HIDDEN3 = 512, 256, 128
NUM_CLASSES = 10
PADDED_CLASSES = 128              # lane-dense final layer (zero-padded 10 -> 128)


def mlp_kernel(x_ref,
               w1_ref, b1_ref,
               w2_ref, b2_ref,
               w3_ref, b3_ref,
               w4_ref, b4_ref,
               out_ref):
    """Fused forward pass for one (TILE_B, 3072) batch tile.

    Weights/biases have constant index_maps, so they are fetched once and stay
    resident in VMEM across grid steps; only the f32 input tile and the
    (TILE_B, 128) f32 output tile stream per step, overlapped with the 4 MXU
    matmuls (bf16 x bf16 -> f32 accumulation). The f32->bf16 input cast is done
    here on the VPU so the HBM side only ever reads the input once.
    """
    x = x_ref[...].astype(jnp.bfloat16)

    h = jnp.dot(x, w1_ref[...], preferred_element_type=jnp.float32) + b1_ref[...]
    h = jnp.maximum(h, 0.0).astype(jnp.bfloat16)

    h = jnp.dot(h, w2_ref[...], preferred_element_type=jnp.float32) + b2_ref[...]
    h = jnp.maximum(h, 0.0).astype(jnp.bfloat16)

    h = jnp.dot(h, w3_ref[...], preferred_element_type=jnp.float32) + b3_ref[...]
    h = jnp.maximum(h, 0.0).astype(jnp.bfloat16)

    out = jnp.dot(h, w4_ref[...], preferred_element_type=jnp.float32) + b4_ref[...]
    out_ref[...] = out.astype(out_ref.dtype)


def _round_up(x, m):
    return ((x + m - 1) // m) * m


def _cdiv(a, b):
    return (a + b - 1) // b


def _vmem_capacity_bytes():
    """Physical VMEM per core; conservative 64 MiB fallback (v7x) if unknown."""
    try:
        return int(pltpu.get_tpu_info().vmem_capacity_bytes)
    except Exception:
        return 64 << 20


def _per_step_vmem_bytes(tb, weight_bytes):
    """Rough per-grid-step VMEM footprint for tile size `tb` (rows)."""
    # f32 input tile and f32 output tile, double-buffered by the pipeline.
    io = 2 * tb * (INPUT_DIM * 4 + PADDED_CLASSES * 4)
    # bf16 copy of x plus f32/bf16 activation temporaries inside the body.
    act = tb * (INPUT_DIM * 2
                + (HIDDEN1 + HIDDEN2 + HIDDEN3) * 6
                + PADDED_CLASSES * 4)
    # Charge weights twice so compilation is safe even if the resident blocks
    # end up default double-buffered (fallback path without pipeline_mode).
    return 2 * weight_bytes + io + act


def mlp_baseline_forward(x_nchw, params, *, tile_b=512):
    """x_nchw: (B, 3, 32, 32) float32 (NCHW). Returns logits (B, 10) float32."""
    B = x_nchw.shape[0]
    # == torch x.view(B, -1); stays f32 — the bf16 cast happens in-kernel.
    x_flat = x_nchw.reshape(B, -1).astype(jnp.float32)

    (w1, b1), (w2, b2), (w3, b3), (w4, b4) = params
    weight_bytes = sum(int(w.size) * w.dtype.itemsize + int(b.size) * b.dtype.itemsize
                       for (w, b) in params)

    vmem_cap = _vmem_capacity_bytes()
    vmem_usable = max(vmem_cap - (8 << 20), 16 << 20)   # headroom for Mosaic scratch

    # Balanced batch tile: minimizes zero-row padding (tb ~= B / ceil(B/tile_b)),
    # multiple of 8 sublanes, then shrunk until the per-step footprint fits.
    n_tiles = max(1, _cdiv(B, tile_b))
    tb = max(8, _round_up(_cdiv(B, n_tiles), 8))
    while tb > 8 and _per_step_vmem_bytes(tb, weight_bytes) > vmem_usable:
        tb = max(8, _round_up(tb // 2, 8))

    B_pad = _round_up(B, tb)
    if B_pad != B:
        x_flat = jnp.pad(x_flat, ((0, B_pad - B), (0, 0)))

    grid = (B_pad // tb,)

    vmem_limit = int(1.25 * _per_step_vmem_bytes(tb, weight_bytes)) + (4 << 20)
    vmem_limit = min(max(vmem_limit, 16 << 20), vmem_usable)

    flops = 2 * B_pad * (INPUT_DIM * HIDDEN1 + HIDDEN1 * HIDDEN2
                         + HIDDEN2 * HIDDEN3 + HIDDEN3 * PADDED_CLASSES)
    bytes_accessed = (int(x_flat.size) * 4          # f32 input stream (in-kernel cast)
                      + weight_bytes                # resident weights, fetched once
                      + B_pad * PADDED_CLASSES * 4) # f32 output
    cost = pl.CostEstimate(flops=flops, transcendentals=0,
                           bytes_accessed=bytes_accessed)

    # Shard the batch across both TensorCores whenever there is more than one
    # tile; re-streaming the ~3.5 MB weight set on the second core is cheap.
    semantics = ("parallel",) if grid[0] >= 2 else ("arbitrary",)

    def build_call(single_buffer_weights):
        def resident(shape):
            # Constant block index -> DMA'd once, resident across the grid.
            if single_buffer_weights:
                return pl.BlockSpec(shape, lambda i: (0, 0),
                                    pipeline_mode=pl.Buffered(1))
            return pl.BlockSpec(shape, lambda i: (0, 0))

        in_specs = [
            pl.BlockSpec((tb, INPUT_DIM), lambda i: (i, 0)),   # streamed f32 x tile
            resident(w1.shape), resident(b1.shape),
            resident(w2.shape), resident(b2.shape),
            resident(w3.shape), resident(b3.shape),
            resident(w4.shape), resident(b4.shape),
        ]
        out_specs = pl.BlockSpec((tb, PADDED_CLASSES), lambda i: (i, 0))

        return pl.pallas_call(
            mlp_kernel,
            out_shape=jax.ShapeDtypeStruct((B_pad, PADDED_CLASSES), jnp.float32),
            grid=grid,
            in_specs=in_specs,
            out_specs=out_specs,
            compiler_params=pltpu.CompilerParams(
                dimension_semantics=semantics,
                vmem_limit_bytes=vmem_limit),
            cost_estimate=cost,
        )

    args = (x_flat, w1, b1, w2, b2, w3, b3, w4, b4)
    try:
        # Single-buffer the resident weight/bias blocks (saves ~3.5 MB VMEM).
        out_padded = build_call(True)(*args)
    except Exception:
        # Fallback for Pallas versions where pipeline_mode isn't supported on
        # the top-level pallas_call pipeline.
        out_padded = build_call(False)(*args)

    return out_padded[:B, :NUM_CLASSES]


def init_params(key, input_dim=INPUT_DIM, hidden1=HIDDEN1, hidden2=HIDDEN2,
                hidden3=HIDDEN3, num_classes=NUM_CLASSES):
    """Deterministic init mirroring nn.Linear's U(-1/sqrt(fan_in), 1/sqrt(fan_in)).

    Weights stored (in_features, out_features) in bfloat16 (kernel does x @ W
    with f32 accumulation). Biases stored as (1, out_features) float32. The
    final layer is zero-padded from `num_classes` to PADDED_CLASSES columns for
    lane-dense MXU/store shapes; the wrapper slices the pad off.
    """
    dims = [(input_dim, hidden1), (hidden1, hidden2),
            (hidden2, hidden3), (hidden3, num_classes)]
    params = []
    for li, (fan_in, fan_out) in enumerate(dims):
        key, kw, kb = jax.random.split(key, 3)
        bound = 1.0 / (fan_in ** 0.5)
        w = jax.random.uniform(kw, (fan_in, fan_out), jnp.float32, -bound, bound)
        b = jax.random.uniform(kb, (1, fan_out), jnp.float32, -bound, bound)
        if li == len(dims) - 1 and fan_out < PADDED_CLASSES:
            w = jnp.pad(w, ((0, 0), (0, PADDED_CLASSES - fan_out)))
            b = jnp.pad(b, ((0, 0), (0, PADDED_CLASSES - fan_out)))
        params.append((w.astype(jnp.bfloat16), b.astype(jnp.float32)))
    return params


def _reference_forward(x_nchw, params):
    """Pure-JAX reference with the same bf16-weight / f32-accumulate math."""
    h = x_nchw.reshape(x_nchw.shape[0], -1).astype(jnp.bfloat16)
    for i, (w, b) in enumerate(params):
        h = jnp.dot(h, w, preferred_element_type=jnp.float32) + b
        if i < 3:
            h = jnp.maximum(h, 0.0).astype(jnp.bfloat16)
    return h[:, :NUM_CLASSES]


if __name__ == "__main__":
    key = jax.random.PRNGKey(0)
    key_x, key_p = jax.random.split(key)

    # Small batch of CIFAR-shaped inputs (NCHW), consistent with input_dim=3072.
    x = jax.random.normal(key_x, (2, 3, 32, 32), dtype=jnp.float32)
    params = init_params(key_p)

    logits = mlp_baseline_forward(x, params)
    logits = jax.block_until_ready(logits)

    ref = _reference_forward(x, params)
    assert logits.shape == (2, NUM_CLASSES)
    assert jnp.allclose(logits, ref, atol=2e-3, rtol=2e-3), (
        float(jnp.max(jnp.abs(logits - ref))))

    print("KERNEL_OK")
</pallas_src>

<mosaic_0001>
module attributes {stable_mosaic.version = 11 : i64} {
  func.func @mlp_kernel(%arg0: i32, %arg1: memref<8x3072xf32, #tpu.memory_space<vmem>>, %arg2: memref<3072x512xbf16, #tpu.memory_space<vmem>>, %arg3: memref<1x512xf32, #tpu.memory_space<vmem>>, %arg4: memref<512x256xbf16, #tpu.memory_space<vmem>>, %arg5: memref<1x256xf32, #tpu.memory_space<vmem>>, %arg6: memref<256x128xbf16, #tpu.memory_space<vmem>>, %arg7: memref<1x128xf32, #tpu.memory_space<vmem>>, %arg8: memref<128x128xbf16, #tpu.memory_space<vmem>>, %arg9: memref<1x128xf32, #tpu.memory_space<vmem>>, %arg10: memref<8x128xf32, #tpu.memory_space<vmem>>) attributes {dimension_semantics = [#tpu.dimension_semantics<arbitrary>], iteration_bounds = array<i64: 1>, scalar_prefetch = 0 : i64, scratch_operands = 0 : i64, tpu.core_type = #tpu.core_type<tc>, window_params = [{transform_indices = @transform_0, window_bounds = array<i64: 8, 3072>}, {pipeline_mode = #tpu.pipeline_mode<synchronous>, transform_indices = @transform_1, window_bounds = array<i64: 3072, 512>}, {pipeline_mode = #tpu.pipeline_mode<synchronous>, transform_indices = @transform_2, window_bounds = array<i64: 1, 512>}, {pipeline_mode = #tpu.pipeline_mode<synchronous>, transform_indices = @transform_3, window_bounds = array<i64: 512, 256>}, {pipeline_mode = #tpu.pipeline_mode<synchronous>, transform_indices = @transform_4, window_bounds = array<i64: 1, 256>}, {pipeline_mode = #tpu.pipeline_mode<synchronous>, transform_indices = @transform_5, window_bounds = array<i64: 256, 128>}, {pipeline_mode = #tpu.pipeline_mode<synchronous>, transform_indices = @transform_6, window_bounds = array<i64: 1, 128>}, {pipeline_mode = #tpu.pipeline_mode<synchronous>, transform_indices = @transform_7, window_bounds = array<i64: 128, 128>}, {pipeline_mode = #tpu.pipeline_mode<synchronous>, transform_indices = @transform_8, window_bounds = array<i64: 1, 128>}, {transform_indices = @transform_9, window_bounds = array<i64: 8, 128>}]} {
    %c0 = arith.constant 0 : index
    %c0_0 = arith.constant 0 : index
    %0 = vector.load %arg1[%c0, %c0_0] : memref<8x3072xf32, #tpu.memory_space<vmem>>, vector<8x3072xf32>
    %1 = arith.truncf %0 : vector<8x3072xf32> to vector<8x3072xbf16>
    %c0_1 = arith.constant 0 : index
    %c0_2 = arith.constant 0 : index
    %2 = vector.load %arg2[%c0_1, %c0_2] : memref<3072x512xbf16, #tpu.memory_space<vmem>>, vector<3072x512xbf16>
    %cst = arith.constant dense<0.000000e+00> : vector<8x512xf32>
    %3 = tpu.matmul %1, %2, %cst {dimension_numbers = #tpu.dot_dimension_numbers<[1], [0], [0], [1], [0, 0, 1, 1], [], []>} : vector<8x3072xbf16>, vector<3072x512xbf16>, vector<8x512xf32> -> vector<8x512xf32>
    %c0_3 = arith.constant 0 : index
    %c0_4 = arith.constant 0 : index
    %4 = vector.load %arg3[%c0_3, %c0_4] : memref<1x512xf32, #tpu.memory_space<vmem>>, vector<1x512xf32>
    %5 = vector.broadcast %4 : vector<1x512xf32> to vector<8x512xf32>
    %6 = arith.addf %3, %5 : vector<8x512xf32>
    %cst_5 = arith.constant 0.000000e+00 : f32
    %7 = vector.broadcast %cst_5 : f32 to vector<8x512xf32>
    %8 = arith.maximumf %6, %7 : vector<8x512xf32>
    %9 = arith.truncf %8 : vector<8x512xf32> to vector<8x512xbf16>
    %c0_6 = arith.constant 0 : index
    %c0_7 = arith.constant 0 : index
    %10 = vector.load %arg4[%c0_6, %c0_7] : memref<512x256xbf16, #tpu.memory_space<vmem>>, vector<512x256xbf16>
    %cst_8 = arith.constant dense<0.000000e+00> : vector<8x256xf32>
    %11 = tpu.matmul %9, %10, %cst_8 {dimension_numbers = #tpu.dot_dimension_numbers<[1], [0], [0], [1], [0, 0, 1, 1], [], []>} : vector<8x512xbf16>, vector<512x256xbf16>, vector<8x256xf32> -> vector<8x256xf32>
    %c0_9 = arith.constant 0 : index
    %c0_10 = arith.constant 0 : index
    %12 = vector.load %arg5[%c0_9, %c0_10] : memref<1x256xf32, #tpu.memory_space<vmem>>, vector<1x256xf32>
    %13 = vector.broadcast %12 : vector<1x256xf32> to vector<8x256xf32>
    %14 = arith.addf %11, %13 : vector<8x256xf32>
    %cst_11 = arith.constant 0.000000e+00 : f32
    %15 = vector.broadcast %cst_11 : f32 to vector<8x256xf32>
    %16 = arith.maximumf %14, %15 : vector<8x256xf32>
    %17 = arith.truncf %16 : vector<8x256xf32> to vector<8x256xbf16>
    %c0_12 = arith.constant 0 : index
    %c0_13 = arith.constant 0 : index
    %18 = vector.load %arg6[%c0_12, %c0_13] : memref<256x128xbf16, #tpu.memory_space<vmem>>, vector<256x128xbf16>
    %cst_14 = arith.constant dense<0.000000e+00> : vector<8x128xf32>
    %19 = tpu.matmul %17, %18, %cst_14 {dimension_numbers = #tpu.dot_dimension_numbers<[1], [0], [0], [1], [0, 0, 1, 1], [], []>} : vector<8x256xbf16>, vector<256x128xbf16>, vector<8x128xf32> -> vector<8x128xf32>
    %c0_15 = arith.constant 0 : index
    %c0_16 = arith.constant 0 : index
    %20 = vector.load %arg7[%c0_15, %c0_16] : memref<1x128xf32, #tpu.memory_space<vmem>>, vector<1x128xf32>
    %21 = vector.broadcast %20 : vector<1x128xf32> to vector<8x128xf32>
    %22 = arith.addf %19, %21 : vector<8x128xf32>
    %cst_17 = arith.constant 0.000000e+00 : f32
    %23 = vector.broadcast %cst_17 : f32 to vector<8x128xf32>
    %24 = arith.maximumf %22, %23 : vector<8x128xf32>
    %25 = arith.truncf %24 : vector<8x128xf32> to vector<8x128xbf16>
    %c0_18 = arith.constant 0 : index
    %c0_19 = arith.constant 0 : index
    %26 = vector.load %arg8[%c0_18, %c0_19] : memref<128x128xbf16, #tpu.memory_space<vmem>>, vector<128x128xbf16>
    %cst_20 = arith.constant dense<0.000000e+00> : vector<8x128xf32>
    %27 = tpu.matmul %25, %26, %cst_20 {dimension_numbers = #tpu.dot_dimension_numbers<[1], [0], [0], [1], [0, 0, 1, 1], [], []>} : vector<8x128xbf16>, vector<128x128xbf16>, vector<8x128xf32> -> vector<8x128xf32>
    %c0_21 = arith.constant 0 : index
    %c0_22 = arith.constant 0 : index
    %28 = vector.load %arg9[%c0_21, %c0_22] : memref<1x128xf32, #tpu.memory_space<vmem>>, vector<1x128xf32>
    %29 = vector.broadcast %28 : vector<1x128xf32> to vector<8x128xf32>
    %30 = arith.addf %27, %29 : vector<8x128xf32>
    %c0_23 = arith.constant 0 : index
    %c0_24 = arith.constant 0 : index
    %31 = vector.load %arg10[%c0_23, %c0_24] : memref<8x128xf32, #tpu.memory_space<vmem>>, vector<8x128xf32>
    tpu.vector_store %arg10[%c0_23, %c0_24], %30 {strides = array<i32>} : memref<8x128xf32, #tpu.memory_space<vmem>>, vector<8x128xf32>,
    return
  }
  func.func @transform_0(%arg0: i32) -> (i32, i32) {
    %c0_i32 = arith.constant 0 : i32
    %c0_i32_0 = arith.constant 0 : i32
    return %arg0, %c0_i32 : i32, i32
  }
  func.func @transform_1(%arg0: i32) -> (i32, i32) {
    %c0_i32 = arith.constant 0 : i32
    %c0_i32_0 = arith.constant 0 : i32
    %c0_i32_1 = arith.constant 0 : i32
    return %c0_i32, %c0_i32_0 : i32, i32
  }
  func.func @transform_2(%arg0: i32) -> (i32, i32) {
    %c0_i32 = arith.constant 0 : i32
    %c0_i32_0 = arith.constant 0 : i32
    %c0_i32_1 = arith.constant 0 : i32
    return %c0_i32, %c0_i32_0 : i32, i32
  }
  func.func @transform_3(%arg0: i32) -> (i32, i32) {
    %c0_i32 = arith.constant 0 : i32
    %c0_i32_0 = arith.constant 0 : i32
    %c0_i32_1 = arith.constant 0 : i32
    return %c0_i32, %c0_i32_0 : i32, i32
  }
  func.func @transform_4(%arg0: i32) -> (i32, i32) {
    %c0_i32 = arith.constant 0 : i32
    %c0_i32_0 = arith.constant 0 : i32
    %c0_i32_1 = arith.constant 0 : i32
    return %c0_i32, %c0_i32_0 : i32, i32
  }
  func.func @transform_5(%arg0: i32) -> (i32, i32) {
    %c0_i32 = arith.constant 0 : i32
    %c0_i32_0 = arith.constant 0 : i32
    %c0_i32_1 = arith.constant 0 : i32
    return %c0_i32, %c0_i32_0 : i32, i32
  }
  func.func @transform_6(%arg0: i32) -> (i32, i32) {
    %c0_i32 = arith.constant 0 : i32
    %c0_i32_0 = arith.constant 0 : i32
    %c0_i32_1 = arith.constant 0 : i32
    return %c0_i32, %c0_i32_0 : i32, i32
  }
  func.func @transform_7(%arg0: i32) -> (i32, i32) {
    %c0_i32 = arith.constant 0 : i32
    %c0_i32_0 = arith.constant 0 : i32
    %c0_i32_1 = arith.constant 0 : i32
    return %c0_i32, %c0_i32_0 : i32, i32
  }
  func.func @transform_8(%arg0: i32) -> (i32, i32) {
    %c0_i32 = arith.constant 0 : i32
    %c0_i32_0 = arith.constant 0 : i32
    %c0_i32_1 = arith.constant 0 : i32
    return %c0_i32, %c0_i32_0 : i32, i32
  }
  func.func @transform_9(%arg0: i32) -> (i32, i32) {
    %c0_i32 = arith.constant 0 : i32
    %c0_i32_0 = arith.constant 0 : i32
    return %arg0, %c0_i32 : i32, i32
  }
}

module attributes {stable_mosaic.version = 11 : i64} {
  func.func @mlp_kernel(%arg0: i32, %arg1: memref<8x3072xf32, #tpu.memory_space<vmem>>, %arg2: memref<3072x512xbf16, #tpu.memory_space<vmem>>, %arg3: memref<1x512xf32, #tpu.memory_space<vmem>>, %arg4: memref<512x256xbf16, #tpu.memory_space<vmem>>, %arg5: memref<1x256xf32, #tpu.memory_space<vmem>>, %arg6: memref<256x128xbf16, #tpu.memory_space<vmem>>, %arg7: memref<1x128xf32, #tpu.memory_space<vmem>>, %arg8: memref<128x128xbf16, #tpu.memory_space<vmem>>, %arg9: memref<1x128xf32, #tpu.memory_space<vmem>>, %arg10: memref<8x128xf32, #tpu.memory_space<vmem>>) attributes {dimension_semantics = [#tpu.dimension_semantics<arbitrary>], iteration_bounds = array<i64: 1>, scalar_prefetch = 0 : i64, scratch_operands = 0 : i64, tpu.core_type = #tpu.core_type<tc>, window_params = [{transform_indices = @transform_0, window_bounds = array<i64: 8, 3072>}, {pipeline_mode = #tpu.pipeline_mode<synchronous>, transform_indices = @transform_1, window_bounds = array<i64: 3072, 512>}, {pipeline_mode = #tpu.pipeline_mode<synchronous>, transform_indices = @transform_2, window_bounds = array<i64: 1, 512>}, {pipeline_mode = #tpu.pipeline_mode<synchronous>, transform_indices = @transform_3, window_bounds = array<i64: 512, 256>}, {pipeline_mode = #tpu.pipeline_mode<synchronous>, transform_indices = @transform_4, window_bounds = array<i64: 1, 256>}, {pipeline_mode = #tpu.pipeline_mode<synchronous>, transform_indices = @transform_5, window_bounds = array<i64: 256, 128>}, {pipeline_mode = #tpu.pipeline_mode<synchronous>, transform_indices = @transform_6, window_bounds = array<i64: 1, 128>}, {pipeline_mode = #tpu.pipeline_mode<synchronous>, transform_indices = @transform_7, window_bounds = array<i64: 128, 128>}, {pipeline_mode = #tpu.pipeline_mode<synchronous>, transform_indices = @transform_8, window_bounds = array<i64: 1, 128>}, {transform_indices = @transform_9, window_bounds = array<i64: 8, 128>}]} {
    %c0 = arith.constant 0 : index
    %c0_0 = arith.constant 0 : index
    %0 = vector.load %arg1[%c0, %c0_0] : memref<8x3072xf32, #tpu.memory_space<vmem>>, vector<8x3072xf32>
    %1 = arith.truncf %0 : vector<8x3072xf32> to vector<8x3072xbf16>
    %c0_1 = arith.constant 0 : index
    %c0_2 = arith.constant 0 : index
    %2 = vector.load %arg2[%c0_1, %c0_2] : memref<3072x512xbf16, #tpu.memory_space<vmem>>, vector<3072x512xbf16>
    %cst = arith.constant dense<0.000000e+00> : vector<8x512xf32>
    %3 = tpu.matmul %1, %2, %cst {dimension_numbers = #tpu.dot_dimension_numbers<[1], [0], [0], [1], [0, 0, 1, 1], [], []>} : vector<8x3072xbf16>, vector<3072x512xbf16>, vector<8x512xf32> -> vector<8x512xf32>
    %c0_3 = arith.constant 0 : index
    %c0_4 = arith.constant 0 : index
    %4 = vector.load %arg3[%c0_3, %c0_4] : memref<1x512xf32, #tpu.memory_space<vmem>>, vector<1x512xf32>
    %5 = vector.broadcast %4 : vector<1x512xf32> to vector<8x512xf32>
    %6 = arith.addf %3, %5 : vector<8x512xf32>
    %cst_5 = arith.constant 0.000000e+00 : f32
    %7 = vector.broadcast %cst_5 : f32 to vector<8x512xf32>
    %8 = arith.maximumf %6, %7 : vector<8x512xf32>
    %9 = arith.truncf %8 : vector<8x512xf32> to vector<8x512xbf16>
    %c0_6 = arith.constant 0 : index
    %c0_7 = arith.constant 0 : index
    %10 = vector.load %arg4[%c0_6, %c0_7] : memref<512x256xbf16, #tpu.memory_space<vmem>>, vector<512x256xbf16>
    %cst_8 = arith.constant dense<0.000000e+00> : vector<8x256xf32>
    %11 = tpu.matmul %9, %10, %cst_8 {dimension_numbers = #tpu.dot_dimension_numbers<[1], [0], [0], [1], [0, 0, 1, 1], [], []>} : vector<8x512xbf16>, vector<512x256xbf16>, vector<8x256xf32> -> vector<8x256xf32>
    %c0_9 = arith.constant 0 : index
    %c0_10 = arith.constant 0 : index
    %12 = vector.load %arg5[%c0_9, %c0_10] : memref<1x256xf32, #tpu.memory_space<vmem>>, vector<1x256xf32>
    %13 = vector.broadcast %12 : vector<1x256xf32> to vector<8x256xf32>
    %14 = arith.addf %11, %13 : vector<8x256xf32>
    %cst_11 = arith.constant 0.000000e+00 : f32
    %15 = vector.broadcast %cst_11 : f32 to vector<8x256xf32>
    %16 = arith.maximumf %14, %15 : vector<8x256xf32>
    %17 = arith.truncf %16 : vector<8x256xf32> to vector<8x256xbf16>
    %c0_12 = arith.constant 0 : index
    %c0_13 = arith.constant 0 : index
    %18 = vector.load %arg6[%c0_12, %c0_13] : memref<256x128xbf16, #tpu.memory_space<vmem>>, vector<256x128xbf16>
    %cst_14 = arith.constant dense<0.000000e+00> : vector<8x128xf32>
    %19 = tpu.matmul %17, %18, %cst_14 {dimension_numbers = #tpu.dot_dimension_numbers<[1], [0], [0], [1], [0, 0, 1, 1], [], []>} : vector<8x256xbf16>, vector<256x128xbf16>, vector<8x128xf32> -> vector<8x128xf32>
    %c0_15 = arith.constant 0 : index
    %c0_16 = arith.constant 0 : index
    %20 = vector.load %arg7[%c0_15, %c0_16] : memref<1x128xf32, #tpu.memory_space<vmem>>, vector<1x128xf32>
    %21 = vector.broadcast %20 : vector<1x128xf32> to vector<8x128xf32>
    %22 = arith.addf %19, %21 : vector<8x128xf32>
    %cst_17 = arith.constant 0.000000e+00 : f32
    %23 = vector.broadcast %cst_17 : f32 to vector<8x128xf32>
    %24 = arith.maximumf %22, %23 : vector<8x128xf32>
    %25 = arith.truncf %24 : vector<8x128xf32> to vector<8x128xbf16>
    %c0_18 = arith.constant 0 : index
    %c0_19 = arith.constant 0 : index
    %26 = vector.load %arg8[%c0_18, %c0_19] : memref<128x128xbf16, #tpu.memory_space<vmem>>, vector<128x128xbf16>
    %cst_20 = arith.constant dense<0.000000e+00> : vector<8x128xf32>
    %27 = tpu.matmul %25, %26, %cst_20 {dimension_numbers = #tpu.dot_dimension_numbers<[1], [0], [0], [1], [0, 0, 1, 1], [], []>} : vector<8x128xbf16>, vector<128x128xbf16>, vector<8x128xf32> -> vector<8x128xf32>
    %c0_21 = arith.constant 0 : index
    %c0_22 = arith.constant 0 : index
    %28 = vector.load %arg9[%c0_21, %c0_22] : memref<1x128xf32, #tpu.memory_space<vmem>>, vector<1x128xf32>
    %29 = vector.broadcast %28 : vector<1x128xf32> to vector<8x128xf32>
    %30 = arith.addf %27, %29 : vector<8x128xf32>
    %c0_23 = arith.constant 0 : index
    %c0_24 = arith.constant 0 : index
    %31 = vector.load %arg10[%c0_23, %c0_24] : memref<8x128xf32, #tpu.memory_space<vmem>>, vector<8x128xf32>
    tpu.vector_store %arg10[%c0_23, %c0_24], %30 {strides = array<i32>} : memref<8x128xf32, #tpu.memory_space<vmem>>, vector<8x128xf32>,
    return
  }
  func.func @transform_0(%arg0: i32) -> (i32, i32) {
    %c0_i32 = arith.constant 0 : i32
    %c0_i32_0 = arith.constant 0 : i32
    return %arg0, %c0_i32 : i32, i32
  }
  func.func @transform_1(%arg0: i32) -> (i32, i32) {
    %c0_i32 = arith.constant 0 : i32
    %c0_i32_0 = arith.constant 0 : i32
    %c0_i32_1 = arith.constant 0 : i32
    return %c0_i32, %c0_i32_0 : i32, i32
  }
  func.func @transform_2(%arg0: i32) -> (i32, i32) {
    %c0_i32 = arith.constant 0 : i32
    %c0_i32_0 = arith.constant 0 : i32
    %c0_i32_1 = arith.constant 0 : i32
    return %c0_i32, %c0_i32_0 : i32, i32
  }
  func.func @transform_3(%arg0: i32) -> (i32, i32) {
    %c0_i32 = arith.constant 0 : i32
    %c0_i32_0 = arith.constant 0 : i32
    %c0_i32_1 = arith.constant 0 : i32
    return %c0_i32, %c0_i32_0 : i32, i32
  }
  func.func @transform_4(%arg0: i32) -> (i32, i32) {
    %c0_i32 = arith.constant 0 : i32
    %c0_i32_0 = arith.constant 0 : i32
    %c0_i32_1 = arith.constant 0 : i32
    return %c0_i32, %c0_i32_0 : i32, i32
  }
  func.func @transform_5(%arg0: i32) -> (i32, i32) {
    %c0_i32 = arith.constant 0 : i32
    %c0_i32_0 = arith.constant 0 : i32
    %c0_i32_1 = arith.constant 0 : i32
    return %c0_i32, %c0_i32_0 : i32, i32
  }
  func.func @transform_6(%arg0: i32) -> (i32, i32) {
    %c0_i32 = arith.constant 0 : i32
    %c0_i32_0 = arith.constant 0 : i32
    %c0_i32_1 = arith.constant 0 : i32
    return %c0_i32, %c0_i32_0 : i32, i32
  }
  func.func @transform_7(%arg0: i32) -> (i32, i32) {
    %c0_i32 = arith.constant 0 : i32
    %c0_i32_0 = arith.constant 0 : i32
    %c0_i32_1 = arith.constant 0 : i32
    return %c0_i32, %c0_i32_0 : i32, i32
  }
  func.func @transform_8(%arg0: i32) -> (i32, i32) {
    %c0_i32 = arith.constant 0 : i32
    %c0_i32_0 = arith.constant 0 : i32
    %c0_i32_1 = arith.constant 0 : i32
    return %c0_i32, %c0_i32_0 : i32, i32
  }
  func.func @transform_9(%arg0: i32) -> (i32, i32) {
    %c0_i32 = arith.constant 0 : i32
    %c0_i32_0 = arith.constant 0 : i32
    return %arg0, %c0_i32 : i32, i32
  }
}

</mosaic_0001>

<bundles_post_ra>
// kernel: tpu_custom_call.1
= control target key start
LH: loop header
LB: loop body
LE: loop exit
PB: predicated region body
PF: predicated region fallthrough
CT: control target
= control target key end

     0   :  { %14 = vsyncpa [#allocation3], 0  ;;  %s9346_s0 = inlined_call_operand.hbm [shape: f32[8,3072], index: 0, kind: input, shape index: {}]   ;;  %s9347_s1 = inlined_call_operand.hbm [shape: bf16[3072,512], index: 1, kind: input, shape index: {}]   ;;  %s9348_s2 = inlined_call_operand.hbm [shape: f32[1,512], index: 2, kind: input, shape index: {}]   ;;  %s9349_s3 = inlined_call_operand.hbm [shape: bf16[512,256], index: 3, kind: input, shape index: {}]   ;;  %s9350_s4 = inlined_call_operand.hbm [shape: f32[1,256], index: 4, kind: input, shape index: {}]   ;;  %s9351_s5 = inlined_call_operand.hbm [shape: bf16[256,128], index: 5, kind: input, shape index: {}]   ;;  %s9352_s6 = inlined_call_operand.hbm [shape: f32[1,128], index: 6, kind: input, shape index: {}]   ;;  %s9353_s7 = inlined_call_operand.hbm [shape: bf16[128,128], index: 7, kind: input, shape index: {}]   ;;  %s9354_s8 = inlined_call_operand.hbm [shape: f32[1,128], index: 8, kind: input, shape index: {}]   ;;  %s9355_s9 = inlined_call_operand.hbm [shape: f32[8,128], index: 9, kind: output, shape index: {}]  }
   0x1   :  { %15 = vsyncpa [#allocation6], 0 }
   0x2   :  { %16 = vsyncpa [#allocation9], 0 }
   0x3   :  { %17 = vsyncpa [#allocation12], 0 }
   0x4   :  { %18 = vsyncpa [#allocation15], 0 }
   0x5   :  { %19 = vsyncpa [#allocation4], 0  ;;  %s9135_s30 = smov [#allocation5]   ;;  %s8903_s13 = scalar_lea.hbm %s9347_s1, 98304 }
   0x6   :  { %s35_s10 = sshll.u32 %s9135_s30, 4  ;;  %p8904_p0 = scmp.ne.s32.totalorder %s9347_s1, %s8903_s13  ;;  %s36_s10 = int_to_ptr.vmem [resolvable:$true] %s35_s10 }
   0x7   :  { %p8907_p1 = scmp.lt.u32.totalorder %s8903_s13, %s9347_s1 }
   0x9   :  { %p8909_p2 = pnand %p8907_p1, %p8904_p0 }
   0xb   :  { %8912 = shalt.err (!%p8909_p2)
}
   0xc   :  { %s8913_s18 = scalar_lea.vmem %s36_s10, 98304  ;;  %p8918_p4 = scmp.lt.s32.totalorder %s36_s10, %s36_s10 }
   0xd   :  { %p8914_p3 = scmp.ne.s32.totalorder %s36_s10, %s8913_s18  ;;  %p8919_p5 = scmp.lt.s32.totalorder %s8913_s18, %s8913_s18 }
   0xf   :  { %p8920_p6 = por %p8919_p5, %p8918_p4 }
  0x11   :  { %p8921_p7 = pnand %p8920_p6, %p8914_p3 }
  0x13   :  { %8924 = shalt.err (!%p8921_p7)
}
  0x14   :  { %s9136_s19 = smov 256   ;;  %s9137_s20 = smov 16  }
  0x15   :  { %41 = dma.hbm_to_vmem [thread:$0]  %s9347_s1, 98304, %s36_s10, [#allocation6], %s9136_s19, %s9136_s19, %s9137_s20  }
  0x16   :  { %s9138_s23 = smov [#allocation8]   ;;  %s8925_s27 = scalar_lea.hbm %s9349_s3, 8192 }
  0x17   :  { %s57_s24 = sshll.u32 %s9138_s23, 4  ;;  %p8926_p8 = scmp.ne.s32.totalorder %s9349_s3, %s8925_s27  ;;  %s58_s24 = int_to_ptr.vmem [resolvable:$true] %s57_s24 }
  0x18   :  { %p8929_p9 = scmp.lt.u32.totalorder %s8925_s27, %s9349_s3 }
  0x1a   :  { %p8931_p10 = pnand %p8929_p9, %p8926_p8 }
  0x1c   :  { %8934 = shalt.err (!%p8931_p10)
}
  0x1d   :  { %s8935_s12 = scalar_lea.vmem %s58_s24, 8192  ;;  %p8940_p12 = scmp.lt.s32.totalorder %s58_s24, %s58_s24 }
  0x1e   :  { %p8936_p11 = scmp.ne.s32.totalorder %s58_s24, %s8935_s12  ;;  %p8941_p13 = scmp.lt.s32.totalorder %s8935_s12, %s8935_s12 }
  0x20   :  { %p8942_p0 = por %p8941_p13, %p8940_p12 }
  0x22   :  { %p8943_p1 = pnand %p8942_p0, %p8936_p11 }
  0x24   :  { %8946 = shalt.err (!%p8943_p1)
}
  0x25   :  { %s9139_s1 = smov 128   ;;  %s9140_s10 = smov 8  }
  0x26   :  { %63 = dma.hbm_to_vmem [thread:$0]  %s9349_s3, 8192, %s58_s24, [#allocation9], %s9139_s1, %s9139_s1, %s9140_s10  }
  0x27   :  { %s9141_s15 = smov [#allocation11]   ;;  %s8947_s19 = scalar_lea.hbm %s9351_s5, 2048 }
  0x28   :  { %s79_s16 = sshll.u32 %s9141_s15, 4  ;;  %p8948_p2 = scmp.ne.s32.totalorder %s9351_s5, %s8947_s19  ;;  %s80_s16 = int_to_ptr.vmem [resolvable:$true] %s79_s16 }
  0x29   :  { %p8951_p3 = scmp.lt.u32.totalorder %s8947_s19, %s9351_s5 }
  0x2b   :  { %p8953_p4 = pnand %p8951_p3, %p8948_p2 }
  0x2d   :  { %8956 = shalt.err (!%p8953_p4)
}
  0x2e   :  { %s8957_s25 = scalar_lea.vmem %s80_s16, 2048  ;;  %p8962_p6 = scmp.lt.s32.totalorder %s80_s16, %s80_s16 }
  0x2f   :  { %p8958_p5 = scmp.ne.s32.totalorder %s80_s16, %s8957_s25  ;;  %p8963_p7 = scmp.lt.s32.totalorder %s8957_s25, %s8957_s25 }
  0x31   :  { %p8964_p8 = por %p8963_p7, %p8962_p6 }
  0x33   :  { %p8965_p9 = pnand %p8964_p8, %p8958_p5 }
  0x35   :  { %8968 = shalt.err (!%p8965_p9)
}
  0x36   :  { %s9142_s3 = smov 64   ;;  %s9143_s24 = smov 4  }
  0x37   :  { %85 = dma.hbm_to_vmem [thread:$0]  %s9351_s5, 2048, %s80_s16, [#allocation12], %s9142_s3, %s9142_s3, %s9143_s24  }
  0x38   :  { %s9144_s28 = smov [#allocation14]   ;;  %s9145_s30 = smov [#allocation2]  }
  0x39   :  { %s101_s29 = sshll.u32 %s9144_s28, 4  ;;  %s26_s11 = sshll.u32 %s9145_s30, 4  ;;  %s102_s29 = int_to_ptr.vmem [resolvable:$true] %s101_s29  ;;  %s27_s11 = int_to_ptr.vmem [resolvable:$true] %s26_s11 }
  0x3a   :  { %s8969_s10 = scalar_lea.hbm %s9353_s7, 1024 }
  0x3b   :  { %p8970_p10 = scmp.ne.s32.totalorder %s9353_s7, %s8969_s10  ;;  %p8973_p11 = scmp.lt.u32.totalorder %s8969_s10, %s9353_s7 }
  0x3d   :  { %p8975_p12 = pnand %p8973_p11, %p8970_p10 }
  0x3f   :  { %8978 = shalt.err (!%p8975_p12)
}
  0x40   :  { %s8979_s5 = scalar_lea.vmem %s102_s29, 1024  ;;  %p8984_p0 = scmp.lt.s32.totalorder %s102_s29, %s102_s29 }
  0x41   :  { %p8980_p13 = scmp.ne.s32.totalorder %s102_s29, %s8979_s5  ;;  %p8985_p1 = scmp.lt.s32.totalorder %s8979_s5, %s8979_s5 }
  0x43   :  { %p8986_p2 = por %p8985_p1, %p8984_p0 }
  0x45   :  { %p8987_p3 = pnand %p8986_p2, %p8980_p13 }
  0x47   :  { %8990 = shalt.err (!%p8987_p3)
}
  0x48   :  { %107 = dma.hbm_to_vmem [thread:$0]  %s9353_s7, 1024, %s102_s29, [#allocation15], %s9142_s3, %s9142_s3, %s9143_s24  }
  0x49   :  { %s8991_s21 = scalar_lea.hbm %s9346_s0, 3072 }
  0x4a   :  { %p8992_p4 = scmp.ne.s32.totalorder %s9346_s0, %s8991_s21  ;;  %p8995_p5 = scmp.lt.u32.totalorder %s8991_s21, %s9346_s0 }
  0x4c   :  { %p8997_p6 = pnand %p8995_p5, %p8992_p4 }
  0x4e   :  { %9000 = shalt.err (!%p8997_p6)
}
  0x4f   :  { %s9001_s27 = scalar_lea.vmem %s27_s11, 3072  ;;  %p9006_p8 = scmp.lt.s32.totalorder %s27_s11, %s27_s11 }
  0x50   :  { %p9002_p7 = scmp.ne.s32.totalorder %s27_s11, %s9001_s27  ;;  %p9007_p9 = scmp.lt.s32.totalorder %s9001_s27, %s9001_s27 }
  0x52   :  { %p9008_p10 = por %p9007_p9, %p9006_p8 }
  0x54   :  { %p9009_p11 = pnand %p9008_p10, %p9002_p7 }
  0x56   :  { %9012 = shalt.err (!%p9009_p11)
}
  0x57   :  { %29 = dma.hbm_to_vmem [thread:$0]  %s9346_s0, 3072, %s27_s11, [#allocation3]  }
  0x58   :  { %s9146_s24 = smov [#allocation7]   ;;  %s9147_s29 = smov [#allocation10]  }
  0x59   :  { %s48_s28 = sshll.u32 %s9146_s24, 4  ;;  %s70_s30 = sshll.u32 %s9147_s29, 4  ;;  %s49_s28 = int_to_ptr.vmem [resolvable:$true] %s48_s28  ;;  %s71_s30 = int_to_ptr.vmem [resolvable:$true] %s70_s30 }
  0x5a   :  { %s9013_s10 = scalar_lea.hbm %s9348_s2, 64 }
  0x5b   :  { %p9014_p12 = scmp.ne.s32.totalorder %s9348_s2, %s9013_s10  ;;  %p9017_p13 = scmp.lt.u32.totalorder %s9013_s10, %s9348_s2 }
  0x5d   :  { %p9019_p0 = pnand %p9017_p13, %p9014_p12 }
  0x5f   :  { %9022 = shalt.err (!%p9019_p0)
}
  0x60   :  { %s9023_s0 = scalar_lea.vmem %s49_s28, 64  ;;  %p9028_p2 = scmp.lt.s32.totalorder %s49_s28, %s49_s28 }
  0x61   :  { %p9024_p1 = scmp.ne.s32.totalorder %s49_s28, %s9023_s0  ;;  %p9029_p3 = scmp.lt.s32.totalorder %s9023_s0, %s9023_s0 }
  0x63   :  { %p9030_p4 = por %p9029_p3, %p9028_p2 }
  0x65   :  { %p9031_p5 = pnand %p9030_p4, %p9024_p1 }
  0x67   :  { %9034 = shalt.err (!%p9031_p5)
}
  0x68   :  { %51 = dma.hbm_to_vmem [thread:$0]  %s9348_s2, 64, %s49_s28, [#allocation6]  }
  0x69   :  { %s9035_s19 = scalar_lea.hbm %s9350_s4, 32 }
  0x6a   :  { %p9036_p6 = scmp.ne.s32.totalorder %s9350_s4, %s9035_s19  ;;  %p9039_p7 = scmp.lt.u32.totalorder %s9035_s19, %s9350_s4 }
  0x6c   :  { %p9041_p8 = pnand %p9039_p7, %p9036_p6 }
  0x6e   :  { %9044 = shalt.err (!%p9041_p8)
}
  0x6f   :  { %s9045_s25 = scalar_lea.vmem %s71_s30, 32  ;;  %p9050_p10 = scmp.lt.s32.totalorder %s71_s30, %s71_s30 }
  0x70   :  { %p9046_p9 = scmp.ne.s32.totalorder %s71_s30, %s9045_s25  ;;  %p9051_p11 = scmp.lt.s32.totalorder %s9045_s25, %s9045_s25 }
  0x72   :  { %p9052_p12 = por %p9051_p11, %p9050_p10 }
  0x74   :  { %p9053_p13 = pnand %p9052_p12, %p9046_p9 }
  0x76   :  { %9056 = shalt.err (!%p9053_p13)
}
  0x77   :  { %73 = dma.hbm_to_vmem [thread:$0]  %s9350_s4, 32, %s71_s30, [#allocation9]  }
  0x78   :  { %s9148_s27 = smov [#allocation13]   ;;  %s9149_s3 = smov [#allocation16]  }
  0x79   :  { %s92_s7 = sshll.u32 %s9148_s27, 4  ;;  %s114_s24 = sshll.u32 %s9149_s3, 4  ;;  %s93_s7 = int_to_ptr.vmem [resolvable:$true] %s92_s7  ;;  %s115_s24 = int_to_ptr.vmem [resolvable:$true] %s114_s24 }
  0x7a   :  { %s9057_s12 = scalar_lea.hbm %s9352_s6, 16 }
  0x7b   :  { %p9058_p0 = scmp.ne.s32.totalorder %s9352_s6, %s9057_s12  ;;  %p9061_p1 = scmp.lt.u32.totalorder %s9057_s12, %s9352_s6 }
  0x7d   :  { %p9063_p2 = pnand %p9061_p1, %p9058_p0 }
  0x7f   :  { %9066 = shalt.err (!%p9063_p2)
}
  0x80   :  { %s9067_s4 = scalar_lea.vmem %s93_s7, 16  ;;  %s9071_s30 = scalar_lea.vmem %s93_s7, 32 }
  0x81   :  { %p9068_p3 = scmp.ne.s32.totalorder %s93_s7, %s9067_s4  ;;  %p9072_p4 = scmp.lt.s32.totalorder %s93_s7, %s93_s7 }
  0x82   :  { %p9073_p5 = scmp.lt.s32.totalorder %s9071_s30, %s9067_s4 }
  0x84   :  { %p9074_p6 = por %p9073_p5, %p9072_p4 }
  0x86   :  { %p9075_p7 = pnand %p9074_p6, %p9068_p3 }
  0x88   :  { %9078 = shalt.err (!%p9075_p7)
}
  0x89   :  { %95 = dma.hbm_to_vmem [thread:$0]  %s9352_s6, 16, %s93_s7, [#allocation12]  }
  0x8a   :  { %s9079_s5 = scalar_lea.hbm %s9354_s8, 16 }
  0x8b   :  { %p9080_p8 = scmp.ne.s32.totalorder %s9354_s8, %s9079_s5  ;;  %p9083_p9 = scmp.lt.u32.totalorder %s9079_s5, %s9354_s8 }
  0x8d   :  { %p9085_p10 = pnand %p9083_p9, %p9080_p8 }
  0x8f   :  { %9088 = shalt.err (!%p9085_p10)
}
  0x90   :  { %s9089_s21 = scalar_lea.vmem %s115_s24, 16  ;;  %s9093_s22 = scalar_lea.vmem %s115_s24, 32 }
  0x91   :  { %p9090_p11 = scmp.ne.s32.totalorder %s115_s24, %s9089_s21  ;;  %p9094_p12 = scmp.lt.s32.totalorder %s115_s24, %s115_s24 }
  0x92   :  { %p9095_p13 = scmp.lt.s32.totalorder %s9093_s22, %s9089_s21 }
  0x94   :  { %p9096_p0 = por %p9095_p13, %p9094_p12 }
  0x96   :  { %p9097_p1 = pnand %p9096_p0, %p9090_p11 }
  0x98   :  { %9100 = shalt.err (!%p9097_p1)
}
  0x99   :  { %117 = dma.hbm_to_vmem [thread:$0]  %s9354_s8, 16, %s115_s24, [#allocation15]  }
  0x9a   :  { %9123 = dma.done.wait [#allocation3], 3072  }
  0x9b   :  { %9124 = vsyncadd [#allocation3], 4294964224 }
  0x9c   :  { %9125 = dma.done.wait [#allocation6], 98368  }
  0x9d   :  { %9126 = vsyncadd [#allocation6], 4294868928 }
  0x9e   :  { %9127 = dma.done.wait [#allocation9], 8224  }
  0x9f   :  { %9128 = vsyncadd [#allocation9], 4294959072 }
  0xa0   :  { %9129 = dma.done.wait [#allocation12], 2064  }
  0xa1   :  { %9130 = vsyncadd [#allocation12], 4294965232 }
  0xa2   :  { %9131 = dma.done.wait [#allocation15], 1040  }
  0xa3   :  { %9132 = vsyncadd [#allocation15], 4294966256  ;;  %v7631_v0 = vld [vmem:[#allocation5 + $0x4] ss:$16 sps:$4 sm:$0xff]   ;;  %v7633_v1 = vld [vmem:[#allocation5 + $0xc] ss:$16 sps:$4 sm:$0xff]  }
  0xa4   :  { %4824 = vmatprep.subr.bf16.mxu0 %v7631_v0  ;;  %v7635_v2 = vld [vmem:[#allocation5] ss:$16 sps:$4 sm:$0xff]   ;;  %v7636_v3 = vld [vmem:[#allocation5 + $0x8] ss:$16 sps:$4 sm:$0xff]   ;;  %5316 = vmatprep.subr.bf16.mxu1 %v7633_v1  ;;  %v7637_v4 = vld [vmem:[#allocation5 + $0x24] ss:$16 sps:$4 sm:$0xff]  }
  0xa5   :  { %4825 = vmatpush1.bf16.msra.mxu0 %v7635_v2  ;;  %5317 = vmatpush1.bf16.msra.mxu1 %v7636_v3  ;;  %v7639_v5 = vld [vmem:[#allocation5 + $0x2c] ss:$16 sps:$4 sm:$0xff]   ;;  %v7641_v6 = vld [vmem:[#allocation5 + $0x20] ss:$16 sps:$4 sm:$0xff]   ;;  %v7642_v7 = vld [vmem:[#allocation5 + $0x28] ss:$16 sps:$4 sm:$0xff]  }
  0xa6   :  { %4826 = vmatprep.subr.bf16.mxu0 %v7637_v4  ;;  %5318 = vmatprep.subr.bf16.mxu1 %v7639_v5  ;;  %v7643_v8 = vld [vmem:[#allocation5 + $0x44] ss:$16 sps:$4 sm:$0xff]   ;;  %v7645_v9 = vld [vmem:[#allocation5 + $0x4c] ss:$16 sps:$4 sm:$0xff]   ;;  %v7647_v10 = vld [vmem:[#allocation5 + $0x40] ss:$16 sps:$4 sm:$0xff]  }
  0xa7   :  { %v7648_v11 = vld [vmem:[#allocation5 + $0x48] ss:$16 sps:$4 sm:$0xff]   ;;  %v7649_v12 = vld [vmem:[#allocation5 + $0x64] ss:$16 sps:$4 sm:$0xff]   ;;  %v7651_v13 = vld [vmem:[#allocation5 + $0x6c] ss:$16 sps:$4 sm:$0xff]  }
  0xa8   :  { %v7653_v14 = vld [vmem:[#allocation5 + $0x60] ss:$16 sps:$4 sm:$0xff]   ;;  %v7654_v15 = vld [vmem:[#allocation5 + $0x68] ss:$16 sps:$4 sm:$0xff]   ;;  %v7655_v16 = vld [vmem:[#allocation5 + $0x84] ss:$16 sps:$4 sm:$0xff]  }
  0xa9   :  { %4827 = vmatpush1.bf16.msra.mxu0 %v7641_v6  ;;  %5319 = vmatpush1.bf16.msra.mxu1 %v7642_v7  ;;  %v7657_v17 = vld [vmem:[#allocation5 + $0x8c] ss:$16 sps:$4 sm:$0xff]   ;;  %v7659_v18 = vld [vmem:[#allocation5 + $0x80] ss:$16 sps:$4 sm:$0xff]   ;;  %v7660_v19 = vld [vmem:[#allocation5 + $0x88] ss:$16 sps:$4 sm:$0xff]  }
  0xaa   :  { %4828 = vmatprep.subr.bf16.mxu0 %v7643_v8  ;;  %5320 = vmatprep.subr.bf16.mxu1 %v7645_v9  ;;  %v7661_v20 = vld [vmem:[#allocation5 + $0xa4] ss:$16 sps:$4 sm:$0xff]   ;;  %v7663_v21 = vld [vmem:[#allocation5 + $0xac] ss:$16 sps:$4 sm:$0xff]   ;;  %v7665_v22 = vld [vmem:[#allocation5 + $0xa0] ss:$16 sps:$4 sm:$0xff]  }
  0xab   :  { %v7666_v23 = vld [vmem:[#allocation5 + $0xa8] ss:$16 sps:$4 sm:$0xff]   ;;  %v7667_v24 = vld [vmem:[#allocation5 + $0xc4] ss:$16 sps:$4 sm:$0xff]   ;;  %v7669_v25 = vld [vmem:[#allocation5 + $0xcc] ss:$16 sps:$4 sm:$0xff]  }
  0xac   :  { %v7671_v26 = vld [vmem:[#allocation5 + $0xc0] ss:$16 sps:$4 sm:$0xff]   ;;  %v7672_v27 = vld [vmem:[#allocation5 + $0xc8] ss:$16 sps:$4 sm:$0xff]   ;;  %v7673_v28 = vld [vmem:[#allocation5 + $0xe4] ss:$16 sps:$4 sm:$0xff]  }
  0xad   :  { %4829 = vmatpush1.bf16.msra.mxu0 %v7647_v10  ;;  %5321 = vmatpush1.bf16.msra.mxu1 %v7648_v11  ;;  %v7675_v29 = vld [vmem:[#allocation5 + $0xec] ss:$16 sps:$4 sm:$0xff]   ;;  %v7677_v30 = vld [vmem:[#allocation5 + $0xe0] ss:$16 sps:$4 sm:$0xff]   ;;  %v7678_v31 = vld [vmem:[#allocation5 + $0xe8] ss:$16 sps:$4 sm:$0xff]  }
  0xae   :  { %4830 = vmatprep.subr.bf16.mxu0 %v7649_v12  ;;  %5322 = vmatprep.subr.bf16.mxu1 %v7651_v13  ;;  %v7679_v32 = vld [vmem:[#allocation5 + $0x104] ss:$16 sps:$4 sm:$0xff]   ;;  %v7681_v33 = vld [vmem:[#allocation5 + $0x10c] ss:$16 sps:$4 sm:$0xff]   ;;  %v7683_v34 = vld [vmem:[#allocation5 + $0x100] ss:$16 sps:$4 sm:$0xff]  }
  0xaf   :  { %v7684_v35 = vld [vmem:[#allocation5 + $0x108] ss:$16 sps:$4 sm:$0xff]   ;;  %v7685_v36 = vld [vmem:[#allocation5 + $0x124] ss:$16 sps:$4 sm:$0xff]   ;;  %v7687_v37 = vld [vmem:[#allocation5 + $0x12c] ss:$16 sps:$4 sm:$0xff]  }
  0xb0   :  { %v7689_v38 = vld [vmem:[#allocation5 + $0x120] ss:$16 sps:$4 sm:$0xff]   ;;  %v7690_v39 = vld [vmem:[#allocation5 + $0x128] ss:$16 sps:$4 sm:$0xff]   ;;  %v7691_v40 = vld [vmem:[#allocation5 + $0x144] ss:$16 sps:$4 sm:$0xff]  }
  0xb1   :  { %4831 = vmatpush1.bf16.msra.mxu0 %v7653_v14  ;;  %5323 = vmatpush1.bf16.msra.mxu1 %v7654_v15  ;;  %v7693_v41 = vld [vmem:[#allocation5 + $0x14c] ss:$16 sps:$4 sm:$0xff]   ;;  %v7695_v42 = vld [vmem:[#allocation5 + $0x140] ss:$16 sps:$4 sm:$0xff]   ;;  %v7696_v43 = vld [vmem:[#allocation5 + $0x148] ss:$16 sps:$4 sm:$0xff]  }
  0xb2   :  { %4832 = vmatprep.subr.bf16.mxu0 %v7655_v16  ;;  %5324 = vmatprep.subr.bf16.mxu1 %v7657_v17  ;;  %v7697_v44 = vld [vmem:[#allocation5 + $0x164] ss:$16 sps:$4 sm:$0xff]   ;;  %v7699_v45 = vld [vmem:[#allocation5 + $0x16c] ss:$16 sps:$4 sm:$0xff]   ;;  %v7701_v47 = vld [vmem:[#allocation5 + $0x160] ss:$16 sps:$4 sm:$0xff]  }
  0xb3   :  { %v147_v46 = vld [vmem:[#allocation2 + $0x8] sm:$0xff]  ;;  %v7703_v50 = vld [vmem:[#allocation5 + $0x184] ss:$16 sps:$4 sm:$0xff]   ;;  %v7707_v52 = vld [vmem:[#allocation5 + $0x180] ss:$16 sps:$4 sm:$0xff]   ;;  %vm9151_vm0 = vmmov 0  }
  0xb4   :  { %v171_v48 = vpack.c.bf16 %v147_v46, %v147_v46  ;;  %v7702_v49 = vld [vmem:[#allocation5 + $0x168] ss:$16 sps:$4 sm:$0xff]   ;;  %v7705_v51 = vld [vmem:[#allocation5 + $0x18c] ss:$16 sps:$4 sm:$0xff]   ;;  %v7709_v54 = vld [vmem:[#allocation5 + $0x1a4] ss:$16 sps:$4 sm:$0xff]  }
  0xb5   :  { %4833 = vmatpush1.bf16.msra.mxu0 %v7659_v18  ;;  %5325 = vmatpush1.bf16.msra.mxu1 %v7660_v19  ;;  %v7708_v53 = vld [vmem:[#allocation5 + $0x188] ss:$16 sps:$4 sm:$0xff]   ;;  %v7711_v55 = vld [vmem:[#allocation5 + $0x1ac] ss:$16 sps:$4 sm:$0xff]   ;;  %v7713_v56 = vld [vmem:[#allocation5 + $0x1a0] ss:$16 sps:$4 sm:$0xff]  }
  0xb6   :  { %4834 = vmatprep.subr.bf16.mxu0 %v7661_v20  ;;  %5326 = vmatprep.subr.bf16.mxu1 %v7663_v21  ;;  %v7714_v57 = vld [vmem:[#allocation5 + $0x1a8] ss:$16 sps:$4 sm:$0xff]   ;;  %v7715_v58 = vld [vmem:[#allocation5 + $0x1c4] ss:$16 sps:$4 sm:$0xff]   ;;  %v7717_v59 = vld [vmem:[#allocation5 + $0x1cc] ss:$16 sps:$4 sm:$0xff]  }
  0xb7   :  { %4856 = vmatprep.mubr.bf16.mxu0 %v171_v48  ;;  %5348 = vmatprep.mubr.bf16.mxu1 %v171_v48  ;;  %v7719_v60 = vld [vmem:[#allocation5 + $0x1c0] ss:$16 sps:$4 sm:$0xff]   ;;  %v7720_v61 = vld [vmem:[#allocation5 + $0x1c8] ss:$16 sps:$4 sm:$0xff]   ;;  %v7721_v62 = vld [vmem:[#allocation5 + $0x1e4] ss:$16 sps:$4 sm:$0xff]  }
  0xb8   :  { %v7723_v63 = vld [vmem:[#allocation5 + $0x1ec] ss:$16 sps:$4 sm:$0xff]   ;;  %v7725_v0 = vld [vmem:[#allocation5 + $0x1e0] ss:$16 sps:$4 sm:$0xff]   ;;  %v7726_v1 = vld [vmem:[#allocation5 + $0x1e8] ss:$16 sps:$4 sm:$0xff]  }
  0xb9   :  { %4835 = vmatpush1.bf16.msra.mxu0 %v7665_v22  ;;  %5327 = vmatpush1.bf16.msra.mxu1 %v7666_v23  ;;  %v146_v2 = vld [vmem:[#allocation2] sm:$0xff]  ;;  %v7732_v4 = vld [vmem:[#allocation5 + $0x20c] ss:$16 sps:$4 sm:$0xff]   ;;  %v7730_v7 = vld [vmem:[#allocation5 + $0x208] ss:$16 sps:$4 sm:$0xff]   ;;  %s9152_s8 = smov [#allocation17]  }
  0xba   :  { %4836 = vmatprep.subr.bf16.mxu0 %v7667_v24  ;;  %5328 = vmatprep.subr.bf16.mxu1 %v7669_v25  ;;  %v7729_v3 = vld [vmem:[#allocation5 + $0x204] ss:$16 sps:$4 sm:$0xff]   ;;  %v170_v5 = vpack.c.bf16 %v146_v2, %v146_v2  ;;  %v7727_v6 = vld [vmem:[#allocation5 + $0x200] ss:$16 sps:$4 sm:$0xff]   ;;  %v7738_v9 = vld [vmem:[#allocation5 + $0x22c] ss:$16 sps:$4 sm:$0xff]  }
  0xbb   :  { %v7735_v8 = vld [vmem:[#allocation5 + $0x224] ss:$16 sps:$4 sm:$0xff]   ;;  %v7733_v10 = vld [vmem:[#allocation5 + $0x220] ss:$16 sps:$4 sm:$0xff]   ;;  %v7736_v11 = vld [vmem:[#allocation5 + $0x228] ss:$16 sps:$4 sm:$0xff]  }
  0xbc   :  { %v7741_v12 = vld [vmem:[#allocation5 + $0x244] ss:$16 sps:$4 sm:$0xff]   ;;  %v7744_v13 = vld [vmem:[#allocation5 + $0x24c] ss:$16 sps:$4 sm:$0xff]   ;;  %v7739_v14 = vld [vmem:[#allocation5 + $0x240] ss:$16 sps:$4 sm:$0xff]  }
  0xbd   :  { %4837 = vmatpush1.bf16.msra.mxu0 %v7671_v26  ;;  %5329 = vmatpush1.bf16.msra.mxu1 %v7672_v27  ;;  %v7742_v15 = vld [vmem:[#allocation5 + $0x248] ss:$16 sps:$4 sm:$0xff]   ;;  %v7747_v16 = vld [vmem:[#allocation5 + $0x264] ss:$16 sps:$4 sm:$0xff]   ;;  %v7750_v17 = vld [vmem:[#allocation5 + $0x26c] ss:$16 sps:$4 sm:$0xff]  }
  0xbe   :  { %4838 = vmatprep.subr.bf16.mxu0 %v7673_v28  ;;  %5330 = vmatprep.subr.bf16.mxu1 %v7675_v29  ;;  %v7745_v18 = vld [vmem:[#allocation5 + $0x260] ss:$16 sps:$4 sm:$0xff]   ;;  %v7748_v19 = vld [vmem:[#allocation5 + $0x268] ss:$16 sps:$4 sm:$0xff]   ;;  %v7753_v20 = vld [vmem:[#allocation5 + $0x284] ss:$16 sps:$4 sm:$0xff]  }
  0xbf   :  { %v7756_v21 = vld [vmem:[#allocation5 + $0x28c] ss:$16 sps:$4 sm:$0xff]   ;;  %v7751_v22 = vld [vmem:[#allocation5 + $0x280] ss:$16 sps:$4 sm:$0xff]   ;;  %v7754_v23 = vld [vmem:[#allocation5 + $0x288] ss:$16 sps:$4 sm:$0xff]  }
  0xc0   :  { %v7759_v24 = vld [vmem:[#allocation5 + $0x2a4] ss:$16 sps:$4 sm:$0xff]   ;;  %v7762_v25 = vld [vmem:[#allocation5 + $0x2ac] ss:$16 sps:$4 sm:$0xff]   ;;  %v7757_v26 = vld [vmem:[#allocation5 + $0x2a0] ss:$16 sps:$4 sm:$0xff]  }
  0xc1   :  { %4839 = vmatpush1.bf16.msra.mxu0 %v7677_v30  ;;  %5331 = vmatpush1.bf16.msra.mxu1 %v7678_v31  ;;  %v7760_v27 = vld [vmem:[#allocation5 + $0x2a8] ss:$16 sps:$4 sm:$0xff]   ;;  %v7765_v28 = vld [vmem:[#allocation5 + $0x2c4] ss:$16 sps:$4 sm:$0xff]   ;;  %v7768_v29 = vld [vmem:[#allocation5 + $0x2cc] ss:$16 sps:$4 sm:$0xff]  }
  0xc2   :  { %4840 = vmatprep.subr.bf16.mxu0 %v7679_v32  ;;  %5332 = vmatprep.subr.bf16.mxu1 %v7681_v33  ;;  %v149_v30 = vld [vmem:[#allocation2 + $0x18] sm:$0xff]  ;;  %v7763_v31 = vld [vmem:[#allocation5 + $0x2c0] ss:$16 sps:$4 sm:$0xff]   ;;  %v7789_v46 = vld [vmem:[#allocation5 + $0x344] ss:$16 sps:$4 sm:$0xff]   ;;  %s6593_s25 = sshll.u32 %s9152_s8, 4  ;;  %s6594_s25 = int_to_ptr.vmem [resolvable:$true] %s6593_s25 }
  0xc3   :  { %v173_v32 = vpack.c.bf16 %v149_v30, %v149_v30  ;;  %v7766_v33 = vld [vmem:[#allocation5 + $0x2c8] ss:$16 sps:$4 sm:$0xff]   ;;  %v7787_v48 = vld [vmem:[#allocation5 + $0x340] ss:$16 sps:$4 sm:$0xff]   ;;  %v7819_v2 = vld [vmem:[#allocation5 + $0x3e4] ss:$16 sps:$4 sm:$0xff]   ;;  %p9106_p3 = scmp.lt.s32.totalorder %s6594_s25, %s6594_s25 }
  0xc4   :  { %v7855_v30 = vld [vmem:[#allocation5 + $0x4a4] ss:$16 sps:$4 sm:$0xff]   ;;  %s9101_s2 = scalar_lea.vmem %s6594_s25, 128 }
  0xc5   :  { %4841 = vmatpush1.bf16.msra.mxu0 %v7683_v34  ;;  %5333 = vmatpush1.bf16.msra.mxu1 %v7684_v35  ;;  %v7771_v34 = vld [vmem:[#allocation5 + $0x2e4] ss:$16 sps:$4 sm:$0xff]   ;;  %v7774_v35 = vld [vmem:[#allocation5 + $0x2ec] ss:$16 sps:$4 sm:$0xff]   ;;  %p9102_p2 = scmp.ne.s32.totalorder %s6594_s25, %s9101_s2  ;;  %p9107_p4 = scmp.lt.s32.totalorder %s9101_s2, %s9101_s2 }
  0xc6   :  { %4842 = vmatprep.subr.bf16.mxu0 %v7685_v36  ;;  %5334 = vmatprep.subr.bf16.mxu1 %v7687_v37  ;;  %v7769_v36 = vld [vmem:[#allocation5 + $0x2e0] ss:$16 sps:$4 sm:$0xff]   ;;  %v7772_v37 = vld [vmem:[#allocation5 + $0x2e8] ss:$16 sps:$4 sm:$0xff]  }
  0xc7   :  { %p9108_p5 = por %p9107_p4, %p9106_p3 }
  0xc9   :  { %4843 = vmatpush1.bf16.msra.mxu0 %v7689_v38  ;;  %5335 = vmatpush1.bf16.msra.mxu1 %v7690_v39  ;;  %v7777_v38 = vld [vmem:[#allocation5 + $0x304] ss:$16 sps:$4 sm:$0xff]   ;;  %v7780_v39 = vld [vmem:[#allocation5 + $0x30c] ss:$16 sps:$4 sm:$0xff]   ;;  %p9109_p6 = pnand %p9108_p5, %p9102_p2 }
  0xca   :  { %4844 = vmatprep.subr.bf16.mxu0 %v7691_v40  ;;  %5336 = vmatprep.subr.bf16.mxu1 %v7693_v41  ;;  %v7775_v40 = vld [vmem:[#allocation5 + $0x300] ss:$16 sps:$4 sm:$0xff]   ;;  %v7778_v41 = vld [vmem:[#allocation5 + $0x308] ss:$16 sps:$4 sm:$0xff]  }
  0xcd   :  { %4845 = vmatpush1.bf16.msra.mxu0 %v7695_v42  ;;  %5337 = vmatpush1.bf16.msra.mxu1 %v7696_v43  ;;  %v7783_v42 = vld [vmem:[#allocation5 + $0x324] ss:$16 sps:$4 sm:$0xff]   ;;  %v7786_v43 = vld [vmem:[#allocation5 + $0x32c] ss:$16 sps:$4 sm:$0xff]  }
  0xce   :  { %4846 = vmatprep.subr.bf16.mxu0 %v7697_v44  ;;  %5338 = vmatprep.subr.bf16.mxu1 %v7699_v45  ;;  %v7781_v44 = vld [vmem:[#allocation5 + $0x320] ss:$16 sps:$4 sm:$0xff]   ;;  %v7784_v45 = vld [vmem:[#allocation5 + $0x328] ss:$16 sps:$4 sm:$0xff]  }
  0xd1   :  { %4847 = vmatpush1.bf16.msra.mxu0 %v7701_v47  ;;  %5339 = vmatpush1.bf16.msra.mxu1 %v7702_v49  ;;  %v7792_v47 = vld [vmem:[#allocation5 + $0x34c] ss:$16 sps:$4 sm:$0xff]   ;;  %v7790_v49 = vld [vmem:[#allocation5 + $0x348] ss:$16 sps:$4 sm:$0xff]  }
  0xd2   :  { %4848 = vmatprep.subr.bf16.mxu0 %v7703_v50  ;;  %5340 = vmatprep.subr.bf16.mxu1 %v7705_v51  ;;  %v7795_v50 = vld [vmem:[#allocation5 + $0x364] ss:$16 sps:$4 sm:$0xff]   ;;  %v7798_v51 = vld [vmem:[#allocation5 + $0x36c] ss:$16 sps:$4 sm:$0xff]  }
  0xd5   :  { %4849 = vmatpush1.bf16.msra.mxu0 %v7707_v52  ;;  %5341 = vmatpush1.bf16.msra.mxu1 %v7708_v53  ;;  %v7793_v52 = vld [vmem:[#allocation5 + $0x360] ss:$16 sps:$4 sm:$0xff]   ;;  %v7796_v53 = vld [vmem:[#allocation5 + $0x368] ss:$16 sps:$4 sm:$0xff]  }
  0xd6   :  { %4850 = vmatprep.subr.bf16.mxu0 %v7709_v54  ;;  %5342 = vmatprep.subr.bf16.mxu1 %v7711_v55  ;;  %v7801_v54 = vld [vmem:[#allocation5 + $0x384] ss:$16 sps:$4 sm:$0xff]   ;;  %v7804_v55 = vld [vmem:[#allocation5 + $0x38c] ss:$16 sps:$4 sm:$0xff]  }
  0xd9   :  { %4851 = vmatpush1.bf16.msra.mxu0 %v7713_v56  ;;  %5343 = vmatpush1.bf16.msra.mxu1 %v7714_v57  ;;  %v7799_v56 = vld [vmem:[#allocation5 + $0x380] ss:$16 sps:$4 sm:$0xff]   ;;  %v7802_v57 = vld [vmem:[#allocation5 + $0x388] ss:$16 sps:$4 sm:$0xff]  }
  0xda   :  { %4852 = vmatprep.subr.bf16.mxu0 %v7715_v58  ;;  %5344 = vmatprep.subr.bf16.mxu1 %v7717_v59  ;;  %v7807_v58 = vld [vmem:[#allocation5 + $0x3a4] ss:$16 sps:$4 sm:$0xff]   ;;  %v7810_v59 = vld [vmem:[#allocation5 + $0x3ac] ss:$16 sps:$4 sm:$0xff]  }
  0xdd   :  { %4853 = vmatpush1.bf16.msra.mxu0 %v7719_v60  ;;  %5345 = vmatpush1.bf16.msra.mxu1 %v7720_v61  ;;  %v7805_v60 = vld [vmem:[#allocation5 + $0x3a0] ss:$16 sps:$4 sm:$0xff]   ;;  %v7808_v61 = vld [vmem:[#allocation5 + $0x3a8] ss:$16 sps:$4 sm:$0xff]  }
  0xde   :  { %4854 = vmatprep.subr.bf16.mxu0 %v7721_v62  ;;  %5346 = vmatprep.subr.bf16.mxu1 %v7723_v63  ;;  %v7813_v62 = vld [vmem:[#allocation5 + $0x3c4] ss:$16 sps:$4 sm:$0xff]   ;;  %v7816_v63 = vld [vmem:[#allocation5 + $0x3cc] ss:$16 sps:$4 sm:$0xff]  }
  0xe1   :  { %4855 = vmatpush1.bf16.msra.mxu0 %v7725_v0  ;;  %5347 = vmatpush1.bf16.msra.mxu1 %v7726_v1  ;;  %v7811_v0 = vld [vmem:[#allocation5 + $0x3c0] ss:$16 sps:$4 sm:$0xff]   ;;  %v7814_v1 = vld [vmem:[#allocation5 + $0x3c8] ss:$16 sps:$4 sm:$0xff]  }
  0xe2   :  { %4865 = vmatprep.subr.bf16.mxu0 %v7729_v3  ;;  %5357 = vmatprep.subr.bf16.mxu1 %v7732_v4  ;;  %v7822_v3 = vld [vmem:[#allocation5 + $0x3ec] ss:$16 sps:$4 sm:$0xff]   ;;  %v7817_v4 = vld [vmem:[#allocation5 + $0x3e0] ss:$16 sps:$4 sm:$0xff]  }
  0xe4   :  { %4857 = vmatmul.mubr.bf16.vlgmr.msra.gmra.mrb[0].mxu0 %v170_v5  ;;  %5349 = vmatmul.mubr.bf16.vlgmr.msra.gmra.mrb[0].mxu1 %v170_v5  ;;  %v7820_v5 = vld [vmem:[#allocation5 + $0x3e8] ss:$16 sps:$4 sm:$0xff]  }
  0xe5   :  { %4866 = vmatpush1.bf16.msra.mxu0 %v7727_v6  ;;  %5358 = vmatpush1.bf16.msra.mxu1 %v7730_v7  ;;  %v7825_v6 = vld [vmem:[#allocation5 + $0x404] ss:$16 sps:$4 sm:$0xff]  }
  0xe6   :  { %4867 = vmatprep.subr.bf16.mxu0 %v7735_v8  ;;  %5359 = vmatprep.subr.bf16.mxu1 %v7738_v9  ;;  %v148_v7 = vld [vmem:[#allocation2 + $0x10] sm:$0xff]  ;;  %v7828_v8 = vld [vmem:[#allocation5 + $0x40c] ss:$16 sps:$4 sm:$0xff]  }
  0xe7   :  { %4897 = vmatprep.mubr.bf16.mxu0 %v173_v32  ;;  %5389 = vmatprep.mubr.bf16.mxu1 %v173_v32  ;;  %v7823_v9 = vld [vmem:[#allocation5 + $0x400] ss:$16 sps:$4 sm:$0xff]  }
  0xe8   :  { %v7853_v32 = vld [vmem:[#allocation5 + $0x4a0] ss:$16 sps:$4 sm:$0xff]  }
  0xe9   :  { %4868 = vmatpush1.bf16.msra.mxu0 %v7733_v10  ;;  %5360 = vmatpush1.bf16.msra.mxu1 %v7736_v11  ;;  %v7826_v10 = vld [vmem:[#allocation5 + $0x408] ss:$16 sps:$4 sm:$0xff]   ;;  %v172_v11 = vpack.c.bf16 %v148_v7, %v148_v7  ;;  %v7918_v7 = vld [vmem:[#allocation5 + $0x5ec] ss:$16 sps:$4 sm:$0xff]  }
  0xea   :  { %4869 = vmatprep.subr.bf16.mxu0 %v7741_v12  ;;  %5361 = vmatprep.subr.bf16.mxu1 %v7744_v13  ;;  %v7831_v12 = vld [vmem:[#allocation5 + $0x424] ss:$16 sps:$4 sm:$0xff]   ;;  %v7834_v13 = vld [vmem:[#allocation5 + $0x42c] ss:$16 sps:$4 sm:$0xff]  }
  0xed   :  { %4870 = vmatpush1.bf16.msra.mxu0 %v7739_v14  ;;  %5362 = vmatpush1.bf16.msra.mxu1 %v7742_v15  ;;  %v151_v14 = vld [vmem:[#allocation2 + $0x28] sm:$0xff] }
  0xee   :  { %4871 = vmatprep.subr.bf16.mxu0 %v7747_v16  ;;  %5363 = vmatprep.subr.bf16.mxu1 %v7750_v17  ;;  %v175_v15 = vpack.c.bf16 %v151_v14, %v151_v14  ;;  %v7829_v16 = vld [vmem:[#allocation5 + $0x420] ss:$16 sps:$4 sm:$0xff]   ;;  %v7832_v17 = vld [vmem:[#allocation5 + $0x428] ss:$16 sps:$4 sm:$0xff]  }
  0xef   :  { %v7922_v14 = vld [vmem:[#allocation5 + $0x608] ss:$16 sps:$4 sm:$0xff]  }
  0xf1   :  { %4872 = vmatpush1.bf16.msra.mxu0 %v7745_v18  ;;  %5364 = vmatpush1.bf16.msra.mxu1 %v7748_v19  ;;  %v7837_v18 = vld [vmem:[#allocation5 + $0x444] ss:$16 sps:$4 sm:$0xff]   ;;  %v7840_v19 = vld [vmem:[#allocation5 + $0x44c] ss:$16 sps:$4 sm:$0xff]  }
  0xf2   :  { %4873 = vmatprep.subr.bf16.mxu0 %v7753_v20  ;;  %5365 = vmatprep.subr.bf16.mxu1 %v7756_v21  ;;  %v7835_v20 = vld [vmem:[#allocation5 + $0x440] ss:$16 sps:$4 sm:$0xff]   ;;  %v7838_v21 = vld [vmem:[#allocation5 + $0x448] ss:$16 sps:$4 sm:$0xff]  }
  0xf5   :  { %4874 = vmatpush1.bf16.msra.mxu0 %v7751_v22  ;;  %5366 = vmatpush1.bf16.msra.mxu1 %v7754_v23  ;;  %v7843_v22 = vld [vmem:[#allocation5 + $0x464] ss:$16 sps:$4 sm:$0xff]   ;;  %v7846_v23 = vld [vmem:[#allocation5 + $0x46c] ss:$16 sps:$4 sm:$0xff]  }
  0xf6   :  { %4875 = vmatprep.subr.bf16.mxu0 %v7759_v24  ;;  %5367 = vmatprep.subr.bf16.mxu1 %v7762_v25  ;;  %v7841_v24 = vld [vmem:[#allocation5 + $0x460] ss:$16 sps:$4 sm:$0xff]   ;;  %v7844_v25 = vld [vmem:[#allocation5 + $0x468] ss:$16 sps:$4 sm:$0xff]  }
  0xf9   :  { %4876 = vmatpush1.bf16.msra.mxu0 %v7757_v26  ;;  %5368 = vmatpush1.bf16.msra.mxu1 %v7760_v27  ;;  %v7849_v26 = vld [vmem:[#allocation5 + $0x484] ss:$16 sps:$4 sm:$0xff]   ;;  %v7852_v27 = vld [vmem:[#allocation5 + $0x48c] ss:$16 sps:$4 sm:$0xff]  }
  0xfa   :  { %4877 = vmatprep.subr.bf16.mxu0 %v7765_v28  ;;  %5369 = vmatprep.subr.bf16.mxu1 %v7768_v29  ;;  %v7847_v28 = vld [vmem:[#allocation5 + $0x480] ss:$16 sps:$4 sm:$0xff]   ;;  %v7850_v29 = vld [vmem:[#allocation5 + $0x488] ss:$16 sps:$4 sm:$0xff]  }
  0xfd   :  { %4878 = vmatpush1.bf16.msra.mxu0 %v7763_v31  ;;  %5370 = vmatpush1.bf16.msra.mxu1 %v7766_v33  ;;  %v7858_v31 = vld [vmem:[#allocation5 + $0x4ac] ss:$16 sps:$4 sm:$0xff]   ;;  %v7856_v33 = vld [vmem:[#allocation5 + $0x4a8] ss:$16 sps:$4 sm:$0xff]  }
  0xfe   :  { %4879 = vmatprep.subr.bf16.mxu0 %v7771_v34  ;;  %5371 = vmatprep.subr.bf16.mxu1 %v7774_v35  ;;  %v7861_v34 = vld [vmem:[#allocation5 + $0x4c4] ss:$16 sps:$4 sm:$0xff]   ;;  %v7864_v35 = vld [vmem:[#allocation5 + $0x4cc] ss:$16 sps:$4 sm:$0xff]  }
 0x101   :  { %4880 = vmatpush1.bf16.msra.mxu0 %v7769_v36  ;;  %5372 = vmatpush1.bf16.msra.mxu1 %v7772_v37  ;;  %v7859_v36 = vld [vmem:[#allocation5 + $0x4c0] ss:$16 sps:$4 sm:$0xff]   ;;  %v7862_v37 = vld [vmem:[#allocation5 + $0x4c8] ss:$16 sps:$4 sm:$0xff]  }
 0x102   :  { %4881 = vmatprep.subr.bf16.mxu0 %v7777_v38  ;;  %5373 = vmatprep.subr.bf16.mxu1 %v7780_v39  ;;  %v7867_v38 = vld [vmem:[#allocation5 + $0x4e4] ss:$16 sps:$4 sm:$0xff]   ;;  %v7870_v39 = vld [vmem:[#allocation5 + $0x4ec] ss:$16 sps:$4 sm:$0xff]  }
 0x105   :  { %4882 = vmatpush1.bf16.msra.mxu0 %v7775_v40  ;;  %5374 = vmatpush1.bf16.msra.mxu1 %v7778_v41  ;;  %v7865_v40 = vld [vmem:[#allocation5 + $0x4e0] ss:$16 sps:$4 sm:$0xff]   ;;  %v7868_v41 = vld [vmem:[#allocation5 + $0x4e8] ss:$16 sps:$4 sm:$0xff]  }
 0x106   :  { %4883 = vmatprep.subr.bf16.mxu0 %v7783_v42  ;;  %5375 = vmatprep.subr.bf16.mxu1 %v7786_v43  ;;  %v7873_v42 = vld [vmem:[#allocation5 + $0x504] ss:$16 sps:$4 sm:$0xff]   ;;  %v7876_v43 = vld [vmem:[#allocation5 + $0x50c] ss:$16 sps:$4 sm:$0xff]  }
 0x109   :  { %4884 = vmatpush1.bf16.msra.mxu0 %v7781_v44  ;;  %5376 = vmatpush1.bf16.msra.mxu1 %v7784_v45  ;;  %v7871_v44 = vld [vmem:[#allocation5 + $0x500] ss:$16 sps:$4 sm:$0xff]   ;;  %v7874_v45 = vld [vmem:[#allocation5 + $0x508] ss:$16 sps:$4 sm:$0xff]  }
 0x10a   :  { %4885 = vmatprep.subr.bf16.mxu0 %v7789_v46  ;;  %5377 = vmatprep.subr.bf16.mxu1 %v7792_v47  ;;  %v7879_v46 = vld [vmem:[#allocation5 + $0x524] ss:$16 sps:$4 sm:$0xff]   ;;  %v7882_v47 = vld [vmem:[#allocation5 + $0x52c] ss:$16 sps:$4 sm:$0xff]  }
 0x10d   :  { %4886 = vmatpush1.bf16.msra.mxu0 %v7787_v48  ;;  %5378 = vmatpush1.bf16.msra.mxu1 %v7790_v49  ;;  %v7877_v48 = vld [vmem:[#allocation5 + $0x520] ss:$16 sps:$4 sm:$0xff]   ;;  %v7880_v49 = vld [vmem:[#allocation5 + $0x528] ss:$16 sps:$4 sm:$0xff]  }
 0x10e   :  { %4887 = vmatprep.subr.bf16.mxu0 %v7795_v50  ;;  %5379 = vmatprep.subr.bf16.mxu1 %v7798_v51  ;;  %v7885_v50 = vld [vmem:[#allocation5 + $0x544] ss:$16 sps:$4 sm:$0xff]   ;;  %v7888_v51 = vld [vmem:[#allocation5 + $0x54c] ss:$16 sps:$4 sm:$0xff]  }
 0x111   :  { %4888 = vmatpush1.bf16.msra.mxu0 %v7793_v52  ;;  %5380 = vmatpush1.bf16.msra.mxu1 %v7796_v53  ;;  %v7883_v52 = vld [vmem:[#allocation5 + $0x540] ss:$16 sps:$4 sm:$0xff]   ;;  %v7886_v53 = vld [vmem:[#allocation5 + $0x548] ss:$16 sps:$4 sm:$0xff]  }
 0x112   :  { %4889 = vmatprep.subr.bf16.mxu0 %v7801_v54  ;;  %5381 = vmatprep.subr.bf16.mxu1 %v7804_v55  ;;  %v7891_v54 = vld [vmem:[#allocation5 + $0x564] ss:$16 sps:$4 sm:$0xff]   ;;  %v7894_v55 = vld [vmem:[#allocation5 + $0x56c] ss:$16 sps:$4 sm:$0xff]  }
 0x115   :  { %4890 = vmatpush1.bf16.msra.mxu0 %v7799_v56  ;;  %5382 = vmatpush1.bf16.msra.mxu1 %v7802_v57  ;;  %v7889_v56 = vld [vmem:[#allocation5 + $0x560] ss:$16 sps:$4 sm:$0xff]   ;;  %v7892_v57 = vld [vmem:[#allocation5 + $0x568] ss:$16 sps:$4 sm:$0xff]  }
 0x116   :  { %4891 = vmatprep.subr.bf16.mxu0 %v7807_v58  ;;  %5383 = vmatprep.subr.bf16.mxu1 %v7810_v59  ;;  %v7897_v58 = vld [vmem:[#allocation5 + $0x584] ss:$16 sps:$4 sm:$0xff]   ;;  %v7900_v59 = vld [vmem:[#allocation5 + $0x58c] ss:$16 sps:$4 sm:$0xff]  }
 0x119   :  { %4892 = vmatpush1.bf16.msra.mxu0 %v7805_v60  ;;  %5384 = vmatpush1.bf16.msra.mxu1 %v7808_v61  ;;  %v7895_v60 = vld [vmem:[#allocation5 + $0x580] ss:$16 sps:$4 sm:$0xff]   ;;  %v7898_v61 = vld [vmem:[#allocation5 + $0x588] ss:$16 sps:$4 sm:$0xff]  }
 0x11a   :  { %4893 = vmatprep.subr.bf16.mxu0 %v7813_v62  ;;  %5385 = vmatprep.subr.bf16.mxu1 %v7816_v63  ;;  %v7903_v62 = vld [vmem:[#allocation5 + $0x5a4] ss:$16 sps:$4 sm:$0xff]   ;;  %v7906_v63 = vld [vmem:[#allocation5 + $0x5ac] ss:$16 sps:$4 sm:$0xff]  }
 0x11d   :  { %4894 = vmatpush1.bf16.msra.mxu0 %v7811_v0  ;;  %5386 = vmatpush1.bf16.msra.mxu1 %v7814_v1  ;;  %v7901_v0 = vld [vmem:[#allocation5 + $0x5a0] ss:$16 sps:$4 sm:$0xff]   ;;  %v7904_v1 = vld [vmem:[#allocation5 + $0x5a8] ss:$16 sps:$4 sm:$0xff]  }
 0x11e   :  { %4895 = vmatprep.subr.bf16.mxu0 %v7819_v2  ;;  %5387 = vmatprep.subr.bf16.mxu1 %v7822_v3  ;;  %v7909_v2 = vld [vmem:[#allocation5 + $0x5c4] ss:$16 sps:$4 sm:$0xff]   ;;  %v7912_v3 = vld [vmem:[#allocation5 + $0x5cc] ss:$16 sps:$4 sm:$0xff]  }
 0x121   :  { %4896 = vmatpush1.bf16.msra.mxu0 %v7817_v4  ;;  %5388 = vmatpush1.bf16.msra.mxu1 %v7820_v5  ;;  %v7907_v4 = vld [vmem:[#allocation5 + $0x5c0] ss:$16 sps:$4 sm:$0xff]   ;;  %v7910_v5 = vld [vmem:[#allocation5 + $0x5c8] ss:$16 sps:$4 sm:$0xff]  }
 0x122   :  { %4906 = vmatprep.subr.bf16.mxu0 %v7825_v6  ;;  %5398 = vmatprep.subr.bf16.mxu1 %v7828_v8  ;;  %v7915_v6 = vld [vmem:[#allocation5 + $0x5e4] ss:$16 sps:$4 sm:$0xff]   ;;  %v7913_v8 = vld [vmem:[#allocation5 + $0x5e0] ss:$16 sps:$4 sm:$0xff]  }
 0x124   :  { %4898 = vmatmul.mubr.bf16.vlgmr.msra.gmra.mrb[0].mxu0 %v172_v11  ;;  %5390 = vmatmul.mubr.bf16.vlgmr.msra.gmra.mrb[0].mxu1 %v172_v11  ;;  %v150_v11 = vld [vmem:[#allocation2 + $0x20] sm:$0xff] }
 0x125   :  { %4907 = vmatpush1.bf16.msra.mxu0 %v7823_v9  ;;  %5399 = vmatpush1.bf16.msra.mxu1 %v7826_v10  ;;  %v7916_v9 = vld [vmem:[#allocation5 + $0x5e8] ss:$16 sps:$4 sm:$0xff]   ;;  %v7921_v10 = vld [vmem:[#allocation5 + $0x604] ss:$16 sps:$4 sm:$0xff]  }
 0x126   :  { %4908 = vmatprep.subr.bf16.mxu0 %v7831_v12  ;;  %5400 = vmatprep.subr.bf16.mxu1 %v7834_v13  ;;  %v7924_v12 = vld [vmem:[#allocation5 + $0x60c] ss:$16 sps:$4 sm:$0xff]   ;;  %v7919_v13 = vld [vmem:[#allocation5 + $0x600] ss:$16 sps:$4 sm:$0xff]  }
 0x127   :  { %4938 = vmatprep.mubr.bf16.mxu0 %v175_v15  ;;  %5430 = vmatprep.mubr.bf16.mxu1 %v175_v15  ;;  %v174_v15 = vpack.c.bf16 %v150_v11, %v150_v11  ;;  %v8014_v11 = vld [vmem:[#allocation5 + $0x7ec] ss:$16 sps:$4 sm:$0xff]  }
 0x129   :  { %4909 = vmatpush1.bf16.msra.mxu0 %v7829_v16  ;;  %5401 = vmatpush1.bf16.msra.mxu1 %v7832_v17  ;;  %v153_v16 = vld [vmem:[#allocation2 + $0x38] sm:$0xff]  ;;  %v7927_v17 = vld [vmem:[#allocation5 + $0x624] ss:$16 sps:$4 sm:$0xff]  }
 0x12a   :  { %4910 = vmatprep.subr.bf16.mxu0 %v7837_v18  ;;  %5402 = vmatprep.subr.bf16.mxu1 %v7840_v19  ;;  %v7930_v18 = vld [vmem:[#allocation5 + $0x62c] ss:$16 sps:$4 sm:$0xff]   ;;  %v177_v19 = vpack.c.bf16 %v153_v16, %v153_v16 }
 0x12b   :  { %v8020_v16 = vld [vmem:[#allocation5 + $0x80c] ss:$16 sps:$4 sm:$0xff]  }
 0x12d   :  { %4911 = vmatpush1.bf16.msra.mxu0 %v7835_v20  ;;  %5403 = vmatpush1.bf16.msra.mxu1 %v7838_v21  ;;  %v7925_v20 = vld [vmem:[#allocation5 + $0x620] ss:$16 sps:$4 sm:$0xff]   ;;  %v7928_v21 = vld [vmem:[#allocation5 + $0x628] ss:$16 sps:$4 sm:$0xff]  }
 0x12e   :  { %4912 = vmatprep.subr.bf16.mxu0 %v7843_v22  ;;  %5404 = vmatprep.subr.bf16.mxu1 %v7846_v23  ;;  %v7933_v22 = vld [vmem:[#allocation5 + $0x644] ss:$16 sps:$4 sm:$0xff]   ;;  %v7936_v23 = vld [vmem:[#allocation5 + $0x64c] ss:$16 sps:$4 sm:$0xff]  }
 0x131   :  { %4913 = vmatpush1.bf16.msra.mxu0 %v7841_v24  ;;  %5405 = vmatpush1.bf16.msra.mxu1 %v7844_v25  ;;  %v7931_v24 = vld [vmem:[#allocation5 + $0x640] ss:$16 sps:$4 sm:$0xff]   ;;  %v7934_v25 = vld [vmem:[#allocation5 + $0x648] ss:$16 sps:$4 sm:$0xff]  }
 0x132   :  { %4914 = vmatprep.subr.bf16.mxu0 %v7849_v26  ;;  %5406 = vmatprep.subr.bf16.mxu1 %v7852_v27  ;;  %v7939_v26 = vld [vmem:[#allocation5 + $0x664] ss:$16 sps:$4 sm:$0xff]   ;;  %v7942_v27 = vld [vmem:[#allocation5 + $0x66c] ss:$16 sps:$4 sm:$0xff]  }
 0x135   :  { %4915 = vmatpush1.bf16.msra.mxu0 %v7847_v28  ;;  %5407 = vmatpush1.bf16.msra.mxu1 %v7850_v29  ;;  %v7937_v28 = vld [vmem:[#allocation5 + $0x660] ss:$16 sps:$4 sm:$0xff]   ;;  %v7940_v29 = vld [vmem:[#allocation5 + $0x668] ss:$16 sps:$4 sm:$0xff]  }
 0x136   :  { %4916 = vmatprep.subr.bf16.mxu0 %v7855_v30  ;;  %5408 = vmatprep.subr.bf16.mxu1 %v7858_v31  ;;  %v7945_v30 = vld [vmem:[#allocation5 + $0x684] ss:$16 sps:$4 sm:$0xff]   ;;  %v7948_v31 = vld [vmem:[#allocation5 + $0x68c] ss:$16 sps:$4 sm:$0xff]  }
 0x139   :  { %4917 = vmatpush1.bf16.msra.mxu0 %v7853_v32  ;;  %5409 = vmatpush1.bf16.msra.mxu1 %v7856_v33  ;;  %v7943_v32 = vld [vmem:[#allocation5 + $0x680] ss:$16 sps:$4 sm:$0xff]   ;;  %v7946_v33 = vld [vmem:[#allocation5 + $0x688] ss:$16 sps:$4 sm:$0xff]  }
 0x13a   :  { %4918 = vmatprep.subr.bf16.mxu0 %v7861_v34  ;;  %5410 = vmatprep.subr.bf16.mxu1 %v7864_v35  ;;  %v7951_v34 = vld [vmem:[#allocation5 + $0x6a4] ss:$16 sps:$4 sm:$0xff]   ;;  %v7954_v35 = vld [vmem:[#allocation5 + $0x6ac] ss:$16 sps:$4 sm:$0xff]  }
 0x13d   :  { %4919 = vmatpush1.bf16.msra.mxu0 %v7859_v36  ;;  %5411 = vmatpush1.bf16.msra.mxu1 %v7862_v37  ;;  %v7949_v36 = vld [vmem:[#allocation5 + $0x6a0] ss:$16 sps:$4 sm:$0xff]   ;;  %v7952_v37 = vld [vmem:[#allocation5 + $0x6a8] ss:$16 sps:$4 sm:$0xff]  }
 0x13e   :  { %4920 = vmatprep.subr.bf16.mxu0 %v7867_v38  ;;  %5412 = vmatprep.subr.bf16.mxu1 %v7870_v39  ;;  %v7957_v38 = vld [vmem:[#allocation5 + $0x6c4] ss:$16 sps:$4 sm:$0xff]   ;;  %v7960_v39 = vld [vmem:[#allocation5 + $0x6cc] ss:$16 sps:$4 sm:$0xff]  }
 0x141   :  { %4921 = vmatpush1.bf16.msra.mxu0 %v7865_v40  ;;  %5413 = vmatpush1.bf16.msra.mxu1 %v7868_v41  ;;  %v7955_v40 = vld [vmem:[#allocation5 + $0x6c0] ss:$16 sps:$4 sm:$0xff]   ;;  %v7958_v41 = vld [vmem:[#allocation5 + $0x6c8] ss:$16 sps:$4 sm:$0xff]  }
 0x142   :  { %4922 = vmatprep.subr.bf16.mxu0 %v7873_v42  ;;  %5414 = vmatprep.subr.bf16.mxu1 %v7876_v43  ;;  %v7963_v42 = vld [vmem:[#allocation5 + $0x6e4] ss:$16 sps:$4 sm:$0xff]   ;;  %v7966_v43 = vld [vmem:[#allocation5 + $0x6ec] ss:$16 sps:$4 sm:$0xff]  }
 0x145   :  { %4923 = vmatpush1.bf16.msra.mxu0 %v7871_v44  ;;  %5415 = vmatpush1.bf16.msra.mxu1 %v7874_v45  ;;  %v7961_v44 = vld [vmem:[#allocation5 + $0x6e0] ss:$16 sps:$4 sm:$0xff]   ;;  %v7964_v45 = vld [vmem:[#allocation5 + $0x6e8] ss:$16 sps:$4 sm:$0xff]  }
 0x146   :  { %4924 = vmatprep.subr.bf16.mxu0 %v7879_v46  ;;  %5416 = vmatprep.subr.bf16.mxu1 %v7882_v47  ;;  %v7969_v46 = vld [vmem:[#allocation5 + $0x704] ss:$16 sps:$4 sm:$0xff]   ;;  %v7972_v47 = vld [vmem:[#allocation5 + $0x70c] ss:$16 sps:$4 sm:$0xff]  }
 0x149   :  { %4925 = vmatpush1.bf16.msra.mxu0 %v7877_v48  ;;  %5417 = vmatpush1.bf16.msra.mxu1 %v7880_v49  ;;  %v7967_v48 = vld [vmem:[#allocation5 + $0x700] ss:$16 sps:$4 sm:$0xff]   ;;  %v7970_v49 = vld [vmem:[#allocation5 + $0x708] ss:$16 sps:$4 sm:$0xff]  }
 0x14a   :  { %4926 = vmatprep.subr.bf16.mxu0 %v7885_v50  ;;  %5418 = vmatprep.subr.bf16.mxu1 %v7888_v51  ;;  %v7975_v50 = vld [vmem:[#allocation5 + $0x724] ss:$16 sps:$4 sm:$0xff]   ;;  %v7978_v51 = vld [vmem:[#allocation5 + $0x72c] ss:$16 sps:$4 sm:$0xff]  }
 0x14d   :  { %4927 = vmatpush1.bf16.msra.mxu0 %v7883_v52  ;;  %5419 = vmatpush1.bf16.msra.mxu1 %v7886_v53  ;;  %v7973_v52 = vld [vmem:[#allocation5 + $0x720] ss:$16 sps:$4 sm:$0xff]   ;;  %v7976_v53 = vld [vmem:[#allocation5 + $0x728] ss:$16 sps:$4 sm:$0xff]  }
 0x14e   :  { %4928 = vmatprep.subr.bf16.mxu0 %v7891_v54  ;;  %5420 = vmatprep.subr.bf16.mxu1 %v7894_v55  ;;  %v7981_v54 = vld [vmem:[#allocation5 + $0x744] ss:$16 sps:$4 sm:$0xff]   ;;  %v7984_v55 = vld [vmem:[#allocation5 + $0x74c] ss:$16 sps:$4 sm:$0xff]  }
 0x151   :  { %4929 = vmatpush1.bf16.msra.mxu0 %v7889_v56  ;;  %5421 = vmatpush1.bf16.msra.mxu1 %v7892_v57  ;;  %v7979_v56 = vld [vmem:[#allocation5 + $0x740] ss:$16 sps:$4 sm:$0xff]   ;;  %v7982_v57 = vld [vmem:[#allocation5 + $0x748] ss:$16 sps:$4 sm:$0xff]  }
 0x152   :  { %4930 = vmatprep.subr.bf16.mxu0 %v7897_v58  ;;  %5422 = vmatprep.subr.bf16.mxu1 %v7900_v59  ;;  %v7987_v58 = vld [vmem:[#allocation5 + $0x764] ss:$16 sps:$4 sm:$0xff]   ;;  %v7990_v59 = vld [vmem:[#allocation5 + $0x76c] ss:$16 sps:$4 sm:$0xff]  }
 0x155   :  { %4931 = vmatpush1.bf16.msra.mxu0 %v7895_v60  ;;  %5423 = vmatpush1.bf16.msra.mxu1 %v7898_v61  ;;  %v7985_v60 = vld [vmem:[#allocation5 + $0x760] ss:$16 sps:$4 sm:$0xff]   ;;  %v7988_v61 = vld [vmem:[#allocation5 + $0x768] ss:$16 sps:$4 sm:$0xff]  }
 0x156   :  { %4932 = vmatprep.subr.bf16.mxu0 %v7903_v62  ;;  %5424 = vmatprep.subr.bf16.mxu1 %v7906_v63  ;;  %v7993_v62 = vld [vmem:[#allocation5 + $0x784] ss:$16 sps:$4 sm:$0xff]   ;;  %v7996_v63 = vld [vmem:[#allocation5 + $0x78c] ss:$16 sps:$4 sm:$0xff]  }
 0x159   :  { %4933 = vmatpush1.bf16.msra.mxu0 %v7901_v0  ;;  %5425 = vmatpush1.bf16.msra.mxu1 %v7904_v1  ;;  %v7991_v0 = vld [vmem:[#allocation5 + $0x780] ss:$16 sps:$4 sm:$0xff]   ;;  %v7994_v1 = vld [vmem:[#allocation5 + $0x788] ss:$16 sps:$4 sm:$0xff]  }
 0x15a   :  { %4934 = vmatprep.subr.bf16.mxu0 %v7909_v2  ;;  %5426 = vmatprep.subr.bf16.mxu1 %v7912_v3  ;;  %v7999_v2 = vld [vmem:[#allocation5 + $0x7a4] ss:$16 sps:$4 sm:$0xff]   ;;  %v8002_v3 = vld [vmem:[#allocation5 + $0x7ac] ss:$16 sps:$4 sm:$0xff]  }
 0x15d   :  { %4935 = vmatpush1.bf16.msra.mxu0 %v7907_v4  ;;  %5427 = vmatpush1.bf16.msra.mxu1 %v7910_v5  ;;  %v7997_v4 = vld [vmem:[#allocation5 + $0x7a0] ss:$16 sps:$4 sm:$0xff]   ;;  %v8000_v5 = vld [vmem:[#allocation5 + $0x7a8] ss:$16 sps:$4 sm:$0xff]  }
 0x15e   :  { %4936 = vmatprep.subr.bf16.mxu0 %v7915_v6  ;;  %5428 = vmatprep.subr.bf16.mxu1 %v7918_v7  ;;  %v8005_v6 = vld [vmem:[#allocation5 + $0x7c4] ss:$16 sps:$4 sm:$0xff]   ;;  %v8008_v7 = vld [vmem:[#allocation5 + $0x7cc] ss:$16 sps:$4 sm:$0xff]  }
 0x161   :  { %4937 = vmatpush1.bf16.msra.mxu0 %v7913_v8  ;;  %5429 = vmatpush1.bf16.msra.mxu1 %v7916_v9  ;;  %v8003_v8 = vld [vmem:[#allocation5 + $0x7c0] ss:$16 sps:$4 sm:$0xff]   ;;  %v8006_v9 = vld [vmem:[#allocation5 + $0x7c8] ss:$16 sps:$4 sm:$0xff]  }
 0x162   :  { %4947 = vmatprep.subr.bf16.mxu0 %v7921_v10  ;;  %5439 = vmatprep.subr.bf16.mxu1 %v7924_v12  ;;  %v8011_v10 = vld [vmem:[#allocation5 + $0x7e4] ss:$16 sps:$4 sm:$0xff]   ;;  %v8009_v12 = vld [vmem:[#allocation5 + $0x7e0] ss:$16 sps:$4 sm:$0xff]  }
 0x164   :  { %4939 = vmatmul.mubr.bf16.vlgmr.msra.gmra.mrb[0].mxu0 %v174_v15  ;;  %5431 = vmatmul.mubr.bf16.vlgmr.msra.gmra.mrb[0].mxu1 %v174_v15  ;;  %v8017_v15 = vld [vmem:[#allocation5 + $0x804] ss:$16 sps:$4 sm:$0xff]  }
 0x165   :  { %4948 = vmatpush1.bf16.msra.mxu0 %v7919_v13  ;;  %5440 = vmatpush1.bf16.msra.mxu1 %v7922_v14  ;;  %v8012_v13 = vld [vmem:[#allocation5 + $0x7e8] ss:$16 sps:$4 sm:$0xff]   ;;  %v152_v14 = vld [vmem:[#allocation2 + $0x30] sm:$0xff] }
 0x166   :  { %4949 = vmatprep.subr.bf16.mxu0 %v7927_v17  ;;  %5441 = vmatprep.subr.bf16.mxu1 %v7930_v18  ;;  %v176_v17 = vpack.c.bf16 %v152_v14, %v152_v14  ;;  %v155_v18 = vld [vmem:[#allocation2 + $0x48] sm:$0xff]  ;;  %v8107_v14 = vld [vmem:[#allocation5 + $0x9e4] ss:$16 sps:$4 sm:$0xff]  }
 0x167   :  { %4979 = vmatprep.mubr.bf16.mxu0 %v177_v19  ;;  %5471 = vmatprep.mubr.bf16.mxu1 %v177_v19  ;;  %v8015_v19 = vld [vmem:[#allocation5 + $0x800] ss:$16 sps:$4 sm:$0xff]  }
 0x169   :  { %4950 = vmatpush1.bf16.msra.mxu0 %v7925_v20  ;;  %5442 = vmatpush1.bf16.msra.mxu1 %v7928_v21  ;;  %v8018_v20 = vld [vmem:[#allocation5 + $0x808] ss:$16 sps:$4 sm:$0xff]   ;;  %v8023_v21 = vld [vmem:[#allocation5 + $0x824] ss:$16 sps:$4 sm:$0xff]  }
 0x16a   :  { %4951 = vmatprep.subr.bf16.mxu0 %v7933_v22  ;;  %5443 = vmatprep.subr.bf16.mxu1 %v7936_v23  ;;  %v8026_v22 = vld [vmem:[#allocation5 + $0x82c] ss:$16 sps:$4 sm:$0xff]   ;;  %v179_v23 = vpack.c.bf16 %v155_v18, %v155_v18  ;;  %v8113_v18 = vld [vmem:[#allocation5 + $0xa04] ss:$16 sps:$4 sm:$0xff]  }
 0x16d   :  { %4952 = vmatpush1.bf16.msra.mxu0 %v7931_v24  ;;  %5444 = vmatpush1.bf16.msra.mxu1 %v7934_v25  ;;  %v8021_v24 = vld [vmem:[#allocation5 + $0x820] ss:$16 sps:$4 sm:$0xff]   ;;  %v8024_v25 = vld [vmem:[#allocation5 + $0x828] ss:$16 sps:$4 sm:$0xff]  }
 0x16e   :  { %4953 = vmatprep.subr.bf16.mxu0 %v7939_v26  ;;  %5445 = vmatprep.subr.bf16.mxu1 %v7942_v27  ;;  %v8029_v26 = vld [vmem:[#allocation5 + $0x844] ss:$16 sps:$4 sm:$0xff]   ;;  %v8032_v27 = vld [vmem:[#allocation5 + $0x84c] ss:$16 sps:$4 sm:$0xff]  }
 0x171   :  { %4954 = vmatpush1.bf16.msra.mxu0 %v7937_v28  ;;  %5446 = vmatpush1.bf16.msra.mxu1 %v7940_v29  ;;  %v8027_v28 = vld [vmem:[#allocation5 + $0x840] ss:$16 sps:$4 sm:$0xff]   ;;  %v8030_v29 = vld [vmem:[#allocation5 + $0x848] ss:$16 sps:$4 sm:$0xff]  }
 0x172   :  { %4955 = vmatprep.subr.bf16.mxu0 %v7945_v30  ;;  %5447 = vmatprep.subr.bf16.mxu1 %v7948_v31  ;;  %v8035_v30 = vld [vmem:[#allocation5 + $0x864] ss:$16 sps:$4 sm:$0xff]   ;;  %v8038_v31 = vld [vmem:[#allocation5 + $0x86c] ss:$16 sps:$4 sm:$0xff]  }
 0x175   :  { %4956 = vmatpush1.bf16.msra.mxu0 %v7943_v32  ;;  %5448 = vmatpush1.bf16.msra.mxu1 %v7946_v33  ;;  %v8033_v32 = vld [vmem:[#allocation5 + $0x860] ss:$16 sps:$4 sm:$0xff]   ;;  %v8036_v33 = vld [vmem:[#allocation5 + $0x868] ss:$16 sps:$4 sm:$0xff]  }
 0x176   :  { %4957 = vmatprep.subr.bf16.mxu0 %v7951_v34  ;;  %5449 = vmatprep.subr.bf16.mxu1 %v7954_v35  ;;  %v8041_v34 = vld [vmem:[#allocation5 + $0x884] ss:$16 sps:$4 sm:$0xff]   ;;  %v8044_v35 = vld [vmem:[#allocation5 + $0x88c] ss:$16 sps:$4 sm:$0xff]  }
 0x179   :  { %4958 = vmatpush1.bf16.msra.mxu0 %v7949_v36  ;;  %5450 = vmatpush1.bf16.msra.mxu1 %v7952_v37  ;;  %v8039_v36 = vld [vmem:[#allocation5 + $0x880] ss:$16 sps:$4 sm:$0xff]   ;;  %v8042_v37 = vld [vmem:[#allocation5 + $0x888] ss:$16 sps:$4 sm:$0xff]  }
 0x17a   :  { %4959 = vmatprep.subr.bf16.mxu0 %v7957_v38  ;;  %5451 = vmatprep.subr.bf16.mxu1 %v7960_v39  ;;  %v8047_v38 = vld [vmem:[#allocation5 + $0x8a4] ss:$16 sps:$4 sm:$0xff]   ;;  %v8050_v39 = vld [vmem:[#allocation5 + $0x8ac] ss:$16 sps:$4 sm:$0xff]  }
 0x17d   :  { %4960 = vmatpush1.bf16.msra.mxu0 %v7955_v40  ;;  %5452 = vmatpush1.bf16.msra.mxu1 %v7958_v41  ;;  %v8045_v40 = vld [vmem:[#allocation5 + $0x8a0] ss:$16 sps:$4 sm:$0xff]   ;;  %v8048_v41 = vld [vmem:[#allocation5 + $0x8a8] ss:$16 sps:$4 sm:$0xff]  }
 0x17e   :  { %4961 = vmatprep.subr.bf16.mxu0 %v7963_v42  ;;  %5453 = vmatprep.subr.bf16.mxu1 %v7966_v43  ;;  %v8053_v42 = vld [vmem:[#allocation5 + $0x8c4] ss:$16 sps:$4 sm:$0xff]   ;;  %v8056_v43 = vld [vmem:[#allocation5 + $0x8cc] ss:$16 sps:$4 sm:$0xff]  }
 0x181   :  { %4962 = vmatpush1.bf16.msra.mxu0 %v7961_v44  ;;  %5454 = vmatpush1.bf16.msra.mxu1 %v7964_v45  ;;  %v8051_v44 = vld [vmem:[#allocation5 + $0x8c0] ss:$16 sps:$4 sm:$0xff]   ;;  %v8054_v45 = vld [vmem:[#allocation5 + $0x8c8] ss:$16 sps:$4 sm:$0xff]  }
 0x182   :  { %4963 = vmatprep.subr.bf16.mxu0 %v7969_v46  ;;  %5455 = vmatprep.subr.bf16.mxu1 %v7972_v47  ;;  %v8059_v46 = vld [vmem:[#allocation5 + $0x8e4] ss:$16 sps:$4 sm:$0xff]   ;;  %v8062_v47 = vld [vmem:[#allocation5 + $0x8ec] ss:$16 sps:$4 sm:$0xff]  }
 0x185   :  { %4964 = vmatpush1.bf16.msra.mxu0 %v7967_v48  ;;  %5456 = vmatpush1.bf16.msra.mxu1 %v7970_v49  ;;  %v8057_v48 = vld [vmem:[#allocation5 + $0x8e0] ss:$16 sps:$4 sm:$0xff]   ;;  %v8060_v49 = vld [vmem:[#allocation5 + $0x8e8] ss:$16 sps:$4 sm:$0xff]  }
 0x186   :  { %4965 = vmatprep.subr.bf16.mxu0 %v7975_v50  ;;  %5457 = vmatprep.subr.bf16.mxu1 %v7978_v51  ;;  %v8065_v50 = vld [vmem:[#allocation5 + $0x904] ss:$16 sps:$4 sm:$0xff]   ;;  %v8068_v51 = vld [vmem:[#allocation5 + $0x90c] ss:$16 sps:$4 sm:$0xff]  }
 0x189   :  { %4966 = vmatpush1.bf16.msra.mxu0 %v7973_v52  ;;  %5458 = vmatpush1.bf16.msra.mxu1 %v7976_v53  ;;  %v8063_v52 = vld [vmem:[#allocation5 + $0x900] ss:$16 sps:$4 sm:$0xff]   ;;  %v8066_v53 = vld [vmem:[#allocation5 + $0x908] ss:$16 sps:$4 sm:$0xff]  }
 0x18a   :  { %4967 = vmatprep.subr.bf16.mxu0 %v7981_v54  ;;  %5459 = vmatprep.subr.bf16.mxu1 %v7984_v55  ;;  %v8071_v54 = vld [vmem:[#allocation5 + $0x924] ss:$16 sps:$4 sm:$0xff]   ;;  %v8074_v55 = vld [vmem:[#allocation5 + $0x92c] ss:$16 sps:$4 sm:$0xff]  }
 0x18d   :  { %4968 = vmatpush1.bf16.msra.mxu0 %v7979_v56  ;;  %5460 = vmatpush1.bf16.msra.mxu1 %v7982_v57  ;;  %v8069_v56 = vld [vmem:[#allocation5 + $0x920] ss:$16 sps:$4 sm:$0xff]   ;;  %v8072_v57 = vld [vmem:[#allocation5 + $0x928] ss:$16 sps:$4 sm:$0xff]  }
 0x18e   :  { %4969 = vmatprep.subr.bf16.mxu0 %v7987_v58  ;;  %5461 = vmatprep.subr.bf16.mxu1 %v7990_v59  ;;  %v8077_v58 = vld [vmem:[#allocation5 + $0x944] ss:$16 sps:$4 sm:$0xff]   ;;  %v8080_v59 = vld [vmem:[#allocation5 + $0x94c] ss:$16 sps:$4 sm:$0xff]  }
 0x191   :  { %4970 = vmatpush1.bf16.msra.mxu0 %v7985_v60  ;;  %5462 = vmatpush1.bf16.msra.mxu1 %v7988_v61  ;;  %v8075_v60 = vld [vmem:[#allocation5 + $0x940] ss:$16 sps:$4 sm:$0xff]   ;;  %v8078_v61 = vld [vmem:[#allocation5 + $0x948] ss:$16 sps:$4 sm:$0xff]  }
 0x192   :  { %4971 = vmatprep.subr.bf16.mxu0 %v7993_v62  ;;  %5463 = vmatprep.subr.bf16.mxu1 %v7996_v63  ;;  %v8083_v62 = vld [vmem:[#allocation5 + $0x964] ss:$16 sps:$4 sm:$0xff]   ;;  %v8086_v63 = vld [vmem:[#allocation5 + $0x96c] ss:$16 sps:$4 sm:$0xff]  }
 0x195   :  { %4972 = vmatpush1.bf16.msra.mxu0 %v7991_v0  ;;  %5464 = vmatpush1.bf16.msra.mxu1 %v7994_v1  ;;  %v8081_v0 = vld [vmem:[#allocation5 + $0x960] ss:$16 sps:$4 sm:$0xff]   ;;  %v8084_v1 = vld [vmem:[#allocation5 + $0x968] ss:$16 sps:$4 sm:$0xff]  }
 0x196   :  { %4973 = vmatprep.subr.bf16.mxu0 %v7999_v2  ;;  %5465 = vmatprep.subr.bf16.mxu1 %v8002_v3  ;;  %v8089_v2 = vld [vmem:[#allocation5 + $0x984] ss:$16 sps:$4 sm:$0xff]   ;;  %v8092_v3 = vld [vmem:[#allocation5 + $0x98c] ss:$16 sps:$4 sm:$0xff]  }
 0x199   :  { %4974 = vmatpush1.bf16.msra.mxu0 %v7997_v4  ;;  %5466 = vmatpush1.bf16.msra.mxu1 %v8000_v5  ;;  %v8087_v4 = vld [vmem:[#allocation5 + $0x980] ss:$16 sps:$4 sm:$0xff]   ;;  %v8090_v5 = vld [vmem:[#allocation5 + $0x988] ss:$16 sps:$4 sm:$0xff]  }
 0x19a   :  { %4975 = vmatprep.subr.bf16.mxu0 %v8005_v6  ;;  %5467 = vmatprep.subr.bf16.mxu1 %v8008_v7  ;;  %v8095_v6 = vld [vmem:[#allocation5 + $0x9a4] ss:$16 sps:$4 sm:$0xff]   ;;  %v8098_v7 = vld [vmem:[#allocation5 + $0x9ac] ss:$16 sps:$4 sm:$0xff]  }
 0x19d   :  { %4976 = vmatpush1.bf16.msra.mxu0 %v8003_v8  ;;  %5468 = vmatpush1.bf16.msra.mxu1 %v8006_v9  ;;  %v8093_v8 = vld [vmem:[#allocation5 + $0x9a0] ss:$16 sps:$4 sm:$0xff]   ;;  %v8096_v9 = vld [vmem:[#allocation5 + $0x9a8] ss:$16 sps:$4 sm:$0xff]  }
 0x19e   :  { %4977 = vmatprep.subr.bf16.mxu0 %v8011_v10  ;;  %5469 = vmatprep.subr.bf16.mxu1 %v8014_v11  ;;  %v8101_v10 = vld [vmem:[#allocation5 + $0x9c4] ss:$16 sps:$4 sm:$0xff]   ;;  %v8104_v11 = vld [vmem:[#allocation5 + $0x9cc] ss:$16 sps:$4 sm:$0xff]  }
 0x1a1   :  { %4978 = vmatpush1.bf16.msra.mxu0 %v8009_v12  ;;  %5470 = vmatpush1.bf16.msra.mxu1 %v8012_v13  ;;  %v8099_v12 = vld [vmem:[#allocation5 + $0x9c0] ss:$16 sps:$4 sm:$0xff]   ;;  %v8102_v13 = vld [vmem:[#allocation5 + $0x9c8] ss:$16 sps:$4 sm:$0xff]  }
 0x1a2   :  { %4988 = vmatprep.subr.bf16.mxu0 %v8017_v15  ;;  %5480 = vmatprep.subr.bf16.mxu1 %v8020_v16  ;;  %v8110_v15 = vld [vmem:[#allocation5 + $0x9ec] ss:$16 sps:$4 sm:$0xff]   ;;  %v8105_v16 = vld [vmem:[#allocation5 + $0x9e0] ss:$16 sps:$4 sm:$0xff]  }
 0x1a4   :  { %4980 = vmatmul.mubr.bf16.vlgmr.msra.gmra.mrb[0].mxu0 %v176_v17  ;;  %5472 = vmatmul.mubr.bf16.vlgmr.msra.gmra.mrb[0].mxu1 %v176_v17  ;;  %v8108_v17 = vld [vmem:[#allocation5 + $0x9e8] ss:$16 sps:$4 sm:$0xff]  }
 0x1a5   :  { %4989 = vmatpush1.bf16.msra.mxu0 %v8015_v19  ;;  %5481 = vmatpush1.bf16.msra.mxu1 %v8018_v20  ;;  %v154_v19 = vld [vmem:[#allocation2 + $0x40] sm:$0xff]  ;;  %v8116_v20 = vld [vmem:[#allocation5 + $0xa0c] ss:$16 sps:$4 sm:$0xff]  }
 0x1a6   :  { %4990 = vmatprep.subr.bf16.mxu0 %v8023_v21  ;;  %5482 = vmatprep.subr.bf16.mxu1 %v8026_v22  ;;  %v157_v21 = vld [vmem:[#allocation2 + $0x58] sm:$0xff]  ;;  %v178_v22 = vpack.c.bf16 %v154_v19, %v154_v19 }
 0x1a7   :  { %5020 = vmatprep.mubr.bf16.mxu0 %v179_v23  ;;  %5512 = vmatprep.mubr.bf16.mxu1 %v179_v23  ;;  %v8111_v23 = vld [vmem:[#allocation5 + $0xa00] ss:$16 sps:$4 sm:$0xff]   ;;  %v8206_v19 = vld [vmem:[#allocation5 + $0xbec] ss:$16 sps:$4 sm:$0xff]  }
 0x1a9   :  { %4991 = vmatpush1.bf16.msra.mxu0 %v8021_v24  ;;  %5483 = vmatpush1.bf16.msra.mxu1 %v8024_v25  ;;  %v8114_v24 = vld [vmem:[#allocation5 + $0xa08] ss:$16 sps:$4 sm:$0xff]   ;;  %v8119_v25 = vld [vmem:[#allocation5 + $0xa24] ss:$16 sps:$4 sm:$0xff]  }
 0x1aa   :  { %4992 = vmatprep.subr.bf16.mxu0 %v8029_v26  ;;  %5484 = vmatprep.subr.bf16.mxu1 %v8032_v27  ;;  %v8122_v26 = vld [vmem:[#allocation5 + $0xa2c] ss:$16 sps:$4 sm:$0xff]   ;;  %v181_v27 = vpack.c.bf16 %v157_v21, %v157_v21  ;;  %v8204_v21 = vld [vmem:[#allocation5 + $0xbe8] ss:$16 sps:$4 sm:$0xff]  }
 0x1ad   :  { %4993 = vmatpush1.bf16.msra.mxu0 %v8027_v28  ;;  %5485 = vmatpush1.bf16.msra.mxu1 %v8030_v29  ;;  %v8117_v28 = vld [vmem:[#allocation5 + $0xa20] ss:$16 sps:$4 sm:$0xff]   ;;  %v8120_v29 = vld [vmem:[#allocation5 + $0xa28] ss:$16 sps:$4 sm:$0xff]  }
 0x1ae   :  { %4994 = vmatprep.subr.bf16.mxu0 %v8035_v30  ;;  %5486 = vmatprep.subr.bf16.mxu1 %v8038_v31  ;;  %v8125_v30 = vld [vmem:[#allocation5 + $0xa44] ss:$16 sps:$4 sm:$0xff]   ;;  %v8128_v31 = vld [vmem:[#allocation5 + $0xa4c] ss:$16 sps:$4 sm:$0xff]  }
 0x1b1   :  { %4995 = vmatpush1.bf16.msra.mxu0 %v8033_v32  ;;  %5487 = vmatpush1.bf16.msra.mxu1 %v8036_v33  ;;  %v8123_v32 = vld [vmem:[#allocation5 + $0xa40] ss:$16 sps:$4 sm:$0xff]   ;;  %v8126_v33 = vld [vmem:[#allocation5 + $0xa48] ss:$16 sps:$4 sm:$0xff]  }
 0x1b2   :  { %4996 = vmatprep.subr.bf16.mxu0 %v8041_v34  ;;  %5488 = vmatprep.subr.bf16.mxu1 %v8044_v35  ;;  %v8131_v34 = vld [vmem:[#allocation5 + $0xa64] ss:$16 sps:$4 sm:$0xff]   ;;  %v8134_v35 = vld [vmem:[#allocation5 + $0xa6c] ss:$16 sps:$4 sm:$0xff]  }
 0x1b5   :  { %4997 = vmatpush1.bf16.msra.mxu0 %v8039_v36  ;;  %5489 = vmatpush1.bf16.msra.mxu1 %v8042_v37  ;;  %v8129_v36 = vld [vmem:[#allocation5 + $0xa60] ss:$16 sps:$4 sm:$0xff]   ;;  %v8132_v37 = vld [vmem:[#allocation5 + $0xa68] ss:$16 sps:$4 sm:$0xff]  }
 0x1b6   :  { %4998 = vmatprep.subr.bf16.mxu0 %v8047_v38  ;;  %5490 = vmatprep.subr.bf16.mxu1 %v8050_v39  ;;  %v8137_v38 = vld [vmem:[#allocation5 + $0xa84] ss:$16 sps:$4 sm:$0xff]   ;;  %v8140_v39 = vld [vmem:[#allocation5 + $0xa8c] ss:$16 sps:$4 sm:$0xff]  }
 0x1b9   :  { %4999 = vmatpush1.bf16.msra.mxu0 %v8045_v40  ;;  %5491 = vmatpush1.bf16.msra.mxu1 %v8048_v41  ;;  %v8135_v40 = vld [vmem:[#allocation5 + $0xa80] ss:$16 sps:$4 sm:$0xff]   ;;  %v8138_v41 = vld [vmem:[#allocation5 + $0xa88] ss:$16 sps:$4 sm:$0xff]  }
 0x1ba   :  { %5000 = vmatprep.subr.bf16.mxu0 %v8053_v42  ;;  %5492 = vmatprep.subr.bf16.mxu1 %v8056_v43  ;;  %v8143_v42 = vld [vmem:[#allocation5 + $0xaa4] ss:$16 sps:$4 sm:$0xff]   ;;  %v8146_v43 = vld [vmem:[#allocation5 + $0xaac] ss:$16 sps:$4 sm:$0xff]  }
 0x1bd   :  { %5001 = vmatpush1.bf16.msra.mxu0 %v8051_v44  ;;  %5493 = vmatpush1.bf16.msra.mxu1 %v8054_v45  ;;  %v8141_v44 = vld [vmem:[#allocation5 + $0xaa0] ss:$16 sps:$4 sm:$0xff]   ;;  %v8144_v45 = vld [vmem:[#allocation5 + $0xaa8] ss:$16 sps:$4 sm:$0xff]  }
 0x1be   :  { %5002 = vmatprep.subr.bf16.mxu0 %v8059_v46  ;;  %5494 = vmatprep.subr.bf16.mxu1 %v8062_v47  ;;  %v8149_v46 = vld [vmem:[#allocation5 + $0xac4] ss:$16 sps:$4 sm:$0xff]   ;;  %v8152_v47 = vld [vmem:[#allocation5 + $0xacc] ss:$16 sps:$4 sm:$0xff]  }
 0x1c1   :  { %5003 = vmatpush1.bf16.msra.mxu0 %v8057_v48  ;;  %5495 = vmatpush1.bf16.msra.mxu1 %v8060_v49  ;;  %v8147_v48 = vld [vmem:[#allocation5 + $0xac0] ss:$16 sps:$4 sm:$0xff]   ;;  %v8150_v49 = vld [vmem:[#allocation5 + $0xac8] ss:$16 sps:$4 sm:$0xff]  }
 0x1c2   :  { %5004 = vmatprep.subr.bf16.mxu0 %v8065_v50  ;;  %5496 = vmatprep.subr.bf16.mxu1 %v8068_v51  ;;  %v8155_v50 = vld [vmem:[#allocation5 + $0xae4] ss:$16 sps:$4 sm:$0xff]   ;;  %v8158_v51 = vld [vmem:[#allocation5 + $0xaec] ss:$16 sps:$4 sm:$0xff]  }
 0x1c5   :  { %5005 = vmatpush1.bf16.msra.mxu0 %v8063_v52  ;;  %5497 = vmatpush1.bf16.msra.mxu1 %v8066_v53  ;;  %v8153_v52 = vld [vmem:[#allocation5 + $0xae0] ss:$16 sps:$4 sm:$0xff]   ;;  %v8156_v53 = vld [vmem:[#allocation5 + $0xae8] ss:$16 sps:$4 sm:$0xff]  }
 0x1c6   :  { %5006 = vmatprep.subr.bf16.mxu0 %v8071_v54  ;;  %5498 = vmatprep.subr.bf16.mxu1 %v8074_v55  ;;  %v8161_v54 = vld [vmem:[#allocation5 + $0xb04] ss:$16 sps:$4 sm:$0xff]   ;;  %v8164_v55 = vld [vmem:[#allocation5 + $0xb0c] ss:$16 sps:$4 sm:$0xff]  }
 0x1c9   :  { %5007 = vmatpush1.bf16.msra.mxu0 %v8069_v56  ;;  %5499 = vmatpush1.bf16.msra.mxu1 %v8072_v57  ;;  %v8159_v56 = vld [vmem:[#allocation5 + $0xb00] ss:$16 sps:$4 sm:$0xff]   ;;  %v8162_v57 = vld [vmem:[#allocation5 + $0xb08] ss:$16 sps:$4 sm:$0xff]  }
 0x1ca   :  { %5008 = vmatprep.subr.bf16.mxu0 %v8077_v58  ;;  %5500 = vmatprep.subr.bf16.mxu1 %v8080_v59  ;;  %v8167_v58 = vld [vmem:[#allocation5 + $0xb24] ss:$16 sps:$4 sm:$0xff]   ;;  %v8170_v59 = vld [vmem:[#allocation5 + $0xb2c] ss:$16 sps:$4 sm:$0xff]  }
 0x1cd   :  { %5009 = vmatpush1.bf16.msra.mxu0 %v8075_v60  ;;  %5501 = vmatpush1.bf16.msra.mxu1 %v8078_v61  ;;  %v8165_v60 = vld [vmem:[#allocation5 + $0xb20] ss:$16 sps:$4 sm:$0xff]   ;;  %v8168_v61 = vld [vmem:[#allocation5 + $0xb28] ss:$16 sps:$4 sm:$0xff]  }
 0x1ce   :  { %5010 = vmatprep.subr.bf16.mxu0 %v8083_v62  ;;  %5502 = vmatprep.subr.bf16.mxu1 %v8086_v63  ;;  %v8173_v62 = vld [vmem:[#allocation5 + $0xb44] ss:$16 sps:$4 sm:$0xff]   ;;  %v8176_v63 = vld [vmem:[#allocation5 + $0xb4c] ss:$16 sps:$4 sm:$0xff]  }
 0x1d1   :  { %5011 = vmatpush1.bf16.msra.mxu0 %v8081_v0  ;;  %5503 = vmatpush1.bf16.msra.mxu1 %v8084_v1  ;;  %v8171_v0 = vld [vmem:[#allocation5 + $0xb40] ss:$16 sps:$4 sm:$0xff]   ;;  %v8174_v1 = vld [vmem:[#allocation5 + $0xb48] ss:$16 sps:$4 sm:$0xff]  }
 0x1d2   :  { %5012 = vmatprep.subr.bf16.mxu0 %v8089_v2  ;;  %5504 = vmatprep.subr.bf16.mxu1 %v8092_v3  ;;  %v8179_v2 = vld [vmem:[#allocation5 + $0xb64] ss:$16 sps:$4 sm:$0xff]   ;;  %v8182_v3 = vld [vmem:[#allocation5 + $0xb6c] ss:$16 sps:$4 sm:$0xff]  }
 0x1d5   :  { %5013 = vmatpush1.bf16.msra.mxu0 %v8087_v4  ;;  %5505 = vmatpush1.bf16.msra.mxu1 %v8090_v5  ;;  %v8177_v4 = vld [vmem:[#allocation5 + $0xb60] ss:$16 sps:$4 sm:$0xff]   ;;  %v8180_v5 = vld [vmem:[#allocation5 + $0xb68] ss:$16 sps:$4 sm:$0xff]  }
 0x1d6   :  { %5014 = vmatprep.subr.bf16.mxu0 %v8095_v6  ;;  %5506 = vmatprep.subr.bf16.mxu1 %v8098_v7  ;;  %v8185_v6 = vld [vmem:[#allocation5 + $0xb84] ss:$16 sps:$4 sm:$0xff]   ;;  %v8188_v7 = vld [vmem:[#allocation5 + $0xb8c] ss:$16 sps:$4 sm:$0xff]  }
 0x1d9   :  { %5015 = vmatpush1.bf16.msra.mxu0 %v8093_v8  ;;  %5507 = vmatpush1.bf16.msra.mxu1 %v8096_v9  ;;  %v8183_v8 = vld [vmem:[#allocation5 + $0xb80] ss:$16 sps:$4 sm:$0xff]   ;;  %v8186_v9 = vld [vmem:[#allocation5 + $0xb88] ss:$16 sps:$4 sm:$0xff]  }
 0x1da   :  { %5016 = vmatprep.subr.bf16.mxu0 %v8101_v10  ;;  %5508 = vmatprep.subr.bf16.mxu1 %v8104_v11  ;;  %v8191_v10 = vld [vmem:[#allocation5 + $0xba4] ss:$16 sps:$4 sm:$0xff]   ;;  %v8194_v11 = vld [vmem:[#allocation5 + $0xbac] ss:$16 sps:$4 sm:$0xff]  }
 0x1dd   :  { %5017 = vmatpush1.bf16.msra.mxu0 %v8099_v12  ;;  %5509 = vmatpush1.bf16.msra.mxu1 %v8102_v13  ;;  %v8189_v12 = vld [vmem:[#allocation5 + $0xba0] ss:$16 sps:$4 sm:$0xff]   ;;  %v8192_v13 = vld [vmem:[#allocation5 + $0xba8] ss:$16 sps:$4 sm:$0xff]  }
 0x1de   :  { %5018 = vmatprep.subr.bf16.mxu0 %v8107_v14  ;;  %5510 = vmatprep.subr.bf16.mxu1 %v8110_v15  ;;  %v8197_v14 = vld [vmem:[#allocation5 + $0xbc4] ss:$16 sps:$4 sm:$0xff]   ;;  %v8200_v15 = vld [vmem:[#allocation5 + $0xbcc] ss:$16 sps:$4 sm:$0xff]  }
 0x1e1   :  { %5019 = vmatpush1.bf16.msra.mxu0 %v8105_v16  ;;  %5511 = vmatpush1.bf16.msra.mxu1 %v8108_v17  ;;  %v8195_v16 = vld [vmem:[#allocation5 + $0xbc0] ss:$16 sps:$4 sm:$0xff]   ;;  %v8198_v17 = vld [vmem:[#allocation5 + $0xbc8] ss:$16 sps:$4 sm:$0xff]  }
 0x1e2   :  { %5029 = vmatprep.subr.bf16.mxu0 %v8113_v18  ;;  %5521 = vmatprep.subr.bf16.mxu1 %v8116_v20  ;;  %v8203_v18 = vld [vmem:[#allocation5 + $0xbe4] ss:$16 sps:$4 sm:$0xff]   ;;  %v8201_v20 = vld [vmem:[#allocation5 + $0xbe0] ss:$16 sps:$4 sm:$0xff]  }
 0x1e4   :  { %5021 = vmatmul.mubr.bf16.vlgmr.msra.gmra.mrb[0].mxu0 %v178_v22  ;;  %5513 = vmatmul.mubr.bf16.vlgmr.msra.gmra.mrb[0].mxu1 %v178_v22  ;;  %v8209_v22 = vld [vmem:[#allocation5 + $0xc04] ss:$16 sps:$4 sm:$0xff]  }
 0x1e5   :  { %5030 = vmatpush1.bf16.msra.mxu0 %v8111_v23  ;;  %5522 = vmatpush1.bf16.msra.mxu1 %v8114_v24  ;;  %v156_v23 = vld [vmem:[#allocation2 + $0x50] sm:$0xff]  ;;  %v8212_v24 = vld [vmem:[#allocation5 + $0xc0c] ss:$16 sps:$4 sm:$0xff]  }
 0x1e6   :  { %5031 = vmatprep.subr.bf16.mxu0 %v8119_v25  ;;  %5523 = vmatprep.subr.bf16.mxu1 %v8122_v26  ;;  %v159_v25 = vld [vmem:[#allocation2 + $0x68] sm:$0xff]  ;;  %v180_v26 = vpack.c.bf16 %v156_v23, %v156_v23 }
 0x1e7   :  { %5061 = vmatprep.mubr.bf16.mxu0 %v181_v27  ;;  %5553 = vmatprep.mubr.bf16.mxu1 %v181_v27  ;;  %v8207_v27 = vld [vmem:[#allocation5 + $0xc00] ss:$16 sps:$4 sm:$0xff]   ;;  %v8302_v23 = vld [vmem:[#allocation5 + $0xdec] ss:$16 sps:$4 sm:$0xff]  }
 0x1e9   :  { %5032 = vmatpush1.bf16.msra.mxu0 %v8117_v28  ;;  %5524 = vmatpush1.bf16.msra.mxu1 %v8120_v29  ;;  %v8210_v28 = vld [vmem:[#allocation5 + $0xc08] ss:$16 sps:$4 sm:$0xff]   ;;  %v8215_v29 = vld [vmem:[#allocation5 + $0xc24] ss:$16 sps:$4 sm:$0xff]  }
 0x1ea   :  { %5033 = vmatprep.subr.bf16.mxu0 %v8125_v30  ;;  %5525 = vmatprep.subr.bf16.mxu1 %v8128_v31  ;;  %v8218_v30 = vld [vmem:[#allocation5 + $0xc2c] ss:$16 sps:$4 sm:$0xff]   ;;  %v183_v31 = vpack.c.bf16 %v159_v25, %v159_v25  ;;  %v8300_v25 = vld [vmem:[#allocation5 + $0xde8] ss:$16 sps:$4 sm:$0xff]  }
 0x1ed   :  { %5034 = vmatpush1.bf16.msra.mxu0 %v8123_v32  ;;  %5526 = vmatpush1.bf16.msra.mxu1 %v8126_v33  ;;  %v8213_v32 = vld [vmem:[#allocation5 + $0xc20] ss:$16 sps:$4 sm:$0xff]   ;;  %v8216_v33 = vld [vmem:[#allocation5 + $0xc28] ss:$16 sps:$4 sm:$0xff]  }
 0x1ee   :  { %5035 = vmatprep.subr.bf16.mxu0 %v8131_v34  ;;  %5527 = vmatprep.subr.bf16.mxu1 %v8134_v35  ;;  %v8221_v34 = vld [vmem:[#allocation5 + $0xc44] ss:$16 sps:$4 sm:$0xff]   ;;  %v8224_v35 = vld [vmem:[#allocation5 + $0xc4c] ss:$16 sps:$4 sm:$0xff]  }
 0x1f1   :  { %5036 = vmatpush1.bf16.msra.mxu0 %v8129_v36  ;;  %5528 = vmatpush1.bf16.msra.mxu1 %v8132_v37  ;;  %v8219_v36 = vld [vmem:[#allocation5 + $0xc40] ss:$16 sps:$4 sm:$0xff]   ;;  %v8222_v37 = vld [vmem:[#allocation5 + $0xc48] ss:$16 sps:$4 sm:$0xff]  }
 0x1f2   :  { %5037 = vmatprep.subr.bf16.mxu0 %v8137_v38  ;;  %5529 = vmatprep.subr.bf16.mxu1 %v8140_v39  ;;  %v8227_v38 = vld [vmem:[#allocation5 + $0xc64] ss:$16 sps:$4 sm:$0xff]   ;;  %v8230_v39 = vld [vmem:[#allocation5 + $0xc6c] ss:$16 sps:$4 sm:$0xff]  }
 0x1f5   :  { %5038 = vmatpush1.bf16.msra.mxu0 %v8135_v40  ;;  %5530 = vmatpush1.bf16.msra.mxu1 %v8138_v41  ;;  %v8225_v40 = vld [vmem:[#allocation5 + $0xc60] ss:$16 sps:$4 sm:$0xff]   ;;  %v8228_v41 = vld [vmem:[#allocation5 + $0xc68] ss:$16 sps:$4 sm:$0xff]  }
 0x1f6   :  { %5039 = vmatprep.subr.bf16.mxu0 %v8143_v42  ;;  %5531 = vmatprep.subr.bf16.mxu1 %v8146_v43  ;;  %v8233_v42 = vld [vmem:[#allocation5 + $0xc84] ss:$16 sps:$4 sm:$0xff]   ;;  %v8236_v43 = vld [vmem:[#allocation5 + $0xc8c] ss:$16 sps:$4 sm:$0xff]  }
 0x1f9   :  { %5040 = vmatpush1.bf16.msra.mxu0 %v8141_v44  ;;  %5532 = vmatpush1.bf16.msra.mxu1 %v8144_v45  ;;  %v8231_v44 = vld [vmem:[#allocation5 + $0xc80] ss:$16 sps:$4 sm:$0xff]   ;;  %v8234_v45 = vld [vmem:[#allocation5 + $0xc88] ss:$16 sps:$4 sm:$0xff]  }
 0x1fa   :  { %5041 = vmatprep.subr.bf16.mxu0 %v8149_v46  ;;  %5533 = vmatprep.subr.bf16.mxu1 %v8152_v47  ;;  %v8239_v46 = vld [vmem:[#allocation5 + $0xca4] ss:$16 sps:$4 sm:$0xff]   ;;  %v8242_v47 = vld [vmem:[#allocation5 + $0xcac] ss:$16 sps:$4 sm:$0xff]  }
 0x1fd   :  { %5042 = vmatpush1.bf16.msra.mxu0 %v8147_v48  ;;  %5534 = vmatpush1.bf16.msra.mxu1 %v8150_v49  ;;  %v8237_v48 = vld [vmem:[#allocation5 + $0xca0] ss:$16 sps:$4 sm:$0xff]   ;;  %v8240_v49 = vld [vmem:[#allocation5 + $0xca8] ss:$16 sps:$4 sm:$0xff]  }
 0x1fe   :  { %5043 = vmatprep.subr.bf16.mxu0 %v8155_v50  ;;  %5535 = vmatprep.subr.bf16.mxu1 %v8158_v51  ;;  %v8245_v50 = vld [vmem:[#allocation5 + $0xcc4] ss:$16 sps:$4 sm:$0xff]   ;;  %v8248_v51 = vld [vmem:[#allocation5 + $0xccc] ss:$16 sps:$4 sm:$0xff]  }
 0x201   :  { %5044 = vmatpush1.bf16.msra.mxu0 %v8153_v52  ;;  %5536 = vmatpush1.bf16.msra.mxu1 %v8156_v53  ;;  %v8243_v52 = vld [vmem:[#allocation5 + $0xcc0] ss:$16 sps:$4 sm:$0xff]   ;;  %v8246_v53 = vld [vmem:[#allocation5 + $0xcc8] ss:$16 sps:$4 sm:$0xff]  }
 0x202   :  { %5045 = vmatprep.subr.bf16.mxu0 %v8161_v54  ;;  %5537 = vmatprep.subr.bf16.mxu1 %v8164_v55  ;;  %v8251_v54 = vld [vmem:[#allocation5 + $0xce4] ss:$16 sps:$4 sm:$0xff]   ;;  %v8254_v55 = vld [vmem:[#allocation5 + $0xcec] ss:$16 sps:$4 sm:$0xff]  }
 0x205   :  { %5046 = vmatpush1.bf16.msra.mxu0 %v8159_v56  ;;  %5538 = vmatpush1.bf16.msra.mxu1 %v8162_v57  ;;  %v8249_v56 = vld [vmem:[#allocation5 + $0xce0] ss:$16 sps:$4 sm:$0xff]   ;;  %v8252_v57 = vld [vmem:[#allocation5 + $0xce8] ss:$16 sps:$4 sm:$0xff]  }
 0x206   :  { %5047 = vmatprep.subr.bf16.mxu0 %v8167_v58  ;;  %5539 = vmatprep.subr.bf16.mxu1 %v8170_v59  ;;  %v8257_v58 = vld [vmem:[#allocation5 + $0xd04] ss:$16 sps:$4 sm:$0xff]   ;;  %v8260_v59 = vld [vmem:[#allocation5 + $0xd0c] ss:$16 sps:$4 sm:$0xff]  }
 0x209   :  { %5048 = vmatpush1.bf16.msra.mxu0 %v8165_v60  ;;  %5540 = vmatpush1.bf16.msra.mxu1 %v8168_v61  ;;  %v8255_v60 = vld [vmem:[#allocation5 + $0xd00] ss:$16 sps:$4 sm:$0xff]   ;;  %v8258_v61 = vld [vmem:[#allocation5 + $0xd08] ss:$16 sps:$4 sm:$0xff]  }
 0x20a   :  { %5049 = vmatprep.subr.bf16.mxu0 %v8173_v62  ;;  %5541 = vmatprep.subr.bf16.mxu1 %v8176_v63  ;;  %v8263_v62 = vld [vmem:[#allocation5 + $0xd24] ss:$16 sps:$4 sm:$0xff]   ;;  %v8266_v63 = vld [vmem:[#allocation5 + $0xd2c] ss:$16 sps:$4 sm:$0xff]  }
 0x20d   :  { %5050 = vmatpush1.bf16.msra.mxu0 %v8171_v0  ;;  %5542 = vmatpush1.bf16.msra.mxu1 %v8174_v1  ;;  %v8261_v0 = vld [vmem:[#allocation5 + $0xd20] ss:$16 sps:$4 sm:$0xff]   ;;  %v8264_v1 = vld [vmem:[#allocation5 + $0xd28] ss:$16 sps:$4 sm:$0xff]  }
 0x20e   :  { %5051 = vmatprep.subr.bf16.mxu0 %v8179_v2  ;;  %5543 = vmatprep.subr.bf16.mxu1 %v8182_v3  ;;  %v8269_v2 = vld [vmem:[#allocation5 + $0xd44] ss:$16 sps:$4 sm:$0xff]   ;;  %v8272_v3 = vld [vmem:[#allocation5 + $0xd4c] ss:$16 sps:$4 sm:$0xff]  }
 0x211   :  { %5052 = vmatpush1.bf16.msra.mxu0 %v8177_v4  ;;  %5544 = vmatpush1.bf16.msra.mxu1 %v8180_v5  ;;  %v8267_v4 = vld [vmem:[#allocation5 + $0xd40] ss:$16 sps:$4 sm:$0xff]   ;;  %v8270_v5 = vld [vmem:[#allocation5 + $0xd48] ss:$16 sps:$4 sm:$0xff]  }
 0x212   :  { %5053 = vmatprep.subr.bf16.mxu0 %v8185_v6  ;;  %5545 = vmatprep.subr.bf16.mxu1 %v8188_v7  ;;  %v8275_v6 = vld [vmem:[#allocation5 + $0xd64] ss:$16 sps:$4 sm:$0xff]   ;;  %v8278_v7 = vld [vmem:[#allocation5 + $0xd6c] ss:$16 sps:$4 sm:$0xff]  }
 0x215   :  { %5054 = vmatpush1.bf16.msra.mxu0 %v8183_v8  ;;  %5546 = vmatpush1.bf16.msra.mxu1 %v8186_v9  ;;  %v8273_v8 = vld [vmem:[#allocation5 + $0xd60] ss:$16 sps:$4 sm:$0xff]   ;;  %v8276_v9 = vld [vmem:[#allocation5 + $0xd68] ss:$16 sps:$4 sm:$0xff]  }
 0x216   :  { %5055 = vmatprep.subr.bf16.mxu0 %v8191_v10  ;;  %5547 = vmatprep.subr.bf16.mxu1 %v8194_v11  ;;  %v8281_v10 = vld [vmem:[#allocation5 + $0xd84] ss:$16 sps:$4 sm:$0xff]   ;;  %v8284_v11 = vld [vmem:[#allocation5 + $0xd8c] ss:$16 sps:$4 sm:$0xff]  }
 0x219   :  { %5056 = vmatpush1.bf16.msra.mxu0 %v8189_v12  ;;  %5548 = vmatpush1.bf16.msra.mxu1 %v8192_v13  ;;  %v8279_v12 = vld [vmem:[#allocation5 + $0xd80] ss:$16 sps:$4 sm:$0xff]   ;;  %v8282_v13 = vld [vmem:[#allocation5 + $0xd88] ss:$16 sps:$4 sm:$0xff]  }
 0x21a   :  { %5057 = vmatprep.subr.bf16.mxu0 %v8197_v14  ;;  %5549 = vmatprep.subr.bf16.mxu1 %v8200_v15  ;;  %v8287_v14 = vld [vmem:[#allocation5 + $0xda4] ss:$16 sps:$4 sm:$0xff]   ;;  %v8290_v15 = vld [vmem:[#allocation5 + $0xdac] ss:$16 sps:$4 sm:$0xff]  }
 0x21d   :  { %5058 = vmatpush1.bf16.msra.mxu0 %v8195_v16  ;;  %5550 = vmatpush1.bf16.msra.mxu1 %v8198_v17  ;;  %v8285_v16 = vld [vmem:[#allocation5 + $0xda0] ss:$16 sps:$4 sm:$0xff]   ;;  %v8288_v17 = vld [vmem:[#allocation5 + $0xda8] ss:$16 sps:$4 sm:$0xff]  }
 0x21e   :  { %5059 = vmatprep.subr.bf16.mxu0 %v8203_v18  ;;  %5551 = vmatprep.subr.bf16.mxu1 %v8206_v19  ;;  %v8293_v18 = vld [vmem:[#allocation5 + $0xdc4] ss:$16 sps:$4 sm:$0xff]   ;;  %v8296_v19 = vld [vmem:[#allocation5 + $0xdcc] ss:$16 sps:$4 sm:$0xff]  }
 0x221   :  { %5060 = vmatpush1.bf16.msra.mxu0 %v8201_v20  ;;  %5552 = vmatpush1.bf16.msra.mxu1 %v8204_v21  ;;  %v8291_v20 = vld [vmem:[#allocation5 + $0xdc0] ss:$16 sps:$4 sm:$0xff]   ;;  %v8294_v21 = vld [vmem:[#allocation5 + $0xdc8] ss:$16 sps:$4 sm:$0xff]  }
 0x222   :  { %5070 = vmatprep.subr.bf16.mxu0 %v8209_v22  ;;  %5562 = vmatprep.subr.bf16.mxu1 %v8212_v24  ;;  %v8299_v22 = vld [vmem:[#allocation5 + $0xde4] ss:$16 sps:$4 sm:$0xff]   ;;  %v8297_v24 = vld [vmem:[#allocation5 + $0xde0] ss:$16 sps:$4 sm:$0xff]  }
 0x224   :  { %5062 = vmatmul.mubr.bf16.vlgmr.msra.gmra.mrb[0].mxu0 %v180_v26  ;;  %5554 = vmatmul.mubr.bf16.vlgmr.msra.gmra.mrb[0].mxu1 %v180_v26  ;;  %v8305_v26 = vld [vmem:[#allocation5 + $0xe04] ss:$16 sps:$4 sm:$0xff]  }
 0x225   :  { %5071 = vmatpush1.bf16.msra.mxu0 %v8207_v27  ;;  %5563 = vmatpush1.bf16.msra.mxu1 %v8210_v28  ;;  %v158_v27 = vld [vmem:[#allocation2 + $0x60] sm:$0xff]  ;;  %v8308_v28 = vld [vmem:[#allocation5 + $0xe0c] ss:$16 sps:$4 sm:$0xff]  }
 0x226   :  { %5072 = vmatprep.subr.bf16.mxu0 %v8215_v29  ;;  %5564 = vmatprep.subr.bf16.mxu1 %v8218_v30  ;;  %v161_v29 = vld [vmem:[#allocation2 + $0x78] sm:$0xff]  ;;  %v182_v30 = vpack.c.bf16 %v158_v27, %v158_v27 }
 0x227   :  { %5102 = vmatprep.mubr.bf16.mxu0 %v183_v31  ;;  %5594 = vmatprep.mubr.bf16.mxu1 %v183_v31  ;;  %v8303_v31 = vld [vmem:[#allocation5 + $0xe00] ss:$16 sps:$4 sm:$0xff]   ;;  %v8398_v27 = vld [vmem:[#allocation5 + $0xfec] ss:$16 sps:$4 sm:$0xff]  }
 0x229   :  { %5073 = vmatpush1.bf16.msra.mxu0 %v8213_v32  ;;  %5565 = vmatpush1.bf16.msra.mxu1 %v8216_v33  ;;  %v8306_v32 = vld [vmem:[#allocation5 + $0xe08] ss:$16 sps:$4 sm:$0xff]   ;;  %v8311_v33 = vld [vmem:[#allocation5 + $0xe24] ss:$16 sps:$4 sm:$0xff]  }
 0x22a   :  { %5074 = vmatprep.subr.bf16.mxu0 %v8221_v34  ;;  %5566 = vmatprep.subr.bf16.mxu1 %v8224_v35  ;;  %v8314_v34 = vld [vmem:[#allocation5 + $0xe2c] ss:$16 sps:$4 sm:$0xff]   ;;  %v185_v35 = vpack.c.bf16 %v161_v29, %v161_v29  ;;  %v8396_v29 = vld [vmem:[#allocation5 + $0xfe8] ss:$16 sps:$4 sm:$0xff]  }
 0x22d   :  { %5075 = vmatpush1.bf16.msra.mxu0 %v8219_v36  ;;  %5567 = vmatpush1.bf16.msra.mxu1 %v8222_v37  ;;  %v8309_v36 = vld [vmem:[#allocation5 + $0xe20] ss:$16 sps:$4 sm:$0xff]   ;;  %v8312_v37 = vld [vmem:[#allocation5 + $0xe28] ss:$16 sps:$4 sm:$0xff]  }
 0x22e   :  { %5076 = vmatprep.subr.bf16.mxu0 %v8227_v38  ;;  %5568 = vmatprep.subr.bf16.mxu1 %v8230_v39  ;;  %v8317_v38 = vld [vmem:[#allocation5 + $0xe44] ss:$16 sps:$4 sm:$0xff]   ;;  %v8320_v39 = vld [vmem:[#allocation5 + $0xe4c] ss:$16 sps:$4 sm:$0xff]  }
 0x231   :  { %5077 = vmatpush1.bf16.msra.mxu0 %v8225_v40  ;;  %5569 = vmatpush1.bf16.msra.mxu1 %v8228_v41  ;;  %v8315_v40 = vld [vmem:[#allocation5 + $0xe40] ss:$16 sps:$4 sm:$0xff]   ;;  %v8318_v41 = vld [vmem:[#allocation5 + $0xe48] ss:$16 sps:$4 sm:$0xff]  }
 0x232   :  { %5078 = vmatprep.subr.bf16.mxu0 %v8233_v42  ;;  %5570 = vmatprep.subr.bf16.mxu1 %v8236_v43  ;;  %v8323_v42 = vld [vmem:[#allocation5 + $0xe64] ss:$16 sps:$4 sm:$0xff]   ;;  %v8326_v43 = vld [vmem:[#allocation5 + $0xe6c] ss:$16 sps:$4 sm:$0xff]  }
 0x235   :  { %5079 = vmatpush1.bf16.msra.mxu0 %v8231_v44  ;;  %5571 = vmatpush1.bf16.msra.mxu1 %v8234_v45  ;;  %v8321_v44 = vld [vmem:[#allocation5 + $0xe60] ss:$16 sps:$4 sm:$0xff]   ;;  %v8324_v45 = vld [vmem:[#allocation5 + $0xe68] ss:$16 sps:$4 sm:$0xff]  }
 0x236   :  { %5080 = vmatprep.subr.bf16.mxu0 %v8239_v46  ;;  %5572 = vmatprep.subr.bf16.mxu1 %v8242_v47  ;;  %v8329_v46 = vld [vmem:[#allocation5 + $0xe84] ss:$16 sps:$4 sm:$0xff]   ;;  %v8332_v47 = vld [vmem:[#allocation5 + $0xe8c] ss:$16 sps:$4 sm:$0xff]  }
 0x239   :  { %5081 = vmatpush1.bf16.msra.mxu0 %v8237_v48  ;;  %5573 = vmatpush1.bf16.msra.mxu1 %v8240_v49  ;;  %v8327_v48 = vld [vmem:[#allocation5 + $0xe80] ss:$16 sps:$4 sm:$0xff]   ;;  %v8330_v49 = vld [vmem:[#allocation5 + $0xe88] ss:$16 sps:$4 sm:$0xff]  }
 0x23a   :  { %5082 = vmatprep.subr.bf16.mxu0 %v8245_v50  ;;  %5574 = vmatprep.subr.bf16.mxu1 %v8248_v51  ;;  %v8335_v50 = vld [vmem:[#allocation5 + $0xea4] ss:$16 sps:$4 sm:$0xff]   ;;  %v8338_v51 = vld [vmem:[#allocation5 + $0xeac] ss:$16 sps:$4 sm:$0xff]  }
 0x23d   :  { %5083 = vmatpush1.bf16.msra.mxu0 %v8243_v52  ;;  %5575 = vmatpush1.bf16.msra.mxu1 %v8246_v53  ;;  %v8333_v52 = vld [vmem:[#allocation5 + $0xea0] ss:$16 sps:$4 sm:$0xff]   ;;  %v8336_v53 = vld [vmem:[#allocation5 + $0xea8] ss:$16 sps:$4 sm:$0xff]  }
 0x23e   :  { %5084 = vmatprep.subr.bf16.mxu0 %v8251_v54  ;;  %5576 = vmatprep.subr.bf16.mxu1 %v8254_v55  ;;  %v8341_v54 = vld [vmem:[#allocation5 + $0xec4] ss:$16 sps:$4 sm:$0xff]   ;;  %v8344_v55 = vld [vmem:[#allocation5 + $0xecc] ss:$16 sps:$4 sm:$0xff]  }
 0x241   :  { %5085 = vmatpush1.bf16.msra.mxu0 %v8249_v56  ;;  %5577 = vmatpush1.bf16.msra.mxu1 %v8252_v57  ;;  %v8339_v56 = vld [vmem:[#allocation5 + $0xec0] ss:$16 sps:$4 sm:$0xff]   ;;  %v8342_v57 = vld [vmem:[#allocation5 + $0xec8] ss:$16 sps:$4 sm:$0xff]  }
 0x242   :  { %5086 = vmatprep.subr.bf16.mxu0 %v8257_v58  ;;  %5578 = vmatprep.subr.bf16.mxu1 %v8260_v59  ;;  %v8347_v58 = vld [vmem:[#allocation5 + $0xee4] ss:$16 sps:$4 sm:$0xff]   ;;  %v8350_v59 = vld [vmem:[#allocation5 + $0xeec] ss:$16 sps:$4 sm:$0xff]  }
 0x245   :  { %5087 = vmatpush1.bf16.msra.mxu0 %v8255_v60  ;;  %5579 = vmatpush1.bf16.msra.mxu1 %v8258_v61  ;;  %v8345_v60 = vld [vmem:[#allocation5 + $0xee0] ss:$16 sps:$4 sm:$0xff]   ;;  %v8348_v61 = vld [vmem:[#allocation5 + $0xee8] ss:$16 sps:$4 sm:$0xff]  }
 0x246   :  { %5088 = vmatprep.subr.bf16.mxu0 %v8263_v62  ;;  %5580 = vmatprep.subr.bf16.mxu1 %v8266_v63  ;;  %v8353_v62 = vld [vmem:[#allocation5 + $0xf04] ss:$16 sps:$4 sm:$0xff]   ;;  %v8356_v63 = vld [vmem:[#allocation5 + $0xf0c] ss:$16 sps:$4 sm:$0xff]  }
 0x249   :  { %5089 = vmatpush1.bf16.msra.mxu0 %v8261_v0  ;;  %5581 = vmatpush1.bf16.msra.mxu1 %v8264_v1  ;;  %v8351_v0 = vld [vmem:[#allocation5 + $0xf00] ss:$16 sps:$4 sm:$0xff]   ;;  %v8354_v1 = vld [vmem:[#allocation5 + $0xf08] ss:$16 sps:$4 sm:$0xff]  }
 0x24a   :  { %5090 = vmatprep.subr.bf16.mxu0 %v8269_v2  ;;  %5582 = vmatprep.subr.bf16.mxu1 %v8272_v3  ;;  %v8359_v2 = vld [vmem:[#allocation5 + $0xf24] ss:$16 sps:$4 sm:$0xff]   ;;  %v8362_v3 = vld [vmem:[#allocation5 + $0xf2c] ss:$16 sps:$4 sm:$0xff]  }
 0x24d   :  { %5091 = vmatpush1.bf16.msra.mxu0 %v8267_v4  ;;  %5583 = vmatpush1.bf16.msra.mxu1 %v8270_v5  ;;  %v8357_v4 = vld [vmem:[#allocation5 + $0xf20] ss:$16 sps:$4 sm:$0xff]   ;;  %v8360_v5 = vld [vmem:[#allocation5 + $0xf28] ss:$16 sps:$4 sm:$0xff]  }
 0x24e   :  { %5092 = vmatprep.subr.bf16.mxu0 %v8275_v6  ;;  %5584 = vmatprep.subr.bf16.mxu1 %v8278_v7  ;;  %v8365_v6 = vld [vmem:[#allocation5 + $0xf44] ss:$16 sps:$4 sm:$0xff]   ;;  %v8368_v7 = vld [vmem:[#allocation5 + $0xf4c] ss:$16 sps:$4 sm:$0xff]  }
 0x251   :  { %5093 = vmatpush1.bf16.msra.mxu0 %v8273_v8  ;;  %5585 = vmatpush1.bf16.msra.mxu1 %v8276_v9  ;;  %v8363_v8 = vld [vmem:[#allocation5 + $0xf40] ss:$16 sps:$4 sm:$0xff]   ;;  %v8366_v9 = vld [vmem:[#allocation5 + $0xf48] ss:$16 sps:$4 sm:$0xff]  }
 0x252   :  { %5094 = vmatprep.subr.bf16.mxu0 %v8281_v10  ;;  %5586 = vmatprep.subr.bf16.mxu1 %v8284_v11  ;;  %v8371_v10 = vld [vmem:[#allocation5 + $0xf64] ss:$16 sps:$4 sm:$0xff]   ;;  %v8374_v11 = vld [vmem:[#allocation5 + $0xf6c] ss:$16 sps:$4 sm:$0xff]  }
 0x255   :  { %5095 = vmatpush1.bf16.msra.mxu0 %v8279_v12  ;;  %5587 = vmatpush1.bf16.msra.mxu1 %v8282_v13  ;;  %v8369_v12 = vld [vmem:[#allocation5 + $0xf60] ss:$16 sps:$4 sm:$0xff]   ;;  %v8372_v13 = vld [vmem:[#allocation5 + $0xf68] ss:$16 sps:$4 sm:$0xff]  }
 0x256   :  { %5096 = vmatprep.subr.bf16.mxu0 %v8287_v14  ;;  %5588 = vmatprep.subr.bf16.mxu1 %v8290_v15  ;;  %v8377_v14 = vld [vmem:[#allocation5 + $0xf84] ss:$16 sps:$4 sm:$0xff]   ;;  %v8380_v15 = vld [vmem:[#allocation5 + $0xf8c] ss:$16 sps:$4 sm:$0xff]  }
 0x259   :  { %5097 = vmatpush1.bf16.msra.mxu0 %v8285_v16  ;;  %5589 = vmatpush1.bf16.msra.mxu1 %v8288_v17  ;;  %v8375_v16 = vld [vmem:[#allocation5 + $0xf80] ss:$16 sps:$4 sm:$0xff]   ;;  %v8378_v17 = vld [vmem:[#allocation5 + $0xf88] ss:$16 sps:$4 sm:$0xff]  }
 0x25a   :  { %5098 = vmatprep.subr.bf16.mxu0 %v8293_v18  ;;  %5590 = vmatprep.subr.bf16.mxu1 %v8296_v19  ;;  %v8383_v18 = vld [vmem:[#allocation5 + $0xfa4] ss:$16 sps:$4 sm:$0xff]   ;;  %v8386_v19 = vld [vmem:[#allocation5 + $0xfac] ss:$16 sps:$4 sm:$0xff]  }
 0x25d   :  { %5099 = vmatpush1.bf16.msra.mxu0 %v8291_v20  ;;  %5591 = vmatpush1.bf16.msra.mxu1 %v8294_v21  ;;  %v8381_v20 = vld [vmem:[#allocation5 + $0xfa0] ss:$16 sps:$4 sm:$0xff]   ;;  %v8384_v21 = vld [vmem:[#allocation5 + $0xfa8] ss:$16 sps:$4 sm:$0xff]  }
 0x25e   :  { %5100 = vmatprep.subr.bf16.mxu0 %v8299_v22  ;;  %5592 = vmatprep.subr.bf16.mxu1 %v8302_v23  ;;  %v8389_v22 = vld [vmem:[#allocation5 + $0xfc4] ss:$16 sps:$4 sm:$0xff]   ;;  %v8392_v23 = vld [vmem:[#allocation5 + $0xfcc] ss:$16 sps:$4 sm:$0xff]  }
 0x261   :  { %5101 = vmatpush1.bf16.msra.mxu0 %v8297_v24  ;;  %5593 = vmatpush1.bf16.msra.mxu1 %v8300_v25  ;;  %v8387_v24 = vld [vmem:[#allocation5 + $0xfc0] ss:$16 sps:$4 sm:$0xff]   ;;  %v8390_v25 = vld [vmem:[#allocation5 + $0xfc8] ss:$16 sps:$4 sm:$0xff]  }
 0x262   :  { %5111 = vmatprep.subr.bf16.mxu0 %v8305_v26  ;;  %5603 = vmatprep.subr.bf16.mxu1 %v8308_v28  ;;  %v8395_v26 = vld [vmem:[#allocation5 + $0xfe4] ss:$16 sps:$4 sm:$0xff]   ;;  %v8393_v28 = vld [vmem:[#allocation5 + $0xfe0] ss:$16 sps:$4 sm:$0xff]  }
 0x264   :  { %5103 = vmatmul.mubr.bf16.vlgmr.msra.gmra.mrb[0].mxu0 %v182_v30  ;;  %5595 = vmatmul.mubr.bf16.vlgmr.msra.gmra.mrb[0].mxu1 %v182_v30  ;;  %v8401_v30 = vld [vmem:[#allocation5 + $0x1004] ss:$16 sps:$4 sm:$0xff]  }
 0x265   :  { %5112 = vmatpush1.bf16.msra.mxu0 %v8303_v31  ;;  %5604 = vmatpush1.bf16.msra.mxu1 %v8306_v32  ;;  %v160_v31 = vld [vmem:[#allocation2 + $0x70] sm:$0xff]  ;;  %v8404_v32 = vld [vmem:[#allocation5 + $0x100c] ss:$16 sps:$4 sm:$0xff]  }
 0x266   :  { %5113 = vmatprep.subr.bf16.mxu0 %v8311_v33  ;;  %5605 = vmatprep.subr.bf16.mxu1 %v8314_v34  ;;  %v163_v33 = vld [vmem:[#allocation2 + $0x88] sm:$0xff]  ;;  %v184_v34 = vpack.c.bf16 %v160_v31, %v160_v31 }
 0x267   :  { %5143 = vmatprep.mubr.bf16.mxu0 %v185_v35  ;;  %5635 = vmatprep.mubr.bf16.mxu1 %v185_v35  ;;  %v8399_v35 = vld [vmem:[#allocation5 + $0x1000] ss:$16 sps:$4 sm:$0xff]   ;;  %v8494_v31 = vld [vmem:[#allocation5 + $0x11ec] ss:$16 sps:$4 sm:$0xff]  }
 0x269   :  { %5114 = vmatpush1.bf16.msra.mxu0 %v8309_v36  ;;  %5606 = vmatpush1.bf16.msra.mxu1 %v8312_v37  ;;  %v8402_v36 = vld [vmem:[#allocation5 + $0x1008] ss:$16 sps:$4 sm:$0xff]   ;;  %v8407_v37 = vld [vmem:[#allocation5 + $0x1024] ss:$16 sps:$4 sm:$0xff]  }
 0x26a   :  { %5115 = vmatprep.subr.bf16.mxu0 %v8317_v38  ;;  %5607 = vmatprep.subr.bf16.mxu1 %v8320_v39  ;;  %v8410_v38 = vld [vmem:[#allocation5 + $0x102c] ss:$16 sps:$4 sm:$0xff]   ;;  %v187_v39 = vpack.c.bf16 %v163_v33, %v163_v33  ;;  %v8492_v33 = vld [vmem:[#allocation5 + $0x11e8] ss:$16 sps:$4 sm:$0xff]  }
 0x26d   :  { %5116 = vmatpush1.bf16.msra.mxu0 %v8315_v40  ;;  %5608 = vmatpush1.bf16.msra.mxu1 %v8318_v41  ;;  %v8405_v40 = vld [vmem:[#allocation5 + $0x1020] ss:$16 sps:$4 sm:$0xff]   ;;  %v8408_v41 = vld [vmem:[#allocation5 + $0x1028] ss:$16 sps:$4 sm:$0xff]  }
 0x26e   :  { %5117 = vmatprep.subr.bf16.mxu0 %v8323_v42  ;;  %5609 = vmatprep.subr.bf16.mxu1 %v8326_v43  ;;  %v8413_v42 = vld [vmem:[#allocation5 + $0x1044] ss:$16 sps:$4 sm:$0xff]   ;;  %v8416_v43 = vld [vmem:[#allocation5 + $0x104c] ss:$16 sps:$4 sm:$0xff]  }
 0x271   :  { %5118 = vmatpush1.bf16.msra.mxu0 %v8321_v44  ;;  %5610 = vmatpush1.bf16.msra.mxu1 %v8324_v45  ;;  %v8411_v44 = vld [vmem:[#allocation5 + $0x1040] ss:$16 sps:$4 sm:$0xff]   ;;  %v8414_v45 = vld [vmem:[#allocation5 + $0x1048] ss:$16 sps:$4 sm:$0xff]  }
 0x272   :  { %5119 = vmatprep.subr.bf16.mxu0 %v8329_v46  ;;  %5611 = vmatprep.subr.bf16.mxu1 %v8332_v47  ;;  %v8419_v46 = vld [vmem:[#allocation5 + $0x1064] ss:$16 sps:$4 sm:$0xff]   ;;  %v8422_v47 = vld [vmem:[#allocation5 + $0x106c] ss:$16 sps:$4 sm:$0xff]  }
 0x275   :  { %5120 = vmatpush1.bf16.msra.mxu0 %v8327_v48  ;;  %5612 = vmatpush1.bf16.msra.mxu1 %v8330_v49  ;;  %v8417_v48 = vld [vmem:[#allocation5 + $0x1060] ss:$16 sps:$4 sm:$0xff]   ;;  %v8420_v49 = vld [vmem:[#allocation5 + $0x1068] ss:$16 sps:$4 sm:$0xff]  }
 0x276   :  { %5121 = vmatprep.subr.bf16.mxu0 %v8335_v50  ;;  %5613 = vmatprep.subr.bf16.mxu1 %v8338_v51  ;;  %v8425_v50 = vld [vmem:[#allocation5 + $0x1084] ss:$16 sps:$4 sm:$0xff]   ;;  %v8428_v51 = vld [vmem:[#allocation5 + $0x108c] ss:$16 sps:$4 sm:$0xff]  }
 0x279   :  { %5122 = vmatpush1.bf16.msra.mxu0 %v8333_v52  ;;  %5614 = vmatpush1.bf16.msra.mxu1 %v8336_v53  ;;  %v8423_v52 = vld [vmem:[#allocation5 + $0x1080] ss:$16 sps:$4 sm:$0xff]   ;;  %v8426_v53 = vld [vmem:[#allocation5 + $0x1088] ss:$16 sps:$4 sm:$0xff]  }
 0x27a   :  { %5123 = vmatprep.subr.bf16.mxu0 %v8341_v54  ;;  %5615 = vmatprep.subr.bf16.mxu1 %v8344_v55  ;;  %v8431_v54 = vld [vmem:[#allocation5 + $0x10a4] ss:$16 sps:$4 sm:$0xff]   ;;  %v8434_v55 = vld [vmem:[#allocation5 + $0x10ac] ss:$16 sps:$4 sm:$0xff]  }
 0x27d   :  { %5124 = vmatpush1.bf16.msra.mxu0 %v8339_v56  ;;  %5616 = vmatpush1.bf16.msra.mxu1 %v8342_v57  ;;  %v8429_v56 = vld [vmem:[#allocation5 + $0x10a0] ss:$16 sps:$4 sm:$0xff]   ;;  %v8432_v57 = vld [vmem:[#allocation5 + $0x10a8] ss:$16 sps:$4 sm:$0xff]  }
 0x27e   :  { %5125 = vmatprep.subr.bf16.mxu0 %v8347_v58  ;;  %5617 = vmatprep.subr.bf16.mxu1 %v8350_v59  ;;  %v8437_v58 = vld [vmem:[#allocation5 + $0x10c4] ss:$16 sps:$4 sm:$0xff]   ;;  %v8440_v59 = vld [vmem:[#allocation5 + $0x10cc] ss:$16 sps:$4 sm:$0xff]  }
 0x281   :  { %5126 = vmatpush1.bf16.msra.mxu0 %v8345_v60  ;;  %5618 = vmatpush1.bf16.msra.mxu1 %v8348_v61  ;;  %v8435_v60 = vld [vmem:[#allocation5 + $0x10c0] ss:$16 sps:$4 sm:$0xff]   ;;  %v8438_v61 = vld [vmem:[#allocation5 + $0x10c8] ss:$16 sps:$4 sm:$0xff]  }
 0x282   :  { %5127 = vmatprep.subr.bf16.mxu0 %v8353_v62  ;;  %5619 = vmatprep.subr.bf16.mxu1 %v8356_v63  ;;  %v8443_v62 = vld [vmem:[#allocation5 + $0x10e4] ss:$16 sps:$4 sm:$0xff]   ;;  %v8446_v63 = vld [vmem:[#allocation5 + $0x10ec] ss:$16 sps:$4 sm:$0xff]  }
 0x285   :  { %5128 = vmatpush1.bf16.msra.mxu0 %v8351_v0  ;;  %5620 = vmatpush1.bf16.msra.mxu1 %v8354_v1  ;;  %v8441_v0 = vld [vmem:[#allocation5 + $0x10e0] ss:$16 sps:$4 sm:$0xff]   ;;  %v8444_v1 = vld [vmem:[#allocation5 + $0x10e8] ss:$16 sps:$4 sm:$0xff]  }
 0x286   :  { %5129 = vmatprep.subr.bf16.mxu0 %v8359_v2  ;;  %5621 = vmatprep.subr.bf16.mxu1 %v8362_v3  ;;  %v8449_v2 = vld [vmem:[#allocation5 + $0x1104] ss:$16 sps:$4 sm:$0xff]   ;;  %v8452_v3 = vld [vmem:[#allocation5 + $0x110c] ss:$16 sps:$4 sm:$0xff]  }
 0x289   :  { %5130 = vmatpush1.bf16.msra.mxu0 %v8357_v4  ;;  %5622 = vmatpush1.bf16.msra.mxu1 %v8360_v5  ;;  %v8447_v4 = vld [vmem:[#allocation5 + $0x1100] ss:$16 sps:$4 sm:$0xff]   ;;  %v8450_v5 = vld [vmem:[#allocation5 + $0x1108] ss:$16 sps:$4 sm:$0xff]  }
 0x28a   :  { %5131 = vmatprep.subr.bf16.mxu0 %v8365_v6  ;;  %5623 = vmatprep.subr.bf16.mxu1 %v8368_v7  ;;  %v8455_v6 = vld [vmem:[#allocation5 + $0x1124] ss:$16 sps:$4 sm:$0xff]   ;;  %v8458_v7 = vld [vmem:[#allocation5 + $0x112c] ss:$16 sps:$4 sm:$0xff]  }
 0x28d   :  { %5132 = vmatpush1.bf16.msra.mxu0 %v8363_v8  ;;  %5624 = vmatpush1.bf16.msra.mxu1 %v8366_v9  ;;  %v8453_v8 = vld [vmem:[#allocation5 + $0x1120] ss:$16 sps:$4 sm:$0xff]   ;;  %v8456_v9 = vld [vmem:[#allocation5 + $0x1128] ss:$16 sps:$4 sm:$0xff]  }
 0x28e   :  { %5133 = vmatprep.subr.bf16.mxu0 %v8371_v10  ;;  %5625 = vmatprep.subr.bf16.mxu1 %v8374_v11  ;;  %v8461_v10 = vld [vmem:[#allocation5 + $0x1144] ss:$16 sps:$4 sm:$0xff]   ;;  %v8464_v11 = vld [vmem:[#allocation5 + $0x114c] ss:$16 sps:$4 sm:$0xff]  }
 0x291   :  { %5134 = vmatpush1.bf16.msra.mxu0 %v8369_v12  ;;  %5626 = vmatpush1.bf16.msra.mxu1 %v8372_v13  ;;  %v8459_v12 = vld [vmem:[#allocation5 + $0x1140] ss:$16 sps:$4 sm:$0xff]   ;;  %v8462_v13 = vld [vmem:[#allocation5 + $0x1148] ss:$16 sps:$4 sm:$0xff]  }
 0x292   :  { %5135 = vmatprep.subr.bf16.mxu0 %v8377_v14  ;;  %5627 = vmatprep.subr.bf16.mxu1 %v8380_v15  ;;  %v8467_v14 = vld [vmem:[#allocation5 + $0x1164] ss:$16 sps:$4 sm:$0xff]   ;;  %v8470_v15 = vld [vmem:[#allocation5 + $0x116c] ss:$16 sps:$4 sm:$0xff]  }
 0x295   :  { %5136 = vmatpush1.bf16.msra.mxu0 %v8375_v16  ;;  %5628 = vmatpush1.bf16.msra.mxu1 %v8378_v17  ;;  %v8465_v16 = vld [vmem:[#allocation5 + $0x1160] ss:$16 sps:$4 sm:$0xff]   ;;  %v8468_v17 = vld [vmem:[#allocation5 + $0x1168] ss:$16 sps:$4 sm:$0xff]  }
 0x296   :  { %5137 = vmatprep.subr.bf16.mxu0 %v8383_v18  ;;  %5629 = vmatprep.subr.bf16.mxu1 %v8386_v19  ;;  %v8473_v18 = vld [vmem:[#allocation5 + $0x1184] ss:$16 sps:$4 sm:$0xff]   ;;  %v8476_v19 = vld [vmem:[#allocation5 + $0x118c] ss:$16 sps:$4 sm:$0xff]  }
 0x299   :  { %5138 = vmatpush1.bf16.msra.mxu0 %v8381_v20  ;;  %5630 = vmatpush1.bf16.msra.mxu1 %v8384_v21  ;;  %v8471_v20 = vld [vmem:[#allocation5 + $0x1180] ss:$16 sps:$4 sm:$0xff]   ;;  %v8474_v21 = vld [vmem:[#allocation5 + $0x1188] ss:$16 sps:$4 sm:$0xff]  }
 0x29a   :  { %5139 = vmatprep.subr.bf16.mxu0 %v8389_v22  ;;  %5631 = vmatprep.subr.bf16.mxu1 %v8392_v23  ;;  %v8479_v22 = vld [vmem:[#allocation5 + $0x11a4] ss:$16 sps:$4 sm:$0xff]   ;;  %v8482_v23 = vld [vmem:[#allocation5 + $0x11ac] ss:$16 sps:$4 sm:$0xff]  }
 0x29d   :  { %5140 = vmatpush1.bf16.msra.mxu0 %v8387_v24  ;;  %5632 = vmatpush1.bf16.msra.mxu1 %v8390_v25  ;;  %v8477_v24 = vld [vmem:[#allocation5 + $0x11a0] ss:$16 sps:$4 sm:$0xff]   ;;  %v8480_v25 = vld [vmem:[#allocation5 + $0x11a8] ss:$16 sps:$4 sm:$0xff]  }
 0x29e   :  { %5141 = vmatprep.subr.bf16.mxu0 %v8395_v26  ;;  %5633 = vmatprep.subr.bf16.mxu1 %v8398_v27  ;;  %v8485_v26 = vld [vmem:[#allocation5 + $0x11c4] ss:$16 sps:$4 sm:$0xff]   ;;  %v8488_v27 = vld [vmem:[#allocation5 + $0x11cc] ss:$16 sps:$4 sm:$0xff]  }
 0x2a1   :  { %5142 = vmatpush1.bf16.msra.mxu0 %v8393_v28  ;;  %5634 = vmatpush1.bf16.msra.mxu1 %v8396_v29  ;;  %v8483_v28 = vld [vmem:[#allocation5 + $0x11c0] ss:$16 sps:$4 sm:$0xff]   ;;  %v8486_v29 = vld [vmem:[#allocation5 + $0x11c8] ss:$16 sps:$4 sm:$0xff]  }
 0x2a2   :  { %5152 = vmatprep.subr.bf16.mxu0 %v8401_v30  ;;  %5644 = vmatprep.subr.bf16.mxu1 %v8404_v32  ;;  %v8491_v30 = vld [vmem:[#allocation5 + $0x11e4] ss:$16 sps:$4 sm:$0xff]   ;;  %v8489_v32 = vld [vmem:[#allocation5 + $0x11e0] ss:$16 sps:$4 sm:$0xff]  }
 0x2a4   :  { %5144 = vmatmul.mubr.bf16.vlgmr.msra.gmra.mrb[0].mxu0 %v184_v34  ;;  %5636 = vmatmul.mubr.bf16.vlgmr.msra.gmra.mrb[0].mxu1 %v184_v34  ;;  %v162_v34 = vld [vmem:[#allocation2 + $0x80] sm:$0xff] }
 0x2a5   :  { %5153 = vmatpush1.bf16.msra.mxu0 %v8399_v35  ;;  %5645 = vmatpush1.bf16.msra.mxu1 %v8402_v36  ;;  %v8497_v35 = vld [vmem:[#allocation5 + $0x1204] ss:$16 sps:$4 sm:$0xff]   ;;  %v8500_v36 = vld [vmem:[#allocation5 + $0x120c] ss:$16 sps:$4 sm:$0xff]  }
 0x2a6   :  { %5154 = vmatprep.subr.bf16.mxu0 %v8407_v37  ;;  %5646 = vmatprep.subr.bf16.mxu1 %v8410_v38  ;;  %v186_v37 = vpack.c.bf16 %v162_v34, %v162_v34  ;;  %v165_v38 = vld [vmem:[#allocation2 + $0x98] sm:$0xff]  ;;  %v8587_v34 = vld [vmem:[#allocation5 + $0x13e4] ss:$16 sps:$4 sm:$0xff]  }
 0x2a7   :  { %5184 = vmatprep.mubr.bf16.mxu0 %v187_v39  ;;  %5676 = vmatprep.mubr.bf16.mxu1 %v187_v39  ;;  %v8495_v39 = vld [vmem:[#allocation5 + $0x1200] ss:$16 sps:$4 sm:$0xff]  }
 0x2a9   :  { %5155 = vmatpush1.bf16.msra.mxu0 %v8405_v40  ;;  %5647 = vmatpush1.bf16.msra.mxu1 %v8408_v41  ;;  %v8498_v40 = vld [vmem:[#allocation5 + $0x1208] ss:$16 sps:$4 sm:$0xff]   ;;  %v8503_v41 = vld [vmem:[#allocation5 + $0x1224] ss:$16 sps:$4 sm:$0xff]  }
 0x2aa   :  { %5156 = vmatprep.subr.bf16.mxu0 %v8413_v42  ;;  %5648 = vmatprep.subr.bf16.mxu1 %v8416_v43  ;;  %v8506_v42 = vld [vmem:[#allocation5 + $0x122c] ss:$16 sps:$4 sm:$0xff]   ;;  %v189_v43 = vpack.c.bf16 %v165_v38, %v165_v38  ;;  %v164_v38 = vld [vmem:[#allocation2 + $0x90] sm:$0xff] }
 0x2ad   :  { %5157 = vmatpush1.bf16.msra.mxu0 %v8411_v44  ;;  %5649 = vmatpush1.bf16.msra.mxu1 %v8414_v45  ;;  %v8501_v44 = vld [vmem:[#allocation5 + $0x1220] ss:$16 sps:$4 sm:$0xff]   ;;  %v8504_v45 = vld [vmem:[#allocation5 + $0x1228] ss:$16 sps:$4 sm:$0xff]  }
 0x2ae   :  { %5158 = vmatprep.subr.bf16.mxu0 %v8419_v46  ;;  %5650 = vmatprep.subr.bf16.mxu1 %v8422_v47  ;;  %v8509_v46 = vld [vmem:[#allocation5 + $0x1244] ss:$16 sps:$4 sm:$0xff]   ;;  %v8512_v47 = vld [vmem:[#allocation5 + $0x124c] ss:$16 sps:$4 sm:$0xff]  }
 0x2b1   :  { %5159 = vmatpush1.bf16.msra.mxu0 %v8417_v48  ;;  %5651 = vmatpush1.bf16.msra.mxu1 %v8420_v49  ;;  %v8507_v48 = vld [vmem:[#allocation5 + $0x1240] ss:$16 sps:$4 sm:$0xff]   ;;  %v8510_v49 = vld [vmem:[#allocation5 + $0x1248] ss:$16 sps:$4 sm:$0xff]  }
 0x2b2   :  { %5160 = vmatprep.subr.bf16.mxu0 %v8425_v50  ;;  %5652 = vmatprep.subr.bf16.mxu1 %v8428_v51  ;;  %v8515_v50 = vld [vmem:[#allocation5 + $0x1264] ss:$16 sps:$4 sm:$0xff]   ;;  %v8518_v51 = vld [vmem:[#allocation5 + $0x126c] ss:$16 sps:$4 sm:$0xff]  }
 0x2b5   :  { %5161 = vmatpush1.bf16.msra.mxu0 %v8423_v52  ;;  %5653 = vmatpush1.bf16.msra.mxu1 %v8426_v53  ;;  %v8513_v52 = vld [vmem:[#allocation5 + $0x1260] ss:$16 sps:$4 sm:$0xff]   ;;  %v8516_v53 = vld [vmem:[#allocation5 + $0x1268] ss:$16 sps:$4 sm:$0xff]  }
 0x2b6   :  { %5162 = vmatprep.subr.bf16.mxu0 %v8431_v54  ;;  %5654 = vmatprep.subr.bf16.mxu1 %v8434_v55  ;;  %v8521_v54 = vld [vmem:[#allocation5 + $0x1284] ss:$16 sps:$4 sm:$0xff]   ;;  %v8524_v55 = vld [vmem:[#allocation5 + $0x128c] ss:$16 sps:$4 sm:$0xff]  }
 0x2b9   :  { %5163 = vmatpush1.bf16.msra.mxu0 %v8429_v56  ;;  %5655 = vmatpush1.bf16.msra.mxu1 %v8432_v57  ;;  %v8519_v56 = vld [vmem:[#allocation5 + $0x1280] ss:$16 sps:$4 sm:$0xff]   ;;  %v8522_v57 = vld [vmem:[#allocation5 + $0x1288] ss:$16 sps:$4 sm:$0xff]  }
 0x2ba   :  { %5164 = vmatprep.subr.bf16.mxu0 %v8437_v58  ;;  %5656 = vmatprep.subr.bf16.mxu1 %v8440_v59  ;;  %v8527_v58 = vld [vmem:[#allocation5 + $0x12a4] ss:$16 sps:$4 sm:$0xff]   ;;  %v8530_v59 = vld [vmem:[#allocation5 + $0x12ac] ss:$16 sps:$4 sm:$0xff]  }
 0x2bd   :  { %5165 = vmatpush1.bf16.msra.mxu0 %v8435_v60  ;;  %5657 = vmatpush1.bf16.msra.mxu1 %v8438_v61  ;;  %v8525_v60 = vld [vmem:[#allocation5 + $0x12a0] ss:$16 sps:$4 sm:$0xff]   ;;  %v8528_v61 = vld [vmem:[#allocation5 + $0x12a8] ss:$16 sps:$4 sm:$0xff]  }
 0x2be   :  { %5166 = vmatprep.subr.bf16.mxu0 %v8443_v62  ;;  %5658 = vmatprep.subr.bf16.mxu1 %v8446_v63  ;;  %v8533_v62 = vld [vmem:[#allocation5 + $0x12c4] ss:$16 sps:$4 sm:$0xff]   ;;  %v8536_v63 = vld [vmem:[#allocation5 + $0x12cc] ss:$16 sps:$4 sm:$0xff]  }
 0x2c1   :  { %5167 = vmatpush1.bf16.msra.mxu0 %v8441_v0  ;;  %5659 = vmatpush1.bf16.msra.mxu1 %v8444_v1  ;;  %v8531_v0 = vld [vmem:[#allocation5 + $0x12c0] ss:$16 sps:$4 sm:$0xff]   ;;  %v8534_v1 = vld [vmem:[#allocation5 + $0x12c8] ss:$16 sps:$4 sm:$0xff]  }
 0x2c2   :  { %5168 = vmatprep.subr.bf16.mxu0 %v8449_v2  ;;  %5660 = vmatprep.subr.bf16.mxu1 %v8452_v3  ;;  %v8539_v2 = vld [vmem:[#allocation5 + $0x12e4] ss:$16 sps:$4 sm:$0xff]   ;;  %v8542_v3 = vld [vmem:[#allocation5 + $0x12ec] ss:$16 sps:$4 sm:$0xff]  }
 0x2c5   :  { %5169 = vmatpush1.bf16.msra.mxu0 %v8447_v4  ;;  %5661 = vmatpush1.bf16.msra.mxu1 %v8450_v5  ;;  %v8537_v4 = vld [vmem:[#allocation5 + $0x12e0] ss:$16 sps:$4 sm:$0xff]   ;;  %v8540_v5 = vld [vmem:[#allocation5 + $0x12e8] ss:$16 sps:$4 sm:$0xff]  }
 0x2c6   :  { %5170 = vmatprep.subr.bf16.mxu0 %v8455_v6  ;;  %5662 = vmatprep.subr.bf16.mxu1 %v8458_v7  ;;  %v8545_v6 = vld [vmem:[#allocation5 + $0x1304] ss:$16 sps:$4 sm:$0xff]   ;;  %v8548_v7 = vld [vmem:[#allocation5 + $0x130c] ss:$16 sps:$4 sm:$0xff]  }
 0x2c9   :  { %5171 = vmatpush1.bf16.msra.mxu0 %v8453_v8  ;;  %5663 = vmatpush1.bf16.msra.mxu1 %v8456_v9  ;;  %v8543_v8 = vld [vmem:[#allocation5 + $0x1300] ss:$16 sps:$4 sm:$0xff]   ;;  %v8546_v9 = vld [vmem:[#allocation5 + $0x1308] ss:$16 sps:$4 sm:$0xff]  }
 0x2ca   :  { %5172 = vmatprep.subr.bf16.mxu0 %v8461_v10  ;;  %5664 = vmatprep.subr.bf16.mxu1 %v8464_v11  ;;  %v8551_v10 = vld [vmem:[#allocation5 + $0x1324] ss:$16 sps:$4 sm:$0xff]   ;;  %v8554_v11 = vld [vmem:[#allocation5 + $0x132c] ss:$16 sps:$4 sm:$0xff]  }
 0x2cd   :  { %5173 = vmatpush1.bf16.msra.mxu0 %v8459_v12  ;;  %5665 = vmatpush1.bf16.msra.mxu1 %v8462_v13  ;;  %v8549_v12 = vld [vmem:[#allocation5 + $0x1320] ss:$16 sps:$4 sm:$0xff]   ;;  %v8552_v13 = vld [vmem:[#allocation5 + $0x1328] ss:$16 sps:$4 sm:$0xff]  }
 0x2ce   :  { %5174 = vmatprep.subr.bf16.mxu0 %v8467_v14  ;;  %5666 = vmatprep.subr.bf16.mxu1 %v8470_v15  ;;  %v8557_v14 = vld [vmem:[#allocation5 + $0x1344] ss:$16 sps:$4 sm:$0xff]   ;;  %v8560_v15 = vld [vmem:[#allocation5 + $0x134c] ss:$16 sps:$4 sm:$0xff]  }
 0x2d1   :  { %5175 = vmatpush1.bf16.msra.mxu0 %v8465_v16  ;;  %5667 = vmatpush1.bf16.msra.mxu1 %v8468_v17  ;;  %v8555_v16 = vld [vmem:[#allocation5 + $0x1340] ss:$16 sps:$4 sm:$0xff]   ;;  %v8558_v17 = vld [vmem:[#allocation5 + $0x1348] ss:$16 sps:$4 sm:$0xff]  }
 0x2d2   :  { %5176 = vmatprep.subr.bf16.mxu0 %v8473_v18  ;;  %5668 = vmatprep.subr.bf16.mxu1 %v8476_v19  ;;  %v8563_v18 = vld [vmem:[#allocation5 + $0x1364] ss:$16 sps:$4 sm:$0xff]   ;;  %v8566_v19 = vld [vmem:[#allocation5 + $0x136c] ss:$16 sps:$4 sm:$0xff]  }
 0x2d5   :  { %5177 = vmatpush1.bf16.msra.mxu0 %v8471_v20  ;;  %5669 = vmatpush1.bf16.msra.mxu1 %v8474_v21  ;;  %v8561_v20 = vld [vmem:[#allocation5 + $0x1360] ss:$16 sps:$4 sm:$0xff]   ;;  %v8564_v21 = vld [vmem:[#allocation5 + $0x1368] ss:$16 sps:$4 sm:$0xff]  }
 0x2d6   :  { %5178 = vmatprep.subr.bf16.mxu0 %v8479_v22  ;;  %5670 = vmatprep.subr.bf16.mxu1 %v8482_v23  ;;  %v8569_v22 = vld [vmem:[#allocation5 + $0x1384] ss:$16 sps:$4 sm:$0xff]   ;;  %v8572_v23 = vld [vmem:[#allocation5 + $0x138c] ss:$16 sps:$4 sm:$0xff]  }
 0x2d9   :  { %5179 = vmatpush1.bf16.msra.mxu0 %v8477_v24  ;;  %5671 = vmatpush1.bf16.msra.mxu1 %v8480_v25  ;;  %v8567_v24 = vld [vmem:[#allocation5 + $0x1380] ss:$16 sps:$4 sm:$0xff]   ;;  %v8570_v25 = vld [vmem:[#allocation5 + $0x1388] ss:$16 sps:$4 sm:$0xff]  }
 0x2da   :  { %5180 = vmatprep.subr.bf16.mxu0 %v8485_v26  ;;  %5672 = vmatprep.subr.bf16.mxu1 %v8488_v27  ;;  %v8575_v26 = vld [vmem:[#allocation5 + $0x13a4] ss:$16 sps:$4 sm:$0xff]   ;;  %v8578_v27 = vld [vmem:[#allocation5 + $0x13ac] ss:$16 sps:$4 sm:$0xff]  }
 0x2dd   :  { %5181 = vmatpush1.bf16.msra.mxu0 %v8483_v28  ;;  %5673 = vmatpush1.bf16.msra.mxu1 %v8486_v29  ;;  %v8573_v28 = vld [vmem:[#allocation5 + $0x13a0] ss:$16 sps:$4 sm:$0xff]   ;;  %v8576_v29 = vld [vmem:[#allocation5 + $0x13a8] ss:$16 sps:$4 sm:$0xff]  }
 0x2de   :  { %5182 = vmatprep.subr.bf16.mxu0 %v8491_v30  ;;  %5674 = vmatprep.subr.bf16.mxu1 %v8494_v31  ;;  %v8581_v30 = vld [vmem:[#allocation5 + $0x13c4] ss:$16 sps:$4 sm:$0xff]   ;;  %v8584_v31 = vld [vmem:[#allocation5 + $0x13cc] ss:$16 sps:$4 sm:$0xff]  }
 0x2e1   :  { %5183 = vmatpush1.bf16.msra.mxu0 %v8489_v32  ;;  %5675 = vmatpush1.bf16.msra.mxu1 %v8492_v33  ;;  %v8579_v32 = vld [vmem:[#allocation5 + $0x13c0] ss:$16 sps:$4 sm:$0xff]   ;;  %v8582_v33 = vld [vmem:[#allocation5 + $0x13c8] ss:$16 sps:$4 sm:$0xff]  }
 0x2e2   :  { %5193 = vmatprep.subr.bf16.mxu0 %v8497_v35  ;;  %5685 = vmatprep.subr.bf16.mxu1 %v8500_v36  ;;  %v8590_v35 = vld [vmem:[#allocation5 + $0x13ec] ss:$16 sps:$4 sm:$0xff]   ;;  %v8585_v36 = vld [vmem:[#allocation5 + $0x13e0] ss:$16 sps:$4 sm:$0xff]  }
 0x2e4   :  { %5185 = vmatmul.mubr.bf16.vlgmr.msra.gmra.mrb[0].mxu0 %v186_v37  ;;  %5677 = vmatmul.mubr.bf16.vlgmr.msra.gmra.mrb[0].mxu1 %v186_v37  ;;  %v8588_v37 = vld [vmem:[#allocation5 + $0x13e8] ss:$16 sps:$4 sm:$0xff]  }
 0x2e5   :  { %5194 = vmatpush1.bf16.msra.mxu0 %v8495_v39  ;;  %5686 = vmatpush1.bf16.msra.mxu1 %v8498_v40  ;;  %v8593_v39 = vld [vmem:[#allocation5 + $0x1404] ss:$16 sps:$4 sm:$0xff]   ;;  %v8596_v40 = vld [vmem:[#allocation5 + $0x140c] ss:$16 sps:$4 sm:$0xff]  }
 0x2e6   :  { %5195 = vmatprep.subr.bf16.mxu0 %v8503_v41  ;;  %5687 = vmatprep.subr.bf16.mxu1 %v8506_v42  ;;  %v188_v41 = vpack.c.bf16 %v164_v38, %v164_v38  ;;  %v167_v42 = vld [vmem:[#allocation2 + $0xa8] sm:$0xff]  ;;  %v8683_v38 = vld [vmem:[#allocation5 + $0x15e4] ss:$16 sps:$4 sm:$0xff]  }
 0x2e7   :  { %5225 = vmatprep.mubr.bf16.mxu0 %v189_v43  ;;  %5717 = vmatprep.mubr.bf16.mxu1 %v189_v43  ;;  %v8591_v43 = vld [vmem:[#allocation5 + $0x1400] ss:$16 sps:$4 sm:$0xff]  }
 0x2e9   :  { %5196 = vmatpush1.bf16.msra.mxu0 %v8501_v44  ;;  %5688 = vmatpush1.bf16.msra.mxu1 %v8504_v45  ;;  %v8594_v44 = vld [vmem:[#allocation5 + $0x1408] ss:$16 sps:$4 sm:$0xff]   ;;  %v8599_v45 = vld [vmem:[#allocation5 + $0x1424] ss:$16 sps:$4 sm:$0xff]  }
 0x2ea   :  { %5197 = vmatprep.subr.bf16.mxu0 %v8509_v46  ;;  %5689 = vmatprep.subr.bf16.mxu1 %v8512_v47  ;;  %v8602_v46 = vld [vmem:[#allocation5 + $0x142c] ss:$16 sps:$4 sm:$0xff]   ;;  %v191_v47 = vpack.c.bf16 %v167_v42, %v167_v42  ;;  %v166_v42 = vld [vmem:[#allocation2 + $0xa0] sm:$0xff] }
 0x2ed   :  { %5198 = vmatpush1.bf16.msra.mxu0 %v8507_v48  ;;  %5690 = vmatpush1.bf16.msra.mxu1 %v8510_v49  ;;  %v8597_v48 = vld [vmem:[#allocation5 + $0x1420] ss:$16 sps:$4 sm:$0xff]   ;;  %v8600_v49 = vld [vmem:[#allocation5 + $0x1428] ss:$16 sps:$4 sm:$0xff]  }
 0x2ee   :  { %5199 = vmatprep.subr.bf16.mxu0 %v8515_v50  ;;  %5691 = vmatprep.subr.bf16.mxu1 %v8518_v51  ;;  %v8605_v50 = vld [vmem:[#allocation5 + $0x1444] ss:$16 sps:$4 sm:$0xff]   ;;  %v8608_v51 = vld [vmem:[#allocation5 + $0x144c] ss:$16 sps:$4 sm:$0xff]  }
 0x2f1   :  { %5200 = vmatpush1.bf16.msra.mxu0 %v8513_v52  ;;  %5692 = vmatpush1.bf16.msra.mxu1 %v8516_v53  ;;  %v8603_v52 = vld [vmem:[#allocation5 + $0x1440] ss:$16 sps:$4 sm:$0xff]   ;;  %v8606_v53 = vld [vmem:[#allocation5 + $0x1448] ss:$16 sps:$4 sm:$0xff]  }
 0x2f2   :  { %5201 = vmatprep.subr.bf16.mxu0 %v8521_v54  ;;  %5693 = vmatprep.subr.bf16.mxu1 %v8524_v55  ;;  %v8611_v54 = vld [vmem:[#allocation5 + $0x1464] ss:$16 sps:$4 sm:$0xff]   ;;  %v8614_v55 = vld [vmem:[#allocation5 + $0x146c] ss:$16 sps:$4 sm:$0xff]  }
 0x2f5   :  { %5202 = vmatpush1.bf16.msra.mxu0 %v8519_v56  ;;  %5694 = vmatpush1.bf16.msra.mxu1 %v8522_v57  ;;  %v8609_v56 = vld [vmem:[#allocation5 + $0x1460] ss:$16 sps:$4 sm:$0xff]   ;;  %v8612_v57 = vld [vmem:[#allocation5 + $0x1468] ss:$16 sps:$4 sm:$0xff]  }
 0x2f6   :  { %5203 = vmatprep.subr.bf16.mxu0 %v8527_v58  ;;  %5695 = vmatprep.subr.bf16.mxu1 %v8530_v59  ;;  %v8617_v58 = vld [vmem:[#allocation5 + $0x1484] ss:$16 sps:$4 sm:$0xff]   ;;  %v8620_v59 = vld [vmem:[#allocation5 + $0x148c] ss:$16 sps:$4 sm:$0xff]  }
 0x2f9   :  { %5204 = vmatpush1.bf16.msra.mxu0 %v8525_v60  ;;  %5696 = vmatpush1.bf16.msra.mxu1 %v8528_v61  ;;  %v8615_v60 = vld [vmem:[#allocation5 + $0x1480] ss:$16 sps:$4 sm:$0xff]   ;;  %v8618_v61 = vld [vmem:[#allocation5 + $0x1488] ss:$16 sps:$4 sm:$0xff]  }
 0x2fa   :  { %5205 = vmatprep.subr.bf16.mxu0 %v8533_v62  ;;  %5697 = vmatprep.subr.bf16.mxu1 %v8536_v63  ;;  %v8623_v62 = vld [vmem:[#allocation5 + $0x14a4] ss:$16 sps:$4 sm:$0xff]   ;;  %v8626_v63 = vld [vmem:[#allocation5 + $0x14ac] ss:$16 sps:$4 sm:$0xff]  }
 0x2fd   :  { %5206 = vmatpush1.bf16.msra.mxu0 %v8531_v0  ;;  %5698 = vmatpush1.bf16.msra.mxu1 %v8534_v1  ;;  %v8621_v0 = vld [vmem:[#allocation5 + $0x14a0] ss:$16 sps:$4 sm:$0xff]   ;;  %v8624_v1 = vld [vmem:[#allocation5 + $0x14a8] ss:$16 sps:$4 sm:$0xff]  }
 0x2fe   :  { %5207 = vmatprep.subr.bf16.mxu0 %v8539_v2  ;;  %5699 = vmatprep.subr.bf16.mxu1 %v8542_v3  ;;  %v8629_v2 = vld [vmem:[#allocation5 + $0x14c4] ss:$16 sps:$4 sm:$0xff]   ;;  %v8632_v3 = vld [vmem:[#allocation5 + $0x14cc] ss:$16 sps:$4 sm:$0xff]  }
 0x301   :  { %5208 = vmatpush1.bf16.msra.mxu0 %v8537_v4  ;;  %5700 = vmatpush1.bf16.msra.mxu1 %v8540_v5  ;;  %v8627_v4 = vld [vmem:[#allocation5 + $0x14c0] ss:$16 sps:$4 sm:$0xff]   ;;  %v8630_v5 = vld [vmem:[#allocation5 + $0x14c8] ss:$16 sps:$4 sm:$0xff]  }
 0x302   :  { %5209 = vmatprep.subr.bf16.mxu0 %v8545_v6  ;;  %5701 = vmatprep.subr.bf16.mxu1 %v8548_v7  ;;  %v8635_v6 = vld [vmem:[#allocation5 + $0x14e4] ss:$16 sps:$4 sm:$0xff]   ;;  %v8638_v7 = vld [vmem:[#allocation5 + $0x14ec] ss:$16 sps:$4 sm:$0xff]  }
 0x305   :  { %5210 = vmatpush1.bf16.msra.mxu0 %v8543_v8  ;;  %5702 = vmatpush1.bf16.msra.mxu1 %v8546_v9  ;;  %v8633_v8 = vld [vmem:[#allocation5 + $0x14e0] ss:$16 sps:$4 sm:$0xff]   ;;  %v8636_v9 = vld [vmem:[#allocation5 + $0x14e8] ss:$16 sps:$4 sm:$0xff]  }
 0x306   :  { %5211 = vmatprep.subr.bf16.mxu0 %v8551_v10  ;;  %5703 = vmatprep.subr.bf16.mxu1 %v8554_v11  ;;  %v8641_v10 = vld [vmem:[#allocation5 + $0x1504] ss:$16 sps:$4 sm:$0xff]   ;;  %v8644_v11 = vld [vmem:[#allocation5 + $0x150c] ss:$16 sps:$4 sm:$0xff]  }
 0x309   :  { %5212 = vmatpush1.bf16.msra.mxu0 %v8549_v12  ;;  %5704 = vmatpush1.bf16.msra.mxu1 %v8552_v13  ;;  %v8639_v12 = vld [vmem:[#allocation5 + $0x1500] ss:$16 sps:$4 sm:$0xff]   ;;  %v8642_v13 = vld [vmem:[#allocation5 + $0x1508] ss:$16 sps:$4 sm:$0xff]  }
 0x30a   :  { %5213 = vmatprep.subr.bf16.mxu0 %v8557_v14  ;;  %5705 = vmatprep.subr.bf16.mxu1 %v8560_v15  ;;  %v8647_v14 = vld [vmem:[#allocation5 + $0x1524] ss:$16 sps:$4 sm:$0xff]   ;;  %v8650_v15 = vld [vmem:[#allocation5 + $0x152c] ss:$16 sps:$4 sm:$0xff]  }
 0x30d   :  { %5214 = vmatpush1.bf16.msra.mxu0 %v8555_v16  ;;  %5706 = vmatpush1.bf16.msra.mxu1 %v8558_v17  ;;  %v8645_v16 = vld [vmem:[#allocation5 + $0x1520] ss:$16 sps:$4 sm:$0xff]   ;;  %v8648_v17 = vld [vmem:[#allocation5 + $0x1528] ss:$16 sps:$4 sm:$0xff]  }
 0x30e   :  { %5215 = vmatprep.subr.bf16.mxu0 %v8563_v18  ;;  %5707 = vmatprep.subr.bf16.mxu1 %v8566_v19  ;;  %v8653_v18 = vld [vmem:[#allocation5 + $0x1544] ss:$16 sps:$4 sm:$0xff]   ;;  %v8656_v19 = vld [vmem:[#allocation5 + $0x154c] ss:$16 sps:$4 sm:$0xff]  }
 0x311   :  { %5216 = vmatpush1.bf16.msra.mxu0 %v8561_v20  ;;  %5708 = vmatpush1.bf16.msra.mxu1 %v8564_v21  ;;  %v8651_v20 = vld [vmem:[#allocation5 + $0x1540] ss:$16 sps:$4 sm:$0xff]   ;;  %v8654_v21 = vld [vmem:[#allocation5 + $0x1548] ss:$16 sps:$4 sm:$0xff]  }
 0x312   :  { %5217 = vmatprep.subr.bf16.mxu0 %v8569_v22  ;;  %5709 = vmatprep.subr.bf16.mxu1 %v8572_v23  ;;  %v8659_v22 = vld [vmem:[#allocation5 + $0x1564] ss:$16 sps:$4 sm:$0xff]   ;;  %v8662_v23 = vld [vmem:[#allocation5 + $0x156c] ss:$16 sps:$4 sm:$0xff]  }
 0x315   :  { %5218 = vmatpush1.bf16.msra.mxu0 %v8567_v24  ;;  %5710 = vmatpush1.bf16.msra.mxu1 %v8570_v25  ;;  %v8657_v24 = vld [vmem:[#allocation5 + $0x1560] ss:$16 sps:$4 sm:$0xff]   ;;  %v8660_v25 = vld [vmem:[#allocation5 + $0x1568] ss:$16 sps:$4 sm:$0xff]  }
 0x316   :  { %5219 = vmatprep.subr.bf16.mxu0 %v8575_v26  ;;  %5711 = vmatprep.subr.bf16.mxu1 %v8578_v27  ;;  %v8665_v26 = vld [vmem:[#allocation5 + $0x1584] ss:$16 sps:$4 sm:$0xff]   ;;  %v8668_v27 = vld [vmem:[#allocation5 + $0x158c] ss:$16 sps:$4 sm:$0xff]  }
 0x319   :  { %5220 = vmatpush1.bf16.msra.mxu0 %v8573_v28  ;;  %5712 = vmatpush1.bf16.msra.mxu1 %v8576_v29  ;;  %v8663_v28 = vld [vmem:[#allocation5 + $0x1580] ss:$16 sps:$4 sm:$0xff]   ;;  %v8666_v29 = vld [vmem:[#allocation5 + $0x1588] ss:$16 sps:$4 sm:$0xff]  }
 0x31a   :  { %5221 = vmatprep.subr.bf16.mxu0 %v8581_v30  ;;  %5713 = vmatprep.subr.bf16.mxu1 %v8584_v31  ;;  %v8671_v30 = vld [vmem:[#allocation5 + $0x15a4] ss:$16 sps:$4 sm:$0xff]   ;;  %v8674_v31 = vld [vmem:[#allocation5 + $0x15ac] ss:$16 sps:$4 sm:$0xff]  }
 0x31d   :  { %5222 = vmatpush1.bf16.msra.mxu0 %v8579_v32  ;;  %5714 = vmatpush1.bf16.msra.mxu1 %v8582_v33  ;;  %v8669_v32 = vld [vmem:[#allocation5 + $0x15a0] ss:$16 sps:$4 sm:$0xff]   ;;  %v8672_v33 = vld [vmem:[#allocation5 + $0x15a8] ss:$16 sps:$4 sm:$0xff]  }
 0x31e   :  { %5223 = vmatprep.subr.bf16.mxu0 %v8587_v34  ;;  %5715 = vmatprep.subr.bf16.mxu1 %v8590_v35  ;;  %v8677_v34 = vld [vmem:[#allocation5 + $0x15c4] ss:$16 sps:$4 sm:$0xff]   ;;  %v8680_v35 = vld [vmem:[#allocation5 + $0x15cc] ss:$16 sps:$4 sm:$0xff]  }
 0x321   :  { %5224 = vmatpush1.bf16.msra.mxu0 %v8585_v36  ;;  %5716 = vmatpush1.bf16.msra.mxu1 %v8588_v37  ;;  %v8675_v36 = vld [vmem:[#allocation5 + $0x15c0] ss:$16 sps:$4 sm:$0xff]   ;;  %v8678_v37 = vld [vmem:[#allocation5 + $0x15c8] ss:$16 sps:$4 sm:$0xff]  }
 0x322   :  { %5234 = vmatprep.subr.bf16.mxu0 %v8593_v39  ;;  %5726 = vmatprep.subr.bf16.mxu1 %v8596_v40  ;;  %v8686_v39 = vld [vmem:[#allocation5 + $0x15ec] ss:$16 sps:$4 sm:$0xff]   ;;  %v8681_v40 = vld [vmem:[#allocation5 + $0x15e0] ss:$16 sps:$4 sm:$0xff]  }
 0x324   :  { %5226 = vmatmul.mubr.bf16.vlgmr.msra.gmra.mrb[0].mxu0 %v188_v41  ;;  %5718 = vmatmul.mubr.bf16.vlgmr.msra.gmra.mrb[0].mxu1 %v188_v41  ;;  %v8684_v41 = vld [vmem:[#allocation5 + $0x15e8] ss:$16 sps:$4 sm:$0xff]  }
 0x325   :  { %5235 = vmatpush1.bf16.msra.mxu0 %v8591_v43  ;;  %5727 = vmatpush1.bf16.msra.mxu1 %v8594_v44  ;;  %v8689_v43 = vld [vmem:[#allocation5 + $0x1604] ss:$16 sps:$4 sm:$0xff]   ;;  %v8692_v44 = vld [vmem:[#allocation5 + $0x160c] ss:$16 sps:$4 sm:$0xff]  }
 0x326   :  { %5236 = vmatprep.subr.bf16.mxu0 %v8599_v45  ;;  %5728 = vmatprep.subr.bf16.mxu1 %v8602_v46  ;;  %v190_v45 = vpack.c.bf16 %v166_v42, %v166_v42  ;;  %v169_v46 = vld [vmem:[#allocation2 + $0xb8] sm:$0xff]  ;;  %v8779_v42 = vld [vmem:[#allocation5 + $0x17e4] ss:$16 sps:$4 sm:$0xff]  }
 0x327   :  { %5266 = vmatprep.mubr.bf16.mxu0 %v191_v47  ;;  %5758 = vmatprep.mubr.bf16.mxu1 %v191_v47  ;;  %v8687_v47 = vld [vmem:[#allocation5 + $0x1600] ss:$16 sps:$4 sm:$0xff]  }
 0x329   :  { %5237 = vmatpush1.bf16.msra.mxu0 %v8597_v48  ;;  %5729 = vmatpush1.bf16.msra.mxu1 %v8600_v49  ;;  %v8690_v48 = vld [vmem:[#allocation5 + $0x1608] ss:$16 sps:$4 sm:$0xff]   ;;  %v8695_v49 = vld [vmem:[#allocation5 + $0x1624] ss:$16 sps:$4 sm:$0xff]  }
 0x32a   :  { %5238 = vmatprep.subr.bf16.mxu0 %v8605_v50  ;;  %5730 = vmatprep.subr.bf16.mxu1 %v8608_v51  ;;  %v8698_v50 = vld [vmem:[#allocation5 + $0x162c] ss:$16 sps:$4 sm:$0xff]   ;;  %v193_v51 = vpack.c.bf16 %v169_v46, %v169_v46  ;;  %v168_v46 = vld [vmem:[#allocation2 + $0xb0] sm:$0xff] }
 0x32d   :  { %5239 = vmatpush1.bf16.msra.mxu0 %v8603_v52  ;;  %5731 = vmatpush1.bf16.msra.mxu1 %v8606_v53  ;;  %v8693_v52 = vld [vmem:[#allocation5 + $0x1620] ss:$16 sps:$4 sm:$0xff]   ;;  %v8696_v53 = vld [vmem:[#allocation5 + $0x1628] ss:$16 sps:$4 sm:$0xff]  }
 0x32e   :  { %5240 = vmatprep.subr.bf16.mxu0 %v8611_v54  ;;  %5732 = vmatprep.subr.bf16.mxu1 %v8614_v55  ;;  %v8701_v54 = vld [vmem:[#allocation5 + $0x1644] ss:$16 sps:$4 sm:$0xff]   ;;  %v8704_v55 = vld [vmem:[#allocation5 + $0x164c] ss:$16 sps:$4 sm:$0xff]  }
 0x331   :  { %5241 = vmatpush1.bf16.msra.mxu0 %v8609_v56  ;;  %5733 = vmatpush1.bf16.msra.mxu1 %v8612_v57  ;;  %v8699_v56 = vld [vmem:[#allocation5 + $0x1640] ss:$16 sps:$4 sm:$0xff]   ;;  %v8702_v57 = vld [vmem:[#allocation5 + $0x1648] ss:$16 sps:$4 sm:$0xff]  }
 0x332   :  { %5242 = vmatprep.subr.bf16.mxu0 %v8617_v58  ;;  %5734 = vmatprep.subr.bf16.mxu1 %v8620_v59  ;;  %v8707_v58 = vld [vmem:[#allocation5 + $0x1664] ss:$16 sps:$4 sm:$0xff]   ;;  %v8710_v59 = vld [vmem:[#allocation5 + $0x166c] ss:$16 sps:$4 sm:$0xff]  }
 0x335   :  { %5243 = vmatpush1.bf16.msra.mxu0 %v8615_v60  ;;  %5735 = vmatpush1.bf16.msra.mxu1 %v8618_v61  ;;  %v8705_v60 = vld [vmem:[#allocation5 + $0x1660] ss:$16 sps:$4 sm:$0xff]   ;;  %v8708_v61 = vld [vmem:[#allocation5 + $0x1668] ss:$16 sps:$4 sm:$0xff]  }
 0x336   :  { %5244 = vmatprep.subr.bf16.mxu0 %v8623_v62  ;;  %5736 = vmatprep.subr.bf16.mxu1 %v8626_v63  ;;  %v8713_v62 = vld [vmem:[#allocation5 + $0x1684] ss:$16 sps:$4 sm:$0xff]   ;;  %v8716_v63 = vld [vmem:[#allocation5 + $0x168c] ss:$16 sps:$4 sm:$0xff]  }
 0x339   :  { %5245 = vmatpush1.bf16.msra.mxu0 %v8621_v0  ;;  %5737 = vmatpush1.bf16.msra.mxu1 %v8624_v1  ;;  %v8711_v0 = vld [vmem:[#allocation5 + $0x1680] ss:$16 sps:$4 sm:$0xff]   ;;  %v8714_v1 = vld [vmem:[#allocation5 + $0x1688] ss:$16 sps:$4 sm:$0xff]  }
 0x33a   :  { %5246 = vmatprep.subr.bf16.mxu0 %v8629_v2  ;;  %5738 = vmatprep.subr.bf16.mxu1 %v8632_v3  ;;  %v8719_v2 = vld [vmem:[#allocation5 + $0x16a4] ss:$16 sps:$4 sm:$0xff]   ;;  %v8722_v3 = vld [vmem:[#allocation5 + $0x16ac] ss:$16 sps:$4 sm:$0xff]  }
 0x33d   :  { %5247 = vmatpush1.bf16.msra.mxu0 %v8627_v4  ;;  %5739 = vmatpush1.bf16.msra.mxu1 %v8630_v5  ;;  %v8717_v4 = vld [vmem:[#allocation5 + $0x16a0] ss:$16 sps:$4 sm:$0xff]   ;;  %v8720_v5 = vld [vmem:[#allocation5 + $0x16a8] ss:$16 sps:$4 sm:$0xff]  }
 0x33e   :  { %5248 = vmatprep.subr.bf16.mxu0 %v8635_v6  ;;  %5740 = vmatprep.subr.bf16.mxu1 %v8638_v7  ;;  %v8725_v6 = vld [vmem:[#allocation5 + $0x16c4] ss:$16 sps:$4 sm:$0xff]   ;;  %v8728_v7 = vld [vmem:[#allocation5 + $0x16cc] ss:$16 sps:$4 sm:$0xff]  }
 0x341   :  { %5249 = vmatpush1.bf16.msra.mxu0 %v8633_v8  ;;  %5741 = vmatpush1.bf16.msra.mxu1 %v8636_v9  ;;  %v8723_v8 = vld [vmem:[#allocation5 + $0x16c0] ss:$16 sps:$4 sm:$0xff]   ;;  %v8726_v9 = vld [vmem:[#allocation5 + $0x16c8] ss:$16 sps:$4 sm:$0xff]  }
 0x342   :  { %5250 = vmatprep.subr.bf16.mxu0 %v8641_v10  ;;  %5742 = vmatprep.subr.bf16.mxu1 %v8644_v11  ;;  %v8731_v10 = vld [vmem:[#allocation5 + $0x16e4] ss:$16 sps:$4 sm:$0xff]   ;;  %v8734_v11 = vld [vmem:[#allocation5 + $0x16ec] ss:$16 sps:$4 sm:$0xff]  }
 0x345   :  { %5251 = vmatpush1.bf16.msra.mxu0 %v8639_v12  ;;  %5743 = vmatpush1.bf16.msra.mxu1 %v8642_v13  ;;  %v8729_v12 = vld [vmem:[#allocation5 + $0x16e0] ss:$16 sps:$4 sm:$0xff]   ;;  %v8732_v13 = vld [vmem:[#allocation5 + $0x16e8] ss:$16 sps:$4 sm:$0xff]  }
 0x346   :  { %5252 = vmatprep.subr.bf16.mxu0 %v8647_v14  ;;  %5744 = vmatprep.subr.bf16.mxu1 %v8650_v15  ;;  %v8737_v14 = vld [vmem:[#allocation5 + $0x1704] ss:$16 sps:$4 sm:$0xff]   ;;  %v8740_v15 = vld [vmem:[#allocation5 + $0x170c] ss:$16 sps:$4 sm:$0xff]  }
 0x349   :  { %5253 = vmatpush1.bf16.msra.mxu0 %v8645_v16  ;;  %5745 = vmatpush1.bf16.msra.mxu1 %v8648_v17  ;;  %v8735_v16 = vld [vmem:[#allocation5 + $0x1700] ss:$16 sps:$4 sm:$0xff]   ;;  %v8738_v17 = vld [vmem:[#allocation5 + $0x1708] ss:$16 sps:$4 sm:$0xff]  }
 0x34a   :  { %5254 = vmatprep.subr.bf16.mxu0 %v8653_v18  ;;  %5746 = vmatprep.subr.bf16.mxu1 %v8656_v19  ;;  %v8743_v18 = vld [vmem:[#allocation5 + $0x1724] ss:$16 sps:$4 sm:$0xff]   ;;  %v8746_v19 = vld [vmem:[#allocation5 + $0x172c] ss:$16 sps:$4 sm:$0xff]  }
 0x34d   :  { %5255 = vmatpush1.bf16.msra.mxu0 %v8651_v20  ;;  %5747 = vmatpush1.bf16.msra.mxu1 %v8654_v21  ;;  %v8741_v20 = vld [vmem:[#allocation5 + $0x1720] ss:$16 sps:$4 sm:$0xff]   ;;  %v8744_v21 = vld [vmem:[#allocation5 + $0x1728] ss:$16 sps:$4 sm:$0xff]  }
 0x34e   :  { %5256 = vmatprep.subr.bf16.mxu0 %v8659_v22  ;;  %5748 = vmatprep.subr.bf16.mxu1 %v8662_v23  ;;  %v8749_v22 = vld [vmem:[#allocation5 + $0x1744] ss:$16 sps:$4 sm:$0xff]   ;;  %v8752_v23 = vld [vmem:[#allocation5 + $0x174c] ss:$16 sps:$4 sm:$0xff]  }
 0x351   :  { %5257 = vmatpush1.bf16.msra.mxu0 %v8657_v24  ;;  %5749 = vmatpush1.bf16.msra.mxu1 %v8660_v25  ;;  %v8747_v24 = vld [vmem:[#allocation5 + $0x1740] ss:$16 sps:$4 sm:$0xff]   ;;  %v8750_v25 = vld [vmem:[#allocation5 + $0x1748] ss:$16 sps:$4 sm:$0xff]  }
 0x352   :  { %5258 = vmatprep.subr.bf16.mxu0 %v8665_v26  ;;  %5750 = vmatprep.subr.bf16.mxu1 %v8668_v27  ;;  %v8755_v26 = vld [vmem:[#allocation5 + $0x1764] ss:$16 sps:$4 sm:$0xff]   ;;  %v8758_v27 = vld [vmem:[#allocation5 + $0x176c] ss:$16 sps:$4 sm:$0xff]  }
 0x355   :  { %5259 = vmatpush1.bf16.msra.mxu0 %v8663_v28  ;;  %5751 = vmatpush1.bf16.msra.mxu1 %v8666_v29  ;;  %v8753_v28 = vld [vmem:[#allocation5 + $0x1760] ss:$16 sps:$4 sm:$0xff]   ;;  %v8756_v29 = vld [vmem:[#allocation5 + $0x1768] ss:$16 sps:$4 sm:$0xff]  }
 0x356   :  { %5260 = vmatprep.subr.bf16.mxu0 %v8671_v30  ;;  %5752 = vmatprep.subr.bf16.mxu1 %v8674_v31  ;;  %v8761_v30 = vld [vmem:[#allocation5 + $0x1784] ss:$16 sps:$4 sm:$0xff]   ;;  %v8764_v31 = vld [vmem:[#allocation5 + $0x178c] ss:$16 sps:$4 sm:$0xff]  }
 0x359   :  { %5261 = vmatpush1.bf16.msra.mxu0 %v8669_v32  ;;  %5753 = vmatpush1.bf16.msra.mxu1 %v8672_v33  ;;  %v8759_v32 = vld [vmem:[#allocation5 + $0x1780] ss:$16 sps:$4 sm:$0xff]   ;;  %v8762_v33 = vld [vmem:[#allocation5 + $0x1788] ss:$16 sps:$4 sm:$0xff]  }
 0x35a   :  { %5262 = vmatprep.subr.bf16.mxu0 %v8677_v34  ;;  %5754 = vmatprep.subr.bf16.mxu1 %v8680_v35  ;;  %v8767_v34 = vld [vmem:[#allocation5 + $0x17a4] ss:$16 sps:$4 sm:$0xff]   ;;  %v8770_v35 = vld [vmem:[#allocation5 + $0x17ac] ss:$16 sps:$4 sm:$0xff]  }
 0x35d   :  { %5263 = vmatpush1.bf16.msra.mxu0 %v8675_v36  ;;  %5755 = vmatpush1.bf16.msra.mxu1 %v8678_v37  ;;  %v8765_v36 = vld [vmem:[#allocation5 + $0x17a0] ss:$16 sps:$4 sm:$0xff]   ;;  %v8768_v37 = vld [vmem:[#allocation5 + $0x17a8] ss:$16 sps:$4 sm:$0xff]  }
 0x35e   :  { %5264 = vmatprep.subr.bf16.mxu0 %v8683_v38  ;;  %5756 = vmatprep.subr.bf16.mxu1 %v8686_v39  ;;  %v8773_v38 = vld [vmem:[#allocation5 + $0x17c4] ss:$16 sps:$4 sm:$0xff]   ;;  %v8776_v39 = vld [vmem:[#allocation5 + $0x17cc] ss:$16 sps:$4 sm:$0xff]  }
 0x361   :  { %5265 = vmatpush1.bf16.msra.mxu0 %v8681_v40  ;;  %5757 = vmatpush1.bf16.msra.mxu1 %v8684_v41  ;;  %v8771_v40 = vld [vmem:[#allocation5 + $0x17c0] ss:$16 sps:$4 sm:$0xff]   ;;  %v8774_v41 = vld [vmem:[#allocation5 + $0x17c8] ss:$16 sps:$4 sm:$0xff]  }
 0x362   :  { %5275 = vmatprep.subr.bf16.mxu0 %v8689_v43  ;;  %5767 = vmatprep.subr.bf16.mxu1 %v8692_v44  ;;  %v8782_v43 = vld [vmem:[#allocation5 + $0x17ec] ss:$16 sps:$4 sm:$0xff]   ;;  %v8777_v44 = vld [vmem:[#allocation5 + $0x17e0] ss:$16 sps:$4 sm:$0xff]  }
 0x364   :  { %5267 = vmatmul.mubr.bf16.vlgmr.msra.gmra.mrb[0].mxu0 %v190_v45  ;;  %5759 = vmatmul.mubr.bf16.vlgmr.msra.gmra.mrb[0].mxu1 %v190_v45  ;;  %v8780_v45 = vld [vmem:[#allocation5 + $0x17e8] ss:$16 sps:$4 sm:$0xff]  }
 0x365   :  { %5276 = vmatpush1.bf16.msra.mxu0 %v8687_v47  ;;  %5768 = vmatpush1.bf16.msra.mxu1 %v8690_v48  ;;  %v8785_v47 = vld [vmem:[#allocation8 + $0x4] ss:$8 sps:$4 sm:$0xff]   ;;  %v192_v48 = vpack.c.bf16 %v168_v46, %v168_v46 }
 0x366   :  { %5277 = vmatprep.subr.bf16.mxu0 %v8695_v49  ;;  %5769 = vmatprep.subr.bf16.mxu1 %v8698_v50  ;;  %v8783_v49 = vld [vmem:[#allocation8] ss:$8 sps:$4 sm:$0xff]   ;;  %v8788_v50 = vld [vmem:[#allocation8 + $0x14] ss:$8 sps:$4 sm:$0xff]  }
 0x367   :  { %5307 = vmatprep.mubr.bf16.mxu0 %v193_v51  ;;  %5799 = vmatprep.mubr.bf16.mxu1 %v193_v51  ;;  %v8786_v51 = vld [vmem:[#allocation8 + $0x10] ss:$8 sps:$4 sm:$0xff]  }
 0x369   :  { %5278 = vmatpush1.bf16.msra.mxu0 %v8693_v52  ;;  %5770 = vmatpush1.bf16.msra.mxu1 %v8696_v53  ;;  %v8791_v52 = vld [vmem:[#allocation8 + $0x24] ss:$8 sps:$4 sm:$0xff]   ;;  %v8789_v53 = vld [vmem:[#allocation8 + $0x20] ss:$8 sps:$4 sm:$0xff]  }
 0x36a   :  { %5279 = vmatprep.subr.bf16.mxu0 %v8701_v54  ;;  %5771 = vmatprep.subr.bf16.mxu1 %v8704_v55  ;;  %v8794_v54 = vld [vmem:[#allocation8 + $0x34] ss:$8 sps:$4 sm:$0xff]   ;;  %v8792_v55 = vld [vmem:[#allocation8 + $0x30] ss:$8 sps:$4 sm:$0xff]  }
 0x36d   :  { %5280 = vmatpush1.bf16.msra.mxu0 %v8699_v56  ;;  %5772 = vmatpush1.bf16.msra.mxu1 %v8702_v57  ;;  %v8797_v56 = vld [vmem:[#allocation8 + $0x44] ss:$8 sps:$4 sm:$0xff]   ;;  %v8795_v57 = vld [vmem:[#allocation8 + $0x40] ss:$8 sps:$4 sm:$0xff]  }
 0x36e   :  { %5281 = vmatprep.subr.bf16.mxu0 %v8707_v58  ;;  %5773 = vmatprep.subr.bf16.mxu1 %v8710_v59  ;;  %v8800_v58 = vld [vmem:[#allocation8 + $0x54] ss:$8 sps:$4 sm:$0xff]   ;;  %v8798_v59 = vld [vmem:[#allocation8 + $0x50] ss:$8 sps:$4 sm:$0xff]  }
 0x371   :  { %5282 = vmatpush1.bf16.msra.mxu0 %v8705_v60  ;;  %5774 = vmatpush1.bf16.msra.mxu1 %v8708_v61  ;;  %v8803_v60 = vld [vmem:[#allocation8 + $0x64] ss:$8 sps:$4 sm:$0xff]   ;;  %v8801_v61 = vld [vmem:[#allocation8 + $0x60] ss:$8 sps:$4 sm:$0xff]  }
 0x372   :  { %5283 = vmatprep.subr.bf16.mxu0 %v8713_v62  ;;  %5775 = vmatprep.subr.bf16.mxu1 %v8716_v63  ;;  %v8806_v62 = vld [vmem:[#allocation8 + $0x74] ss:$8 sps:$4 sm:$0xff]   ;;  %v8804_v63 = vld [vmem:[#allocation8 + $0x70] ss:$8 sps:$4 sm:$0xff]  }
 0x375   :  { %5284 = vmatpush1.bf16.msra.mxu0 %v8711_v0  ;;  %5776 = vmatpush1.bf16.msra.mxu1 %v8714_v1  ;;  %v8809_v0 = vld [vmem:[#allocation8 + $0x84] ss:$8 sps:$4 sm:$0xff]   ;;  %v8807_v1 = vld [vmem:[#allocation8 + $0x80] ss:$8 sps:$4 sm:$0xff]  }
 0x376   :  { %5285 = vmatprep.subr.bf16.mxu0 %v8719_v2  ;;  %5777 = vmatprep.subr.bf16.mxu1 %v8722_v3  ;;  %v8812_v2 = vld [vmem:[#allocation8 + $0x94] ss:$8 sps:$4 sm:$0xff]   ;;  %v8810_v3 = vld [vmem:[#allocation8 + $0x90] ss:$8 sps:$4 sm:$0xff]  }
 0x379   :  { %5286 = vmatpush1.bf16.msra.mxu0 %v8717_v4  ;;  %5778 = vmatpush1.bf16.msra.mxu1 %v8720_v5  ;;  %v8815_v4 = vld [vmem:[#allocation8 + $0xa4] ss:$8 sps:$4 sm:$0xff]   ;;  %v8813_v5 = vld [vmem:[#allocation8 + $0xa0] ss:$8 sps:$4 sm:$0xff]  }
 0x37a   :  { %5287 = vmatprep.subr.bf16.mxu0 %v8725_v6  ;;  %5779 = vmatprep.subr.bf16.mxu1 %v8728_v7  ;;  %v8818_v6 = vld [vmem:[#allocation8 + $0xb4] ss:$8 sps:$4 sm:$0xff]   ;;  %v8816_v7 = vld [vmem:[#allocation8 + $0xb0] ss:$8 sps:$4 sm:$0xff]  }
 0x37d   :  { %5288 = vmatpush1.bf16.msra.mxu0 %v8723_v8  ;;  %5780 = vmatpush1.bf16.msra.mxu1 %v8726_v9  ;;  %v8821_v8 = vld [vmem:[#allocation8 + $0xc4] ss:$8 sps:$4 sm:$0xff]   ;;  %v8819_v9 = vld [vmem:[#allocation8 + $0xc0] ss:$8 sps:$4 sm:$0xff]  }
 0x37e   :  { %5289 = vmatprep.subr.bf16.mxu0 %v8731_v10  ;;  %5781 = vmatprep.subr.bf16.mxu1 %v8734_v11  ;;  %v8824_v10 = vld [vmem:[#allocation8 + $0xd4] ss:$8 sps:$4 sm:$0xff]   ;;  %v8822_v11 = vld [vmem:[#allocation8 + $0xd0] ss:$8 sps:$4 sm:$0xff]  }
 0x381   :  { %5290 = vmatpush1.bf16.msra.mxu0 %v8729_v12  ;;  %5782 = vmatpush1.bf16.msra.mxu1 %v8732_v13  ;;  %v8827_v12 = vld [vmem:[#allocation8 + $0xe4] ss:$8 sps:$4 sm:$0xff]   ;;  %v8825_v13 = vld [vmem:[#allocation8 + $0xe0] ss:$8 sps:$4 sm:$0xff]  }
 0x382   :  { %5291 = vmatprep.subr.bf16.mxu0 %v8737_v14  ;;  %5783 = vmatprep.subr.bf16.mxu1 %v8740_v15  ;;  %v8830_v14 = vld [vmem:[#allocation8 + $0xf4] ss:$8 sps:$4 sm:$0xff]   ;;  %v8828_v15 = vld [vmem:[#allocation8 + $0xf0] ss:$8 sps:$4 sm:$0xff]  }
 0x385   :  { %5292 = vmatpush1.bf16.msra.mxu0 %v8735_v16  ;;  %5784 = vmatpush1.bf16.msra.mxu1 %v8738_v17  ;;  %v8833_v16 = vld [vmem:[#allocation8 + $0x104] ss:$8 sps:$4 sm:$0xff]  }
 0x386   :  { %5293 = vmatprep.subr.bf16.mxu0 %v8743_v18  ;;  %5785 = vmatprep.subr.bf16.mxu1 %v8746_v19  ;;  %v8879_v17 = vld [vmem:[#allocation11 + $0x40] sm:$0xff]   ;;  %v8881_v19 = vld [vmem:[#allocation11 + $0x48] sm:$0xff]  }
 0x387   :  { %v8880_v18 = vld [vmem:[#allocation11] sm:$0xff]  }
 0x389   :  { %5294 = vmatpush1.bf16.msra.mxu0 %v8741_v20  ;;  %5786 = vmatpush1.bf16.msra.mxu1 %v8744_v21  ;;  %v8882_v20 = vld [vmem:[#allocation11 + $0x8] sm:$0xff]   ;;  %v8883_v21 = vld [vmem:[#allocation11 + $0x50] sm:$0xff]  }
 0x38a   :  { %5295 = vmatprep.subr.bf16.mxu0 %v8749_v22  ;;  %5787 = vmatprep.subr.bf16.mxu1 %v8752_v23  ;;  %v8884_v22 = vld [vmem:[#allocation11 + $0x10] sm:$0xff]   ;;  %v8885_v23 = vld [vmem:[#allocation11 + $0x58] sm:$0xff]  }
 0x38d   :  { %5296 = vmatpush1.bf16.msra.mxu0 %v8747_v24  ;;  %5788 = vmatpush1.bf16.msra.mxu1 %v8750_v25  ;;  %v8886_v24 = vld [vmem:[#allocation11 + $0x18] sm:$0xff]   ;;  %v8887_v25 = vld [vmem:[#allocation11 + $0x60] sm:$0xff]  }
 0x38e   :  { %5297 = vmatprep.subr.bf16.mxu0 %v8755_v26  ;;  %5789 = vmatprep.subr.bf16.mxu1 %v8758_v27  ;;  %v8888_v26 = vld [vmem:[#allocation11 + $0x20] sm:$0xff]   ;;  %v8889_v27 = vld [vmem:[#allocation11 + $0x68] sm:$0xff]  }
 0x391   :  { %5298 = vmatpush1.bf16.msra.mxu0 %v8753_v28  ;;  %5790 = vmatpush1.bf16.msra.mxu1 %v8756_v29  ;;  %v8890_v28 = vld [vmem:[#allocation11 + $0x28] sm:$0xff]   ;;  %v964_v29 = vlaneseq }
 0x392   :  { %5299 = vmatprep.subr.bf16.mxu0 %v8761_v30  ;;  %5791 = vmatprep.subr.bf16.mxu1 %v8764_v31 }
 0x393   :  { %v9311_v30 = vshrl.u32 %v964_v29, 7  ;;  %v8893_v29 = vld [vmem:[#allocation11 + $0x78] sm:$0xff]  }
 0x395   :  { %5300 = vmatpush1.bf16.msra.mxu0 %v8759_v32  ;;  %5792 = vmatpush1.bf16.msra.mxu1 %v8762_v33  ;;  %v966_v31 = vsub.s32 0, %v9311_v30  ;;  %v9314_v32 = vld [vmem:[#allocation7] sm:$0xf]  ;;  %v970_v33 = vsub.s32 1, %v9311_v30 }
 0x396   :  { %5301 = vmatprep.subr.bf16.mxu0 %v8767_v34  ;;  %5793 = vmatprep.subr.bf16.mxu1 %v8770_v35  ;;  %v978_v34 = vsub.s32 3, %v9311_v30 }
 0x397   :  { %v967_v35 = vrot.slane %v9314_v32, %v966_v31 }
 0x399   :  { %5302 = vmatpush1.bf16.msra.mxu0 %v8765_v36  ;;  %5794 = vmatpush1.bf16.msra.mxu1 %v8768_v37  ;;  %v971_v36 = vrot.slane %v9314_v32, %v970_v33  ;;  %v979_v37 = vrot.slane %v9314_v32, %v978_v34  ;;  %v9150_v34 = vmov 0.0  }
 0x39a   :  { %5303 = vmatprep.subr.bf16.mxu0 %v8773_v38  ;;  %5795 = vmatprep.subr.bf16.mxu1 %v8776_v39 }
 0x39d   :  { %5304 = vmatpush1.bf16.msra.mxu0 %v8771_v40  ;;  %5796 = vmatpush1.bf16.msra.mxu1 %v8774_v41 }
 0x39e   :  { %5305 = vmatprep.subr.bf16.mxu0 %v8779_v42  ;;  %5797 = vmatprep.subr.bf16.mxu1 %v8782_v43 }
 0x3a1   :  { %5306 = vmatpush1.bf16.msra.mxu0 %v8777_v44  ;;  %5798 = vmatpush1.bf16.msra.mxu1 %v8780_v45 }
 0x3a2   :  { %6212 = vmatprep.subr.bf16.mxu0 %v8785_v47  ;;  %7464 = vmatprep.subr.bf16.mxu1 %v8879_v17  ;;  %v8872_v17 = vld [vmem:[#allocation8 + $0x1d4] ss:$8 sps:$4 sm:$0xff]  }
 0x3a4   :  { %5308 = vmatmul.mubr.bf16.vlgmr.msra.gmra.mrb[0].mxu0 %v192_v48  ;;  %5800 = vmatmul.mubr.bf16.vlgmr.msra.gmra.mrb[0].mxu1 %v192_v48 }
 0x3a5   :  { %6213 = vmatpush1.bf16.msra.mxu0 %v8783_v49  ;;  %7465 = vmatpush3.bf16.msra.mxu1 %v8880_v18  ;;  %v8870_v18 = vld [vmem:[#allocation8 + $0x1d0] ss:$8 sps:$4 sm:$0xff]  }
 0x3a6   :  { %6214 = vmatprep.subr.bf16.mxu0 %v8788_v50  ;;  %7466 = vmatprep.subr.bf16.mxu1 %v8881_v19 }
 0x3a9   :  { %6215 = vmatpush1.bf16.msra.mxu0 %v8786_v51  ;;  %7467 = vmatpush3.bf16.msra.mxu1 %v8882_v20  ;;  %v8875_v20 = vld [vmem:[#allocation8 + $0x1e4] ss:$8 sps:$4 sm:$0xff]  }
 0x3aa   :  { %6216 = vmatprep.subr.bf16.mxu0 %v8791_v52  ;;  %7468 = vmatprep.subr.bf16.mxu1 %v8883_v21  ;;  %v8873_v21 = vld [vmem:[#allocation8 + $0x1e0] ss:$8 sps:$4 sm:$0xff]  }
 0x3ad   :  { %6217 = vmatpush1.bf16.msra.mxu0 %v8789_v53  ;;  %7469 = vmatpush3.bf16.msra.mxu1 %v8884_v22  ;;  %v8831_v53 = vld [vmem:[#allocation8 + $0x100] ss:$8 sps:$4 sm:$0xff]  }
 0x3ae   :  { %6218 = vmatprep.subr.bf16.mxu0 %v8794_v54  ;;  %7470 = vmatprep.subr.bf16.mxu1 %v8885_v23  ;;  %v8878_v23 = vld [vmem:[#allocation8 + $0x1f4] ss:$8 sps:$4 sm:$0xff]  }
 0x3b1   :  { %6219 = vmatpush1.bf16.msra.mxu0 %v8792_v55  ;;  %7471 = vmatpush3.bf16.msra.mxu1 %v8886_v24  ;;  %v8836_v55 = vld [vmem:[#allocation8 + $0x114] ss:$8 sps:$4 sm:$0xff]   ;;  %v8876_v24 = vld [vmem:[#allocation8 + $0x1f0] ss:$8 sps:$4 sm:$0xff]  }
 0x3b2   :  { %6220 = vmatprep.subr.bf16.mxu0 %v8797_v56  ;;  %7472 = vmatprep.subr.bf16.mxu1 %v8887_v25 }
 0x3b5   :  { %6221 = vmatpush1.bf16.msra.mxu0 %v8795_v57  ;;  %7473 = vmatpush3.bf16.msra.mxu1 %v8888_v26  ;;  %v8834_v57 = vld [vmem:[#allocation8 + $0x110] ss:$8 sps:$4 sm:$0xff]  }
 0x3b6   :  { %6222 = vmatprep.subr.bf16.mxu0 %v8800_v58  ;;  %7474 = vmatprep.subr.bf16.mxu1 %v8889_v27  ;;  %v8839_v58 = vld [vmem:[#allocation8 + $0x124] ss:$8 sps:$4 sm:$0xff]   ;;  %v8891_v27 = vld [vmem:[#allocation11 + $0x70] sm:$0xff]  }
 0x3b9   :  { %6223 = vmatpush1.bf16.msra.mxu0 %v8798_v59  ;;  %7475 = vmatpush3.bf16.msra.mxu1 %v8890_v28  ;;  %v8837_v59 = vld [vmem:[#allocation8 + $0x120] ss:$8 sps:$4 sm:$0xff]   ;;  %v8892_v28 = vld [vmem:[#allocation11 + $0x30] sm:$0xff]  }
 0x3ba   :  { %6224 = vmatprep.subr.bf16.mxu0 %v8803_v60  ;;  %v8842_v60 = vld [vmem:[#allocation8 + $0x134] ss:$8 sps:$4 sm:$0xff]   ;;  %7476 = vmatprep.subr.bf16.mxu1 %v8891_v27 }
 0x3bd   :  { %6225 = vmatpush1.bf16.msra.mxu0 %v8801_v61  ;;  %v8840_v61 = vld [vmem:[#allocation8 + $0x130] ss:$8 sps:$4 sm:$0xff]   ;;  %7477 = vmatpush3.bf16.msra.mxu1 %v8892_v28 }
 0x3be   :  { %6226 = vmatprep.subr.bf16.mxu0 %v8806_v62  ;;  %v8845_v62 = vld [vmem:[#allocation8 + $0x144] ss:$8 sps:$4 sm:$0xff]   ;;  %7478 = vmatprep.subr.bf16.mxu1 %v8893_v29 }
 0x3c1   :  { %6227 = vmatpush1.bf16.msra.mxu0 %v8804_v63  ;;  %v8843_v63 = vld [vmem:[#allocation8 + $0x140] ss:$8 sps:$4 sm:$0xff]  }
 0x3c2   :  { %6228 = vmatprep.subr.bf16.mxu0 %v8809_v0  ;;  %v8848_v0 = vld [vmem:[#allocation8 + $0x154] ss:$8 sps:$4 sm:$0xff]  }
 0x3c5   :  { %6229 = vmatpush1.bf16.msra.mxu0 %v8807_v1  ;;  %v8846_v1 = vld [vmem:[#allocation8 + $0x150] ss:$8 sps:$4 sm:$0xff]  }
 0x3c6   :  { %6230 = vmatprep.subr.bf16.mxu0 %v8812_v2  ;;  %v8851_v2 = vld [vmem:[#allocation8 + $0x164] ss:$8 sps:$4 sm:$0xff]  }
 0x3c9   :  { %6231 = vmatpush1.bf16.msra.mxu0 %v8810_v3  ;;  %v8849_v3 = vld [vmem:[#allocation8 + $0x160] ss:$8 sps:$4 sm:$0xff]  }
 0x3ca   :  { %6232 = vmatprep.subr.bf16.mxu0 %v8815_v4  ;;  %v8854_v4 = vld [vmem:[#allocation8 + $0x174] ss:$8 sps:$4 sm:$0xff]  }
 0x3cd   :  { %6233 = vmatpush1.bf16.msra.mxu0 %v8813_v5  ;;  %v8852_v5 = vld [vmem:[#allocation8 + $0x170] ss:$8 sps:$4 sm:$0xff]  }
 0x3ce   :  { %6234 = vmatprep.subr.bf16.mxu0 %v8818_v6  ;;  %v8857_v6 = vld [vmem:[#allocation8 + $0x184] ss:$8 sps:$4 sm:$0xff]  }
 0x3d1   :  { %6235 = vmatpush1.bf16.msra.mxu0 %v8816_v7  ;;  %v8855_v7 = vld [vmem:[#allocation8 + $0x180] ss:$8 sps:$4 sm:$0xff]  }
 0x3d2   :  { %6236 = vmatprep.subr.bf16.mxu0 %v8821_v8  ;;  %v8860_v8 = vld [vmem:[#allocation8 + $0x194] ss:$8 sps:$4 sm:$0xff]  }
 0x3d5   :  { %6237 = vmatpush1.bf16.msra.mxu0 %v8819_v9  ;;  %v8858_v9 = vld [vmem:[#allocation8 + $0x190] ss:$8 sps:$4 sm:$0xff]  }
 0x3d6   :  { %6238 = vmatprep.subr.bf16.mxu0 %v8824_v10  ;;  %v8863_v10 = vld [vmem:[#allocation8 + $0x1a4] ss:$8 sps:$4 sm:$0xff]  }
 0x3d9   :  { %6239 = vmatpush1.bf16.msra.mxu0 %v8822_v11  ;;  %v8861_v11 = vld [vmem:[#allocation8 + $0x1a0] ss:$8 sps:$4 sm:$0xff]  }
 0x3da   :  { %6240 = vmatprep.subr.bf16.mxu0 %v8827_v12  ;;  %v8866_v12 = vld [vmem:[#allocation8 + $0x1b4] ss:$8 sps:$4 sm:$0xff]  }
 0x3dd   :  { %6241 = vmatpush1.bf16.msra.mxu0 %v8825_v13  ;;  %v8864_v13 = vld [vmem:[#allocation8 + $0x1b0] ss:$8 sps:$4 sm:$0xff]  }
 0x3de   :  { %6242 = vmatprep.subr.bf16.mxu0 %v8830_v14  ;;  %v8869_v14 = vld [vmem:[#allocation8 + $0x1c4] ss:$8 sps:$4 sm:$0xff]  }
 0x3e1   :  { %6243 = vmatpush1.bf16.msra.mxu0 %v8828_v15  ;;  %v8867_v15 = vld [vmem:[#allocation8 + $0x1c0] ss:$8 sps:$4 sm:$0xff]  }
 0x3e2   :  { %6253 = vmatprep.subr.bf16.mxu0 %v8833_v16  ;;  %v974_v16 = vsub.s32 2, %v9311_v30  ;;  %v8898_v30 = vld [vmem:[#allocation14 + $0x18] sm:$0xff]  }
 0x3e4   :  { %v975_v19 = vrot.slane %v9314_v32, %v974_v16  ;;  %v8894_v32 = vld [vmem:[#allocation11 + $0x38] sm:$0xff]  }
 0x3e5   :  { %7479 = vmatpush3.bf16.msra.mxu1 %v8894_v32 }
 0x3e6   :  { %7495 = vmatprep.subr.bf16.mxu1 %v9150_v34 }
 0x477   :  { %v5309_v38 = vpop.f32.mrb[0].mxu0  ;;  %v9325_v39 = vpop.f32.mrb[0].mxu1 }
 0x478   :  { %v7515_v40 = vadd.f32 %v5309_v38, %v967_v35  ;;  %v5311_v41 = vpop.f32.mrb[1].mxu0  ;;  %v5803_v42 = vpop.f32.mrb[1].mxu1  ;;  %v7517_v22 = vadd.f32 %v9325_v39, %v975_v19  ;;  %v5880_v35 = vld [vmem:[#allocation10] sm:$0x3] }
 0x479   :  { %v7516_v43 = vadd.f32 %v5311_v41, %v971_v36  ;;  %v7518_v44 = vadd.f32 %v5803_v42, %v979_v37  ;;  %v5313_v45 = vpop.f32.mrb[2].mxu0  ;;  %v5805_v46 = vpop.f32.mrb[2].mxu1  ;;  %v5885_v36 = vrot.slane %v5880_v35, %v966_v31  ;;  %v5889_v37 = vrot.slane %v5880_v35, %v970_v33  ;;  %v8897_v31 = vld [vmem:[#allocation14 + $0x10] sm:$0xff]   ;;  %v8899_v33 = vld [vmem:[#allocation14 + $0x20] sm:$0xff]  }
 0x47a   :  { %v5808_v47 = vmax.f32 %v7515_v40, 0.0  ;;  %v5314_v48 = vpop.f32.mrb[3].mxu0  ;;  %v5806_v49 = vpop.f32.mrb[3].mxu1  ;;  %v5810_v25 = vmax.f32 %v7517_v22, 0.0 }
 0x47b   :  { %v5809_v50 = vmax.f32 %v7516_v43, 0.0  ;;  %v5811_v51 = vmax.f32 %v7518_v44, 0.0  ;;  %v8896_v49 = vld [vmem:[#allocation14 + $0x8] sm:$0xff]  }
 0x47c   :  { %v5812_v54 = vpack.c.bf16 %v5808_v47, %v5808_v47  ;;  %v5814_v26 = vpack.c.bf16 %v5810_v25, %v5810_v25  ;;  %v8895_v47 = vld [vmem:[#allocation14] sm:$0xff]  }
 0x47d   :  { %v5813_v52 = vpack.c.bf16 %v5809_v50, %v5809_v50  ;;  %v5815_v56 = vpack.c.bf16 %v5811_v51, %v5811_v51  ;;  %v8900_v50 = vld [vmem:[#allocation14 + $0x28] sm:$0xff]   ;;  %v8901_v51 = vld [vmem:[#allocation14 + $0x30] sm:$0xff]  }
 0x47f   :  { %6244 = vmatprep.mubr.bf16.mxu0 %v5813_v52  ;;  %v8902_v52 = vld [vmem:[#allocation14 + $0x38] sm:$0xff]  }
 0x480   :  { %6245 = vmatmul.mubr.bf16.vlgmr.msra.gmra.mrb[4].mxu0 %v5812_v54  ;;  %v7438_v54 = vld [vmem:[#allocation13] ss:$0 sm:$0xff] }
 0x481   :  { %6254 = vmatpush1.bf16.msra.mxu0 %v8831_v53  ;;  %6285 = vmatprep.mubr.bf16.mxu0 %v5815_v56 }
 0x482   :  { %6255 = vmatprep.subr.bf16.mxu0 %v8836_v55 }
 0x485   :  { %6256 = vmatpush1.bf16.msra.mxu0 %v8834_v57 }
 0x486   :  { %6257 = vmatprep.subr.bf16.mxu0 %v8839_v58 }
 0x489   :  { %6258 = vmatpush1.bf16.msra.mxu0 %v8837_v59 }
 0x48a   :  { %6259 = vmatprep.subr.bf16.mxu0 %v8842_v60 }
 0x48d   :  { %6260 = vmatpush1.bf16.msra.mxu0 %v8840_v61 }
 0x48e   :  { %6261 = vmatprep.subr.bf16.mxu0 %v8845_v62  ;;  %v7455_v62 = vld [vmem:[#allocation16] ss:$0 sm:$0xff] }
 0x491   :  { %6262 = vmatpush1.bf16.msra.mxu0 %v8843_v63 }
 0x492   :  { %6263 = vmatprep.subr.bf16.mxu0 %v8848_v0 }
 0x495   :  { %6264 = vmatpush1.bf16.msra.mxu0 %v8846_v1 }
 0x496   :  { %6265 = vmatprep.subr.bf16.mxu0 %v8851_v2 }
 0x499   :  { %6266 = vmatpush1.bf16.msra.mxu0 %v8849_v3 }
 0x49a   :  { %6267 = vmatprep.subr.bf16.mxu0 %v8854_v4 }
 0x49d   :  { %6268 = vmatpush1.bf16.msra.mxu0 %v8852_v5 }
 0x49e   :  { %6269 = vmatprep.subr.bf16.mxu0 %v8857_v6 }
 0x4a1   :  { %6270 = vmatpush1.bf16.msra.mxu0 %v8855_v7 }
 0x4a2   :  { %6271 = vmatprep.subr.bf16.mxu0 %v8860_v8 }
 0x4a5   :  { %6272 = vmatpush1.bf16.msra.mxu0 %v8858_v9 }
 0x4a6   :  { %6273 = vmatprep.subr.bf16.mxu0 %v8863_v10 }
 0x4a9   :  { %6274 = vmatpush1.bf16.msra.mxu0 %v8861_v11 }
 0x4aa   :  { %6275 = vmatprep.subr.bf16.mxu0 %v8866_v12 }
 0x4ad   :  { %6276 = vmatpush1.bf16.msra.mxu0 %v8864_v13 }
 0x4ae   :  { %6277 = vmatprep.subr.bf16.mxu0 %v8869_v14 }
 0x4b1   :  { %6278 = vmatpush1.bf16.msra.mxu0 %v8867_v15 }
 0x4b2   :  { %6279 = vmatprep.subr.bf16.mxu0 %v8872_v17 }
 0x4b5   :  { %6280 = vmatpush1.bf16.msra.mxu0 %v8870_v18 }
 0x4b6   :  { %6281 = vmatprep.subr.bf16.mxu0 %v8875_v20 }
 0x4b9   :  { %6282 = vmatpush1.bf16.msra.mxu0 %v8873_v21 }
 0x4ba   :  { %6283 = vmatprep.subr.bf16.mxu0 %v8878_v23 }
 0x4bd   :  { %6284 = vmatpush1.bf16.msra.mxu0 %v8876_v24 }
 0x4c0   :  { %6286 = vmatmul.mubr.bf16.vlgmr.msra.gmra.mrb[4].mxu0 %v5814_v26 }
 0x593   :  { %v6287_v38 = vpop.f32.mrb[4].mxu0 }
 0x594   :  { %v7519_v39 = vadd.f32 %v6287_v38, %v5885_v36  ;;  %v6289_v40 = vpop.f32.mrb[5].mxu0 }
 0x595   :  { %v7520_v41 = vadd.f32 %v6289_v40, %v5889_v37  ;;  %v6291_v42 = vpop.f32.mrb[6].mxu0 }
 0x596   :  { %v6294_v43 = vmax.f32 %v7519_v39, 0.0  ;;  %v6292_v44 = vpop.f32.mrb[7].mxu0 }
 0x597   :  { %v6295_v45 = vmax.f32 %v7520_v41, 0.0 }
 0x598   :  { %v6296_v48 = vpack.c.bf16 %v6294_v43, %v6294_v43 }
 0x599   :  { %v6297_v46 = vpack.c.bf16 %v6295_v45, %v6295_v45 }
 0x59b   :  { %6465 = vmatprep.mubr.bf16.mxu1 %v6297_v46 }
 0x59c   :  { %6466 = vmatmul.mubr.bf16.vlgmr.msra.gmra.mrb[4].mxu1 %v6296_v48 }
 0x59d   :  { %7496 = vmatpush3.bf16.msra.mxu1 %v8895_v47  ;;  %7511 = vmatprep.mubr.msk.bf16.mxu1 %vm9151_vm0, %v9150_v34 }
 0x59e   :  { %7497 = vmatprep.subr.bf16.mxu1 %v9150_v34 }
 0x5a1   :  { %7498 = vmatpush3.bf16.msra.mxu1 %v8896_v49 }
 0x5a2   :  { %7499 = vmatprep.subr.bf16.mxu1 %v9150_v34 }
 0x5a5   :  { %7500 = vmatpush3.bf16.msra.mxu1 %v8897_v31 }
 0x5a6   :  { %7501 = vmatprep.subr.bf16.mxu1 %v9150_v34 }
 0x5a9   :  { %7502 = vmatpush3.bf16.msra.mxu1 %v8898_v30 }
 0x5aa   :  { %7503 = vmatprep.subr.bf16.mxu1 %v9150_v34 }
 0x5ad   :  { %7504 = vmatpush3.bf16.msra.mxu1 %v8899_v33 }
 0x5ae   :  { %7505 = vmatprep.subr.bf16.mxu1 %v9150_v34 }
 0x5b1   :  { %7506 = vmatpush3.bf16.msra.mxu1 %v8900_v50 }
 0x5b2   :  { %7507 = vmatprep.subr.bf16.mxu1 %v9150_v34 }
 0x5b5   :  { %7508 = vmatpush3.bf16.msra.mxu1 %v8901_v51 }
 0x5b6   :  { %7509 = vmatprep.subr.bf16.mxu1 %v9150_v34 }
 0x5b9   :  { %7510 = vmatpush3.bf16.msra.mxu1 %v8902_v52 }
 0x66f   :  { %v7480_v53 = vpop.f32.mrb[4].mxu1 }
 0x670   :  { %v7481_v55 = vpop.f32.mrb[5].mxu1 }
 0x671   :  { %v7482_v56 = vadd.f32 %v7481_v55, %v7480_v53  ;;  %v7483_v57 = vpop.f32.mrb[6].mxu1 }
 0x672   :  { %v7484_v58 = vpop.f32.mrb[7].mxu1 }
 0x673   :  { %v6468_v59 = vadd.f32 %v7482_v56, %v7438_v54 }
 0x675   :  { %v6473_v60 = vmax.f32 %v6468_v59, 0.0 }
 0x677   :  { %v6474_v61 = vpack.c.bf16 %v6473_v60, %v6473_v60 }
 0x679   :  { %7512 = vmatmul.mubr.bf16.vlgmr.msra.gmra.mrb[8].mxu1 %v6474_v61 }
 0x74c   :  { %v6580_v63 = vpop.f32.mrb[8].mxu1 }
 0x74d   :  { %v6581_v0 = vadd.f32 %v7455_v62, %v6580_v63  ;;  %v7513_v1 = vpop.f32.mrb[9].mxu1 }
 0x74e   :  { %v6583_v2 = vpop.f32.mrb[10].mxu1 }
 0x74f   :  { %6586 = vst [vmem:[#allocation17] sm:$0xff] %v6581_v0  ;;  %v7514_v3 = vpop.f32.mrb[11].mxu1 }
 0x750   :  { %9112 = shalt.err (!%p9109_p6)
}
 0x751   :  { %s9113_s7 = scalar_lea.hbm %s9355_s9, 128 }
 0x752   :  { %p9114_p7 = scmp.ne.s32.totalorder %s9355_s9, %s9113_s7  ;;  %p9117_p8 = scmp.lt.u32.totalorder %s9113_s7, %s9355_s9 }
 0x754   :  { %p9119_p9 = pnand %p9117_p8, %p9114_p7 }
 0x756   :  { %9122 = shalt.err (!%p9119_p9)
}
 0x757   :  { %6596 = dma.vmem_to_hbm [thread:$0]  %s6594_s25, 128, %s9355_s9, [#allocation4]  }
 0x758   :  { %9133 = dma.done.wait [#allocation4], 128  }
 0x759   :  { %9134 = vsyncadd [#allocation4], 4294967168 }
 0x75a   :  { %6600 = vsyncpa [#allocation3], 1 }
 0x75b   :  { %6601 = vsyncpa [#allocation6], 1 }
 0x75c   :  { %6602 = vsyncpa [#allocation9], 1 }
 0x75d   :  { %6603 = vsyncpa [#allocation12], 1 }
 0x75e   :  { %6604 = vsyncpa [#allocation15], 1 }
 0x75f   :  { %6605 = vsyncpa [#allocation4], 1 }

// kernel: tpu_custom_call.1
= control target key start
LH: loop header
LB: loop body
LE: loop exit
PB: predicated region body
PF: predicated region fallthrough
CT: control target
= control target key end

     0   :  { %14 = vsyncpa [#allocation3], 0  ;;  %s9346_s0 = inlined_call_operand.hbm [shape: f32[8,3072], index: 0, kind: input, shape index: {}]   ;;  %s9347_s1 = inlined_call_operand.hbm [shape: bf16[3072,512], index: 1, kind: input, shape index: {}]   ;;  %s9348_s2 = inlined_call_operand.hbm [shape: f32[1,512], index: 2, kind: input, shape index: {}]   ;;  %s9349_s3 = inlined_call_operand.hbm [shape: bf16[512,256], index: 3, kind: input, shape index: {}]   ;;  %s9350_s4 = inlined_call_operand.hbm [shape: f32[1,256], index: 4, kind: input, shape index: {}]   ;;  %s9351_s5 = inlined_call_operand.hbm [shape: bf16[256,128], index: 5, kind: input, shape index: {}]   ;;  %s9352_s6 = inlined_call_operand.hbm [shape: f32[1,128], index: 6, kind: input, shape index: {}]   ;;  %s9353_s7 = inlined_call_operand.hbm [shape: bf16[128,128], index: 7, kind: input, shape index: {}]   ;;  %s9354_s8 = inlined_call_operand.hbm [shape: f32[1,128], index: 8, kind: input, shape index: {}]   ;;  %s9355_s9 = inlined_call_operand.hbm [shape: f32[8,128], index: 9, kind: output, shape index: {}]  }
   0x1   :  { %15 = vsyncpa [#allocation6], 0 }
   0x2   :  { %16 = vsyncpa [#allocation9], 0 }
   0x3   :  { %17 = vsyncpa [#allocation12], 0 }
   0x4   :  { %18 = vsyncpa [#allocation15], 0 }
   0x5   :  { %19 = vsyncpa [#allocation4], 0  ;;  %s9135_s30 = smov [#allocation5]   ;;  %s8903_s13 = scalar_lea.hbm %s9347_s1, 98304 }
   0x6   :  { %s35_s10 = sshll.u32 %s9135_s30, 4  ;;  %p8904_p0 = scmp.ne.s32.totalorder %s9347_s1, %s8903_s13  ;;  %s36_s10 = int_to_ptr.vmem [resolvable:$true] %s35_s10 }
   0x7   :  { %p8907_p1 = scmp.lt.u32.totalorder %s8903_s13, %s9347_s1 }
   0x9   :  { %p8909_p2 = pnand %p8907_p1, %p8904_p0 }
   0xb   :  { %8912 = shalt.err (!%p8909_p2)
}
   0xc   :  { %s8913_s18 = scalar_lea.vmem %s36_s10, 98304  ;;  %p8918_p4 = scmp.lt.s32.totalorder %s36_s10, %s36_s10 }
   0xd   :  { %p8914_p3 = scmp.ne.s32.totalorder %s36_s10, %s8913_s18  ;;  %p8919_p5 = scmp.lt.s32.totalorder %s8913_s18, %s8913_s18 }
   0xf   :  { %p8920_p6 = por %p8919_p5, %p8918_p4 }
  0x11   :  { %p8921_p7 = pnand %p8920_p6, %p8914_p3 }
  0x13   :  { %8924 = shalt.err (!%p8921_p7)
}
  0x14   :  { %s9136_s19 = smov 256   ;;  %s9137_s20 = smov 16  }
  0x15   :  { %41 = dma.hbm_to_vmem [thread:$0]  %s9347_s1, 98304, %s36_s10, [#allocation6], %s9136_s19, %s9136_s19, %s9137_s20  }
  0x16   :  { %s9138_s23 = smov [#allocation8]   ;;  %s8925_s27 = scalar_lea.hbm %s9349_s3, 8192 }
  0x17   :  { %s57_s24 = sshll.u32 %s9138_s23, 4  ;;  %p8926_p8 = scmp.ne.s32.totalorder %s9349_s3, %s8925_s27  ;;  %s58_s24 = int_to_ptr.vmem [resolvable:$true] %s57_s24 }
  0x18   :  { %p8929_p9 = scmp.lt.u32.totalorder %s8925_s27, %s9349_s3 }
  0x1a   :  { %p8931_p10 = pnand %p8929_p9, %p8926_p8 }
  0x1c   :  { %8934 = shalt.err (!%p8931_p10)
}
  0x1d   :  { %s8935_s12 = scalar_lea.vmem %s58_s24, 8192  ;;  %p8940_p12 = scmp.lt.s32.totalorder %s58_s24, %s58_s24 }
  0x1e   :  { %p8936_p11 = scmp.ne.s32.totalorder %s58_s24, %s8935_s12  ;;  %p8941_p13 = scmp.lt.s32.totalorder %s8935_s12, %s8935_s12 }
  0x20   :  { %p8942_p0 = por %p8941_p13, %p8940_p12 }
  0x22   :  { %p8943_p1 = pnand %p8942_p0, %p8936_p11 }
  0x24   :  { %8946 = shalt.err (!%p8943_p1)
}
  0x25   :  { %s9139_s1 = smov 128   ;;  %s9140_s10 = smov 8  }
  0x26   :  { %63 = dma.hbm_to_vmem [thread:$0]  %s9349_s3, 8192, %s58_s24, [#allocation9], %s9139_s1, %s9139_s1, %s9140_s10  }
  0x27   :  { %s9141_s15 = smov [#allocation11]   ;;  %s8947_s19 = scalar_lea.hbm %s9351_s5, 2048 }
  0x28   :  { %s79_s16 = sshll.u32 %s9141_s15, 4  ;;  %p8948_p2 = scmp.ne.s32.totalorder %s9351_s5, %s8947_s19  ;;  %s80_s16 = int_to_ptr.vmem [resolvable:$true] %s79_s16 }
  0x29   :  { %p8951_p3 = scmp.lt.u32.totalorder %s8947_s19, %s9351_s5 }
  0x2b   :  { %p8953_p4 = pnand %p8951_p3, %p8948_p2 }
  0x2d   :  { %8956 = shalt.err (!%p8953_p4)
}
  0x2e   :  { %s8957_s25 = scalar_lea.vmem %s80_s16, 2048  ;;  %p8962_p6 = scmp.lt.s32.totalorder %s80_s16, %s80_s16 }
  0x2f   :  { %p8958_p5 = scmp.ne.s32.totalorder %s80_s16, %s8957_s25  ;;  %p8963_p7 = scmp.lt.s32.totalorder %s8957_s25, %s8957_s25 }
  0x31   :  { %p8964_p8 = por %p8963_p7, %p8962_p6 }
  0x33   :  { %p8965_p9 = pnand %p8964_p8, %p8958_p5 }
  0x35   :  { %8968 = shalt.err (!%p8965_p9)
}
  0x36   :  { %s9142_s3 = smov 64   ;;  %s9143_s24 = smov 4  }
  0x37   :  { %85 = dma.hbm_to_vmem [thread:$0]  %s9351_s5, 2048, %s80_s16, [#allocation12], %s9142_s3, %s9142_s3, %s9143_s24  }
  0x38   :  { %s9144_s28 = smov [#allocation14]   ;;  %s9145_s30 = smov [#allocation2]  }
  0x39   :  { %s101_s29 = sshll.u32 %s9144_s28, 4  ;;  %s26_s11 = sshll.u32 %s9145_s30, 4  ;;  %s102_s29 = int_to_ptr.vmem [resolvable:$true] %s101_s29  ;;  %s27_s11 = int_to_ptr.vmem [resolvable:$true] %s26_s11 }
  0x3a   :  { %s8969_s10 = scalar_lea.hbm %s9353_s7, 1024 }
  0x3b   :  { %p8970_p10 = scmp.ne.s32.totalorder %s9353_s7, %s8969_s10  ;;  %p8973_p11 = scmp.lt.u32.totalorder %s8969_s10, %s9353_s7 }
  0x3d   :  { %p8975_p12 = pnand %p8973_p11, %p8970_p10 }
  0x3f   :  { %8978 = shalt.err (!%p8975_p12)
}
  0x40   :  { %s8979_s5 = scalar_lea.vmem %s102_s29, 1024  ;;  %p8984_p0 = scmp.lt.s32.totalorder %s102_s29, %s102_s29 }
  0x41   :  { %p8980_p13 = scmp.ne.s32.totalorder %s102_s29, %s8979_s5  ;;  %p8985_p1 = scmp.lt.s32.totalorder %s8979_s5, %s8979_s5 }
  0x43   :  { %p8986_p2 = por %p8985_p1, %p8984_p0 }
  0x45   :  { %p8987_p3 = pnand %p8986_p2, %p8980_p13 }
  0x47   :  { %8990 = shalt.err (!%p8987_p3)
}
  0x48   :  { %107 = dma.hbm_to_vmem [thread:$0]  %s9353_s7, 1024, %s102_s29, [#allocation15], %s9142_s3, %s9142_s3, %s9143_s24  }
  0x49   :  { %s8991_s21 = scalar_lea.hbm %s9346_s0, 3072 }
  0x4a   :  { %p8992_p4 = scmp.ne.s32.totalorder %s9346_s0, %s8991_s21  ;;  %p8995_p5 = scmp.lt.u32.totalorder %s8991_s21, %s9346_s0 }
  0x4c   :  { %p8997_p6 = pnand %p8995_p5, %p8992_p4 }
  0x4e   :  { %9000 = shalt.err (!%p8997_p6)
}
  0x4f   :  { %s9001_s27 = scalar_lea.vmem %s27_s11, 3072  ;;  %p9006_p8 = scmp.lt.s32.totalorder %s27_s11, %s27_s11 }
  0x50   :  { %p9002_p7 = scmp.ne.s32.totalorder %s27_s11, %s9001_s27  ;;  %p9007_p9 = scmp.lt.s32.totalorder %s9001_s27, %s9001_s27 }
  0x52   :  { %p9008_p10 = por %p9007_p9, %p9006_p8 }
  0x54   :  { %p9009_p11 = pnand %p9008_p10, %p9002_p7 }
  0x56   :  { %9012 = shalt.err (!%p9009_p11)
}
  0x57   :  { %29 = dma.hbm_to_vmem [thread:$0]  %s9346_s0, 3072, %s27_s11, [#allocation3]  }
  0x58   :  { %s9146_s24 = smov [#allocation7]   ;;  %s9147_s29 = smov [#allocation10]  }
  0x59   :  { %s48_s28 = sshll.u32 %s9146_s24, 4  ;;  %s70_s30 = sshll.u32 %s9147_s29, 4  ;;  %s49_s28 = int_to_ptr.vmem [resolvable:$true] %s48_s28  ;;  %s71_s30 = int_to_ptr.vmem [resolvable:$true] %s70_s30 }
  0x5a   :  { %s9013_s10 = scalar_lea.hbm %s9348_s2, 64 }
  0x5b   :  { %p9014_p12 = scmp.ne.s32.totalorder %s9348_s2, %s9013_s10  ;;  %p9017_p13 = scmp.lt.u32.totalorder %s9013_s10, %s9348_s2 }
  0x5d   :  { %p9019_p0 = pnand %p9017_p13, %p9014_p12 }
  0x5f   :  { %9022 = shalt.err (!%p9019_p0)
}
  0x60   :  { %s9023_s0 = scalar_lea.vmem %s49_s28, 64  ;;  %p9028_p2 = scmp.lt.s32.totalorder %s49_s28, %s49_s28 }
  0x61   :  { %p9024_p1 = scmp.ne.s32.totalorder %s49_s28, %s9023_s0  ;;  %p9029_p3 = scmp.lt.s32.totalorder %s9023_s0, %s9023_s0 }
  0x63   :  { %p9030_p4 = por %p9029_p3, %p9028_p2 }
  0x65   :  { %p9031_p5 = pnand %p9030_p4, %p9024_p1 }
  0x67   :  { %9034 = shalt.err (!%p9031_p5)
}
  0x68   :  { %51 = dma.hbm_to_vmem [thread:$0]  %s9348_s2, 64, %s49_s28, [#allocation6]  }
  0x69   :  { %s9035_s19 = scalar_lea.hbm %s9350_s4, 32 }
  0x6a   :  { %p9036_p6 = scmp.ne.s32.totalorder %s9350_s4, %s9035_s19  ;;  %p9039_p7 = scmp.lt.u32.totalorder %s9035_s19, %s9350_s4 }
  0x6c   :  { %p9041_p8 = pnand %p9039_p7, %p9036_p6 }
  0x6e   :  { %9044 = shalt.err (!%p9041_p8)
}
  0x6f   :  { %s9045_s25 = scalar_lea.vmem %s71_s30, 32  ;;  %p9050_p10 = scmp.lt.s32.totalorder %s71_s30, %s71_s30 }
  0x70   :  { %p9046_p9 = scmp.ne.s32.totalorder %s71_s30, %s9045_s25  ;;  %p9051_p11 = scmp.lt.s32.totalorder %s9045_s25, %s9045_s25 }
  0x72   :  { %p9052_p12 = por %p9051_p11, %p9050_p10 }
  0x74   :  { %p9053_p13 = pnand %p9052_p12, %p9046_p9 }
  0x76   :  { %9056 = shalt.err (!%p9053_p13)
}
  0x77   :  { %73 = dma.hbm_to_vmem [thread:$0]  %s9350_s4, 32, %s71_s30, [#allocation9]  }
  0x78   :  { %s9148_s27 = smov [#allocation13]   ;;  %s9149_s3 = smov [#allocation16]  }
  0x79   :  { %s92_s7 = sshll.u32 %s9148_s27, 4  ;;  %s114_s24 = sshll.u32 %s9149_s3, 4  ;;  %s93_s7 = int_to_ptr.vmem [resolvable:$true] %s92_s7  ;;  %s115_s24 = int_to_ptr.vmem [resolvable:$true] %s114_s24 }
  0x7a   :  { %s9057_s12 = scalar_lea.hbm %s9352_s6, 16 }
  0x7b   :  { %p9058_p0 = scmp.ne.s32.totalorder %s9352_s6, %s9057_s12  ;;  %p9061_p1 = scmp.lt.u32.totalorder %s9057_s12, %s9352_s6 }
  0x7d   :  { %p9063_p2 = pnand %p9061_p1, %p9058_p0 }
  0x7f   :  { %9066 = shalt.err (!%p9063_p2)
}
  0x80   :  { %s9067_s4 = scalar_lea.vmem %s93_s7, 16  ;;  %s9071_s30 = scalar_lea.vmem %s93_s7, 32 }
  0x81   :  { %p9068_p3 = scmp.ne.s32.totalorder %s93_s7, %s9067_s4  ;;  %p9072_p4 = scmp.lt.s32.totalorder %s93_s7, %s93_s7 }
  0x82   :  { %p9073_p5 = scmp.lt.s32.totalorder %s9071_s30, %s9067_s4 }
  0x84   :  { %p9074_p6 = por %p9073_p5, %p9072_p4 }
  0x86   :  { %p9075_p7 = pnand %p9074_p6, %p9068_p3 }
  0x88   :  { %9078 = shalt.err (!%p9075_p7)
}
  0x89   :  { %95 = dma.hbm_to_vmem [thread:$0]  %s9352_s6, 16, %s93_s7, [#allocation12]  }
  0x8a   :  { %s9079_s5 = scalar_lea.hbm %s9354_s8, 16 }
  0x8b   :  { %p9080_p8 = scmp.ne.s32.totalorder %s9354_s8, %s9079_s5  ;;  %p9083_p9 = scmp.lt.u32.totalorder %s9079_s5, %s9354_s8 }
  0x8d   :  { %p9085_p10 = pnand %p9083_p9, %p9080_p8 }
  0x8f   :  { %9088 = shalt.err (!%p9085_p10)
}
  0x90   :  { %s9089_s21 = scalar_lea.vmem %s115_s24, 16  ;;  %s9093_s22 = scalar_lea.vmem %s115_s24, 32 }
  0x91   :  { %p9090_p11 = scmp.ne.s32.totalorder %s115_s24, %s9089_s21  ;;  %p9094_p12 = scmp.lt.s32.totalorder %s115_s24, %s115_s24 }
  0x92   :  { %p9095_p13 = scmp.lt.s32.totalorder %s9093_s22, %s9089_s21 }
  0x94   :  { %p9096_p0 = por %p9095_p13, %p9094_p12 }
  0x96   :  { %p9097_p1 = pnand %p9096_p0, %p9090_p11 }
  0x98   :  { %9100 = shalt.err (!%p9097_p1)
}
  0x99   :  { %117 = dma.hbm_to_vmem [thread:$0]  %s9354_s8, 16, %s115_s24, [#allocation15]  }
  0x9a   :  { %9123 = dma.done.wait [#allocation3], 3072  }
  0x9b   :  { %9124 = vsyncadd [#allocation3], 4294964224 }
  0x9c   :  { %9125 = dma.done.wait [#allocation6], 98368  }
  0x9d   :  { %9126 = vsyncadd [#allocation6], 4294868928 }
  0x9e   :  { %9127 = dma.done.wait [#allocation9], 8224  }
  0x9f   :  { %9128 = vsyncadd [#allocation9], 4294959072 }
  0xa0   :  { %9129 = dma.done.wait [#allocation12], 2064  }
  0xa1   :  { %9130 = vsyncadd [#allocation12], 4294965232 }
  0xa2   :  { %9131 = dma.done.wait [#allocation15], 1040  }
  0xa3   :  { %9132 = vsyncadd [#allocation15], 4294966256  ;;  %v7631_v0 = vld [vmem:[#allocation5 + $0x4] ss:$16 sps:$4 sm:$0xff]   ;;  %v7633_v1 = vld [vmem:[#allocation5 + $0xc] ss:$16 sps:$4 sm:$0xff]  }
  0xa4   :  { %4824 = vmatprep.subr.bf16.mxu0 %v7631_v0  ;;  %v7635_v2 = vld [vmem:[#allocation5] ss:$16 sps:$4 sm:$0xff]   ;;  %v7636_v3 = vld [vmem:[#allocation5 + $0x8] ss:$16 sps:$4 sm:$0xff]   ;;  %5316 = vmatprep.subr.bf16.mxu1 %v7633_v1  ;;  %v7637_v4 = vld [vmem:[#allocation5 + $0x24] ss:$16 sps:$4 sm:$0xff]  }
  0xa5   :  { %4825 = vmatpush1.bf16.msra.mxu0 %v7635_v2  ;;  %5317 = vmatpush1.bf16.msra.mxu1 %v7636_v3  ;;  %v7639_v5 = vld [vmem:[#allocation5 + $0x2c] ss:$16 sps:$4 sm:$0xff]   ;;  %v7641_v6 = vld [vmem:[#allocation5 + $0x20] ss:$16 sps:$4 sm:$0xff]   ;;  %v7642_v7 = vld [vmem:[#allocation5 + $0x28] ss:$16 sps:$4 sm:$0xff]  }
  0xa6   :  { %4826 = vmatprep.subr.bf16.mxu0 %v7637_v4  ;;  %5318 = vmatprep.subr.bf16.mxu1 %v7639_v5  ;;  %v7643_v8 = vld [vmem:[#allocation5 + $0x44] ss:$16 sps:$4 sm:$0xff]   ;;  %v7645_v9 = vld [vmem:[#allocation5 + $0x4c] ss:$16 sps:$4 sm:$0xff]   ;;  %v7647_v10 = vld [vmem:[#allocation5 + $0x40] ss:$16 sps:$4 sm:$0xff]  }
  0xa7   :  { %v7648_v11 = vld [vmem:[#allocation5 + $0x48] ss:$16 sps:$4 sm:$0xff]   ;;  %v7649_v12 = vld [vmem:[#allocation5 + $0x64] ss:$16 sps:$4 sm:$0xff]   ;;  %v7651_v13 = vld [vmem:[#allocation5 + $0x6c] ss:$16 sps:$4 sm:$0xff]  }
  0xa8   :  { %v7653_v14 = vld [vmem:[#allocation5 + $0x60] ss:$16 sps:$4 sm:$0xff]   ;;  %v7654_v15 = vld [vmem:[#allocation5 + $0x68] ss:$16 sps:$4 sm:$0xff]   ;;  %v7655_v16 = vld [vmem:[#allocation5 + $0x84] ss:$16 sps:$4 sm:$0xff]  }
  0xa9   :  { %4827 = vmatpush1.bf16.msra.mxu0 %v7641_v6  ;;  %5319 = vmatpush1.bf16.msra.mxu1 %v7642_v7  ;;  %v7657_v17 = vld [vmem:[#allocation5 + $0x8c] ss:$16 sps:$4 sm:$0xff]   ;;  %v7659_v18 = vld [vmem:[#allocation5 + $0x80] ss:$16 sps:$4 sm:$0xff]   ;;  %v7660_v19 = vld [vmem:[#allocation5 + $0x88] ss:$16 sps:$4 sm:$0xff]  }
  0xaa   :  { %4828 = vmatprep.subr.bf16.mxu0 %v7643_v8  ;;  %5320 = vmatprep.subr.bf16.mxu1 %v7645_v9  ;;  %v7661_v20 = vld [vmem:[#allocation5 + $0xa4] ss:$16 sps:$4 sm:$0xff]   ;;  %v7663_v21 = vld [vmem:[#allocation5 + $0xac] ss:$16 sps:$4 sm:$0xff]   ;;  %v7665_v22 = vld [vmem:[#allocation5 + $0xa0] ss:$16 sps:$4 sm:$0xff]  }
  0xab   :  { %v7666_v23 = vld [vmem:[#allocation5 + $0xa8] ss:$16 sps:$4 sm:$0xff]   ;;  %v7667_v24 = vld [vmem:[#allocation5 + $0xc4] ss:$16 sps:$4 sm:$0xff]   ;;  %v7669_v25 = vld [vmem:[#allocation5 + $0xcc] ss:$16 sps:$4 sm:$0xff]  }
  0xac   :  { %v7671_v26 = vld [vmem:[#allocation5 + $0xc0] ss:$16 sps:$4 sm:$0xff]   ;;  %v7672_v27 = vld [vmem:[#allocation5 + $0xc8] ss:$16 sps:$4 sm:$0xff]   ;;  %v7673_v28 = vld [vmem:[#allocation5 + $0xe4] ss:$16 sps:$4 sm:$0xff]  }
  0xad   :  { %4829 = vmatpush1.bf16.msra.mxu0 %v7647_v10  ;;  %5321 = vmatpush1.bf16.msra.mxu1 %v7648_v11  ;;  %v7675_v29 = vld [vmem:[#allocation5 + $0xec] ss:$16 sps:$4 sm:$0xff]   ;;  %v7677_v30 = vld [vmem:[#allocation5 + $0xe0] ss:$16 sps:$4 sm:$0xff]   ;;  %v7678_v31 = vld [vmem:[#allocation5 + $0xe8] ss:$16 sps:$4 sm:$0xff]  }
  0xae   :  { %4830 = vmatprep.subr.bf16.mxu0 %v7649_v12  ;;  %5322 = vmatprep.subr.bf16.mxu1 %v7651_v13  ;;  %v7679_v32 = vld [vmem:[#allocation5 + $0x104] ss:$16 sps:$4 sm:$0xff]   ;;  %v7681_v33 = vld [vmem:[#allocation5 + $0x10c] ss:$16 sps:$4 sm:$0xff]   ;;  %v7683_v34 = vld [vmem:[#allocation5 + $0x100] ss:$16 sps:$4 sm:$0xff]  }
  0xaf   :  { %v7684_v35 = vld [vmem:[#allocation5 + $0x108] ss:$16 sps:$4 sm:$0xff]   ;;  %v7685_v36 = vld [vmem:[#allocation5 + $0x124] ss:$16 sps:$4 sm:$0xff]   ;;  %v7687_v37 = vld [vmem:[#allocation5 + $0x12c] ss:$16 sps:$4 sm:$0xff]  }
  0xb0   :  { %v7689_v38 = vld [vmem:[#allocation5 + $0x120] ss:$16 sps:$4 sm:$0xff]   ;;  %v7690_v39 = vld [vmem:[#allocation5 + $0x128] ss:$16 sps:$4 sm:$0xff]   ;;  %v7691_v40 = vld [vmem:[#allocation5 + $0x144] ss:$16 sps:$4 sm:$0xff]  }
  0xb1   :  { %4831 = vmatpush1.bf16.msra.mxu0 %v7653_v14  ;;  %5323 = vmatpush1.bf16.msra.mxu1 %v7654_v15  ;;  %v7693_v41 = vld [vmem:[#allocation5 + $0x14c] ss:$16 sps:$4 sm:$0xff]   ;;  %v7695_v42 = vld [vmem:[#allocation5 + $0x140] ss:$16 sps:$4 sm:$0xff]   ;;  %v7696_v43 = vld [vmem:[#allocation5 + $0x148] ss:$16 sps:$4 sm:$0xff]  }
  0xb2   :  { %4832 = vmatprep.subr.bf16.mxu0 %v7655_v16  ;;  %5324 = vmatprep.subr.bf16.mxu1 %v7657_v17  ;;  %v7697_v44 = vld [vmem:[#allocation5 + $0x164] ss:$16 sps:$4 sm:$0xff]   ;;  %v7699_v45 = vld [vmem:[#allocation5 + $0x16c] ss:$16 sps:$4 sm:$0xff]   ;;  %v7701_v47 = vld [vmem:[#allocation5 + $0x160] ss:$16 sps:$4 sm:$0xff]  }
  0xb3   :  { %v147_v46 = vld [vmem:[#allocation2 + $0x8] sm:$0xff]  ;;  %v7703_v50 = vld [vmem:[#allocation5 + $0x184] ss:$16 sps:$4 sm:$0xff]   ;;  %v7707_v52 = vld [vmem:[#allocation5 + $0x180] ss:$16 sps:$4 sm:$0xff]   ;;  %vm9151_vm0 = vmmov 0  }
  0xb4   :  { %v171_v48 = vpack.c.bf16 %v147_v46, %v147_v46  ;;  %v7702_v49 = vld [vmem:[#allocation5 + $0x168] ss:$16 sps:$4 sm:$0xff]   ;;  %v7705_v51 = vld [vmem:[#allocation5 + $0x18c] ss:$16 sps:$4 sm:$0xff]   ;;  %v7709_v54 = vld [vmem:[#allocation5 + $0x1a4] ss:$16 sps:$4 sm:$0xff]  }
  0xb5   :  { %4833 = vmatpush1.bf16.msra.mxu0 %v7659_v18  ;;  %5325 = vmatpush1.bf16.msra.mxu1 %v7660_v19  ;;  %v7708_v53 = vld [vmem:[#allocation5 + $0x188] ss:$16 sps:$4 sm:$0xff]   ;;  %v7711_v55 = vld [vmem:[#allocation5 + $0x1ac] ss:$16 sps:$4 sm:$0xff]   ;;  %v7713_v56 = vld [vmem:[#allocation5 + $0x1a0] ss:$16 sps:$4 sm:$0xff]  }
  0xb6   :  { %4834 = vmatprep.subr.bf16.mxu0 %v7661_v20  ;;  %5326 = vmatprep.subr.bf16.mxu1 %v7663_v21  ;;  %v7714_v57 = vld [vmem:[#allocation5 + $0x1a8] ss:$16 sps:$4 sm:$0xff]   ;;  %v7715_v58 = vld [vmem:[#allocation5 + $0x1c4] ss:$16 sps:$4 sm:$0xff]   ;;  %v7717_v59 = vld [vmem:[#allocation5 + $0x1cc] ss:$16 sps:$4 sm:$0xff]  }
  0xb7   :  { %4856 = vmatprep.mubr.bf16.mxu0 %v171_v48  ;;  %5348 = vmatprep.mubr.bf16.mxu1 %v171_v48  ;;  %v7719_v60 = vld [vmem:[#allocation5 + $0x1c0] ss:$16 sps:$4 sm:$0xff]   ;;  %v7720_v61 = vld [vmem:[#allocation5 + $0x1c8] ss:$16 sps:$4 sm:$0xff]   ;;  %v7721_v62 = vld [vmem:[#allocation5 + $0x1e4] ss:$16 sps:$4 sm:$0xff]  }
  0xb8   :  { %v7723_v63 = vld [vmem:[#allocation5 + $0x1ec] ss:$16 sps:$4 sm:$0xff]   ;;  %v7725_v0 = vld [vmem:[#allocation5 + $0x1e0] ss:$16 sps:$4 sm:$0xff]   ;;  %v7726_v1 = vld [vmem:[#allocation5 + $0x1e8] ss:$16 sps:$4 sm:$0xff]  }
  0xb9   :  { %4835 = vmatpush1.bf16.msra.mxu0 %v7665_v22  ;;  %5327 = vmatpush1.bf16.msra.mxu1 %v7666_v23  ;;  %v146_v2 = vld [vmem:[#allocation2] sm:$0xff]  ;;  %v7732_v4 = vld [vmem:[#allocation5 + $0x20c] ss:$16 sps:$4 sm:$0xff]   ;;  %v7730_v7 = vld [vmem:[#allocation5 + $0x208] ss:$16 sps:$4 sm:$0xff]   ;;  %s9152_s8 = smov [#allocation17]  }
  0xba   :  { %4836 = vmatprep.subr.bf16.mxu0 %v7667_v24  ;;  %5328 = vmatprep.subr.bf16.mxu1 %v7669_v25  ;;  %v7729_v3 = vld [vmem:[#allocation5 + $0x204] ss:$16 sps:$4 sm:$0xff]   ;;  %v170_v5 = vpack.c.bf16 %v146_v2, %v146_v2  ;;  %v7727_v6 = vld [vmem:[#allocation5 + $0x200] ss:$16 sps:$4 sm:$0xff]   ;;  %v7738_v9 = vld [vmem:[#allocation5 + $0x22c] ss:$16 sps:$4 sm:$0xff]  }
  0xbb   :  { %v7735_v8 = vld [vmem:[#allocation5 + $0x224] ss:$16 sps:$4 sm:$0xff]   ;;  %v7733_v10 = vld [vmem:[#allocation5 + $0x220] ss:$16 sps:$4 sm:$0xff]   ;;  %v7736_v11 = vld [vmem:[#allocation5 + $0x228] ss:$16 sps:$4 sm:$0xff]  }
  0xbc   :  { %v7741_v12 = vld [vmem:[#allocation5 + $0x244] ss:$16 sps:$4 sm:$0xff]   ;;  %v7744_v13 = vld [vmem:[#allocation5 + $0x24c] ss:$16 sps:$4 sm:$0xff]   ;;  %v7739_v14 = vld [vmem:[#allocation5 + $0x240] ss:$16 sps:$4 sm:$0xff]  }
  0xbd   :  { %4837 = vmatpush1.bf16.msra.mxu0 %v7671_v26  ;;  %5329 = vmatpush1.bf16.msra.mxu1 %v7672_v27  ;;  %v7742_v15 = vld [vmem:[#allocation5 + $0x248] ss:$16 sps:$4 sm:$0xff]   ;;  %v7747_v16 = vld [vmem:[#allocation5 + $0x264] ss:$16 sps:$4 sm:$0xff]   ;;  %v7750_v17 = vld [vmem:[#allocation5 + $0x26c] ss:$16 sps:$4 sm:$0xff]  }
  0xbe   :  { %4838 = vmatprep.subr.bf16.mxu0 %v7673_v28  ;;  %5330 = vmatprep.subr.bf16.mxu1 %v7675_v29  ;;  %v7745_v18 = vld [vmem:[#allocation5 + $0x260] ss:$16 sps:$4 sm:$0xff]   ;;  %v7748_v19 = vld [vmem:[#allocation5 + $0x268] ss:$16 sps:$4 sm:$0xff]   ;;  %v7753_v20 = vld [vmem:[#allocation5 + $0x284] ss:$16 sps:$4 sm:$0xff]  }
  0xbf   :  { %v7756_v21 = vld [vmem:[#allocation5 + $0x28c] ss:$16 sps:$4 sm:$0xff]   ;;  %v7751_v22 = vld [vmem:[#allocation5 + $0x280] ss:$16 sps:$4 sm:$0xff]   ;;  %v7754_v23 = vld [vmem:[#allocation5 + $0x288] ss:$16 sps:$4 sm:$0xff]  }
  0xc0   :  { %v7759_v24 = vld [vmem:[#allocation5 + $0x2a4] ss:$16 sps:$4 sm:$0xff]   ;;  %v7762_v25 = vld [vmem:[#allocation5 + $0x2ac] ss:$16 sps:$4 sm:$0xff]   ;;  %v7757_v26 = vld [vmem:[#allocation5 + $0x2a0] ss:$16 sps:$4 sm:$0xff]  }
  0xc1   :  { %4839 = vmatpush1.bf16.msra.mxu0 %v7677_v30  ;;  %5331 = vmatpush1.bf16.msra.mxu1 %v7678_v31  ;;  %v7760_v27 = vld [vmem:[#allocation5 + $0x2a8] ss:$16 sps:$4 sm:$0xff]   ;;  %v7765_v28 = vld [vmem:[#allocation5 + $0x2c4] ss:$16 sps:$4 sm:$0xff]   ;;  %v7768_v29 = vld [vmem:[#allocation5 + $0x2cc] ss:$16 sps:$4 sm:$0xff]  }
  0xc2   :  { %4840 = vmatprep.subr.bf16.mxu0 %v7679_v32  ;;  %5332 = vmatprep.subr.bf16.mxu1 %v7681_v33  ;;  %v149_v30 = vld [vmem:[#allocation2 + $0x18] sm:$0xff]  ;;  %v7763_v31 = vld [vmem:[#allocation5 + $0x2c0] ss:$16 sps:$4 sm:$0xff]   ;;  %v7789_v46 = vld [vmem:[#allocation5 + $0x344] ss:$16 sps:$4 sm:$0xff]   ;;  %s6593_s25 = sshll.u32 %s9152_s8, 4  ;;  %s6594_s25 = int_to_ptr.vmem [resolvable:$true] %s6593_s25 }
  0xc3   :  { %v173_v32 = vpack.c.bf16 %v149_v30, %v149_v30  ;;  %v7766_v33 = vld [vmem:[#allocation5 + $0x2c8] ss:$16 sps:$4 sm:$0xff]   ;;  %v7787_v48 = vld [vmem:[#allocation5 + $0x340] ss:$16 sps:$4 sm:$0xff]   ;;  %v7819_v2 = vld [vmem:[#allocation5 + $0x3e4] ss:$16 sps:$4 sm:$0xff]   ;;  %p9106_p3 = scmp.lt.s32.totalorder %s6594_s25, %s6594_s25 }
  0xc4   :  { %v7855_v30 = vld [vmem:[#allocation5 + $0x4a4] ss:$16 sps:$4 sm:$0xff]   ;;  %s9101_s2 = scalar_lea.vmem %s6594_s25, 128 }
  0xc5   :  { %4841 = vmatpush1.bf16.msra.mxu0 %v7683_v34  ;;  %5333 = vmatpush1.bf16.msra.mxu1 %v7684_v35  ;;  %v7771_v34 = vld [vmem:[#allocation5 + $0x2e4] ss:$16 sps:$4 sm:$0xff]   ;;  %v7774_v35 = vld [vmem:[#allocation5 + $0x2ec] ss:$16 sps:$4 sm:$0xff]   ;;  %p9102_p2 = scmp.ne.s32.totalorder %s6594_s25, %s9101_s2  ;;  %p9107_p4 = scmp.lt.s32.totalorder %s9101_s2, %s9101_s2 }
  0xc6   :  { %4842 = vmatprep.subr.bf16.mxu0 %v7685_v36  ;;  %5334 = vmatprep.subr.bf16.mxu1 %v7687_v37  ;;  %v7769_v36 = vld [vmem:[#allocation5 + $0x2e0] ss:$16 sps:$4 sm:$0xff]   ;;  %v7772_v37 = vld [vmem:[#allocation5 + $0x2e8] ss:$16 sps:$4 sm:$0xff]  }
  0xc7   :  { %p9108_p5 = por %p9107_p4, %p9106_p3 }
  0xc9   :  { %4843 = vmatpush1.bf16.msra.mxu0 %v7689_v38  ;;  %5335 = vmatpush1.bf16.msra.mxu1 %v7690_v39  ;;  %v7777_v38 = vld [vmem:[#allocation5 + $0x304] ss:$16 sps:$4 sm:$0xff]   ;;  %v7780_v39 = vld [vmem:[#allocation5 + $0x30c] ss:$16 sps:$4 sm:$0xff]   ;;  %p9109_p6 = pnand %p9108_p5, %p9102_p2 }
  0xca   :  { %4844 = vmatprep.subr.bf16.mxu0 %v7691_v40  ;;  %5336 = vmatprep.subr.bf16.mxu1 %v7693_v41  ;;  %v7775_v40 = vld [vmem:[#allocation5 + $0x300] ss:$16 sps:$4 sm:$0xff]   ;;  %v7778_v41 = vld [vmem:[#allocation5 + $0x308] ss:$16 sps:$4 sm:$0xff]  }
  0xcd   :  { %4845 = vmatpush1.bf16.msra.mxu0 %v7695_v42  ;;  %5337 = vmatpush1.bf16.msra.mxu1 %v7696_v43  ;;  %v7783_v42 = vld [vmem:[#allocation5 + $0x324] ss:$16 sps:$4 sm:$0xff]   ;;  %v7786_v43 = vld [vmem:[#allocation5 + $0x32c] ss:$16 sps:$4 sm:$0xff]  }
  0xce   :  { %4846 = vmatprep.subr.bf16.mxu0 %v7697_v44  ;;  %5338 = vmatprep.subr.bf16.mxu1 %v7699_v45  ;;  %v7781_v44 = vld [vmem:[#allocation5 + $0x320] ss:$16 sps:$4 sm:$0xff]   ;;  %v7784_v45 = vld [vmem:[#allocation5 + $0x328] ss:$16 sps:$4 sm:$0xff]  }
  0xd1   :  { %4847 = vmatpush1.bf16.msra.mxu0 %v7701_v47  ;;  %5339 = vmatpush1.bf16.msra.mxu1 %v7702_v49  ;;  %v7792_v47 = vld [vmem:[#allocation5 + $0x34c] ss:$16 sps:$4 sm:$0xff]   ;;  %v7790_v49 = vld [vmem:[#allocation5 + $0x348] ss:$16 sps:$4 sm:$0xff]  }
  0xd2   :  { %4848 = vmatprep.subr.bf16.mxu0 %v7703_v50  ;;  %5340 = vmatprep.subr.bf16.mxu1 %v7705_v51  ;;  %v7795_v50 = vld [vmem:[#allocation5 + $0x364] ss:$16 sps:$4 sm:$0xff]   ;;  %v7798_v51 = vld [vmem:[#allocation5 + $0x36c] ss:$16 sps:$4 sm:$0xff]  }
  0xd5   :  { %4849 = vmatpush1.bf16.msra.mxu0 %v7707_v52  ;;  %5341 = vmatpush1.bf16.msra.mxu1 %v7708_v53  ;;  %v7793_v52 = vld [vmem:[#allocation5 + $0x360] ss:$16 sps:$4 sm:$0xff]   ;;  %v7796_v53 = vld [vmem:[#allocation5 + $0x368] ss:$16 sps:$4 sm:$0xff]  }
  0xd6   :  { %4850 = vmatprep.subr.bf16.mxu0 %v7709_v54  ;;  %5342 = vmatprep.subr.bf16.mxu1 %v7711_v55  ;;  %v7801_v54 = vld [vmem:[#allocation5 + $0x384] ss:$16 sps:$4 sm:$0xff]   ;;  %v7804_v55 = vld [vmem:[#allocation5 + $0x38c] ss:$16 sps:$4 sm:$0xff]  }
  0xd9   :  { %4851 = vmatpush1.bf16.msra.mxu0 %v7713_v56  ;;  %5343 = vmatpush1.bf16.msra.mxu1 %v7714_v57  ;;  %v7799_v56 = vld [vmem:[#allocation5 + $0x380] ss:$16 sps:$4 sm:$0xff]   ;;  %v7802_v57 = vld [vmem:[#allocation5 + $0x388] ss:$16 sps:$4 sm:$0xff]  }
  0xda   :  { %4852 = vmatprep.subr.bf16.mxu0 %v7715_v58  ;;  %5344 = vmatprep.subr.bf16.mxu1 %v7717_v59  ;;  %v7807_v58 = vld [vmem:[#allocation5 + $0x3a4] ss:$16 sps:$4 sm:$0xff]   ;;  %v7810_v59 = vld [vmem:[#allocation5 + $0x3ac] ss:$16 sps:$4 sm:$0xff]  }
  0xdd   :  { %4853 = vmatpush1.bf16.msra.mxu0 %v7719_v60  ;;  %5345 = vmatpush1.bf16.msra.mxu1 %v7720_v61  ;;  %v7805_v60 = vld [vmem:[#allocation5 + $0x3a0] ss:$16 sps:$4 sm:$0xff]   ;;  %v7808_v61 = vld [vmem:[#allocation5 + $0x3a8] ss:$16 sps:$4 sm:$0xff]  }
  0xde   :  { %4854 = vmatprep.subr.bf16.mxu0 %v7721_v62  ;;  %5346 = vmatprep.subr.bf16.mxu1 %v7723_v63  ;;  %v7813_v62 = vld [vmem:[#allocation5 + $0x3c4] ss:$16 sps:$4 sm:$0xff]   ;;  %v7816_v63 = vld [vmem:[#allocation5 + $0x3cc] ss:$16 sps:$4 sm:$0xff]  }
  0xe1   :  { %4855 = vmatpush1.bf16.msra.mxu0 %v7725_v0  ;;  %5347 = vmatpush1.bf16.msra.mxu1 %v7726_v1  ;;  %v7811_v0 = vld [vmem:[#allocation5 + $0x3c0] ss:$16 sps:$4 sm:$0xff]   ;;  %v7814_v1 = vld [vmem:[#allocation5 + $0x3c8] ss:$16 sps:$4 sm:$0xff]  }
  0xe2   :  { %4865 = vmatprep.subr.bf16.mxu0 %v7729_v3  ;;  %5357 = vmatprep.subr.bf16.mxu1 %v7732_v4  ;;  %v7822_v3 = vld [vmem:[#allocation5 + $0x3ec] ss:$16 sps:$4 sm:$0xff]   ;;  %v7817_v4 = vld [vmem:[#allocation5 + $0x3e0] ss:$16 sps:$4 sm:$0xff]  }
  0xe4   :  { %4857 = vmatmul.mubr.bf16.vlgmr.msra.gmra.mrb[0].mxu0 %v170_v5  ;;  %5349 = vmatmul.mubr.bf16.vlgmr.msra.gmra.mrb[0].mxu1 %v170_v5  ;;  %v7820_v5 = vld [vmem:[#allocation5 + $0x3e8] ss:$16 sps:$4 sm:$0xff]  }
  0xe5   :  { %4866 = vmatpush1.bf16.msra.mxu0 %v7727_v6  ;;  %5358 = vmatpush1.bf16.msra.mxu1 %v7730_v7  ;;  %v7825_v6 = vld [vmem:[#allocation5 + $0x404] ss:$16 sps:$4 sm:$0xff]  }
  0xe6   :  { %4867 = vmatprep.subr.bf16.mxu0 %v7735_v8  ;;  %5359 = vmatprep.subr.bf16.mxu1 %v7738_v9  ;;  %v148_v7 = vld [vmem:[#allocation2 + $0x10] sm:$0xff]  ;;  %v7828_v8 = vld [vmem:[#allocation5 + $0x40c] ss:$16 sps:$4 sm:$0xff]  }
  0xe7   :  { %4897 = vmatprep.mubr.bf16.mxu0 %v173_v32  ;;  %5389 = vmatprep.mubr.bf16.mxu1 %v173_v32  ;;  %v7823_v9 = vld [vmem:[#allocation5 + $0x400] ss:$16 sps:$4 sm:$0xff]  }
  0xe8   :  { %v7853_v32 = vld [vmem:[#allocation5 + $0x4a0] ss:$16 sps:$4 sm:$0xff]  }
  0xe9   :  { %4868 = vmatpush1.bf16.msra.mxu0 %v7733_v10  ;;  %5360 = vmatpush1.bf16.msra.mxu1 %v7736_v11  ;;  %v7826_v10 = vld [vmem:[#allocation5 + $0x408] ss:$16 sps:$4 sm:$0xff]   ;;  %v172_v11 = vpack.c.bf16 %v148_v7, %v148_v7  ;;  %v7918_v7 = vld [vmem:[#allocation5 + $0x5ec] ss:$16 sps:$4 sm:$0xff]  }
  0xea   :  { %4869 = vmatprep.subr.bf16.mxu0 %v7741_v12  ;;  %5361 = vmatprep.subr.bf16.mxu1 %v7744_v13  ;;  %v7831_v12 = vld [vmem:[#allocation5 + $0x424] ss:$16 sps:$4 sm:$0xff]   ;;  %v7834_v13 = vld [vmem:[#allocation5 + $0x42c] ss:$16 sps:$4 sm:$0xff]  }
  0xed   :  { %4870 = vmatpush1.bf16.msra.mxu0 %v7739_v14  ;;  %5362 = vmatpush1.bf16.msra.mxu1 %v7742_v15  ;;  %v151_v14 = vld [vmem:[#allocation2 + $0x28] sm:$0xff] }
  0xee   :  { %4871 = vmatprep.subr.bf16.mxu0 %v7747_v16  ;;  %5363 = vmatprep.subr.bf16.mxu1 %v7750_v17  ;;  %v175_v15 = vpack.c.bf16 %v151_v14, %v151_v14  ;;  %v7829_v16 = vld [vmem:[#allocation5 + $0x420] ss:$16 sps:$4 sm:$0xff]   ;;  %v7832_v17 = vld [vmem:[#allocation5 + $0x428] ss:$16 sps:$4 sm:$0xff]  }
  0xef   :  { %v7922_v14 = vld [vmem:[#allocation5 + $0x608] ss:$16 sps:$4 sm:$0xff]  }
  0xf1   :  { %4872 = vmatpush1.bf16.msra.mxu0 %v7745_v18  ;;  %5364 = vmatpush1.bf16.msra.mxu1 %v7748_v19  ;;  %v7837_v18 = vld [vmem:[#allocation5 + $0x444] ss:$16 sps:$4 sm:$0xff]   ;;  %v7840_v19 = vld [vmem:[#allocation5 + $0x44c] ss:$16 sps:$4 sm:$0xff]  }
  0xf2   :  { %4873 = vmatprep.subr.bf16.mxu0 %v7753_v20  ;;  %5365 = vmatprep.subr.bf16.mxu1 %v7756_v21  ;;  %v7835_v20 = vld [vmem:[#allocation5 + $0x440] ss:$16 sps:$4 sm:$0xff]   ;;  %v7838_v21 = vld [vmem:[#allocation5 + $0x448] ss:$16 sps:$4 sm:$0xff]  }
  0xf5   :  { %4874 = vmatpush1.bf16.msra.mxu0 %v7751_v22  ;;  %5366 = vmatpush1.bf16.msra.mxu1 %v7754_v23  ;;  %v7843_v22 = vld [vmem:[#allocation5 + $0x464] ss:$16 sps:$4 sm:$0xff]   ;;  %v7846_v23 = vld [vmem:[#allocation5 + $0x46c] ss:$16 sps:$4 sm:$0xff]  }
  0xf6   :  { %4875 = vmatprep.subr.bf16.mxu0 %v7759_v24  ;;  %5367 = vmatprep.subr.bf16.mxu1 %v7762_v25  ;;  %v7841_v24 = vld [vmem:[#allocation5 + $0x460] ss:$16 sps:$4 sm:$0xff]   ;;  %v7844_v25 = vld [vmem:[#allocation5 + $0x468] ss:$16 sps:$4 sm:$0xff]  }
  0xf9   :  { %4876 = vmatpush1.bf16.msra.mxu0 %v7757_v26  ;;  %5368 = vmatpush1.bf16.msra.mxu1 %v7760_v27  ;;  %v7849_v26 = vld [vmem:[#allocation5 + $0x484] ss:$16 sps:$4 sm:$0xff]   ;;  %v7852_v27 = vld [vmem:[#allocation5 + $0x48c] ss:$16 sps:$4 sm:$0xff]  }
  0xfa   :  { %4877 = vmatprep.subr.bf16.mxu0 %v7765_v28  ;;  %5369 = vmatprep.subr.bf16.mxu1 %v7768_v29  ;;  %v7847_v28 = vld [vmem:[#allocation5 + $0x480] ss:$16 sps:$4 sm:$0xff]   ;;  %v7850_v29 = vld [vmem:[#allocation5 + $0x488] ss:$16 sps:$4 sm:$0xff]  }
  0xfd   :  { %4878 = vmatpush1.bf16.msra.mxu0 %v7763_v31  ;;  %5370 = vmatpush1.bf16.msra.mxu1 %v7766_v33  ;;  %v7858_v31 = vld [vmem:[#allocation5 + $0x4ac] ss:$16 sps:$4 sm:$0xff]   ;;  %v7856_v33 = vld [vmem:[#allocation5 + $0x4a8] ss:$16 sps:$4 sm:$0xff]  }
  0xfe   :  { %4879 = vmatprep.subr.bf16.mxu0 %v7771_v34  ;;  %5371 = vmatprep.subr.bf16.mxu1 %v7774_v35  ;;  %v7861_v34 = vld [vmem:[#allocation5 + $0x4c4] ss:$16 sps:$4 sm:$0xff]   ;;  %v7864_v35 = vld [vmem:[#allocation5 + $0x4cc] ss:$16 sps:$4 sm:$0xff]  }
 0x101   :  { %4880 = vmatpush1.bf16.msra.mxu0 %v7769_v36  ;;  %5372 = vmatpush1.bf16.msra.mxu1 %v7772_v37  ;;  %v7859_v36 = vld [vmem:[#allocation5 + $0x4c0] ss:$16 sps:$4 sm:$0xff]   ;;  %v7862_v37 = vld [vmem:[#allocation5 + $0x4c8] ss:$16 sps:$4 sm:$0xff]  }
 0x102   :  { %4881 = vmatprep.subr.bf16.mxu0 %v7777_v38  ;;  %5373 = vmatprep.subr.bf16.mxu1 %v7780_v39  ;;  %v7867_v38 = vld [vmem:[#allocation5 + $0x4e4] ss:$16 sps:$4 sm:$0xff]   ;;  %v7870_v39 = vld [vmem:[#allocation5 + $0x4ec] ss:$16 sps:$4 sm:$0xff]  }
 0x105   :  { %4882 = vmatpush1.bf16.msra.mxu0 %v7775_v40  ;;  %5374 = vmatpush1.bf16.msra.mxu1 %v7778_v41  ;;  %v7865_v40 = vld [vmem:[#allocation5 + $0x4e0] ss:$16 sps:$4 sm:$0xff]   ;;  %v7868_v41 = vld [vmem:[#allocation5 + $0x4e8] ss:$16 sps:$4 sm:$0xff]  }
 0x106   :  { %4883 = vmatprep.subr.bf16.mxu0 %v7783_v42  ;;  %5375 = vmatprep.subr.bf16.mxu1 %v7786_v43  ;;  %v7873_v42 = vld [vmem:[#allocation5 + $0x504] ss:$16 sps:$4 sm:$0xff]   ;;  %v7876_v43 = vld [vmem:[#allocation5 + $0x50c] ss:$16 sps:$4 sm:$0xff]  }
 0x109   :  { %4884 = vmatpush1.bf16.msra.mxu0 %v7781_v44  ;;  %5376 = vmatpush1.bf16.msra.mxu1 %v7784_v45  ;;  %v7871_v44 = vld [vmem:[#allocation5 + $0x500] ss:$16 sps:$4 sm:$0xff]   ;;  %v7874_v45 = vld [vmem:[#allocation5 + $0x508] ss:$16 sps:$4 sm:$0xff]  }
 0x10a   :  { %4885 = vmatprep.subr.bf16.mxu0 %v7789_v46  ;;  %5377 = vmatprep.subr.bf16.mxu1 %v7792_v47  ;;  %v7879_v46 = vld [vmem:[#allocation5 + $0x524] ss:$16 sps:$4 sm:$0xff]   ;;  %v7882_v47 = vld [vmem:[#allocation5 + $0x52c] ss:$16 sps:$4 sm:$0xff]  }
 0x10d   :  { %4886 = vmatpush1.bf16.msra.mxu0 %v7787_v48  ;;  %5378 = vmatpush1.bf16.msra.mxu1 %v7790_v49  ;;  %v7877_v48 = vld [vmem:[#allocation5 + $0x520] ss:$16 sps:$4 sm:$0xff]   ;;  %v7880_v49 = vld [vmem:[#allocation5 + $0x528] ss:$16 sps:$4 sm:$0xff]  }
 0x10e   :  { %4887 = vmatprep.subr.bf16.mxu0 %v7795_v50  ;;  %5379 = vmatprep.subr.bf16.mxu1 %v7798_v51  ;;  %v7885_v50 = vld [vmem:[#allocation5 + $0x544] ss:$16 sps:$4 sm:$0xff]   ;;  %v7888_v51 = vld [vmem:[#allocation5 + $0x54c] ss:$16 sps:$4 sm:$0xff]  }
 0x111   :  { %4888 = vmatpush1.bf16.msra.mxu0 %v7793_v52  ;;  %5380 = vmatpush1.bf16.msra.mxu1 %v7796_v53  ;;  %v7883_v52 = vld [vmem:[#allocation5 + $0x540] ss:$16 sps:$4 sm:$0xff]   ;;  %v7886_v53 = vld [vmem:[#allocation5 + $0x548] ss:$16 sps:$4 sm:$0xff]  }
 0x112   :  { %4889 = vmatprep.subr.bf16.mxu0 %v7801_v54  ;;  %5381 = vmatprep.subr.bf16.mxu1 %v7804_v55  ;;  %v7891_v54 = vld [vmem:[#allocation5 + $0x564] ss:$16 sps:$4 sm:$0xff]   ;;  %v7894_v55 = vld [vmem:[#allocation5 + $0x56c] ss:$16 sps:$4 sm:$0xff]  }
 0x115   :  { %4890 = vmatpush1.bf16.msra.mxu0 %v7799_v56  ;;  %5382 = vmatpush1.bf16.msra.mxu1 %v7802_v57  ;;  %v7889_v56 = vld [vmem:[#allocation5 + $0x560] ss:$16 sps:$4 sm:$0xff]   ;;  %v7892_v57 = vld [vmem:[#allocation5 + $0x568] ss:$16 sps:$4 sm:$0xff]  }
 0x116   :  { %4891 = vmatprep.subr.bf16.mxu0 %v7807_v58  ;;  %5383 = vmatprep.subr.bf16.mxu1 %v7810_v59  ;;  %v7897_v58 = vld [vmem:[#allocation5 + $0x584] ss:$16 sps:$4 sm:$0xff]   ;;  %v7900_v59 = vld [vmem:[#allocation5 + $0x58c] ss:$16 sps:$4 sm:$0xff]  }
 0x119   :  { %4892 = vmatpush1.bf16.msra.mxu0 %v7805_v60  ;;  %5384 = vmatpush1.bf16.msra.mxu1 %v7808_v61  ;;  %v7895_v60 = vld [vmem:[#allocation5 + $0x580] ss:$16 sps:$4 sm:$0xff]   ;;  %v7898_v61 = vld [vmem:[#allocation5 + $0x588] ss:$16 sps:$4 sm:$0xff]  }
 0x11a   :  { %4893 = vmatprep.subr.bf16.mxu0 %v7813_v62  ;;  %5385 = vmatprep.subr.bf16.mxu1 %v7816_v63  ;;  %v7903_v62 = vld [vmem:[#allocation5 + $0x5a4] ss:$16 sps:$4 sm:$0xff]   ;;  %v7906_v63 = vld [vmem:[#allocation5 + $0x5ac] ss:$16 sps:$4 sm:$0xff]  }
 0x11d   :  { %4894 = vmatpush1.bf16.msra.mxu0 %v7811_v0  ;;  %5386 = vmatpush1.bf16.msra.mxu1 %v7814_v1  ;;  %v7901_v0 = vld [vmem:[#allocation5 + $0x5a0] ss:$16 sps:$4 sm:$0xff]   ;;  %v7904_v1 = vld [vmem:[#allocation5 + $0x5a8] ss:$16 sps:$4 sm:$0xff]  }
 0x11e   :  { %4895 = vmatprep.subr.bf16.mxu0 %v7819_v2  ;;  %5387 = vmatprep.subr.bf16.mxu1 %v7822_v3  ;;  %v7909_v2 = vld [vmem:[#allocation5 + $0x5c4] ss:$16 sps:$4 sm:$0xff]   ;;  %v7912_v3 = vld [vmem:[#allocation5 + $0x5cc] ss:$16 sps:$4 sm:$0xff]  }
 0x121   :  { %4896 = vmatpush1.bf16.msra.mxu0 %v7817_v4  ;;  %5388 = vmatpush1.bf16.msra.mxu1 %v7820_v5  ;;  %v7907_v4 = vld [vmem:[#allocation5 + $0x5c0] ss:$16 sps:$4 sm:$0xff]   ;;  %v7910_v5 = vld [vmem:[#allocation5 + $0x5c8] ss:$16 sps:$4 sm:$0xff]  }
 0x122   :  { %4906 = vmatprep.subr.bf16.mxu0 %v7825_v6  ;;  %5398 = vmatprep.subr.bf16.mxu1 %v7828_v8  ;;  %v7915_v6 = vld [vmem:[#allocation5 + $0x5e4] ss:$16 sps:$4 sm:$0xff]   ;;  %v7913_v8 = vld [vmem:[#allocation5 + $0x5e0] ss:$16 sps:$4 sm:$0xff]  }
 0x124   :  { %4898 = vmatmul.mubr.bf16.vlgmr.msra.gmra.mrb[0].mxu0 %v172_v11  ;;  %5390 = vmatmul.mubr.bf16.vlgmr.msra.gmra.mrb[0].mxu1 %v172_v11  ;;  %v150_v11 = vld [vmem:[#allocation2 + $0x20] sm:$0xff] }
 0x125   :  { %4907 = vmatpush1.bf16.msra.mxu0 %v7823_v9  ;;  %5399 = vmatpush1.bf16.msra.mxu1 %v7826_v10  ;;  %v7916_v9 = vld [vmem:[#allocation5 + $0x5e8] ss:$16 sps:$4 sm:$0xff]   ;;  %v7921_v10 = vld [vmem:[#allocation5 + $0x604] ss:$16 sps:$4 sm:$0xff]  }
 0x126   :  { %4908 = vmatprep.subr.bf16.mxu0 %v7831_v12  ;;  %5400 = vmatprep.subr.bf16.mxu1 %v7834_v13  ;;  %v7924_v12 = vld [vmem:[#allocation5 + $0x60c] ss:$16 sps:$4 sm:$0xff]   ;;  %v7919_v13 = vld [vmem:[#allocation5 + $0x600] ss:$16 sps:$4 sm:$0xff]  }
 0x127   :  { %4938 = vmatprep.mubr.bf16.mxu0 %v175_v15  ;;  %5430 = vmatprep.mubr.bf16.mxu1 %v175_v15  ;;  %v174_v15 = vpack.c.bf16 %v150_v11, %v150_v11  ;;  %v8014_v11 = vld [vmem:[#allocation5 + $0x7ec] ss:$16 sps:$4 sm:$0xff]  }
 0x129   :  { %4909 = vmatpush1.bf16.msra.mxu0 %v7829_v16  ;;  %5401 = vmatpush1.bf16.msra.mxu1 %v7832_v17  ;;  %v153_v16 = vld [vmem:[#allocation2 + $0x38] sm:$0xff]  ;;  %v7927_v17 = vld [vmem:[#allocation5 + $0x624] ss:$16 sps:$4 sm:$0xff]  }
 0x12a   :  { %4910 = vmatprep.subr.bf16.mxu0 %v7837_v18  ;;  %5402 = vmatprep.subr.bf16.mxu1 %v7840_v19  ;;  %v7930_v18 = vld [vmem:[#allocation5 + $0x62c] ss:$16 sps:$4 sm:$0xff]   ;;  %v177_v19 = vpack.c.bf16 %v153_v16, %v153_v16 }
 0x12b   :  { %v8020_v16 = vld [vmem:[#allocation5 + $0x80c] ss:$16 sps:$4 sm:$0xff]  }
 0x12d   :  { %4911 = vmatpush1.bf16.msra.mxu0 %v7835_v20  ;;  %5403 = vmatpush1.bf16.msra.mxu1 %v7838_v21  ;;  %v7925_v20 = vld [vmem:[#allocation5 + $0x620] ss:$16 sps:$4 sm:$0xff]   ;;  %v7928_v21 = vld [vmem:[#allocation5 + $0x628] ss:$16 sps:$4 sm:$0xff]  }
 0x12e   :  { %4912 = vmatprep.subr.bf16.mxu0 %v7843_v22  ;;  %5404 = vmatprep.subr.bf16.mxu1 %v7846_v23  ;;  %v7933_v22 = vld [vmem:[#allocation5 + $0x644] ss:$16 sps:$4 sm:$0xff]   ;;  %v7936_v23 = vld [vmem:[#allocation5 + $0x64c] ss:$16 sps:$4 sm:$0xff]  }
 0x131   :  { %4913 = vmatpush1.bf16.msra.mxu0 %v7841_v24  ;;  %5405 = vmatpush1.bf16.msra.mxu1 %v7844_v25  ;;  %v7931_v24 = vld [vmem:[#allocation5 + $0x640] ss:$16 sps:$4 sm:$0xff]   ;;  %v7934_v25 = vld [vmem:[#allocation5 + $0x648] ss:$16 sps:$4 sm:$0xff]  }
 0x132   :  { %4914 = vmatprep.subr.bf16.mxu0 %v7849_v26  ;;  %5406 = vmatprep.subr.bf16.mxu1 %v7852_v27  ;;  %v7939_v26 = vld [vmem:[#allocation5 + $0x664] ss:$16 sps:$4 sm:$0xff]   ;;  %v7942_v27 = vld [vmem:[#allocation5 + $0x66c] ss:$16 sps:$4 sm:$0xff]  }
 0x135   :  { %4915 = vmatpush1.bf16.msra.mxu0 %v7847_v28  ;;  %5407 = vmatpush1.bf16.msra.mxu1 %v7850_v29  ;;  %v7937_v28 = vld [vmem:[#allocation5 + $0x660] ss:$16 sps:$4 sm:$0xff]   ;;  %v7940_v29 = vld [vmem:[#allocation5 + $0x668] ss:$16 sps:$4 sm:$0xff]  }
 0x136   :  { %4916 = vmatprep.subr.bf16.mxu0 %v7855_v30  ;;  %5408 = vmatprep.subr.bf16.mxu1 %v7858_v31  ;;  %v7945_v30 = vld [vmem:[#allocation5 + $0x684] ss:$16 sps:$4 sm:$0xff]   ;;  %v7948_v31 = vld [vmem:[#allocation5 + $0x68c] ss:$16 sps:$4 sm:$0xff]  }
 0x139   :  { %4917 = vmatpush1.bf16.msra.mxu0 %v7853_v32  ;;  %5409 = vmatpush1.bf16.msra.mxu1 %v7856_v33  ;;  %v7943_v32 = vld [vmem:[#allocation5 + $0x680] ss:$16 sps:$4 sm:$0xff]   ;;  %v7946_v33 = vld [vmem:[#allocation5 + $0x688] ss:$16 sps:$4 sm:$0xff]  }
 0x13a   :  { %4918 = vmatprep.subr.bf16.mxu0 %v7861_v34  ;;  %5410 = vmatprep.subr.bf16.mxu1 %v7864_v35  ;;  %v7951_v34 = vld [vmem:[#allocation5 + $0x6a4] ss:$16 sps:$4 sm:$0xff]   ;;  %v7954_v35 = vld [vmem:[#allocation5 + $0x6ac] ss:$16 sps:$4 sm:$0xff]  }
 0x13d   :  { %4919 = vmatpush1.bf16.msra.mxu0 %v7859_v36  ;;  %5411 = vmatpush1.bf16.msra.mxu1 %v7862_v37  ;;  %v7949_v36 = vld [vmem:[#allocation5 + $0x6a0] ss:$16 sps:$4 sm:$0xff]   ;;  %v7952_v37 = vld [vmem:[#allocation5 + $0x6a8] ss:$16 sps:$4 sm:$0xff]  }
 0x13e   :  { %4920 = vmatprep.subr.bf16.mxu0 %v7867_v38  ;;  %5412 = vmatprep.subr.bf16.mxu1 %v7870_v39  ;;  %v7957_v38 = vld [vmem:[#allocation5 + $0x6c4] ss:$16 sps:$4 sm:$0xff]   ;;  %v7960_v39 = vld [vmem:[#allocation5 + $0x6cc] ss:$16 sps:$4 sm:$0xff]  }
 0x141   :  { %4921 = vmatpush1.bf16.msra.mxu0 %v7865_v40  ;;  %5413 = vmatpush1.bf16.msra.mxu1 %v7868_v41  ;;  %v7955_v40 = vld [vmem:[#allocation5 + $0x6c0] ss:$16 sps:$4 sm:$0xff]   ;;  %v7958_v41 = vld [vmem:[#allocation5 + $0x6c8] ss:$16 sps:$4 sm:$0xff]  }
 0x142   :  { %4922 = vmatprep.subr.bf16.mxu0 %v7873_v42  ;;  %5414 = vmatprep.subr.bf16.mxu1 %v7876_v43  ;;  %v7963_v42 = vld [vmem:[#allocation5 + $0x6e4] ss:$16 sps:$4 sm:$0xff]   ;;  %v7966_v43 = vld [vmem:[#allocation5 + $0x6ec] ss:$16 sps:$4 sm:$0xff]  }
 0x145   :  { %4923 = vmatpush1.bf16.msra.mxu0 %v7871_v44  ;;  %5415 = vmatpush1.bf16.msra.mxu1 %v7874_v45  ;;  %v7961_v44 = vld [vmem:[#allocation5 + $0x6e0] ss:$16 sps:$4 sm:$0xff]   ;;  %v7964_v45 = vld [vmem:[#allocation5 + $0x6e8] ss:$16 sps:$4 sm:$0xff]  }
 0x146   :  { %4924 = vmatprep.subr.bf16.mxu0 %v7879_v46  ;;  %5416 = vmatprep.subr.bf16.mxu1 %v7882_v47  ;;  %v7969_v46 = vld [vmem:[#allocation5 + $0x704] ss:$16 sps:$4 sm:$0xff]   ;;  %v7972_v47 = vld [vmem:[#allocation5 + $0x70c] ss:$16 sps:$4 sm:$0xff]  }
 0x149   :  { %4925 = vmatpush1.bf16.msra.mxu0 %v7877_v48  ;;  %5417 = vmatpush1.bf16.msra.mxu1 %v7880_v49  ;;  %v7967_v48 = vld [vmem:[#allocation5 + $0x700] ss:$16 sps:$4 sm:$0xff]   ;;  %v7970_v49 = vld [vmem:[#allocation5 + $0x708] ss:$16 sps:$4 sm:$0xff]  }
 0x14a   :  { %4926 = vmatprep.subr.bf16.mxu0 %v7885_v50  ;;  %5418 = vmatprep.subr.bf16.mxu1 %v7888_v51  ;;  %v7975_v50 = vld [vmem:[#allocation5 + $0x724] ss:$16 sps:$4 sm:$0xff]   ;;  %v7978_v51 = vld [vmem:[#allocation5 + $0x72c] ss:$16 sps:$4 sm:$0xff]  }
 0x14d   :  { %4927 = vmatpush1.bf16.msra.mxu0 %v7883_v52  ;;  %5419 = vmatpush1.bf16.msra.mxu1 %v7886_v53  ;;  %v7973_v52 = vld [vmem:[#allocation5 + $0x720] ss:$16 sps:$4 sm:$0xff]   ;;  %v7976_v53 = vld [vmem:[#allocation5 + $0x728] ss:$16 sps:$4 sm:$0xff]  }
 0x14e   :  { %4928 = vmatprep.subr.bf16.mxu0 %v7891_v54  ;;  %5420 = vmatprep.subr.bf16.mxu1 %v7894_v55  ;;  %v7981_v54 = vld [vmem:[#allocation5 + $0x744] ss:$16 sps:$4 sm:$0xff]   ;;  %v7984_v55 = vld [vmem:[#allocation5 + $0x74c] ss:$16 sps:$4 sm:$0xff]  }
 0x151   :  { %4929 = vmatpush1.bf16.msra.mxu0 %v7889_v56  ;;  %5421 = vmatpush1.bf16.msra.mxu1 %v7892_v57  ;;  %v7979_v56 = vld [vmem:[#allocation5 + $0x740] ss:$16 sps:$4 sm:$0xff]   ;;  %v7982_v57 = vld [vmem:[#allocation5 + $0x748] ss:$16 sps:$4 sm:$0xff]  }
 0x152   :  { %4930 = vmatprep.subr.bf16.mxu0 %v7897_v58  ;;  %5422 = vmatprep.subr.bf16.mxu1 %v7900_v59  ;;  %v7987_v58 = vld [vmem:[#allocation5 + $0x764] ss:$16 sps:$4 sm:$0xff]   ;;  %v7990_v59 = vld [vmem:[#allocation5 + $0x76c] ss:$16 sps:$4 sm:$0xff]  }
 0x155   :  { %4931 = vmatpush1.bf16.msra.mxu0 %v7895_v60  ;;  %5423 = vmatpush1.bf16.msra.mxu1 %v7898_v61  ;;  %v7985_v60 = vld [vmem:[#allocation5 + $0x760] ss:$16 sps:$4 sm:$0xff]   ;;  %v7988_v61 = vld [vmem:[#allocation5 + $0x768] ss:$16 sps:$4 sm:$0xff]  }
 0x156   :  { %4932 = vmatprep.subr.bf16.mxu0 %v7903_v62  ;;  %5424 = vmatprep.subr.bf16.mxu1 %v7906_v63  ;;  %v7993_v62 = vld [vmem:[#allocation5 + $0x784] ss:$16 sps:$4 sm:$0xff]   ;;  %v7996_v63 = vld [vmem:[#allocation5 + $0x78c] ss:$16 sps:$4 sm:$0xff]  }
 0x159   :  { %4933 = vmatpush1.bf16.msra.mxu0 %v7901_v0  ;;  %5425 = vmatpush1.bf16.msra.mxu1 %v7904_v1  ;;  %v7991_v0 = vld [vmem:[#allocation5 + $0x780] ss:$16 sps:$4 sm:$0xff]   ;;  %v7994_v1 = vld [vmem:[#allocation5 + $0x788] ss:$16 sps:$4 sm:$0xff]  }
 0x15a   :  { %4934 = vmatprep.subr.bf16.mxu0 %v7909_v2  ;;  %5426 = vmatprep.subr.bf16.mxu1 %v7912_v3  ;;  %v7999_v2 = vld [vmem:[#allocation5 + $0x7a4] ss:$16 sps:$4 sm:$0xff]   ;;  %v8002_v3 = vld [vmem:[#allocation5 + $0x7ac] ss:$16 sps:$4 sm:$0xff]  }
 0x15d   :  { %4935 = vmatpush1.bf16.msra.mxu0 %v7907_v4  ;;  %5427 = vmatpush1.bf16.msra.mxu1 %v7910_v5  ;;  %v7997_v4 = vld [vmem:[#allocation5 + $0x7a0] ss:$16 sps:$4 sm:$0xff]   ;;  %v8000_v5 = vld [vmem:[#allocation5 + $0x7a8] ss:$16 sps:$4 sm:$0xff]  }
 0x15e   :  { %4936 = vmatprep.subr.bf16.mxu0 %v7915_v6  ;;  %5428 = vmatprep.subr.bf16.mxu1 %v7918_v7  ;;  %v8005_v6 = vld [vmem:[#allocation5 + $0x7c4] ss:$16 sps:$4 sm:$0xff]   ;;  %v8008_v7 = vld [vmem:[#allocation5 + $0x7cc] ss:$16 sps:$4 sm:$0xff]  }
 0x161   :  { %4937 = vmatpush1.bf16.msra.mxu0 %v7913_v8  ;;  %5429 = vmatpush1.bf16.msra.mxu1 %v7916_v9  ;;  %v8003_v8 = vld [vmem:[#allocation5 + $0x7c0] ss:$16 sps:$4 sm:$0xff]   ;;  %v8006_v9 = vld [vmem:[#allocation5 + $0x7c8] ss:$16 sps:$4 sm:$0xff]  }
 0x162   :  { %4947 = vmatprep.subr.bf16.mxu0 %v7921_v10  ;;  %5439 = vmatprep.subr.bf16.mxu1 %v7924_v12  ;;  %v8011_v10 = vld [vmem:[#allocation5 + $0x7e4] ss:$16 sps:$4 sm:$0xff]   ;;  %v8009_v12 = vld [vmem:[#allocation5 + $0x7e0] ss:$16 sps:$4 sm:$0xff]  }
 0x164   :  { %4939 = vmatmul.mubr.bf16.vlgmr.msra.gmra.mrb[0].mxu0 %v174_v15  ;;  %5431 = vmatmul.mubr.bf16.vlgmr.msra.gmra.mrb[0].mxu1 %v174_v15  ;;  %v8017_v15 = vld [vmem:[#allocation5 + $0x804] ss:$16 sps:$4 sm:$0xff]  }
 0x165   :  { %4948 = vmatpush1.bf16.msra.mxu0 %v7919_v13  ;;  %5440 = vmatpush1.bf16.msra.mxu1 %v7922_v14  ;;  %v8012_v13 = vld [vmem:[#allocation5 + $0x7e8] ss:$16 sps:$4 sm:$0xff]   ;;  %v152_v14 = vld [vmem:[#allocation2 + $0x30] sm:$0xff] }
 0x166   :  { %4949 = vmatprep.subr.bf16.mxu0 %v7927_v17  ;;  %5441 = vmatprep.subr.bf16.mxu1 %v7930_v18  ;;  %v176_v17 = vpack.c.bf16 %v152_v14, %v152_v14  ;;  %v155_v18 = vld [vmem:[#allocation2 + $0x48] sm:$0xff]  ;;  %v8107_v14 = vld [vmem:[#allocation5 + $0x9e4] ss:$16 sps:$4 sm:$0xff]  }
 0x167   :  { %4979 = vmatprep.mubr.bf16.mxu0 %v177_v19  ;;  %5471 = vmatprep.mubr.bf16.mxu1 %v177_v19  ;;  %v8015_v19 = vld [vmem:[#allocation5 + $0x800] ss:$16 sps:$4 sm:$0xff]  }
 0x169   :  { %4950 = vmatpush1.bf16.msra.mxu0 %v7925_v20  ;;  %5442 = vmatpush1.bf16.msra.mxu1 %v7928_v21  ;;  %v8018_v20 = vld [vmem:[#allocation5 + $0x808] ss:$16 sps:$4 sm:$0xff]   ;;  %v8023_v21 = vld [vmem:[#allocation5 + $0x824] ss:$16 sps:$4 sm:$0xff]  }
 0x16a   :  { %4951 = vmatprep.subr.bf16.mxu0 %v7933_v22  ;;  %5443 = vmatprep.subr.bf16.mxu1 %v7936_v23  ;;  %v8026_v22 = vld [vmem:[#allocation5 + $0x82c] ss:$16 sps:$4 sm:$0xff]   ;;  %v179_v23 = vpack.c.bf16 %v155_v18, %v155_v18  ;;  %v8113_v18 = vld [vmem:[#allocation5 + $0xa04] ss:$16 sps:$4 sm:$0xff]  }
 0x16d   :  { %4952 = vmatpush1.bf16.msra.mxu0 %v7931_v24  ;;  %5444 = vmatpush1.bf16.msra.mxu1 %v7934_v25  ;;  %v8021_v24 = vld [vmem:[#allocation5 + $0x820] ss:$16 sps:$4 sm:$0xff]   ;;  %v8024_v25 = vld [vmem:[#allocation5 + $0x828] ss:$16 sps:$4 sm:$0xff]  }
 0x16e   :  { %4953 = vmatprep.subr.bf16.mxu0 %v7939_v26  ;;  %5445 = vmatprep.subr.bf16.mxu1 %v7942_v27  ;;  %v8029_v26 = vld [vmem:[#allocation5 + $0x844] ss:$16 sps:$4 sm:$0xff]   ;;  %v8032_v27 = vld [vmem:[#allocation5 + $0x84c] ss:$16 sps:$4 sm:$0xff]  }
 0x171   :  { %4954 = vmatpush1.bf16.msra.mxu0 %v7937_v28  ;;  %5446 = vmatpush1.bf16.msra.mxu1 %v7940_v29  ;;  %v8027_v28 = vld [vmem:[#allocation5 + $0x840] ss:$16 sps:$4 sm:$0xff]   ;;  %v8030_v29 = vld [vmem:[#allocation5 + $0x848] ss:$16 sps:$4 sm:$0xff]  }
 0x172   :  { %4955 = vmatprep.subr.bf16.mxu0 %v7945_v30  ;;  %5447 = vmatprep.subr.bf16.mxu1 %v7948_v31  ;;  %v8035_v30 = vld [vmem:[#allocation5 + $0x864] ss:$16 sps:$4 sm:$0xff]   ;;  %v8038_v31 = vld [vmem:[#allocation5 + $0x86c] ss:$16 sps:$4 sm:$0xff]  }
 0x175   :  { %4956 = vmatpush1.bf16.msra.mxu0 %v7943_v32  ;;  %5448 = vmatpush1.bf16.msra.mxu1 %v7946_v33  ;;  %v8033_v32 = vld [vmem:[#allocation5 + $0x860] ss:$16 sps:$4 sm:$0xff]   ;;  %v8036_v33 = vld [vmem:[#allocation5 + $0x868] ss:$16 sps:$4 sm:$0xff]  }
 0x176   :  { %4957 = vmatprep.subr.bf16.mxu0 %v7951_v34  ;;  %5449 = vmatprep.subr.bf16.mxu1 %v7954_v35  ;;  %v8041_v34 = vld [vmem:[#allocation5 + $0x884] ss:$16 sps:$4 sm:$0xff]   ;;  %v8044_v35 = vld [vmem:[#allocation5 + $0x88c] ss:$16 sps:$4 sm:$0xff]  }
 0x179   :  { %4958 = vmatpush1.bf16.msra.mxu0 %v7949_v36  ;;  %5450 = vmatpush1.bf16.msra.mxu1 %v7952_v37  ;;  %v8039_v36 = vld [vmem:[#allocation5 + $0x880] ss:$16 sps:$4 sm:$0xff]   ;;  %v8042_v37 = vld [vmem:[#allocation5 + $0x888] ss:$16 sps:$4 sm:$0xff]  }
 0x17a   :  { %4959 = vmatprep.subr.bf16.mxu0 %v7957_v38  ;;  %5451 = vmatprep.subr.bf16.mxu1 %v7960_v39  ;;  %v8047_v38 = vld [vmem:[#allocation5 + $0x8a4] ss:$16 sps:$4 sm:$0xff]   ;;  %v8050_v39 = vld [vmem:[#allocation5 + $0x8ac] ss:$16 sps:$4 sm:$0xff]  }
 0x17d   :  { %4960 = vmatpush1.bf16.msra.mxu0 %v7955_v40  ;;  %5452 = vmatpush1.bf16.msra.mxu1 %v7958_v41  ;;  %v8045_v40 = vld [vmem:[#allocation5 + $0x8a0] ss:$16 sps:$4 sm:$0xff]   ;;  %v8048_v41 = vld [vmem:[#allocation5 + $0x8a8] ss:$16 sps:$4 sm:$0xff]  }
 0x17e   :  { %4961 = vmatprep.subr.bf16.mxu0 %v7963_v42  ;;  %5453 = vmatprep.subr.bf16.mxu1 %v7966_v43  ;;  %v8053_v42 = vld [vmem:[#allocation5 + $0x8c4] ss:$16 sps:$4 sm:$0xff]   ;;  %v8056_v43 = vld [vmem:[#allocation5 + $0x8cc] ss:$16 sps:$4 sm:$0xff]  }
 0x181   :  { %4962 = vmatpush1.bf16.msra.mxu0 %v7961_v44  ;;  %5454 = vmatpush1.bf16.msra.mxu1 %v7964_v45  ;;  %v8051_v44 = vld [vmem:[#allocation5 + $0x8c0] ss:$16 sps:$4 sm:$0xff]   ;;  %v8054_v45 = vld [vmem:[#allocation5 + $0x8c8] ss:$16 sps:$4 sm:$0xff]  }
 0x182   :  { %4963 = vmatprep.subr.bf16.mxu0 %v7969_v46  ;;  %5455 = vmatprep.subr.bf16.mxu1 %v7972_v47  ;;  %v8059_v46 = vld [vmem:[#allocation5 + $0x8e4] ss:$16 sps:$4 sm:$0xff]   ;;  %v8062_v47 = vld [vmem:[#allocation5 + $0x8ec] ss:$16 sps:$4 sm:$0xff]  }
 0x185   :  { %4964 = vmatpush1.bf16.msra.mxu0 %v7967_v48  ;;  %5456 = vmatpush1.bf16.msra.mxu1 %v7970_v49  ;;  %v8057_v48 = vld [vmem:[#allocation5 + $0x8e0] ss:$16 sps:$4 sm:$0xff]   ;;  %v8060_v49 = vld [vmem:[#allocation5 + $0x8e8] ss:$16 sps:$4 sm:$0xff]  }
 0x186   :  { %4965 = vmatprep.subr.bf16.mxu0 %v7975_v50  ;;  %5457 = vmatprep.subr.bf16.mxu1 %v7978_v51  ;;  %v8065_v50 = vld [vmem:[#allocation5 + $0x904] ss:$16 sps:$4 sm:$0xff]   ;;  %v8068_v51 = vld [vmem:[#allocation5 + $0x90c] ss:$16 sps:$4 sm:$0xff]  }
 0x189   :  { %4966 = vmatpush1.bf16.msra.mxu0 %v7973_v52  ;;  %5458 = vmatpush1.bf16.msra.mxu1 %v7976_v53  ;;  %v8063_v52 = vld [vmem:[#allocation5 + $0x900] ss:$16 sps:$4 sm:$0xff]   ;;  %v8066_v53 = vld [vmem:[#allocation5 + $0x908] ss:$16 sps:$4 sm:$0xff]  }
 0x18a   :  { %4967 = vmatprep.subr.bf16.mxu0 %v7981_v54  ;;  %5459 = vmatprep.subr.bf16.mxu1 %v7984_v55  ;;  %v8071_v54 = vld [vmem:[#allocation5 + $0x924] ss:$16 sps:$4 sm:$0xff]   ;;  %v8074_v55 = vld [vmem:[#allocation5 + $0x92c] ss:$16 sps:$4 sm:$0xff]  }
 0x18d   :  { %4968 = vmatpush1.bf16.msra.mxu0 %v7979_v56  ;;  %5460 = vmatpush1.bf16.msra.mxu1 %v7982_v57  ;;  %v8069_v56 = vld [vmem:[#allocation5 + $0x920] ss:$16 sps:$4 sm:$0xff]   ;;  %v8072_v57 = vld [vmem:[#allocation5 + $0x928] ss:$16 sps:$4 sm:$0xff]  }
 0x18e   :  { %4969 = vmatprep.subr.bf16.mxu0 %v7987_v58  ;;  %5461 = vmatprep.subr.bf16.mxu1 %v7990_v59  ;;  %v8077_v58 = vld [vmem:[#allocation5 + $0x944] ss:$16 sps:$4 sm:$0xff]   ;;  %v8080_v59 = vld [vmem:[#allocation5 + $0x94c] ss:$16 sps:$4 sm:$0xff]  }
 0x191   :  { %4970 = vmatpush1.bf16.msra.mxu0 %v7985_v60  ;;  %5462 = vmatpush1.bf16.msra.mxu1 %v7988_v61  ;;  %v8075_v60 = vld [vmem:[#allocation5 + $0x940] ss:$16 sps:$4 sm:$0xff]   ;;  %v8078_v61 = vld [vmem:[#allocation5 + $0x948] ss:$16 sps:$4 sm:$0xff]  }
 0x192   :  { %4971 = vmatprep.subr.bf16.mxu0 %v7993_v62  ;;  %5463 = vmatprep.subr.bf16.mxu1 %v7996_v63  ;;  %v8083_v62 = vld [vmem:[#allocation5 + $0x964] ss:$16 sps:$4 sm:$0xff]   ;;  %v8086_v63 = vld [vmem:[#allocation5 + $0x96c] ss:$16 sps:$4 sm:$0xff]  }
 0x195   :  { %4972 = vmatpush1.bf16.msra.mxu0 %v7991_v0  ;;  %5464 = vmatpush1.bf16.msra.mxu1 %v7994_v1  ;;  %v8081_v0 = vld [vmem:[#allocation5 + $0x960] ss:$16 sps:$4 sm:$0xff]   ;;  %v8084_v1 = vld [vmem:[#allocation5 + $0x968] ss:$16 sps:$4 sm:$0xff]  }
 0x196   :  { %4973 = vmatprep.subr.bf16.mxu0 %v7999_v2  ;;  %5465 = vmatprep.subr.bf16.mxu1 %v8002_v3  ;;  %v8089_v2 = vld [vmem:[#allocation5 + $0x984] ss:$16 sps:$4 sm:$0xff]   ;;  %v8092_v3 = vld [vmem:[#allocation5 + $0x98c] ss:$16 sps:$4 sm:$0xff]  }
 0x199   :  { %4974 = vmatpush1.bf16.msra.mxu0 %v7997_v4  ;;  %5466 = vmatpush1.bf16.msra.mxu1 %v8000_v5  ;;  %v8087_v4 = vld [vmem:[#allocation5 + $0x980] ss:$16 sps:$4 sm:$0xff]   ;;  %v8090_v5 = vld [vmem:[#allocation5 + $0x988] ss:$16 sps:$4 sm:$0xff]  }
 0x19a   :  { %4975 = vmatprep.subr.bf16.mxu0 %v8005_v6  ;;  %5467 = vmatprep.subr.bf16.mxu1 %v8008_v7  ;;  %v8095_v6 = vld [vmem:[#allocation5 + $0x9a4] ss:$16 sps:$4 sm:$0xff]   ;;  %v8098_v7 = vld [vmem:[#allocation5 + $0x9ac] ss:$16 sps:$4 sm:$0xff]  }
 0x19d   :  { %4976 = vmatpush1.bf16.msra.mxu0 %v8003_v8  ;;  %5468 = vmatpush1.bf16.msra.mxu1 %v8006_v9  ;;  %v8093_v8 = vld [vmem:[#allocation5 + $0x9a0] ss:$16 sps:$4 sm:$0xff]   ;;  %v8096_v9 = vld [vmem:[#allocation5 + $0x9a8] ss:$16 sps:$4 sm:$0xff]  }
 0x19e   :  { %4977 = vmatprep.subr.bf16.mxu0 %v8011_v10  ;;  %5469 = vmatprep.subr.bf16.mxu1 %v8014_v11  ;;  %v8101_v10 = vld [vmem:[#allocation5 + $0x9c4] ss:$16 sps:$4 sm:$0xff]   ;;  %v8104_v11 = vld [vmem:[#allocation5 + $0x9cc] ss:$16 sps:$4 sm:$0xff]  }
 0x1a1   :  { %4978 = vmatpush1.bf16.msra.mxu0 %v8009_v12  ;;  %5470 = vmatpush1.bf16.msra.mxu1 %v8012_v13  ;;  %v8099_v12 = vld [vmem:[#allocation5 + $0x9c0] ss:$16 sps:$4 sm:$0xff]   ;;  %v8102_v13 = vld [vmem:[#allocation5 + $0x9c8] ss:$16 sps:$4 sm:$0xff]  }
 0x1a2   :  { %4988 = vmatprep.subr.bf16.mxu0 %v8017_v15  ;;  %5480 = vmatprep.subr.bf16.mxu1 %v8020_v16  ;;  %v8110_v15 = vld [vmem:[#allocation5 + $0x9ec] ss:$16 sps:$4 sm:$0xff]   ;;  %v8105_v16 = vld [vmem:[#allocation5 + $0x9e0] ss:$16 sps:$4 sm:$0xff]  }
 0x1a4   :  { %4980 = vmatmul.mubr.bf16.vlgmr.msra.gmra.mrb[0].mxu0 %v176_v17  ;;  %5472 = vmatmul.mubr.bf16.vlgmr.msra.gmra.mrb[0].mxu1 %v176_v17  ;;  %v8108_v17 = vld [vmem:[#allocation5 + $0x9e8] ss:$16 sps:$4 sm:$0xff]  }
 0x1a5   :  { %4989 = vmatpush1.bf16.msra.mxu0 %v8015_v19  ;;  %5481 = vmatpush1.bf16.msra.mxu1 %v8018_v20  ;;  %v154_v19 = vld [vmem:[#allocation2 + $0x40] sm:$0xff]  ;;  %v8116_v20 = vld [vmem:[#allocation5 + $0xa0c] ss:$16 sps:$4 sm:$0xff]  }
 0x1a6   :  { %4990 = vmatprep.subr.bf16.mxu0 %v8023_v21  ;;  %5482 = vmatprep.subr.bf16.mxu1 %v8026_v22  ;;  %v157_v21 = vld [vmem:[#allocation2 + $0x58] sm:$0xff]  ;;  %v178_v22 = vpack.c.bf16 %v154_v19, %v154_v19 }
 0x1a7   :  { %5020 = vmatprep.mubr.bf16.mxu0 %v179_v23  ;;  %5512 = vmatprep.mubr.bf16.mxu1 %v179_v23  ;;  %v8111_v23 = vld [vmem:[#allocation5 + $0xa00] ss:$16 sps:$4 sm:$0xff]   ;;  %v8206_v19 = vld [vmem:[#allocation5 + $0xbec] ss:$16 sps:$4 sm:$0xff]  }
 0x1a9   :  { %4991 = vmatpush1.bf16.msra.mxu0 %v8021_v24  ;;  %5483 = vmatpush1.bf16.msra.mxu1 %v8024_v25  ;;  %v8114_v24 = vld [vmem:[#allocation5 + $0xa08] ss:$16 sps:$4 sm:$0xff]   ;;  %v8119_v25 = vld [vmem:[#allocation5 + $0xa24] ss:$16 sps:$4 sm:$0xff]  }
 0x1aa   :  { %4992 = vmatprep.subr.bf16.mxu0 %v8029_v26  ;;  %5484 = vmatprep.subr.bf16.mxu1 %v8032_v27  ;;  %v8122_v26 = vld [vmem:[#allocation5 + $0xa2c] ss:$16 sps:$4 sm:$0xff]   ;;  %v181_v27 = vpack.c.bf16 %v157_v21, %v157_v21  ;;  %v8204_v21 = vld [vmem:[#allocation5 + $0xbe8] ss:$16 sps:$4 sm:$0xff]  }
 0x1ad   :  { %4993 = vmatpush1.bf16.msra.mxu0 %v8027_v28  ;;  %5485 = vmatpush1.bf16.msra.mxu1 %v8030_v29  ;;  %v8117_v28 = vld [vmem:[#allocation5 + $0xa20] ss:$16 sps:$4 sm:$0xff]   ;;  %v8120_v29 = vld [vmem:[#allocation5 + $0xa28] ss:$16 sps:$4 sm:$0xff]  }
 0x1ae   :  { %4994 = vmatprep.subr.bf16.mxu0 %v8035_v30  ;;  %5486 = vmatprep.subr.bf16.mxu1 %v8038_v31  ;;  %v8125_v30 = vld [vmem:[#allocation5 + $0xa44] ss:$16 sps:$4 sm:$0xff]   ;;  %v8128_v31 = vld [vmem:[#allocation5 + $0xa4c] ss:$16 sps:$4 sm:$0xff]  }
 0x1b1   :  { %4995 = vmatpush1.bf16.msra.mxu0 %v8033_v32  ;;  %5487 = vmatpush1.bf16.msra.mxu1 %v8036_v33  ;;  %v8123_v32 = vld [vmem:[#allocation5 + $0xa40] ss:$16 sps:$4 sm:$0xff]   ;;  %v8126_v33 = vld [vmem:[#allocation5 + $0xa48] ss:$16 sps:$4 sm:$0xff]  }
 0x1b2   :  { %4996 = vmatprep.subr.bf16.mxu0 %v8041_v34  ;;  %5488 = vmatprep.subr.bf16.mxu1 %v8044_v35  ;;  %v8131_v34 = vld [vmem:[#allocation5 + $0xa64] ss:$16 sps:$4 sm:$0xff]   ;;  %v8134_v35 = vld [vmem:[#allocation5 + $0xa6c] ss:$16 sps:$4 sm:$0xff]  }
 0x1b5   :  { %4997 = vmatpush1.bf16.msra.mxu0 %v8039_v36  ;;  %5489 = vmatpush1.bf16.msra.mxu1 %v8042_v37  ;;  %v8129_v36 = vld [vmem:[#allocation5 + $0xa60] ss:$16 sps:$4 sm:$0xff]   ;;  %v8132_v37 = vld [vmem:[#allocation5 + $0xa68] ss:$16 sps:$4 sm:$0xff]  }
 0x1b6   :  { %4998 = vmatprep.subr.bf16.mxu0 %v8047_v38  ;;  %5490 = vmatprep.subr.bf16.mxu1 %v8050_v39  ;;  %v8137_v38 = vld [vmem:[#allocation5 + $0xa84] ss:$16 sps:$4 sm:$0xff]   ;;  %v8140_v39 = vld [vmem:[#allocation5 + $0xa8c] ss:$16 sps:$4 sm:$0xff]  }
 0x1b9   :  { %4999 = vmatpush1.bf16.msra.mxu0 %v8045_v40  ;;  %5491 = vmatpush1.bf16.msra.mxu1 %v8048_v41  ;;  %v8135_v40 = vld [vmem:[#allocation5 + $0xa80] ss:$16 sps:$4 sm:$0xff]   ;;  %v8138_v41 = vld [vmem:[#allocation5 + $0xa88] ss:$16 sps:$4 sm:$0xff]  }
 0x1ba   :  { %5000 = vmatprep.subr.bf16.mxu0 %v8053_v42  ;;  %5492 = vmatprep.subr.bf16.mxu1 %v8056_v43  ;;  %v8143_v42 = vld [vmem:[#allocation5 + $0xaa4] ss:$16 sps:$4 sm:$0xff]   ;;  %v8146_v43 = vld [vmem:[#allocation5 + $0xaac] ss:$16 sps:$4 sm:$0xff]  }
 0x1bd   :  { %5001 = vmatpush1.bf16.msra.mxu0 %v8051_v44  ;;  %5493 = vmatpush1.bf16.msra.mxu1 %v8054_v45  ;;  %v8141_v44 = vld [vmem:[#allocation5 + $0xaa0] ss:$16 sps:$4 sm:$0xff]   ;;  %v8144_v45 = vld [vmem:[#allocation5 + $0xaa8] ss:$16 sps:$4 sm:$0xff]  }
 0x1be   :  { %5002 = vmatprep.subr.bf16.mxu0 %v8059_v46  ;;  %5494 = vmatprep.subr.bf16.mxu1 %v8062_v47  ;;  %v8149_v46 = vld [vmem:[#allocation5 + $0xac4] ss:$16 sps:$4 sm:$0xff]   ;;  %v8152_v47 = vld [vmem:[#allocation5 + $0xacc] ss:$16 sps:$4 sm:$0xff]  }
 0x1c1   :  { %5003 = vmatpush1.bf16.msra.mxu0 %v8057_v48  ;;  %5495 = vmatpush1.bf16.msra.mxu1 %v8060_v49  ;;  %v8147_v48 = vld [vmem:[#allocation5 + $0xac0] ss:$16 sps:$4 sm:$0xff]   ;;  %v8150_v49 = vld [vmem:[#allocation5 + $0xac8] ss:$16 sps:$4 sm:$0xff]  }
 0x1c2   :  { %5004 = vmatprep.subr.bf16.mxu0 %v8065_v50  ;;  %5496 = vmatprep.subr.bf16.mxu1 %v8068_v51  ;;  %v8155_v50 = vld [vmem:[#allocation5 + $0xae4] ss:$16 sps:$4 sm:$0xff]   ;;  %v8158_v51 = vld [vmem:[#allocation5 + $0xaec] ss:$16 sps:$4 sm:$0xff]  }
 0x1c5   :  { %5005 = vmatpush1.bf16.msra.mxu0 %v8063_v52  ;;  %5497 = vmatpush1.bf16.msra.mxu1 %v8066_v53  ;;  %v8153_v52 = vld [vmem:[#allocation5 + $0xae0] ss:$16 sps:$4 sm:$0xff]   ;;  %v8156_v53 = vld [vmem:[#allocation5 + $0xae8] ss:$16 sps:$4 sm:$0xff]  }
 0x1c6   :  { %5006 = vmatprep.subr.bf16.mxu0 %v8071_v54  ;;  %5498 = vmatprep.subr.bf16.mxu1 %v8074_v55  ;;  %v8161_v54 = vld [vmem:[#allocation5 + $0xb04] ss:$16 sps:$4 sm:$0xff]   ;;  %v8164_v55 = vld [vmem:[#allocation5 + $0xb0c] ss:$16 sps:$4 sm:$0xff]  }
 0x1c9   :  { %5007 = vmatpush1.bf16.msra.mxu0 %v8069_v56  ;;  %5499 = vmatpush1.bf16.msra.mxu1 %v8072_v57  ;;  %v8159_v56 = vld [vmem:[#allocation5 + $0xb00] ss:$16 sps:$4 sm:$0xff]   ;;  %v8162_v57 = vld [vmem:[#allocation5 + $0xb08] ss:$16 sps:$4 sm:$0xff]  }
 0x1ca   :  { %5008 = vmatprep.subr.bf16.mxu0 %v8077_v58  ;;  %5500 = vmatprep.subr.bf16.mxu1 %v8080_v59  ;;  %v8167_v58 = vld [vmem:[#allocation5 + $0xb24] ss:$16 sps:$4 sm:$0xff]   ;;  %v8170_v59 = vld [vmem:[#allocation5 + $0xb2c] ss:$16 sps:$4 sm:$0xff]  }
 0x1cd   :  { %5009 = vmatpush1.bf16.msra.mxu0 %v8075_v60  ;;  %5501 = vmatpush1.bf16.msra.mxu1 %v8078_v61  ;;  %v8165_v60 = vld [vmem:[#allocation5 + $0xb20] ss:$16 sps:$4 sm:$0xff]   ;;  %v8168_v61 = vld [vmem:[#allocation5 + $0xb28] ss:$16 sps:$4 sm:$0xff]  }
 0x1ce   :  { %5010 = vmatprep.subr.bf16.mxu0 %v8083_v62  ;;  %5502 = vmatprep.subr.bf16.mxu1 %v8086_v63  ;;  %v8173_v62 = vld [vmem:[#allocation5 + $0xb44] ss:$16 sps:$4 sm:$0xff]   ;;  %v8176_v63 = vld [vmem:[#allocation5 + $0xb4c] ss:$16 sps:$4 sm:$0xff]  }
 0x1d1   :  { %5011 = vmatpush1.bf16.msra.mxu0 %v8081_v0  ;;  %5503 = vmatpush1.bf16.msra.mxu1 %v8084_v1  ;;  %v8171_v0 = vld [vmem:[#allocation5 + $0xb40] ss:$16 sps:$4 sm:$0xff]   ;;  %v8174_v1 = vld [vmem:[#allocation5 + $0xb48] ss:$16 sps:$4 sm:$0xff]  }
 0x1d2   :  { %5012 = vmatprep.subr.bf16.mxu0 %v8089_v2  ;;  %5504 = vmatprep.subr.bf16.mxu1 %v8092_v3  ;;  %v8179_v2 = vld [vmem:[#allocation5 + $0xb64] ss:$16 sps:$4 sm:$0xff]   ;;  %v8182_v3 = vld [vmem:[#allocation5 + $0xb6c] ss:$16 sps:$4 sm:$0xff]  }
 0x1d5   :  { %5013 = vmatpush1.bf16.msra.mxu0 %v8087_v4  ;;  %5505 = vmatpush1.bf16.msra.mxu1 %v8090_v5  ;;  %v8177_v4 = vld [vmem:[#allocation5 + $0xb60] ss:$16 sps:$4 sm:$0xff]   ;;  %v8180_v5 = vld [vmem:[#allocation5 + $0xb68] ss:$16 sps:$4 sm:$0xff]  }
 0x1d6   :  { %5014 = vmatprep.subr.bf16.mxu0 %v8095_v6  ;;  %5506 = vmatprep.subr.bf16.mxu1 %v8098_v7  ;;  %v8185_v6 = vld [vmem:[#allocation5 + $0xb84] ss:$16 sps:$4 sm:$0xff]   ;;  %v8188_v7 = vld [vmem:[#allocation5 + $0xb8c] ss:$16 sps:$4 sm:$0xff]  }
 0x1d9   :  { %5015 = vmatpush1.bf16.msra.mxu0 %v8093_v8  ;;  %5507 = vmatpush1.bf16.msra.mxu1 %v8096_v9  ;;  %v8183_v8 = vld [vmem:[#allocation5 + $0xb80] ss:$16 sps:$4 sm:$0xff]   ;;  %v8186_v9 = vld [vmem:[#allocation5 + $0xb88] ss:$16 sps:$4 sm:$0xff]  }
 0x1da   :  { %5016 = vmatprep.subr.bf16.mxu0 %v8101_v10  ;;  %5508 = vmatprep.subr.bf16.mxu1 %v8104_v11  ;;  %v8191_v10 = vld [vmem:[#allocation5 + $0xba4] ss:$16 sps:$4 sm:$0xff]   ;;  %v8194_v11 = vld [vmem:[#allocation5 + $0xbac] ss:$16 sps:$4 sm:$0xff]  }
 0x1dd   :  { %5017 = vmatpush1.bf16.msra.mxu0 %v8099_v12  ;;  %5509 = vmatpush1.bf16.msra.mxu1 %v8102_v13  ;;  %v8189_v12 = vld [vmem:[#allocation5 + $0xba0] ss:$16 sps:$4 sm:$0xff]   ;;  %v8192_v13 = vld [vmem:[#allocation5 + $0xba8] ss:$16 sps:$4 sm:$0xff]  }
 0x1de   :  { %5018 = vmatprep.subr.bf16.mxu0 %v8107_v14  ;;  %5510 = vmatprep.subr.bf16.mxu1 %v8110_v15  ;;  %v8197_v14 = vld [vmem:[#allocation5 + $0xbc4] ss:$16 sps:$4 sm:$0xff]   ;;  %v8200_v15 = vld [vmem:[#allocation5 + $0xbcc] ss:$16 sps:$4 sm:$0xff]  }
 0x1e1   :  { %5019 = vmatpush1.bf16.msra.mxu0 %v8105_v16  ;;  %5511 = vmatpush1.bf16.msra.mxu1 %v8108_v17  ;;  %v8195_v16 = vld [vmem:[#allocation5 + $0xbc0] ss:$16 sps:$4 sm:$0xff]   ;;  %v8198_v17 = vld [vmem:[#allocation5 + $0xbc8] ss:$16 sps:$4 sm:$0xff]  }
 0x1e2   :  { %5029 = vmatprep.subr.bf16.mxu0 %v8113_v18  ;;  %5521 = vmatprep.subr.bf16.mxu1 %v8116_v20  ;;  %v8203_v18 = vld [vmem:[#allocation5 + $0xbe4] ss:$16 sps:$4 sm:$0xff]   ;;  %v8201_v20 = vld [vmem:[#allocation5 + $0xbe0] ss:$16 sps:$4 sm:$0xff]  }
 0x1e4   :  { %5021 = vmatmul.mubr.bf16.vlgmr.msra.gmra.mrb[0].mxu0 %v178_v22  ;;  %5513 = vmatmul.mubr.bf16.vlgmr.msra.gmra.mrb[0].mxu1 %v178_v22  ;;  %v8209_v22 = vld [vmem:[#allocation5 + $0xc04] ss:$16 sps:$4 sm:$0xff]  }
 0x1e5   :  { %5030 = vmatpush1.bf16.msra.mxu0 %v8111_v23  ;;  %5522 = vmatpush1.bf16.msra.mxu1 %v8114_v24  ;;  %v156_v23 = vld [vmem:[#allocation2 + $0x50] sm:$0xff]  ;;  %v8212_v24 = vld [vmem:[#allocation5 + $0xc0c] ss:$16 sps:$4 sm:$0xff]  }
 0x1e6   :  { %5031 = vmatprep.subr.bf16.mxu0 %v8119_v25  ;;  %5523 = vmatprep.subr.bf16.mxu1 %v8122_v26  ;;  %v159_v25 = vld [vmem:[#allocation2 + $0x68] sm:$0xff]  ;;  %v180_v26 = vpack.c.bf16 %v156_v23, %v156_v23 }
 0x1e7   :  { %5061 = vmatprep.mubr.bf16.mxu0 %v181_v27  ;;  %5553 = vmatprep.mubr.bf16.mxu1 %v181_v27  ;;  %v8207_v27 = vld [vmem:[#allocation5 + $0xc00] ss:$16 sps:$4 sm:$0xff]   ;;  %v8302_v23 = vld [vmem:[#allocation5 + $0xdec] ss:$16 sps:$4 sm:$0xff]  }
 0x1e9   :  { %5032 = vmatpush1.bf16.msra.mxu0 %v8117_v28  ;;  %5524 = vmatpush1.bf16.msra.mxu1 %v8120_v29  ;;  %v8210_v28 = vld [vmem:[#allocation5 + $0xc08] ss:$16 sps:$4 sm:$0xff]   ;;  %v8215_v29 = vld [vmem:[#allocation5 + $0xc24] ss:$16 sps:$4 sm:$0xff]  }
 0x1ea   :  { %5033 = vmatprep.subr.bf16.mxu0 %v8125_v30  ;;  %5525 = vmatprep.subr.bf16.mxu1 %v8128_v31  ;;  %v8218_v30 = vld [vmem:[#allocation5 + $0xc2c] ss:$16 sps:$4 sm:$0xff]   ;;  %v183_v31 = vpack.c.bf16 %v159_v25, %v159_v25  ;;  %v8300_v25 = vld [vmem:[#allocation5 + $0xde8] ss:$16 sps:$4 sm:$0xff]  }
 0x1ed   :  { %5034 = vmatpush1.bf16.msra.mxu0 %v8123_v32  ;;  %5526 = vmatpush1.bf16.msra.mxu1 %v8126_v33  ;;  %v8213_v32 = vld [vmem:[#allocation5 + $0xc20] ss:$16 sps:$4 sm:$0xff]   ;;  %v8216_v33 = vld [vmem:[#allocation5 + $0xc28] ss:$16 sps:$4 sm:$0xff]  }
 0x1ee   :  { %5035 = vmatprep.subr.bf16.mxu0 %v8131_v34  ;;  %5527 = vmatprep.subr.bf16.mxu1 %v8134_v35  ;;  %v8221_v34 = vld [vmem:[#allocation5 + $0xc44] ss:$16 sps:$4 sm:$0xff]   ;;  %v8224_v35 = vld [vmem:[#allocation5 + $0xc4c] ss:$16 sps:$4 sm:$0xff]  }
 0x1f1   :  { %5036 = vmatpush1.bf16.msra.mxu0 %v8129_v36  ;;  %5528 = vmatpush1.bf16.msra.mxu1 %v8132_v37  ;;  %v8219_v36 = vld [vmem:[#allocation5 + $0xc40] ss:$16 sps:$4 sm:$0xff]   ;;  %v8222_v37 = vld [vmem:[#allocation5 + $0xc48] ss:$16 sps:$4 sm:$0xff]  }
 0x1f2   :  { %5037 = vmatprep.subr.bf16.mxu0 %v8137_v38  ;;  %5529 = vmatprep.subr.bf16.mxu1 %v8140_v39  ;;  %v8227_v38 = vld [vmem:[#allocation5 + $0xc64] ss:$16 sps:$4 sm:$0xff]   ;;  %v8230_v39 = vld [vmem:[#allocation5 + $0xc6c] ss:$16 sps:$4 sm:$0xff]  }
 0x1f5   :  { %5038 = vmatpush1.bf16.msra.mxu0 %v8135_v40  ;;  %5530 = vmatpush1.bf16.msra.mxu1 %v8138_v41  ;;  %v8225_v40 = vld [vmem:[#allocation5 + $0xc60] ss:$16 sps:$4 sm:$0xff]   ;;  %v8228_v41 = vld [vmem:[#allocation5 + $0xc68] ss:$16 sps:$4 sm:$0xff]  }
 0x1f6   :  { %5039 = vmatprep.subr.bf16.mxu0 %v8143_v42  ;;  %5531 = vmatprep.subr.bf16.mxu1 %v8146_v43  ;;  %v8233_v42 = vld [vmem:[#allocation5 + $0xc84] ss:$16 sps:$4 sm:$0xff]   ;;  %v8236_v43 = vld [vmem:[#allocation5 + $0xc8c] ss:$16 sps:$4 sm:$0xff]  }
 0x1f9   :  { %5040 = vmatpush1.bf16.msra.mxu0 %v8141_v44  ;;  %5532 = vmatpush1.bf16.msra.mxu1 %v8144_v45  ;;  %v8231_v44 = vld [vmem:[#allocation5 + $0xc80] ss:$16 sps:$4 sm:$0xff]   ;;  %v8234_v45 = vld [vmem:[#allocation5 + $0xc88] ss:$16 sps:$4 sm:$0xff]  }
 0x1fa   :  { %5041 = vmatprep.subr.bf16.mxu0 %v8149_v46  ;;  %5533 = vmatprep.subr.bf16.mxu1 %v8152_v47  ;;  %v8239_v46 = vld [vmem:[#allocation5 + $0xca4] ss:$16 sps:$4 sm:$0xff]   ;;  %v8242_v47 = vld [vmem:[#allocation5 + $0xcac] ss:$16 sps:$4 sm:$0xff]  }
 0x1fd   :  { %5042 = vmatpush1.bf16.msra.mxu0 %v8147_v48  ;;  %5534 = vmatpush1.bf16.msra.mxu1 %v8150_v49  ;;  %v8237_v48 = vld [vmem:[#allocation5 + $0xca0] ss:$16 sps:$4 sm:$0xff]   ;;  %v8240_v49 = vld [vmem:[#allocation5 + $0xca8] ss:$16 sps:$4 sm:$0xff]  }
 0x1fe   :  { %5043 = vmatprep.subr.bf16.mxu0 %v8155_v50  ;;  %5535 = vmatprep.subr.bf16.mxu1 %v8158_v51  ;;  %v8245_v50 = vld [vmem:[#allocation5 + $0xcc4] ss:$16 sps:$4 sm:$0xff]   ;;  %v8248_v51 = vld [vmem:[#allocation5 + $0xccc] ss:$16 sps:$4 sm:$0xff]  }
 0x201   :  { %5044 = vmatpush1.bf16.msra.mxu0 %v8153_v52  ;;  %5536 = vmatpush1.bf16.msra.mxu1 %v8156_v53  ;;  %v8243_v52 = vld [vmem:[#allocation5 + $0xcc0] ss:$16 sps:$4 sm:$0xff]   ;;  %v8246_v53 = vld [vmem:[#allocation5 + $0xcc8] ss:$16 sps:$4 sm:$0xff]  }
 0x202   :  { %5045 = vmatprep.subr.bf16.mxu0 %v8161_v54  ;;  %5537 = vmatprep.subr.bf16.mxu1 %v8164_v55  ;;  %v8251_v54 = vld [vmem:[#allocation5 + $0xce4] ss:$16 sps:$4 sm:$0xff]   ;;  %v8254_v55 = vld [vmem:[#allocation5 + $0xcec] ss:$16 sps:$4 sm:$0xff]  }
 0x205   :  { %5046 = vmatpush1.bf16.msra.mxu0 %v8159_v56  ;;  %5538 = vmatpush1.bf16.msra.mxu1 %v8162_v57  ;;  %v8249_v56 = vld [vmem:[#allocation5 + $0xce0] ss:$16 sps:$4 sm:$0xff]   ;;  %v8252_v57 = vld [vmem:[#allocation5 + $0xce8] ss:$16 sps:$4 sm:$0xff]  }
 0x206   :  { %5047 = vmatprep.subr.bf16.mxu0 %v8167_v58  ;;  %5539 = vmatprep.subr.bf16.mxu1 %v8170_v59  ;;  %v8257_v58 = vld [vmem:[#allocation5 + $0xd04] ss:$16 sps:$4 sm:$0xff]   ;;  %v8260_v59 = vld [vmem:[#allocation5 + $0xd0c] ss:$16 sps:$4 sm:$0xff]  }
 0x209   :  { %5048 = vmatpush1.bf16.msra.mxu0 %v8165_v60  ;;  %5540 = vmatpush1.bf16.msra.mxu1 %v8168_v61  ;;  %v8255_v60 = vld [vmem:[#allocation5 + $0xd00] ss:$16 sps:$4 sm:$0xff]   ;;  %v8258_v61 = vld [vmem:[#allocation5 + $0xd08] ss:$16 sps:$4 sm:$0xff]  }
 0x20a   :  { %5049 = vmatprep.subr.bf16.mxu0 %v8173_v62  ;;  %5541 = vmatprep.subr.bf16.mxu1 %v8176_v63  ;;  %v8263_v62 = vld [vmem:[#allocation5 + $0xd24] ss:$16 sps:$4 sm:$0xff]   ;;  %v8266_v63 = vld [vmem:[#allocation5 + $0xd2c] ss:$16 sps:$4 sm:$0xff]  }
 0x20d   :  { %5050 = vmatpush1.bf16.msra.mxu0 %v8171_v0  ;;  %5542 = vmatpush1.bf16.msra.mxu1 %v8174_v1  ;;  %v8261_v0 = vld [vmem:[#allocation5 + $0xd20] ss:$16 sps:$4 sm:$0xff]   ;;  %v8264_v1 = vld [vmem:[#allocation5 + $0xd28] ss:$16 sps:$4 sm:$0xff]  }
 0x20e   :  { %5051 = vmatprep.subr.bf16.mxu0 %v8179_v2  ;;  %5543 = vmatprep.subr.bf16.mxu1 %v8182_v3  ;;  %v8269_v2 = vld [vmem:[#allocation5 + $0xd44] ss:$16 sps:$4 sm:$0xff]   ;;  %v8272_v3 = vld [vmem:[#allocation5 + $0xd4c] ss:$16 sps:$4 sm:$0xff]  }
 0x211   :  { %5052 = vmatpush1.bf16.msra.mxu0 %v8177_v4  ;;  %5544 = vmatpush1.bf16.msra.mxu1 %v8180_v5  ;;  %v8267_v4 = vld [vmem:[#allocation5 + $0xd40] ss:$16 sps:$4 sm:$0xff]   ;;  %v8270_v5 = vld [vmem:[#allocation5 + $0xd48] ss:$16 sps:$4 sm:$0xff]  }
 0x212   :  { %5053 = vmatprep.subr.bf16.mxu0 %v8185_v6  ;;  %5545 = vmatprep.subr.bf16.mxu1 %v8188_v7  ;;  %v8275_v6 = vld [vmem:[#allocation5 + $0xd64] ss:$16 sps:$4 sm:$0xff]   ;;  %v8278_v7 = vld [vmem:[#allocation5 + $0xd6c] ss:$16 sps:$4 sm:$0xff]  }
 0x215   :  { %5054 = vmatpush1.bf16.msra.mxu0 %v8183_v8  ;;  %5546 = vmatpush1.bf16.msra.mxu1 %v8186_v9  ;;  %v8273_v8 = vld [vmem:[#allocation5 + $0xd60] ss:$16 sps:$4 sm:$0xff]   ;;  %v8276_v9 = vld [vmem:[#allocation5 + $0xd68] ss:$16 sps:$4 sm:$0xff]  }
 0x216   :  { %5055 = vmatprep.subr.bf16.mxu0 %v8191_v10  ;;  %5547 = vmatprep.subr.bf16.mxu1 %v8194_v11  ;;  %v8281_v10 = vld [vmem:[#allocation5 + $0xd84] ss:$16 sps:$4 sm:$0xff]   ;;  %v8284_v11 = vld [vmem:[#allocation5 + $0xd8c] ss:$16 sps:$4 sm:$0xff]  }
 0x219   :  { %5056 = vmatpush1.bf16.msra.mxu0 %v8189_v12  ;;  %5548 = vmatpush1.bf16.msra.mxu1 %v8192_v13  ;;  %v8279_v12 = vld [vmem:[#allocation5 + $0xd80] ss:$16 sps:$4 sm:$0xff]   ;;  %v8282_v13 = vld [vmem:[#allocation5 + $0xd88] ss:$16 sps:$4 sm:$0xff]  }
 0x21a   :  { %5057 = vmatprep.subr.bf16.mxu0 %v8197_v14  ;;  %5549 = vmatprep.subr.bf16.mxu1 %v8200_v15  ;;  %v8287_v14 = vld [vmem:[#allocation5 + $0xda4] ss:$16 sps:$4 sm:$0xff]   ;;  %v8290_v15 = vld [vmem:[#allocation5 + $0xdac] ss:$16 sps:$4 sm:$0xff]  }
 0x21d   :  { %5058 = vmatpush1.bf16.msra.mxu0 %v8195_v16  ;;  %5550 = vmatpush1.bf16.msra.mxu1 %v8198_v17  ;;  %v8285_v16 = vld [vmem:[#allocation5 + $0xda0] ss:$16 sps:$4 sm:$0xff]   ;;  %v8288_v17 = vld [vmem:[#allocation5 + $0xda8] ss:$16 sps:$4 sm:$0xff]  }
 0x21e   :  { %5059 = vmatprep.subr.bf16.mxu0 %v8203_v18  ;;  %5551 = vmatprep.subr.bf16.mxu1 %v8206_v19  ;;  %v8293_v18 = vld [vmem:[#allocation5 + $0xdc4] ss:$16 sps:$4 sm:$0xff]   ;;  %v8296_v19 = vld [vmem:[#allocation5 + $0xdcc] ss:$16 sps:$4 sm:$0xff]  }
 0x221   :  { %5060 = vmatpush1.bf16.msra.mxu0 %v8201_v20  ;;  %5552 = vmatpush1.bf16.msra.mxu1 %v8204_v21  ;;  %v8291_v20 = vld [vmem:[#allocation5 + $0xdc0] ss:$16 sps:$4 sm:$0xff]   ;;  %v8294_v21 = vld [vmem:[#allocation5 + $0xdc8] ss:$16 sps:$4 sm:$0xff]  }
 0x222   :  { %5070 = vmatprep.subr.bf16.mxu0 %v8209_v22  ;;  %5562 = vmatprep.subr.bf16.mxu1 %v8212_v24  ;;  %v8299_v22 = vld [vmem:[#allocation5 + $0xde4] ss:$16 sps:$4 sm:$0xff]   ;;  %v8297_v24 = vld [vmem:[#allocation5 + $0xde0] ss:$16 sps:$4 sm:$0xff]  }
 0x224   :  { %5062 = vmatmul.mubr.bf16.vlgmr.msra.gmra.mrb[0].mxu0 %v180_v26  ;;  %5554 = vmatmul.mubr.bf16.vlgmr.msra.gmra.mrb[0].mxu1 %v180_v26  ;;  %v8305_v26 = vld [vmem:[#allocation5 + $0xe04] ss:$16 sps:$4 sm:$0xff]  }
 0x225   :  { %5071 = vmatpush1.bf16.msra.mxu0 %v8207_v27  ;;  %5563 = vmatpush1.bf16.msra.mxu1 %v8210_v28  ;;  %v158_v27 = vld [vmem:[#allocation2 + $0x60] sm:$0xff]  ;;  %v8308_v28 = vld [vmem:[#allocation5 + $0xe0c] ss:$16 sps:$4 sm:$0xff]  }
 0x226   :  { %5072 = vmatprep.subr.bf16.mxu0 %v8215_v29  ;;  %5564 = vmatprep.subr.bf16.mxu1 %v8218_v30  ;;  %v161_v29 = vld [vmem:[#allocation2 + $0x78] sm:$0xff]  ;;  %v182_v30 = vpack.c.bf16 %v158_v27, %v158_v27 }
 0x227   :  { %5102 = vmatprep.mubr.bf16.mxu0 %v183_v31  ;;  %5594 = vmatprep.mubr.bf16.mxu1 %v183_v31  ;;  %v8303_v31 = vld [vmem:[#allocation5 + $0xe00] ss:$16 sps:$4 sm:$0xff]   ;;  %v8398_v27 = vld [vmem:[#allocation5 + $0xfec] ss:$16 sps:$4 sm:$0xff]  }
 0x229   :  { %5073 = vmatpush1.bf16.msra.mxu0 %v8213_v32  ;;  %5565 = vmatpush1.bf16.msra.mxu1 %v8216_v33  ;;  %v8306_v32 = vld [vmem:[#allocation5 + $0xe08] ss:$16 sps:$4 sm:$0xff]   ;;  %v8311_v33 = vld [vmem:[#allocation5 + $0xe24] ss:$16 sps:$4 sm:$0xff]  }
 0x22a   :  { %5074 = vmatprep.subr.bf16.mxu0 %v8221_v34  ;;  %5566 = vmatprep.subr.bf16.mxu1 %v8224_v35  ;;  %v8314_v34 = vld [vmem:[#allocation5 + $0xe2c] ss:$16 sps:$4 sm:$0xff]   ;;  %v185_v35 = vpack.c.bf16 %v161_v29, %v161_v29  ;;  %v8396_v29 = vld [vmem:[#allocation5 + $0xfe8] ss:$16 sps:$4 sm:$0xff]  }
 0x22d   :  { %5075 = vmatpush1.bf16.msra.mxu0 %v8219_v36  ;;  %5567 = vmatpush1.bf16.msra.mxu1 %v8222_v37  ;;  %v8309_v36 = vld [vmem:[#allocation5 + $0xe20] ss:$16 sps:$4 sm:$0xff]   ;;  %v8312_v37 = vld [vmem:[#allocation5 + $0xe28] ss:$16 sps:$4 sm:$0xff]  }
 0x22e   :  { %5076 = vmatprep.subr.bf16.mxu0 %v8227_v38  ;;  %5568 = vmatprep.subr.bf16.mxu1 %v8230_v39  ;;  %v8317_v38 = vld [vmem:[#allocation5 + $0xe44] ss:$16 sps:$4 sm:$0xff]   ;;  %v8320_v39 = vld [vmem:[#allocation5 + $0xe4c] ss:$16 sps:$4 sm:$0xff]  }
 0x231   :  { %5077 = vmatpush1.bf16.msra.mxu0 %v8225_v40  ;;  %5569 = vmatpush1.bf16.msra.mxu1 %v8228_v41  ;;  %v8315_v40 = vld [vmem:[#allocation5 + $0xe40] ss:$16 sps:$4 sm:$0xff]   ;;  %v8318_v41 = vld [vmem:[#allocation5 + $0xe48] ss:$16 sps:$4 sm:$0xff]  }
 0x232   :  { %5078 = vmatprep.subr.bf16.mxu0 %v8233_v42  ;;  %5570 = vmatprep.subr.bf16.mxu1 %v8236_v43  ;;  %v8323_v42 = vld [vmem:[#allocation5 + $0xe64] ss:$16 sps:$4 sm:$0xff]   ;;  %v8326_v43 = vld [vmem:[#allocation5 + $0xe6c] ss:$16 sps:$4 sm:$0xff]  }
 0x235   :  { %5079 = vmatpush1.bf16.msra.mxu0 %v8231_v44  ;;  %5571 = vmatpush1.bf16.msra.mxu1 %v8234_v45  ;;  %v8321_v44 = vld [vmem:[#allocation5 + $0xe60] ss:$16 sps:$4 sm:$0xff]   ;;  %v8324_v45 = vld [vmem:[#allocation5 + $0xe68] ss:$16 sps:$4 sm:$0xff]  }
 0x236   :  { %5080 = vmatprep.subr.bf16.mxu0 %v8239_v46  ;;  %5572 = vmatprep.subr.bf16.mxu1 %v8242_v47  ;;  %v8329_v46 = vld [vmem:[#allocation5 + $0xe84] ss:$16 sps:$4 sm:$0xff]   ;;  %v8332_v47 = vld [vmem:[#allocation5 + $0xe8c] ss:$16 sps:$4 sm:$0xff]  }
 0x239   :  { %5081 = vmatpush1.bf16.msra.mxu0 %v8237_v48  ;;  %5573 = vmatpush1.bf16.msra.mxu1 %v8240_v49  ;;  %v8327_v48 = vld [vmem:[#allocation5 + $0xe80] ss:$16 sps:$4 sm:$0xff]   ;;  %v8330_v49 = vld [vmem:[#allocation5 + $0xe88] ss:$16 sps:$4 sm:$0xff]  }
 0x23a   :  { %5082 = vmatprep.subr.bf16.mxu0 %v8245_v50  ;;  %5574 = vmatprep.subr.bf16.mxu1 %v8248_v51  ;;  %v8335_v50 = vld [vmem:[#allocation5 + $0xea4] ss:$16 sps:$4 sm:$0xff]   ;;  %v8338_v51 = vld [vmem:[#allocation5 + $0xeac] ss:$16 sps:$4 sm:$0xff]  }
 0x23d   :  { %5083 = vmatpush1.bf16.msra.mxu0 %v8243_v52  ;;  %5575 = vmatpush1.bf16.msra.mxu1 %v8246_v53  ;;  %v8333_v52 = vld [vmem:[#allocation5 + $0xea0] ss:$16 sps:$4 sm:$0xff]   ;;  %v8336_v53 = vld [vmem:[#allocation5 + $0xea8] ss:$16 sps:$4 sm:$0xff]  }
 0x23e   :  { %5084 = vmatprep.subr.bf16.mxu0 %v8251_v54  ;;  %5576 = vmatprep.subr.bf16.mxu1 %v8254_v55  ;;  %v8341_v54 = vld [vmem:[#allocation5 + $0xec4] ss:$16 sps:$4 sm:$0xff]   ;;  %v8344_v55 = vld [vmem:[#allocation5 + $0xecc] ss:$16 sps:$4 sm:$0xff]  }
 0x241   :  { %5085 = vmatpush1.bf16.msra.mxu0 %v8249_v56  ;;  %5577 = vmatpush1.bf16.msra.mxu1 %v8252_v57  ;;  %v8339_v56 = vld [vmem:[#allocation5 + $0xec0] ss:$16 sps:$4 sm:$0xff]   ;;  %v8342_v57 = vld [vmem:[#allocation5 + $0xec8] ss:$16 sps:$4 sm:$0xff]  }
 0x242   :  { %5086 = vmatprep.subr.bf16.mxu0 %v8257_v58  ;;  %5578 = vmatprep.subr.bf16.mxu1 %v8260_v59  ;;  %v8347_v58 = vld [vmem:[#allocation5 + $0xee4] ss:$16 sps:$4 sm:$0xff]   ;;  %v8350_v59 = vld [vmem:[#allocation5 + $0xeec] ss:$16 sps:$4 sm:$0xff]  }
 0x245   :  { %5087 = vmatpush1.bf16.msra.mxu0 %v8255_v60  ;;  %5579 = vmatpush1.bf16.msra.mxu1 %v8258_v61  ;;  %v8345_v60 = vld [vmem:[#allocation5 + $0xee0] ss:$16 sps:$4 sm:$0xff]   ;;  %v8348_v61 = vld [vmem:[#allocation5 + $0xee8] ss:$16 sps:$4 sm:$0xff]  }
 0x246   :  { %5088 = vmatprep.subr.bf16.mxu0 %v8263_v62  ;;  %5580 = vmatprep.subr.bf16.mxu1 %v8266_v63  ;;  %v8353_v62 = vld [vmem:[#allocation5 + $0xf04] ss:$16 sps:$4 sm:$0xff]   ;;  %v8356_v63 = vld [vmem:[#allocation5 + $0xf0c] ss:$16 sps:$4 sm:$0xff]  }
 0x249   :  { %5089 = vmatpush1.bf16.msra.mxu0 %v8261_v0  ;;  %5581 = vmatpush1.bf16.msra.mxu1 %v8264_v1  ;;  %v8351_v0 = vld [vmem:[#allocation5 + $0xf00] ss:$16 sps:$4 sm:$0xff]   ;;  %v8354_v1 = vld [vmem:[#allocation5 + $0xf08] ss:$16 sps:$4 sm:$0xff]  }
 0x24a   :  { %5090 = vmatprep.subr.bf16.mxu0 %v8269_v2  ;;  %5582 = vmatprep.subr.bf16.mxu1 %v8272_v3  ;;  %v8359_v2 = vld [vmem:[#allocation5 + $0xf24] ss:$16 sps:$4 sm:$0xff]   ;;  %v8362_v3 = vld [vmem:[#allocation5 + $0xf2c] ss:$16 sps:$4 sm:$0xff]  }
 0x24d   :  { %5091 = vmatpush1.bf16.msra.mxu0 %v8267_v4  ;;  %5583 = vmatpush1.bf16.msra.mxu1 %v8270_v5  ;;  %v8357_v4 = vld [vmem:[#allocation5 + $0xf20] ss:$16 sps:$4 sm:$0xff]   ;;  %v8360_v5 = vld [vmem:[#allocation5 + $0xf28] ss:$16 sps:$4 sm:$0xff]  }
 0x24e   :  { %5092 = vmatprep.subr.bf16.mxu0 %v8275_v6  ;;  %5584 = vmatprep.subr.bf16.mxu1 %v8278_v7  ;;  %v8365_v6 = vld [vmem:[#allocation5 + $0xf44] ss:$16 sps:$4 sm:$0xff]   ;;  %v8368_v7 = vld [vmem:[#allocation5 + $0xf4c] ss:$16 sps:$4 sm:$0xff]  }
 0x251   :  { %5093 = vmatpush1.bf16.msra.mxu0 %v8273_v8  ;;  %5585 = vmatpush1.bf16.msra.mxu1 %v8276_v9  ;;  %v8363_v8 = vld [vmem:[#allocation5 + $0xf40] ss:$16 sps:$4 sm:$0xff]   ;;  %v8366_v9 = vld [vmem:[#allocation5 + $0xf48] ss:$16 sps:$4 sm:$0xff]  }
 0x252   :  { %5094 = vmatprep.subr.bf16.mxu0 %v8281_v10  ;;  %5586 = vmatprep.subr.bf16.mxu1 %v8284_v11  ;;  %v8371_v10 = vld [vmem:[#allocation5 + $0xf64] ss:$16 sps:$4 sm:$0xff]   ;;  %v8374_v11 = vld [vmem:[#allocation5 + $0xf6c] ss:$16 sps:$4 sm:$0xff]  }
 0x255   :  { %5095 = vmatpush1.bf16.msra.mxu0 %v8279_v12  ;;  %5587 = vmatpush1.bf16.msra.mxu1 %v8282_v13  ;;  %v8369_v12 = vld [vmem:[#allocation5 + $0xf60] ss:$16 sps:$4 sm:$0xff]   ;;  %v8372_v13 = vld [vmem:[#allocation5 + $0xf68] ss:$16 sps:$4 sm:$0xff]  }
 0x256   :  { %5096 = vmatprep.subr.bf16.mxu0 %v8287_v14  ;;  %5588 = vmatprep.subr.bf16.mxu1 %v8290_v15  ;;  %v8377_v14 = vld [vmem:[#allocation5 + $0xf84] ss:$16 sps:$4 sm:$0xff]   ;;  %v8380_v15 = vld [vmem:[#allocation5 + $0xf8c] ss:$16 sps:$4 sm:$0xff]  }
 0x259   :  { %5097 = vmatpush1.bf16.msra.mxu0 %v8285_v16  ;;  %5589 = vmatpush1.bf16.msra.mxu1 %v8288_v17  ;;  %v8375_v16 = vld [vmem:[#allocation5 + $0xf80] ss:$16 sps:$4 sm:$0xff]   ;;  %v8378_v17 = vld [vmem:[#allocation5 + $0xf88] ss:$16 sps:$4 sm:$0xff]  }
 0x25a   :  { %5098 = vmatprep.subr.bf16.mxu0 %v8293_v18  ;;  %5590 = vmatprep.subr.bf16.mxu1 %v8296_v19  ;;  %v8383_v18 = vld [vmem:[#allocation5 + $0xfa4] ss:$16 sps:$4 sm:$0xff]   ;;  %v8386_v19 = vld [vmem:[#allocation5 + $0xfac] ss:$16 sps:$4 sm:$0xff]  }
 0x25d   :  { %5099 = vmatpush1.bf16.msra.mxu0 %v8291_v20  ;;  %5591 = vmatpush1.bf16.msra.mxu1 %v8294_v21  ;;  %v8381_v20 = vld [vmem:[#allocation5 + $0xfa0] ss:$16 sps:$4 sm:$0xff]   ;;  %v8384_v21 = vld [vmem:[#allocation5 + $0xfa8] ss:$16 sps:$4 sm:$0xff]  }
 0x25e   :  { %5100 = vmatprep.subr.bf16.mxu0 %v8299_v22  ;;  %5592 = vmatprep.subr.bf16.mxu1 %v8302_v23  ;;  %v8389_v22 = vld [vmem:[#allocation5 + $0xfc4] ss:$16 sps:$4 sm:$0xff]   ;;  %v8392_v23 = vld [vmem:[#allocation5 + $0xfcc] ss:$16 sps:$4 sm:$0xff]  }
 0x261   :  { %5101 = vmatpush1.bf16.msra.mxu0 %v8297_v24  ;;  %5593 = vmatpush1.bf16.msra.mxu1 %v8300_v25  ;;  %v8387_v24 = vld [vmem:[#allocation5 + $0xfc0] ss:$16 sps:$4 sm:$0xff]   ;;  %v8390_v25 = vld [vmem:[#allocation5 + $0xfc8] ss:$16 sps:$4 sm:$0xff]  }
 0x262   :  { %5111 = vmatprep.subr.bf16.mxu0 %v8305_v26  ;;  %5603 = vmatprep.subr.bf16.mxu1 %v8308_v28  ;;  %v8395_v26 = vld [vmem:[#allocation5 + $0xfe4] ss:$16 sps:$4 sm:$0xff]   ;;  %v8393_v28 = vld [vmem:[#allocation5 + $0xfe0] ss:$16 sps:$4 sm:$0xff]  }
 0x264   :  { %5103 = vmatmul.mubr.bf16.vlgmr.msra.gmra.mrb[0].mxu0 %v182_v30  ;;  %5595 = vmatmul.mubr.bf16.vlgmr.msra.gmra.mrb[0].mxu1 %v182_v30  ;;  %v8401_v30 = vld [vmem:[#allocation5 + $0x1004] ss:$16 sps:$4 sm:$0xff]  }
 0x265   :  { %5112 = vmatpush1.bf16.msra.mxu0 %v8303_v31  ;;  %5604 = vmatpush1.bf16.msra.mxu1 %v8306_v32  ;;  %v160_v31 = vld [vmem:[#allocation2 + $0x70] sm:$0xff]  ;;  %v8404_v32 = vld [vmem:[#allocation5 + $0x100c] ss:$16 sps:$4 sm:$0xff]  }
 0x266   :  { %5113 = vmatprep.subr.bf16.mxu0 %v8311_v33  ;;  %5605 = vmatprep.subr.bf16.mxu1 %v8314_v34  ;;  %v163_v33 = vld [vmem:[#allocation2 + $0x88] sm:$0xff]  ;;  %v184_v34 = vpack.c.bf16 %v160_v31, %v160_v31 }
 0x267   :  { %5143 = vmatprep.mubr.bf16.mxu0 %v185_v35  ;;  %5635 = vmatprep.mubr.bf16.mxu1 %v185_v35  ;;  %v8399_v35 = vld [vmem:[#allocation5 + $0x1000] ss:$16 sps:$4 sm:$0xff]   ;;  %v8494_v31 = vld [vmem:[#allocation5 + $0x11ec] ss:$16 sps:$4 sm:$0xff]  }
 0x269   :  { %5114 = vmatpush1.bf16.msra.mxu0 %v8309_v36  ;;  %5606 = vmatpush1.bf16.msra.mxu1 %v8312_v37  ;;  %v8402_v36 = vld [vmem:[#allocation5 + $0x1008] ss:$16 sps:$4 sm:$0xff]   ;;  %v8407_v37 = vld [vmem:[#allocation5 + $0x1024] ss:$16 sps:$4 sm:$0xff]  }
 0x26a   :  { %5115 = vmatprep.subr.bf16.mxu0 %v8317_v38  ;;  %5607 = vmatprep.subr.bf16.mxu1 %v8320_v39  ;;  %v8410_v38 = vld [vmem:[#allocation5 + $0x102c] ss:$16 sps:$4 sm:$0xff]   ;;  %v187_v39 = vpack.c.bf16 %v163_v33, %v163_v33  ;;  %v8492_v33 = vld [vmem:[#allocation5 + $0x11e8] ss:$16 sps:$4 sm:$0xff]  }
 0x26d   :  { %5116 = vmatpush1.bf16.msra.mxu0 %v8315_v40  ;;  %5608 = vmatpush1.bf16.msra.mxu1 %v8318_v41  ;;  %v8405_v40 = vld [vmem:[#allocation5 + $0x1020] ss:$16 sps:$4 sm:$0xff]   ;;  %v8408_v41 = vld [vmem:[#allocation5 + $0x1028] ss:$16 sps:$4 sm:$0xff]  }
 0x26e   :  { %5117 = vmatprep.subr.bf16.mxu0 %v8323_v42  ;;  %5609 = vmatprep.subr.bf16.mxu1 %v8326_v43  ;;  %v8413_v42 = vld [vmem:[#allocation5 + $0x1044] ss:$16 sps:$4 sm:$0xff]   ;;  %v8416_v43 = vld [vmem:[#allocation5 + $0x104c] ss:$16 sps:$4 sm:$0xff]  }
 0x271   :  { %5118 = vmatpush1.bf16.msra.mxu0 %v8321_v44  ;;  %5610 = vmatpush1.bf16.msra.mxu1 %v8324_v45  ;;  %v8411_v44 = vld [vmem:[#allocation5 + $0x1040] ss:$16 sps:$4 sm:$0xff]   ;;  %v8414_v45 = vld [vmem:[#allocation5 + $0x1048] ss:$16 sps:$4 sm:$0xff]  }
 0x272   :  { %5119 = vmatprep.subr.bf16.mxu0 %v8329_v46  ;;  %5611 = vmatprep.subr.bf16.mxu1 %v8332_v47  ;;  %v8419_v46 = vld [vmem:[#allocation5 + $0x1064] ss:$16 sps:$4 sm:$0xff]   ;;  %v8422_v47 = vld [vmem:[#allocation5 + $0x106c] ss:$16 sps:$4 sm:$0xff]  }
 0x275   :  { %5120 = vmatpush1.bf16.msra.mxu0 %v8327_v48  ;;  %5612 = vmatpush1.bf16.msra.mxu1 %v8330_v49  ;;  %v8417_v48 = vld [vmem:[#allocation5 + $0x1060] ss:$16 sps:$4 sm:$0xff]   ;;  %v8420_v49 = vld [vmem:[#allocation5 + $0x1068] ss:$16 sps:$4 sm:$0xff]  }
 0x276   :  { %5121 = vmatprep.subr.bf16.mxu0 %v8335_v50  ;;  %5613 = vmatprep.subr.bf16.mxu1 %v8338_v51  ;;  %v8425_v50 = vld [vmem:[#allocation5 + $0x1084] ss:$16 sps:$4 sm:$0xff]   ;;  %v8428_v51 = vld [vmem:[#allocation5 + $0x108c] ss:$16 sps:$4 sm:$0xff]  }
 0x279   :  { %5122 = vmatpush1.bf16.msra.mxu0 %v8333_v52  ;;  %5614 = vmatpush1.bf16.msra.mxu1 %v8336_v53  ;;  %v8423_v52 = vld [vmem:[#allocation5 + $0x1080] ss:$16 sps:$4 sm:$0xff]   ;;  %v8426_v53 = vld [vmem:[#allocation5 + $0x1088] ss:$16 sps:$4 sm:$0xff]  }
 0x27a   :  { %5123 = vmatprep.subr.bf16.mxu0 %v8341_v54  ;;  %5615 = vmatprep.subr.bf16.mxu1 %v8344_v55  ;;  %v8431_v54 = vld [vmem:[#allocation5 + $0x10a4] ss:$16 sps:$4 sm:$0xff]   ;;  %v8434_v55 = vld [vmem:[#allocation5 + $0x10ac] ss:$16 sps:$4 sm:$0xff]  }
 0x27d   :  { %5124 = vmatpush1.bf16.msra.mxu0 %v8339_v56  ;;  %5616 = vmatpush1.bf16.msra.mxu1 %v8342_v57  ;;  %v8429_v56 = vld [vmem:[#allocation5 + $0x10a0] ss:$16 sps:$4 sm:$0xff]   ;;  %v8432_v57 = vld [vmem:[#allocation5 + $0x10a8] ss:$16 sps:$4 sm:$0xff]  }
 0x27e   :  { %5125 = vmatprep.subr.bf16.mxu0 %v8347_v58  ;;  %5617 = vmatprep.subr.bf16.mxu1 %v8350_v59  ;;  %v8437_v58 = vld [vmem:[#allocation5 + $0x10c4] ss:$16 sps:$4 sm:$0xff]   ;;  %v8440_v59 = vld [vmem:[#allocation5 + $0x10cc] ss:$16 sps:$4 sm:$0xff]  }
 0x281   :  { %5126 = vmatpush1.bf16.msra.mxu0 %v8345_v60  ;;  %5618 = vmatpush1.bf16.msra.mxu1 %v8348_v61  ;;  %v8435_v60 = vld [vmem:[#allocation5 + $0x10c0] ss:$16 sps:$4 sm:$0xff]   ;;  %v8438_v61 = vld [vmem:[#allocation5 + $0x10c8] ss:$16 sps:$4 sm:$0xff]  }
 0x282   :  { %5127 = vmatprep.subr.bf16.mxu0 %v8353_v62  ;;  %5619 = vmatprep.subr.bf16.mxu1 %v8356_v63  ;;  %v8443_v62 = vld [vmem:[#allocation5 + $0x10e4] ss:$16 sps:$4 sm:$0xff]   ;;  %v8446_v63 = vld [vmem:[#allocation5 + $0x10ec] ss:$16 sps:$4 sm:$0xff]  }
 0x285   :  { %5128 = vmatpush1.bf16.msra.mxu0 %v8351_v0  ;;  %5620 = vmatpush1.bf16.msra.mxu1 %v8354_v1  ;;  %v8441_v0 = vld [vmem:[#allocation5 + $0x10e0] ss:$16 sps:$4 sm:$0xff]   ;;  %v8444_v1 = vld [vmem:[#allocation5 + $0x10e8] ss:$16 sps:$4 sm:$0xff]  }
 0x286   :  { %5129 = vmatprep.subr.bf16.mxu0 %v8359_v2  ;;  %5621 = vmatprep.subr.bf16.mxu1 %v8362_v3  ;;  %v8449_v2 = vld [vmem:[#allocation5 + $0x1104] ss:$16 sps:$4 sm:$0xff]   ;;  %v8452_v3 = vld [vmem:[#allocation5 + $0x110c] ss:$16 sps:$4 sm:$0xff]  }
 0x289   :  { %5130 = vmatpush1.bf16.msra.mxu0 %v8357_v4  ;;  %5622 = vmatpush1.bf16.msra.mxu1 %v8360_v5  ;;  %v8447_v4 = vld [vmem:[#allocation5 + $0x1100] ss:$16 sps:$4 sm:$0xff]   ;;  %v8450_v5 = vld [vmem:[#allocation5 + $0x1108] ss:$16 sps:$4 sm:$0xff]  }
 0x28a   :  { %5131 = vmatprep.subr.bf16.mxu0 %v8365_v6  ;;  %5623 = vmatprep.subr.bf16.mxu1 %v8368_v7  ;;  %v8455_v6 = vld [vmem:[#allocation5 + $0x1124] ss:$16 sps:$4 sm:$0xff]   ;;  %v8458_v7 = vld [vmem:[#allocation5 + $0x112c] ss:$16 sps:$4 sm:$0xff]  }
 0x28d   :  { %5132 = vmatpush1.bf16.msra.mxu0 %v8363_v8  ;;  %5624 = vmatpush1.bf16.msra.mxu1 %v8366_v9  ;;  %v8453_v8 = vld [vmem:[#allocation5 + $0x1120] ss:$16 sps:$4 sm:$0xff]   ;;  %v8456_v9 = vld [vmem:[#allocation5 + $0x1128] ss:$16 sps:$4 sm:$0xff]  }
 0x28e   :  { %5133 = vmatprep.subr.bf16.mxu0 %v8371_v10  ;;  %5625 = vmatprep.subr.bf16.mxu1 %v8374_v11  ;;  %v8461_v10 = vld [vmem:[#allocation5 + $0x1144] ss:$16 sps:$4 sm:$0xff]   ;;  %v8464_v11 = vld [vmem:[#allocation5 + $0x114c] ss:$16 sps:$4 sm:$0xff]  }
 0x291   :  { %5134 = vmatpush1.bf16.msra.mxu0 %v8369_v12  ;;  %5626 = vmatpush1.bf16.msra.mxu1 %v8372_v13  ;;  %v8459_v12 = vld [vmem:[#allocation5 + $0x1140] ss:$16 sps:$4 sm:$0xff]   ;;  %v8462_v13 = vld [vmem:[#allocation5 + $0x1148] ss:$16 sps:$4 sm:$0xff]  }
 0x292   :  { %5135 = vmatprep.subr.bf16.mxu0 %v8377_v14  ;;  %5627 = vmatprep.subr.bf16.mxu1 %v8380_v15  ;;  %v8467_v14 = vld [vmem:[#allocation5 + $0x1164] ss:$16 sps:$4 sm:$0xff]   ;;  %v8470_v15 = vld [vmem:[#allocation5 + $0x116c] ss:$16 sps:$4 sm:$0xff]  }
 0x295   :  { %5136 = vmatpush1.bf16.msra.mxu0 %v8375_v16  ;;  %5628 = vmatpush1.bf16.msra.mxu1 %v8378_v17  ;;  %v8465_v16 = vld [vmem:[#allocation5 + $0x1160] ss:$16 sps:$4 sm:$0xff]   ;;  %v8468_v17 = vld [vmem:[#allocation5 + $0x1168] ss:$16 sps:$4 sm:$0xff]  }
 0x296   :  { %5137 = vmatprep.subr.bf16.mxu0 %v8383_v18  ;;  %5629 = vmatprep.subr.bf16.mxu1 %v8386_v19  ;;  %v8473_v18 = vld [vmem:[#allocation5 + $0x1184] ss:$16 sps:$4 sm:$0xff]   ;;  %v8476_v19 = vld [vmem:[#allocation5 + $0x118c] ss:$16 sps:$4 sm:$0xff]  }
 0x299   :  { %5138 = vmatpush1.bf16.msra.mxu0 %v8381_v20  ;;  %5630 = vmatpush1.bf16.msra.mxu1 %v8384_v21  ;;  %v8471_v20 = vld [vmem:[#allocation5 + $0x1180] ss:$16 sps:$4 sm:$0xff]   ;;  %v8474_v21 = vld [vmem:[#allocation5 + $0x1188] ss:$16 sps:$4 sm:$0xff]  }
 0x29a   :  { %5139 = vmatprep.subr.bf16.mxu0 %v8389_v22  ;;  %5631 = vmatprep.subr.bf16.mxu1 %v8392_v23  ;;  %v8479_v22 = vld [vmem:[#allocation5 + $0x11a4] ss:$16 sps:$4 sm:$0xff]   ;;  %v8482_v23 = vld [vmem:[#allocation5 + $0x11ac] ss:$16 sps:$4 sm:$0xff]  }
 0x29d   :  { %5140 = vmatpush1.bf16.msra.mxu0 %v8387_v24  ;;  %5632 = vmatpush1.bf16.msra.mxu1 %v8390_v25  ;;  %v8477_v24 = vld [vmem:[#allocation5 + $0x11a0] ss:$16 sps:$4 sm:$0xff]   ;;  %v8480_v25 = vld [vmem:[#allocation5 + $0x11a8] ss:$16 sps:$4 sm:$0xff]  }
 0x29e   :  { %5141 = vmatprep.subr.bf16.mxu0 %v8395_v26  ;;  %5633 = vmatprep.subr.bf16.mxu1 %v8398_v27  ;;  %v8485_v26 = vld [vmem:[#allocation5 + $0x11c4] ss:$16 sps:$4 sm:$0xff]   ;;  %v8488_v27 = vld [vmem:[#allocation5 + $0x11cc] ss:$16 sps:$4 sm:$0xff]  }
 0x2a1   :  { %5142 = vmatpush1.bf16.msra.mxu0 %v8393_v28  ;;  %5634 = vmatpush1.bf16.msra.mxu1 %v8396_v29  ;;  %v8483_v28 = vld [vmem:[#allocation5 + $0x11c0] ss:$16 sps:$4 sm:$0xff]   ;;  %v8486_v29 = vld [vmem:[#allocation5 + $0x11c8] ss:$16 sps:$4 sm:$0xff]  }
 0x2a2   :  { %5152 = vmatprep.subr.bf16.mxu0 %v8401_v30  ;;  %5644 = vmatprep.subr.bf16.mxu1 %v8404_v32  ;;  %v8491_v30 = vld [vmem:[#allocation5 + $0x11e4] ss:$16 sps:$4 sm:$0xff]   ;;  %v8489_v32 = vld [vmem:[#allocation5 + $0x11e0] ss:$16 sps:$4 sm:$0xff]  }
 0x2a4   :  { %5144 = vmatmul.mubr.bf16.vlgmr.msra.gmra.mrb[0].mxu0 %v184_v34  ;;  %5636 = vmatmul.mubr.bf16.vlgmr.msra.gmra.mrb[0].mxu1 %v184_v34  ;;  %v162_v34 = vld [vmem:[#allocation2 + $0x80] sm:$0xff] }
 0x2a5   :  { %5153 = vmatpush1.bf16.msra.mxu0 %v8399_v35  ;;  %5645 = vmatpush1.bf16.msra.mxu1 %v8402_v36  ;;  %v8497_v35 = vld [vmem:[#allocation5 + $0x1204] ss:$16 sps:$4 sm:$0xff]   ;;  %v8500_v36 = vld [vmem:[#allocation5 + $0x120c] ss:$16 sps:$4 sm:$0xff]  }
 0x2a6   :  { %5154 = vmatprep.subr.bf16.mxu0 %v8407_v37  ;;  %5646 = vmatprep.subr.bf16.mxu1 %v8410_v38  ;;  %v186_v37 = vpack.c.bf16 %v162_v34, %v162_v34  ;;  %v165_v38 = vld [vmem:[#allocation2 + $0x98] sm:$0xff]  ;;  %v8587_v34 = vld [vmem:[#allocation5 + $0x13e4] ss:$16 sps:$4 sm:$0xff]  }
 0x2a7   :  { %5184 = vmatprep.mubr.bf16.mxu0 %v187_v39  ;;  %5676 = vmatprep.mubr.bf16.mxu1 %v187_v39  ;;  %v8495_v39 = vld [vmem:[#allocation5 + $0x1200] ss:$16 sps:$4 sm:$0xff]  }
 0x2a9   :  { %5155 = vmatpush1.bf16.msra.mxu0 %v8405_v40  ;;  %5647 = vmatpush1.bf16.msra.mxu1 %v8408_v41  ;;  %v8498_v40 = vld [vmem:[#allocation5 + $0x1208] ss:$16 sps:$4 sm:$0xff]   ;;  %v8503_v41 = vld [vmem:[#allocation5 + $0x1224] ss:$16 sps:$4 sm:$0xff]  }
 0x2aa   :  { %5156 = vmatprep.subr.bf16.mxu0 %v8413_v42  ;;  %5648 = vmatprep.subr.bf16.mxu1 %v8416_v43  ;;  %v8506_v42 = vld [vmem:[#allocation5 + $0x122c] ss:$16 sps:$4 sm:$0xff]   ;;  %v189_v43 = vpack.c.bf16 %v165_v38, %v165_v38  ;;  %v164_v38 = vld [vmem:[#allocation2 + $0x90] sm:$0xff] }
 0x2ad   :  { %5157 = vmatpush1.bf16.msra.mxu0 %v8411_v44  ;;  %5649 = vmatpush1.bf16.msra.mxu1 %v8414_v45  ;;  %v8501_v44 = vld [vmem:[#allocation5 + $0x1220] ss:$16 sps:$4 sm:$0xff]   ;;  %v8504_v45 = vld [vmem:[#allocation5 + $0x1228] ss:$16 sps:$4 sm:$0xff]  }
 0x2ae   :  { %5158 = vmatprep.subr.bf16.mxu0 %v8419_v46  ;;  %5650 = vmatprep.subr.bf16.mxu1 %v8422_v47  ;;  %v8509_v46 = vld [vmem:[#allocation5 + $0x1244] ss:$16 sps:$4 sm:$0xff]   ;;  %v8512_v47 = vld [vmem:[#allocation5 + $0x124c] ss:$16 sps:$4 sm:$0xff]  }
 0x2b1   :  { %5159 = vmatpush1.bf16.msra.mxu0 %v8417_v48  ;;  %5651 = vmatpush1.bf16.msra.mxu1 %v8420_v49  ;;  %v8507_v48 = vld [vmem:[#allocation5 + $0x1240] ss:$16 sps:$4 sm:$0xff]   ;;  %v8510_v49 = vld [vmem:[#allocation5 + $0x1248] ss:$16 sps:$4 sm:$0xff]  }
 0x2b2   :  { %5160 = vmatprep.subr.bf16.mxu0 %v8425_v50  ;;  %5652 = vmatprep.subr.bf16.mxu1 %v8428_v51  ;;  %v8515_v50 = vld [vmem:[#allocation5 + $0x1264] ss:$16 sps:$4 sm:$0xff]   ;;  %v8518_v51 = vld [vmem:[#allocation5 + $0x126c] ss:$16 sps:$4 sm:$0xff]  }
 0x2b5   :  { %5161 = vmatpush1.bf16.msra.mxu0 %v8423_v52  ;;  %5653 = vmatpush1.bf16.msra.mxu1 %v8426_v53  ;;  %v8513_v52 = vld [vmem:[#allocation5 + $0x1260] ss:$16 sps:$4 sm:$0xff]   ;;  %v8516_v53 = vld [vmem:[#allocation5 + $0x1268] ss:$16 sps:$4 sm:$0xff]  }
 0x2b6   :  { %5162 = vmatprep.subr.bf16.mxu0 %v8431_v54  ;;  %5654 = vmatprep.subr.bf16.mxu1 %v8434_v55  ;;  %v8521_v54 = vld [vmem:[#allocation5 + $0x1284] ss:$16 sps:$4 sm:$0xff]   ;;  %v8524_v55 = vld [vmem:[#allocation5 + $0x128c] ss:$16 sps:$4 sm:$0xff]  }
 0x2b9   :  { %5163 = vmatpush1.bf16.msra.mxu0 %v8429_v56  ;;  %5655 = vmatpush1.bf16.msra.mxu1 %v8432_v57  ;;  %v8519_v56 = vld [vmem:[#allocation5 + $0x1280] ss:$16 sps:$4 sm:$0xff]   ;;  %v8522_v57 = vld [vmem:[#allocation5 + $0x1288] ss:$16 sps:$4 sm:$0xff]  }
 0x2ba   :  { %5164 = vmatprep.subr.bf16.mxu0 %v8437_v58  ;;  %5656 = vmatprep.subr.bf16.mxu1 %v8440_v59  ;;  %v8527_v58 = vld [vmem:[#allocation5 + $0x12a4] ss:$16 sps:$4 sm:$0xff]   ;;  %v8530_v59 = vld [vmem:[#allocation5 + $0x12ac] ss:$16 sps:$4 sm:$0xff]  }
 0x2bd   :  { %5165 = vmatpush1.bf16.msra.mxu0 %v8435_v60  ;;  %5657 = vmatpush1.bf16.msra.mxu1 %v8438_v61  ;;  %v8525_v60 = vld [vmem:[#allocation5 + $0x12a0] ss:$16 sps:$4 sm:$0xff]   ;;  %v8528_v61 = vld [vmem:[#allocation5 + $0x12a8] ss:$16 sps:$4 sm:$0xff]  }
 0x2be   :  { %5166 = vmatprep.subr.bf16.mxu0 %v8443_v62  ;;  %5658 = vmatprep.subr.bf16.mxu1 %v8446_v63  ;;  %v8533_v62 = vld [vmem:[#allocation5 + $0x12c4] ss:$16 sps:$4 sm:$0xff]   ;;  %v8536_v63 = vld [vmem:[#allocation5 + $0x12cc] ss:$16 sps:$4 sm:$0xff]  }
 0x2c1   :  { %5167 = vmatpush1.bf16.msra.mxu0 %v8441_v0  ;;  %5659 = vmatpush1.bf16.msra.mxu1 %v8444_v1  ;;  %v8531_v0 = vld [vmem:[#allocation5 + $0x12c0] ss:$16 sps:$4 sm:$0xff]   ;;  %v8534_v1 = vld [vmem:[#allocation5 + $0x12c8] ss:$16 sps:$4 sm:$0xff]  }
 0x2c2   :  { %5168 = vmatprep.subr.bf16.mxu0 %v8449_v2  ;;  %5660 = vmatprep.subr.bf16.mxu1 %v8452_v3  ;;  %v8539_v2 = vld [vmem:[#allocation5 + $0x12e4] ss:$16 sps:$4 sm:$0xff]   ;;  %v8542_v3 = vld [vmem:[#allocation5 + $0x12ec] ss:$16 sps:$4 sm:$0xff]  }
 0x2c5   :  { %5169 = vmatpush1.bf16.msra.mxu0 %v8447_v4  ;;  %5661 = vmatpush1.bf16.msra.mxu1 %v8450_v5  ;;  %v8537_v4 = vld [vmem:[#allocation5 + $0x12e0] ss:$16 sps:$4 sm:$0xff]   ;;  %v8540_v5 = vld [vmem:[#allocation5 + $0x12e8] ss:$16 sps:$4 sm:$0xff]  }
 0x2c6   :  { %5170 = vmatprep.subr.bf16.mxu0 %v8455_v6  ;;  %5662 = vmatprep.subr.bf16.mxu1 %v8458_v7  ;;  %v8545_v6 = vld [vmem:[#allocation5 + $0x1304] ss:$16 sps:$4 sm:$0xff]   ;;  %v8548_v7 = vld [vmem:[#allocation5 + $0x130c] ss:$16 sps:$4 sm:$0xff]  }
 0x2c9   :  { %5171 = vmatpush1.bf16.msra.mxu0 %v8453_v8  ;;  %5663 = vmatpush1.bf16.msra.mxu1 %v8456_v9  ;;  %v8543_v8 = vld [vmem:[#allocation5 + $0x1300] ss:$16 sps:$4 sm:$0xff]   ;;  %v8546_v9 = vld [vmem:[#allocation5 + $0x1308] ss:$16 sps:$4 sm:$0xff]  }
 0x2ca   :  { %5172 = vmatprep.subr.bf16.mxu0 %v8461_v10  ;;  %5664 = vmatprep.subr.bf16.mxu1 %v8464_v11  ;;  %v8551_v10 = vld [vmem:[#allocation5 + $0x1324] ss:$16 sps:$4 sm:$0xff]   ;;  %v8554_v11 = vld [vmem:[#allocation5 + $0x132c] ss:$16 sps:$4 sm:$0xff]  }
 0x2cd   :  { %5173 = vmatpush1.bf16.msra.mxu0 %v8459_v12  ;;  %5665 = vmatpush1.bf16.msra.mxu1 %v8462_v13  ;;  %v8549_v12 = vld [vmem:[#allocation5 + $0x1320] ss:$16 sps:$4 sm:$0xff]   ;;  %v8552_v13 = vld [vmem:[#allocation5 + $0x1328] ss:$16 sps:$4 sm:$0xff]  }
 0x2ce   :  { %5174 = vmatprep.subr.bf16.mxu0 %v8467_v14  ;;  %5666 = vmatprep.subr.bf16.mxu1 %v8470_v15  ;;  %v8557_v14 = vld [vmem:[#allocation5 + $0x1344] ss:$16 sps:$4 sm:$0xff]   ;;  %v8560_v15 = vld [vmem:[#allocation5 + $0x134c] ss:$16 sps:$4 sm:$0xff]  }
 0x2d1   :  { %5175 = vmatpush1.bf16.msra.mxu0 %v8465_v16  ;;  %5667 = vmatpush1.bf16.msra.mxu1 %v8468_v17  ;;  %v8555_v16 = vld [vmem:[#allocation5 + $0x1340] ss:$16 sps:$4 sm:$0xff]   ;;  %v8558_v17 = vld [vmem:[#allocation5 + $0x1348] ss:$16 sps:$4 sm:$0xff]  }
 0x2d2   :  { %5176 = vmatprep.subr.bf16.mxu0 %v8473_v18  ;;  %5668 = vmatprep.subr.bf16.mxu1 %v8476_v19  ;;  %v8563_v18 = vld [vmem:[#allocation5 + $0x1364] ss:$16 sps:$4 sm:$0xff]   ;;  %v8566_v19 = vld [vmem:[#allocation5 + $0x136c] ss:$16 sps:$4 sm:$0xff]  }
 0x2d5   :  { %5177 = vmatpush1.bf16.msra.mxu0 %v8471_v20  ;;  %5669 = vmatpush1.bf16.msra.mxu1 %v8474_v21  ;;  %v8561_v20 = vld [vmem:[#allocation5 + $0x1360] ss:$16 sps:$4 sm:$0xff]   ;;  %v8564_v21 = vld [vmem:[#allocation5 + $0x1368] ss:$16 sps:$4 sm:$0xff]  }
 0x2d6   :  { %5178 = vmatprep.subr.bf16.mxu0 %v8479_v22  ;;  %5670 = vmatprep.subr.bf16.mxu1 %v8482_v23  ;;  %v8569_v22 = vld [vmem:[#allocation5 + $0x1384] ss:$16 sps:$4 sm:$0xff]   ;;  %v8572_v23 = vld [vmem:[#allocation5 + $0x138c] ss:$16 sps:$4 sm:$0xff]  }
 0x2d9   :  { %5179 = vmatpush1.bf16.msra.mxu0 %v8477_v24  ;;  %5671 = vmatpush1.bf16.msra.mxu1 %v8480_v25  ;;  %v8567_v24 = vld [vmem:[#allocation5 + $0x1380] ss:$16 sps:$4 sm:$0xff]   ;;  %v8570_v25 = vld [vmem:[#allocation5 + $0x1388] ss:$16 sps:$4 sm:$0xff]  }
 0x2da   :  { %5180 = vmatprep.subr.bf16.mxu0 %v8485_v26  ;;  %5672 = vmatprep.subr.bf16.mxu1 %v8488_v27  ;;  %v8575_v26 = vld [vmem:[#allocation5 + $0x13a4] ss:$16 sps:$4 sm:$0xff]   ;;  %v8578_v27 = vld [vmem:[#allocation5 + $0x13ac] ss:$16 sps:$4 sm:$0xff]  }
 0x2dd   :  { %5181 = vmatpush1.bf16.msra.mxu0 %v8483_v28  ;;  %5673 = vmatpush1.bf16.msra.mxu1 %v8486_v29  ;;  %v8573_v28 = vld [vmem:[#allocation5 + $0x13a0] ss:$16 sps:$4 sm:$0xff]   ;;  %v8576_v29 = vld [vmem:[#allocation5 + $0x13a8] ss:$16 sps:$4 sm:$0xff]  }
 0x2de   :  { %5182 = vmatprep.subr.bf16.mxu0 %v8491_v30  ;;  %5674 = vmatprep.subr.bf16.mxu1 %v8494_v31  ;;  %v8581_v30 = vld [vmem:[#allocation5 + $0x13c4] ss:$16 sps:$4 sm:$0xff]   ;;  %v8584_v31 = vld [vmem:[#allocation5 + $0x13cc] ss:$16 sps:$4 sm:$0xff]  }
 0x2e1   :  { %5183 = vmatpush1.bf16.msra.mxu0 %v8489_v32  ;;  %5675 = vmatpush1.bf16.msra.mxu1 %v8492_v33  ;;  %v8579_v32 = vld [vmem:[#allocation5 + $0x13c0] ss:$16 sps:$4 sm:$0xff]   ;;  %v8582_v33 = vld [vmem:[#allocation5 + $0x13c8] ss:$16 sps:$4 sm:$0xff]  }
 0x2e2   :  { %5193 = vmatprep.subr.bf16.mxu0 %v8497_v35  ;;  %5685 = vmatprep.subr.bf16.mxu1 %v8500_v36  ;;  %v8590_v35 = vld [vmem:[#allocation5 + $0x13ec] ss:$16 sps:$4 sm:$0xff]   ;;  %v8585_v36 = vld [vmem:[#allocation5 + $0x13e0] ss:$16 sps:$4 sm:$0xff]  }
 0x2e4   :  { %5185 = vmatmul.mubr.bf16.vlgmr.msra.gmra.mrb[0].mxu0 %v186_v37  ;;  %5677 = vmatmul.mubr.bf16.vlgmr.msra.gmra.mrb[0].mxu1 %v186_v37  ;;  %v8588_v37 = vld [vmem:[#allocation5 + $0x13e8] ss:$16 sps:$4 sm:$0xff]  }
 0x2e5   :  { %5194 = vmatpush1.bf16.msra.mxu0 %v8495_v39  ;;  %5686 = vmatpush1.bf16.msra.mxu1 %v8498_v40  ;;  %v8593_v39 = vld [vmem:[#allocation5 + $0x1404] ss:$16 sps:$4 sm:$0xff]   ;;  %v8596_v40 = vld [vmem:[#allocation5 + $0x140c] ss:$16 sps:$4 sm:$0xff]  }
 0x2e6   :  { %5195 = vmatprep.subr.bf16.mxu0 %v8503_v41  ;;  %5687 = vmatprep.subr.bf16.mxu1 %v8506_v42  ;;  %v188_v41 = vpack.c.bf16 %v164_v38, %v164_v38  ;;  %v167_v42 = vld [vmem:[#allocation2 + $0xa8] sm:$0xff]  ;;  %v8683_v38 = vld [vmem:[#allocation5 + $0x15e4] ss:$16 sps:$4 sm:$0xff]  }
 0x2e7   :  { %5225 = vmatprep.mubr.bf16.mxu0 %v189_v43  ;;  %5717 = vmatprep.mubr.bf16.mxu1 %v189_v43  ;;  %v8591_v43 = vld [vmem:[#allocation5 + $0x1400] ss:$16 sps:$4 sm:$0xff]  }
 0x2e9   :  { %5196 = vmatpush1.bf16.msra.mxu0 %v8501_v44  ;;  %5688 = vmatpush1.bf16.msra.mxu1 %v8504_v45  ;;  %v8594_v44 = vld [vmem:[#allocation5 + $0x1408] ss:$16 sps:$4 sm:$0xff]   ;;  %v8599_v45 = vld [vmem:[#allocation5 + $0x1424] ss:$16 sps:$4 sm:$0xff]  }
 0x2ea   :  { %5197 = vmatprep.subr.bf16.mxu0 %v8509_v46  ;;  %5689 = vmatprep.subr.bf16.mxu1 %v8512_v47  ;;  %v8602_v46 = vld [vmem:[#allocation5 + $0x142c] ss:$16 sps:$4 sm:$0xff]   ;;  %v191_v47 = vpack.c.bf16 %v167_v42, %v167_v42  ;;  %v166_v42 = vld [vmem:[#allocation2 + $0xa0] sm:$0xff] }
 0x2ed   :  { %5198 = vmatpush1.bf16.msra.mxu0 %v8507_v48  ;;  %5690 = vmatpush1.bf16.msra.mxu1 %v8510_v49  ;;  %v8597_v48 = vld [vmem:[#allocation5 + $0x1420] ss:$16 sps:$4 sm:$0xff]   ;;  %v8600_v49 = vld [vmem:[#allocation5 + $0x1428] ss:$16 sps:$4 sm:$0xff]  }
 0x2ee   :  { %5199 = vmatprep.subr.bf16.mxu0 %v8515_v50  ;;  %5691 = vmatprep.subr.bf16.mxu1 %v8518_v51  ;;  %v8605_v50 = vld [vmem:[#allocation5 + $0x1444] ss:$16 sps:$4 sm:$0xff]   ;;  %v8608_v51 = vld [vmem:[#allocation5 + $0x144c] ss:$16 sps:$4 sm:$0xff]  }
 0x2f1   :  { %5200 = vmatpush1.bf16.msra.mxu0 %v8513_v52  ;;  %5692 = vmatpush1.bf16.msra.mxu1 %v8516_v53  ;;  %v8603_v52 = vld [vmem:[#allocation5 + $0x1440] ss:$16 sps:$4 sm:$0xff]   ;;  %v8606_v53 = vld [vmem:[#allocation5 + $0x1448] ss:$16 sps:$4 sm:$0xff]  }
 0x2f2   :  { %5201 = vmatprep.subr.bf16.mxu0 %v8521_v54  ;;  %5693 = vmatprep.subr.bf16.mxu1 %v8524_v55  ;;  %v8611_v54 = vld [vmem:[#allocation5 + $0x1464] ss:$16 sps:$4 sm:$0xff]   ;;  %v8614_v55 = vld [vmem:[#allocation5 + $0x146c] ss:$16 sps:$4 sm:$0xff]  }
 0x2f5   :  { %5202 = vmatpush1.bf16.msra.mxu0 %v8519_v56  ;;  %5694 = vmatpush1.bf16.msra.mxu1 %v8522_v57  ;;  %v8609_v56 = vld [vmem:[#allocation5 + $0x1460] ss:$16 sps:$4 sm:$0xff]   ;;  %v8612_v57 = vld [vmem:[#allocation5 + $0x1468] ss:$16 sps:$4 sm:$0xff]  }
 0x2f6   :  { %5203 = vmatprep.subr.bf16.mxu0 %v8527_v58  ;;  %5695 = vmatprep.subr.bf16.mxu1 %v8530_v59  ;;  %v8617_v58 = vld [vmem:[#allocation5 + $0x1484] ss:$16 sps:$4 sm:$0xff]   ;;  %v8620_v59 = vld [vmem:[#allocation5 + $0x148c] ss:$16 sps:$4 sm:$0xff]  }
 0x2f9   :  { %5204 = vmatpush1.bf16.msra.mxu0 %v8525_v60  ;;  %5696 = vmatpush1.bf16.msra.mxu1 %v8528_v61  ;;  %v8615_v60 = vld [vmem:[#allocation5 + $0x1480] ss:$16 sps:$4 sm:$0xff]   ;;  %v8618_v61 = vld [vmem:[#allocation5 + $0x1488] ss:$16 sps:$4 sm:$0xff]  }
 0x2fa   :  { %5205 = vmatprep.subr.bf16.mxu0 %v8533_v62  ;;  %5697 = vmatprep.subr.bf16.mxu1 %v8536_v63  ;;  %v8623_v62 = vld [vmem:[#allocation5 + $0x14a4] ss:$16 sps:$4 sm:$0xff]   ;;  %v8626_v63 = vld [vmem:[#allocation5 + $0x14ac] ss:$16 sps:$4 sm:$0xff]  }
 0x2fd   :  { %5206 = vmatpush1.bf16.msra.mxu0 %v8531_v0  ;;  %5698 = vmatpush1.bf16.msra.mxu1 %v8534_v1  ;;  %v8621_v0 = vld [vmem:[#allocation5 + $0x14a0] ss:$16 sps:$4 sm:$0xff]   ;;  %v8624_v1 = vld [vmem:[#allocation5 + $0x14a8] ss:$16 sps:$4 sm:$0xff]  }
 0x2fe   :  { %5207 = vmatprep.subr.bf16.mxu0 %v8539_v2  ;;  %5699 = vmatprep.subr.bf16.mxu1 %v8542_v3  ;;  %v8629_v2 = vld [vmem:[#allocation5 + $0x14c4] ss:$16 sps:$4 sm:$0xff]   ;;  %v8632_v3 = vld [vmem:[#allocation5 + $0x14cc] ss:$16 sps:$4 sm:$0xff]  }
 0x301   :  { %5208 = vmatpush1.bf16.msra.mxu0 %v8537_v4  ;;  %5700 = vmatpush1.bf16.msra.mxu1 %v8540_v5  ;;  %v8627_v4 = vld [vmem:[#allocation5 + $0x14c0] ss:$16 sps:$4 sm:$0xff]   ;;  %v8630_v5 = vld [vmem:[#allocation5 + $0x14c8] ss:$16 sps:$4 sm:$0xff]  }
 0x302   :  { %5209 = vmatprep.subr.bf16.mxu0 %v8545_v6  ;;  %5701 = vmatprep.subr.bf16.mxu1 %v8548_v7  ;;  %v8635_v6 = vld [vmem:[#allocation5 + $0x14e4] ss:$16 sps:$4 sm:$0xff]   ;;  %v8638_v7 = vld [vmem:[#allocation5 + $0x14ec] ss:$16 sps:$4 sm:$0xff]  }
 0x305   :  { %5210 = vmatpush1.bf16.msra.mxu0 %v8543_v8  ;;  %5702 = vmatpush1.bf16.msra.mxu1 %v8546_v9  ;;  %v8633_v8 = vld [vmem:[#allocation5 + $0x14e0] ss:$16 sps:$4 sm:$0xff]   ;;  %v8636_v9 = vld [vmem:[#allocation5 + $0x14e8] ss:$16 sps:$4 sm:$0xff]  }
 0x306   :  { %5211 = vmatprep.subr.bf16.mxu0 %v8551_v10  ;;  %5703 = vmatprep.subr.bf16.mxu1 %v8554_v11  ;;  %v8641_v10 = vld [vmem:[#allocation5 + $0x1504] ss:$16 sps:$4 sm:$0xff]   ;;  %v8644_v11 = vld [vmem:[#allocation5 + $0x150c] ss:$16 sps:$4 sm:$0xff]  }
 0x309   :  { %5212 = vmatpush1.bf16.msra.mxu0 %v8549_v12  ;;  %5704 = vmatpush1.bf16.msra.mxu1 %v8552_v13  ;;  %v8639_v12 = vld [vmem:[#allocation5 + $0x1500] ss:$16 sps:$4 sm:$0xff]   ;;  %v8642_v13 = vld [vmem:[#allocation5 + $0x1508] ss:$16 sps:$4 sm:$0xff]  }
 0x30a   :  { %5213 = vmatprep.subr.bf16.mxu0 %v8557_v14  ;;  %5705 = vmatprep.subr.bf16.mxu1 %v8560_v15  ;;  %v8647_v14 = vld [vmem:[#allocation5 + $0x1524] ss:$16 sps:$4 sm:$0xff]   ;;  %v8650_v15 = vld [vmem:[#allocation5 + $0x152c] ss:$16 sps:$4 sm:$0xff]  }
 0x30d   :  { %5214 = vmatpush1.bf16.msra.mxu0 %v8555_v16  ;;  %5706 = vmatpush1.bf16.msra.mxu1 %v8558_v17  ;;  %v8645_v16 = vld [vmem:[#allocation5 + $0x1520] ss:$16 sps:$4 sm:$0xff]   ;;  %v8648_v17 = vld [vmem:[#allocation5 + $0x1528] ss:$16 sps:$4 sm:$0xff]  }
 0x30e   :  { %5215 = vmatprep.subr.bf16.mxu0 %v8563_v18  ;;  %5707 = vmatprep.subr.bf16.mxu1 %v8566_v19  ;;  %v8653_v18 = vld [vmem:[#allocation5 + $0x1544] ss:$16 sps:$4 sm:$0xff]   ;;  %v8656_v19 = vld [vmem:[#allocation5 + $0x154c] ss:$16 sps:$4 sm:$0xff]  }
 0x311   :  { %5216 = vmatpush1.bf16.msra.mxu0 %v8561_v20  ;;  %5708 = vmatpush1.bf16.msra.mxu1 %v8564_v21  ;;  %v8651_v20 = vld [vmem:[#allocation5 + $0x1540] ss:$16 sps:$4 sm:$0xff]   ;;  %v8654_v21 = vld [vmem:[#allocation5 + $0x1548] ss:$16 sps:$4 sm:$0xff]  }
 0x312   :  { %5217 = vmatprep.subr.bf16.mxu0 %v8569_v22  ;;  %5709 = vmatprep.subr.bf16.mxu1 %v8572_v23  ;;  %v8659_v22 = vld [vmem:[#allocation5 + $0x1564] ss:$16 sps:$4 sm:$0xff]   ;;  %v8662_v23 = vld [vmem:[#allocation5 + $0x156c] ss:$16 sps:$4 sm:$0xff]  }
 0x315   :  { %5218 = vmatpush1.bf16.msra.mxu0 %v8567_v24  ;;  %5710 = vmatpush1.bf16.msra.mxu1 %v8570_v25  ;;  %v8657_v24 = vld [vmem:[#allocation5 + $0x1560] ss:$16 sps:$4 sm:$0xff]   ;;  %v8660_v25 = vld [vmem:[#allocation5 + $0x1568] ss:$16 sps:$4 sm:$0xff]  }
 0x316   :  { %5219 = vmatprep.subr.bf16.mxu0 %v8575_v26  ;;  %5711 = vmatprep.subr.bf16.mxu1 %v8578_v27  ;;  %v8665_v26 = vld [vmem:[#allocation5 + $0x1584] ss:$16 sps:$4 sm:$0xff]   ;;  %v8668_v27 = vld [vmem:[#allocation5 + $0x158c] ss:$16 sps:$4 sm:$0xff]  }
 0x319   :  { %5220 = vmatpush1.bf16.msra.mxu0 %v8573_v28  ;;  %5712 = vmatpush1.bf16.msra.mxu1 %v8576_v29  ;;  %v8663_v28 = vld [vmem:[#allocation5 + $0x1580] ss:$16 sps:$4 sm:$0xff]   ;;  %v8666_v29 = vld [vmem:[#allocation5 + $0x1588] ss:$16 sps:$4 sm:$0xff]  }
 0x31a   :  { %5221 = vmatprep.subr.bf16.mxu0 %v8581_v30  ;;  %5713 = vmatprep.subr.bf16.mxu1 %v8584_v31  ;;  %v8671_v30 = vld [vmem:[#allocation5 + $0x15a4] ss:$16 sps:$4 sm:$0xff]   ;;  %v8674_v31 = vld [vmem:[#allocation5 + $0x15ac] ss:$16 sps:$4 sm:$0xff]  }
 0x31d   :  { %5222 = vmatpush1.bf16.msra.mxu0 %v8579_v32  ;;  %5714 = vmatpush1.bf16.msra.mxu1 %v8582_v33  ;;  %v8669_v32 = vld [vmem:[#allocation5 + $0x15a0] ss:$16 sps:$4 sm:$0xff]   ;;  %v8672_v33 = vld [vmem:[#allocation5 + $0x15a8] ss:$16 sps:$4 sm:$0xff]  }
 0x31e   :  { %5223 = vmatprep.subr.bf16.mxu0 %v8587_v34  ;;  %5715 = vmatprep.subr.bf16.mxu1 %v8590_v35  ;;  %v8677_v34 = vld [vmem:[#allocation5 + $0x15c4] ss:$16 sps:$4 sm:$0xff]   ;;  %v8680_v35 = vld [vmem:[#allocation5 + $0x15cc] ss:$16 sps:$4 sm:$0xff]  }
 0x321   :  { %5224 = vmatpush1.bf16.msra.mxu0 %v8585_v36  ;;  %5716 = vmatpush1.bf16.msra.mxu1 %v8588_v37  ;;  %v8675_v36 = vld [vmem:[#allocation5 + $0x15c0] ss:$16 sps:$4 sm:$0xff]   ;;  %v8678_v37 = vld [vmem:[#allocation5 + $0x15c8] ss:$16 sps:$4 sm:$0xff]  }
 0x322   :  { %5234 = vmatprep.subr.bf16.mxu0 %v8593_v39  ;;  %5726 = vmatprep.subr.bf16.mxu1 %v8596_v40  ;;  %v8686_v39 = vld [vmem:[#allocation5 + $0x15ec] ss:$16 sps:$4 sm:$0xff]   ;;  %v8681_v40 = vld [vmem:[#allocation5 + $0x15e0] ss:$16 sps:$4 sm:$0xff]  }
 0x324   :  { %5226 = vmatmul.mubr.bf16.vlgmr.msra.gmra.mrb[0].mxu0 %v188_v41  ;;  %5718 = vmatmul.mubr.bf16.vlgmr.msra.gmra.mrb[0].mxu1 %v188_v41  ;;  %v8684_v41 = vld [vmem:[#allocation5 + $0x15e8] ss:$16 sps:$4 sm:$0xff]  }
 0x325   :  { %5235 = vmatpush1.bf16.msra.mxu0 %v8591_v43  ;;  %5727 = vmatpush1.bf16.msra.mxu1 %v8594_v44  ;;  %v8689_v43 = vld [vmem:[#allocation5 + $0x1604] ss:$16 sps:$4 sm:$0xff]   ;;  %v8692_v44 = vld [vmem:[#allocation5 + $0x160c] ss:$16 sps:$4 sm:$0xff]  }
 0x326   :  { %5236 = vmatprep.subr.bf16.mxu0 %v8599_v45  ;;  %5728 = vmatprep.subr.bf16.mxu1 %v8602_v46  ;;  %v190_v45 = vpack.c.bf16 %v166_v42, %v166_v42  ;;  %v169_v46 = vld [vmem:[#allocation2 + $0xb8] sm:$0xff]  ;;  %v8779_v42 = vld [vmem:[#allocation5 + $0x17e4] ss:$16 sps:$4 sm:$0xff]  }
 0x327   :  { %5266 = vmatprep.mubr.bf16.mxu0 %v191_v47  ;;  %5758 = vmatprep.mubr.bf16.mxu1 %v191_v47  ;;  %v8687_v47 = vld [vmem:[#allocation5 + $0x1600] ss:$16 sps:$4 sm:$0xff]  }
 0x329   :  { %5237 = vmatpush1.bf16.msra.mxu0 %v8597_v48  ;;  %5729 = vmatpush1.bf16.msra.mxu1 %v8600_v49  ;;  %v8690_v48 = vld [vmem:[#allocation5 + $0x1608] ss:$16 sps:$4 sm:$0xff]   ;;  %v8695_v49 = vld [vmem:[#allocation5 + $0x1624] ss:$16 sps:$4 sm:$0xff]  }
 0x32a   :  { %5238 = vmatprep.subr.bf16.mxu0 %v8605_v50  ;;  %5730 = vmatprep.subr.bf16.mxu1 %v8608_v51  ;;  %v8698_v50 = vld [vmem:[#allocation5 + $0x162c] ss:$16 sps:$4 sm:$0xff]   ;;  %v193_v51 = vpack.c.bf16 %v169_v46, %v169_v46  ;;  %v168_v46 = vld [vmem:[#allocation2 + $0xb0] sm:$0xff] }
 0x32d   :  { %5239 = vmatpush1.bf16.msra.mxu0 %v8603_v52  ;;  %5731 = vmatpush1.bf16.msra.mxu1 %v8606_v53  ;;  %v8693_v52 = vld [vmem:[#allocation5 + $0x1620] ss:$16 sps:$4 sm:$0xff]   ;;  %v8696_v53 = vld [vmem:[#allocation5 + $0x1628] ss:$16 sps:$4 sm:$0xff]  }
 0x32e   :  { %5240 = vmatprep.subr.bf16.mxu0 %v8611_v54  ;;  %5732 = vmatprep.subr.bf16.mxu1 %v8614_v55  ;;  %v8701_v54 = vld [vmem:[#allocation5 + $0x1644] ss:$16 sps:$4 sm:$0xff]   ;;  %v8704_v55 = vld [vmem:[#allocation5 + $0x164c] ss:$16 sps:$4 sm:$0xff]  }
 0x331   :  { %5241 = vmatpush1.bf16.msra.mxu0 %v8609_v56  ;;  %5733 = vmatpush1.bf16.msra.mxu1 %v8612_v57  ;;  %v8699_v56 = vld [vmem:[#allocation5 + $0x1640] ss:$16 sps:$4 sm:$0xff]   ;;  %v8702_v57 = vld [vmem:[#allocation5 + $0x1648] ss:$16 sps:$4 sm:$0xff]  }
 0x332   :  { %5242 = vmatprep.subr.bf16.mxu0 %v8617_v58  ;;  %5734 = vmatprep.subr.bf16.mxu1 %v8620_v59  ;;  %v8707_v58 = vld [vmem:[#allocation5 + $0x1664] ss:$16 sps:$4 sm:$0xff]   ;;  %v8710_v59 = vld [vmem:[#allocation5 + $0x166c] ss:$16 sps:$4 sm:$0xff]  }
 0x335   :  { %5243 = vmatpush1.bf16.msra.mxu0 %v8615_v60  ;;  %5735 = vmatpush1.bf16.msra.mxu1 %v8618_v61  ;;  %v8705_v60 = vld [vmem:[#allocation5 + $0x1660] ss:$16 sps:$4 sm:$0xff]   ;;  %v8708_v61 = vld [vmem:[#allocation5 + $0x1668] ss:$16 sps:$4 sm:$0xff]  }
 0x336   :  { %5244 = vmatprep.subr.bf16.mxu0 %v8623_v62  ;;  %5736 = vmatprep.subr.bf16.mxu1 %v8626_v63  ;;  %v8713_v62 = vld [vmem:[#allocation5 + $0x1684] ss:$16 sps:$4 sm:$0xff]   ;;  %v8716_v63 = vld [vmem:[#allocation5 + $0x168c] ss:$16 sps:$4 sm:$0xff]  }
 0x339   :  { %5245 = vmatpush1.bf16.msra.mxu0 %v8621_v0  ;;  %5737 = vmatpush1.bf16.msra.mxu1 %v8624_v1  ;;  %v8711_v0 = vld [vmem:[#allocation5 + $0x1680] ss:$16 sps:$4 sm:$0xff]   ;;  %v8714_v1 = vld [vmem:[#allocation5 + $0x1688] ss:$16 sps:$4 sm:$0xff]  }
 0x33a   :  { %5246 = vmatprep.subr.bf16.mxu0 %v8629_v2  ;;  %5738 = vmatprep.subr.bf16.mxu1 %v8632_v3  ;;  %v8719_v2 = vld [vmem:[#allocation5 + $0x16a4] ss:$16 sps:$4 sm:$0xff]   ;;  %v8722_v3 = vld [vmem:[#allocation5 + $0x16ac] ss:$16 sps:$4 sm:$0xff]  }
 0x33d   :  { %5247 = vmatpush1.bf16.msra.mxu0 %v8627_v4  ;;  %5739 = vmatpush1.bf16.msra.mxu1 %v8630_v5  ;;  %v8717_v4 = vld [vmem:[#allocation5 + $0x16a0] ss:$16 sps:$4 sm:$0xff]   ;;  %v8720_v5 = vld [vmem:[#allocation5 + $0x16a8] ss:$16 sps:$4 sm:$0xff]  }
 0x33e   :  { %5248 = vmatprep.subr.bf16.mxu0 %v8635_v6  ;;  %5740 = vmatprep.subr.bf16.mxu1 %v8638_v7  ;;  %v8725_v6 = vld [vmem:[#allocation5 + $0x16c4] ss:$16 sps:$4 sm:$0xff]   ;;  %v8728_v7 = vld [vmem:[#allocation5 + $0x16cc] ss:$16 sps:$4 sm:$0xff]  }
 0x341   :  { %5249 = vmatpush1.bf16.msra.mxu0 %v8633_v8  ;;  %5741 = vmatpush1.bf16.msra.mxu1 %v8636_v9  ;;  %v8723_v8 = vld [vmem:[#allocation5 + $0x16c0] ss:$16 sps:$4 sm:$0xff]   ;;  %v8726_v9 = vld [vmem:[#allocation5 + $0x16c8] ss:$16 sps:$4 sm:$0xff]  }
 0x342   :  { %5250 = vmatprep.subr.bf16.mxu0 %v8641_v10  ;;  %5742 = vmatprep.subr.bf16.mxu1 %v8644_v11  ;;  %v8731_v10 = vld [vmem:[#allocation5 + $0x16e4] ss:$16 sps:$4 sm:$0xff]   ;;  %v8734_v11 = vld [vmem:[#allocation5 + $0x16ec] ss:$16 sps:$4 sm:$0xff]  }
 0x345   :  { %5251 = vmatpush1.bf16.msra.mxu0 %v8639_v12  ;;  %5743 = vmatpush1.bf16.msra.mxu1 %v8642_v13  ;;  %v8729_v12 = vld [vmem:[#allocation5 + $0x16e0] ss:$16 sps:$4 sm:$0xff]   ;;  %v8732_v13 = vld [vmem:[#allocation5 + $0x16e8] ss:$16 sps:$4 sm:$0xff]  }
 0x346   :  { %5252 = vmatprep.subr.bf16.mxu0 %v8647_v14  ;;  %5744 = vmatprep.subr.bf16.mxu1 %v8650_v15  ;;  %v8737_v14 = vld [vmem:[#allocation5 + $0x1704] ss:$16 sps:$4 sm:$0xff]   ;;  %v8740_v15 = vld [vmem:[#allocation5 + $0x170c] ss:$16 sps:$4 sm:$0xff]  }
 0x349   :  { %5253 = vmatpush1.bf16.msra.mxu0 %v8645_v16  ;;  %5745 = vmatpush1.bf16.msra.mxu1 %v8648_v17  ;;  %v8735_v16 = vld [vmem:[#allocation5 + $0x1700] ss:$16 sps:$4 sm:$0xff]   ;;  %v8738_v17 = vld [vmem:[#allocation5 + $0x1708] ss:$16 sps:$4 sm:$0xff]  }
 0x34a   :  { %5254 = vmatprep.subr.bf16.mxu0 %v8653_v18  ;;  %5746 = vmatprep.subr.bf16.mxu1 %v8656_v19  ;;  %v8743_v18 = vld [vmem:[#allocation5 + $0x1724] ss:$16 sps:$4 sm:$0xff]   ;;  %v8746_v19 = vld [vmem:[#allocation5 + $0x172c] ss:$16 sps:$4 sm:$0xff]  }
 0x34d   :  { %5255 = vmatpush1.bf16.msra.mxu0 %v8651_v20  ;;  %5747 = vmatpush1.bf16.msra.mxu1 %v8654_v21  ;;  %v8741_v20 = vld [vmem:[#allocation5 + $0x1720] ss:$16 sps:$4 sm:$0xff]   ;;  %v8744_v21 = vld [vmem:[#allocation5 + $0x1728] ss:$16 sps:$4 sm:$0xff]  }
 0x34e   :  { %5256 = vmatprep.subr.bf16.mxu0 %v8659_v22  ;;  %5748 = vmatprep.subr.bf16.mxu1 %v8662_v23  ;;  %v8749_v22 = vld [vmem:[#allocation5 + $0x1744] ss:$16 sps:$4 sm:$0xff]   ;;  %v8752_v23 = vld [vmem:[#allocation5 + $0x174c] ss:$16 sps:$4 sm:$0xff]  }
 0x351   :  { %5257 = vmatpush1.bf16.msra.mxu0 %v8657_v24  ;;  %5749 = vmatpush1.bf16.msra.mxu1 %v8660_v25  ;;  %v8747_v24 = vld [vmem:[#allocation5 + $0x1740] ss:$16 sps:$4 sm:$0xff]   ;;  %v8750_v25 = vld [vmem:[#allocation5 + $0x1748] ss:$16 sps:$4 sm:$0xff]  }
 0x352   :  { %5258 = vmatprep.subr.bf16.mxu0 %v8665_v26  ;;  %5750 = vmatprep.subr.bf16.mxu1 %v8668_v27  ;;  %v8755_v26 = vld [vmem:[#allocation5 + $0x1764] ss:$16 sps:$4 sm:$0xff]   ;;  %v8758_v27 = vld [vmem:[#allocation5 + $0x176c] ss:$16 sps:$4 sm:$0xff]  }
 0x355   :  { %5259 = vmatpush1.bf16.msra.mxu0 %v8663_v28  ;;  %5751 = vmatpush1.bf16.msra.mxu1 %v8666_v29  ;;  %v8753_v28 = vld [vmem:[#allocation5 + $0x1760] ss:$16 sps:$4 sm:$0xff]   ;;  %v8756_v29 = vld [vmem:[#allocation5 + $0x1768] ss:$16 sps:$4 sm:$0xff]  }
 0x356   :  { %5260 = vmatprep.subr.bf16.mxu0 %v8671_v30  ;;  %5752 = vmatprep.subr.bf16.mxu1 %v8674_v31  ;;  %v8761_v30 = vld [vmem:[#allocation5 + $0x1784] ss:$16 sps:$4 sm:$0xff]   ;;  %v8764_v31 = vld [vmem:[#allocation5 + $0x178c] ss:$16 sps:$4 sm:$0xff]  }
 0x359   :  { %5261 = vmatpush1.bf16.msra.mxu0 %v8669_v32  ;;  %5753 = vmatpush1.bf16.msra.mxu1 %v8672_v33  ;;  %v8759_v32 = vld [vmem:[#allocation5 + $0x1780] ss:$16 sps:$4 sm:$0xff]   ;;  %v8762_v33 = vld [vmem:[#allocation5 + $0x1788] ss:$16 sps:$4 sm:$0xff]  }
 0x35a   :  { %5262 = vmatprep.subr.bf16.mxu0 %v8677_v34  ;;  %5754 = vmatprep.subr.bf16.mxu1 %v8680_v35  ;;  %v8767_v34 = vld [vmem:[#allocation5 + $0x17a4] ss:$16 sps:$4 sm:$0xff]   ;;  %v8770_v35 = vld [vmem:[#allocation5 + $0x17ac] ss:$16 sps:$4 sm:$0xff]  }
 0x35d   :  { %5263 = vmatpush1.bf16.msra.mxu0 %v8675_v36  ;;  %5755 = vmatpush1.bf16.msra.mxu1 %v8678_v37  ;;  %v8765_v36 = vld [vmem:[#allocation5 + $0x17a0] ss:$16 sps:$4 sm:$0xff]   ;;  %v8768_v37 = vld [vmem:[#allocation5 + $0x17a8] ss:$16 sps:$4 sm:$0xff]  }
 0x35e   :  { %5264 = vmatprep.subr.bf16.mxu0 %v8683_v38  ;;  %5756 = vmatprep.subr.bf16.mxu1 %v8686_v39  ;;  %v8773_v38 = vld [vmem:[#allocation5 + $0x17c4] ss:$16 sps:$4 sm:$0xff]   ;;  %v8776_v39 = vld [vmem:[#allocation5 + $0x17cc] ss:$16 sps:$4 sm:$0xff]  }
 0x361   :  { %5265 = vmatpush1.bf16.msra.mxu0 %v8681_v40  ;;  %5757 = vmatpush1.bf16.msra.mxu1 %v8684_v41  ;;  %v8771_v40 = vld [vmem:[#allocation5 + $0x17c0] ss:$16 sps:$4 sm:$0xff]   ;;  %v8774_v41 = vld [vmem:[#allocation5 + $0x17c8] ss:$16 sps:$4 sm:$0xff]  }
 0x362   :  { %5275 = vmatprep.subr.bf16.mxu0 %v8689_v43  ;;  %5767 = vmatprep.subr.bf16.mxu1 %v8692_v44  ;;  %v8782_v43 = vld [vmem:[#allocation5 + $0x17ec] ss:$16 sps:$4 sm:$0xff]   ;;  %v8777_v44 = vld [vmem:[#allocation5 + $0x17e0] ss:$16 sps:$4 sm:$0xff]  }
 0x364   :  { %5267 = vmatmul.mubr.bf16.vlgmr.msra.gmra.mrb[0].mxu0 %v190_v45  ;;  %5759 = vmatmul.mubr.bf16.vlgmr.msra.gmra.mrb[0].mxu1 %v190_v45  ;;  %v8780_v45 = vld [vmem:[#allocation5 + $0x17e8] ss:$16 sps:$4 sm:$0xff]  }
 0x365   :  { %5276 = vmatpush1.bf16.msra.mxu0 %v8687_v47  ;;  %5768 = vmatpush1.bf16.msra.mxu1 %v8690_v48  ;;  %v8785_v47 = vld [vmem:[#allocation8 + $0x4] ss:$8 sps:$4 sm:$0xff]   ;;  %v192_v48 = vpack.c.bf16 %v168_v46, %v168_v46 }
 0x366   :  { %5277 = vmatprep.subr.bf16.mxu0 %v8695_v49  ;;  %5769 = vmatprep.subr.bf16.mxu1 %v8698_v50  ;;  %v8783_v49 = vld [vmem:[#allocation8] ss:$8 sps:$4 sm:$0xff]   ;;  %v8788_v50 = vld [vmem:[#allocation8 + $0x14] ss:$8 sps:$4 sm:$0xff]  }
 0x367   :  { %5307 = vmatprep.mubr.bf16.mxu0 %v193_v51  ;;  %5799 = vmatprep.mubr.bf16.mxu1 %v193_v51  ;;  %v8786_v51 = vld [vmem:[#allocation8 + $0x10] ss:$8 sps:$4 sm:$0xff]  }
 0x369   :  { %5278 = vmatpush1.bf16.msra.mxu0 %v8693_v52  ;;  %5770 = vmatpush1.bf16.msra.mxu1 %v8696_v53  ;;  %v8791_v52 = vld [vmem:[#allocation8 + $0x24] ss:$8 sps:$4 sm:$0xff]   ;;  %v8789_v53 = vld [vmem:[#allocation8 + $0x20] ss:$8 sps:$4 sm:$0xff]  }
 0x36a   :  { %5279 = vmatprep.subr.bf16.mxu0 %v8701_v54  ;;  %5771 = vmatprep.subr.bf16.mxu1 %v8704_v55  ;;  %v8794_v54 = vld [vmem:[#allocation8 + $0x34] ss:$8 sps:$4 sm:$0xff]   ;;  %v8792_v55 = vld [vmem:[#allocation8 + $0x30] ss:$8 sps:$4 sm:$0xff]  }
 0x36d   :  { %5280 = vmatpush1.bf16.msra.mxu0 %v8699_v56  ;;  %5772 = vmatpush1.bf16.msra.mxu1 %v8702_v57  ;;  %v8797_v56 = vld [vmem:[#allocation8 + $0x44] ss:$8 sps:$4 sm:$0xff]   ;;  %v8795_v57 = vld [vmem:[#allocation8 + $0x40] ss:$8 sps:$4 sm:$0xff]  }
 0x36e   :  { %5281 = vmatprep.subr.bf16.mxu0 %v8707_v58  ;;  %5773 = vmatprep.subr.bf16.mxu1 %v8710_v59  ;;  %v8800_v58 = vld [vmem:[#allocation8 + $0x54] ss:$8 sps:$4 sm:$0xff]   ;;  %v8798_v59 = vld [vmem:[#allocation8 + $0x50] ss:$8 sps:$4 sm:$0xff]  }
 0x371   :  { %5282 = vmatpush1.bf16.msra.mxu0 %v8705_v60  ;;  %5774 = vmatpush1.bf16.msra.mxu1 %v8708_v61  ;;  %v8803_v60 = vld [vmem:[#allocation8 + $0x64] ss:$8 sps:$4 sm:$0xff]   ;;  %v8801_v61 = vld [vmem:[#allocation8 + $0x60] ss:$8 sps:$4 sm:$0xff]  }
 0x372   :  { %5283 = vmatprep.subr.bf16.mxu0 %v8713_v62  ;;  %5775 = vmatprep.subr.bf16.mxu1 %v8716_v63  ;;  %v8806_v62 = vld [vmem:[#allocation8 + $0x74] ss:$8 sps:$4 sm:$0xff]   ;;  %v8804_v63 = vld [vmem:[#allocation8 + $0x70] ss:$8 sps:$4 sm:$0xff]  }
 0x375   :  { %5284 = vmatpush1.bf16.msra.mxu0 %v8711_v0  ;;  %5776 = vmatpush1.bf16.msra.mxu1 %v8714_v1  ;;  %v8809_v0 = vld [vmem:[#allocation8 + $0x84] ss:$8 sps:$4 sm:$0xff]   ;;  %v8807_v1 = vld [vmem:[#allocation8 + $0x80] ss:$8 sps:$4 sm:$0xff]  }
 0x376   :  { %5285 = vmatprep.subr.bf16.mxu0 %v8719_v2  ;;  %5777 = vmatprep.subr.bf16.mxu1 %v8722_v3  ;;  %v8812_v2 = vld [vmem:[#allocation8 + $0x94] ss:$8 sps:$4 sm:$0xff]   ;;  %v8810_v3 = vld [vmem:[#allocation8 + $0x90] ss:$8 sps:$4 sm:$0xff]  }
 0x379   :  { %5286 = vmatpush1.bf16.msra.mxu0 %v8717_v4  ;;  %5778 = vmatpush1.bf16.msra.mxu1 %v8720_v5  ;;  %v8815_v4 = vld [vmem:[#allocation8 + $0xa4] ss:$8 sps:$4 sm:$0xff]   ;;  %v8813_v5 = vld [vmem:[#allocation8 + $0xa0] ss:$8 sps:$4 sm:$0xff]  }
 0x37a   :  { %5287 = vmatprep.subr.bf16.mxu0 %v8725_v6  ;;  %5779 = vmatprep.subr.bf16.mxu1 %v8728_v7  ;;  %v8818_v6 = vld [vmem:[#allocation8 + $0xb4] ss:$8 sps:$4 sm:$0xff]   ;;  %v8816_v7 = vld [vmem:[#allocation8 + $0xb0] ss:$8 sps:$4 sm:$0xff]  }
 0x37d   :  { %5288 = vmatpush1.bf16.msra.mxu0 %v8723_v8  ;;  %5780 = vmatpush1.bf16.msra.mxu1 %v8726_v9  ;;  %v8821_v8 = vld [vmem:[#allocation8 + $0xc4] ss:$8 sps:$4 sm:$0xff]   ;;  %v8819_v9 = vld [vmem:[#allocation8 + $0xc0] ss:$8 sps:$4 sm:$0xff]  }
 0x37e   :  { %5289 = vmatprep.subr.bf16.mxu0 %v8731_v10  ;;  %5781 = vmatprep.subr.bf16.mxu1 %v8734_v11  ;;  %v8824_v10 = vld [vmem:[#allocation8 + $0xd4] ss:$8 sps:$4 sm:$0xff]   ;;  %v8822_v11 = vld [vmem:[#allocation8 + $0xd0] ss:$8 sps:$4 sm:$0xff]  }
 0x381   :  { %5290 = vmatpush1.bf16.msra.mxu0 %v8729_v12  ;;  %5782 = vmatpush1.bf16.msra.mxu1 %v8732_v13  ;;  %v8827_v12 = vld [vmem:[#allocation8 + $0xe4] ss:$8 sps:$4 sm:$0xff]   ;;  %v8825_v13 = vld [vmem:[#allocation8 + $0xe0] ss:$8 sps:$4 sm:$0xff]  }
 0x382   :  { %5291 = vmatprep.subr.bf16.mxu0 %v8737_v14  ;;  %5783 = vmatprep.subr.bf16.mxu1 %v8740_v15  ;;  %v8830_v14 = vld [vmem:[#allocation8 + $0xf4] ss:$8 sps:$4 sm:$0xff]   ;;  %v8828_v15 = vld [vmem:[#allocation8 + $0xf0] ss:$8 sps:$4 sm:$0xff]  }
 0x385   :  { %5292 = vmatpush1.bf16.msra.mxu0 %v8735_v16  ;;  %5784 = vmatpush1.bf16.msra.mxu1 %v8738_v17  ;;  %v8833_v16 = vld [vmem:[#allocation8 + $0x104] ss:$8 sps:$4 sm:$0xff]  }
 0x386   :  { %5293 = vmatprep.subr.bf16.mxu0 %v8743_v18  ;;  %5785 = vmatprep.subr.bf16.mxu1 %v8746_v19  ;;  %v8879_v17 = vld [vmem:[#allocation11 + $0x40] sm:$0xff]   ;;  %v8881_v19 = vld [vmem:[#allocation11 + $0x48] sm:$0xff]  }
 0x387   :  { %v8880_v18 = vld [vmem:[#allocation11] sm:$0xff]  }
 0x389   :  { %5294 = vmatpush1.bf16.msra.mxu0 %v8741_v20  ;;  %5786 = vmatpush1.bf16.msra.mxu1 %v8744_v21  ;;  %v8882_v20 = vld [vmem:[#allocation11 + $0x8] sm:$0xff]   ;;  %v8883_v21 = vld [vmem:[#allocation11 + $0x50] sm:$0xff]  }
 0x38a   :  { %5295 = vmatprep.subr.bf16.mxu0 %v8749_v22  ;;  %5787 = vmatprep.subr.bf16.mxu1 %v8752_v23  ;;  %v8884_v22 = vld [vmem:[#allocation11 + $0x10] sm:$0xff]   ;;  %v8885_v23 = vld [vmem:[#allocation11 + $0x58] sm:$0xff]  }
 0x38d   :  { %5296 = vmatpush1.bf16.msra.mxu0 %v8747_v24  ;;  %5788 = vmatpush1.bf16.msra.mxu1 %v8750_v25  ;;  %v8886_v24 = vld [vmem:[#allocation11 + $0x18] sm:$0xff]   ;;  %v8887_v25 = vld [vmem:[#allocation11 + $0x60] sm:$0xff]  }
 0x38e   :  { %5297 = vmatprep.subr.bf16.mxu0 %v8755_v26  ;;  %5789 = vmatprep.subr.bf16.mxu1 %v8758_v27  ;;  %v8888_v26 = vld [vmem:[#allocation11 + $0x20] sm:$0xff]   ;;  %v8889_v27 = vld [vmem:[#allocation11 + $0x68] sm:$0xff]  }
 0x391   :  { %5298 = vmatpush1.bf16.msra.mxu0 %v8753_v28  ;;  %5790 = vmatpush1.bf16.msra.mxu1 %v8756_v29  ;;  %v8890_v28 = vld [vmem:[#allocation11 + $0x28] sm:$0xff]   ;;  %v964_v29 = vlaneseq }
 0x392   :  { %5299 = vmatprep.subr.bf16.mxu0 %v8761_v30  ;;  %5791 = vmatprep.subr.bf16.mxu1 %v8764_v31 }
 0x393   :  { %v9311_v30 = vshrl.u32 %v964_v29, 7  ;;  %v8893_v29 = vld [vmem:[#allocation11 + $0x78] sm:$0xff]  }
 0x395   :  { %5300 = vmatpush1.bf16.msra.mxu0 %v8759_v32  ;;  %5792 = vmatpush1.bf16.msra.mxu1 %v8762_v33  ;;  %v966_v31 = vsub.s32 0, %v9311_v30  ;;  %v9314_v32 = vld [vmem:[#allocation7] sm:$0xf]  ;;  %v970_v33 = vsub.s32 1, %v9311_v30 }
 0x396   :  { %5301 = vmatprep.subr.bf16.mxu0 %v8767_v34  ;;  %5793 = vmatprep.subr.bf16.mxu1 %v8770_v35  ;;  %v978_v34 = vsub.s32 3, %v9311_v30 }
 0x397   :  { %v967_v35 = vrot.slane %v9314_v32, %v966_v31 }
 0x399   :  { %5302 = vmatpush1.bf16.msra.mxu0 %v8765_v36  ;;  %5794 = vmatpush1.bf16.msra.mxu1 %v8768_v37  ;;  %v971_v36 = vrot.slane %v9314_v32, %v970_v33  ;;  %v979_v37 = vrot.slane %v9314_v32, %v978_v34  ;;  %v9150_v34 = vmov 0.0  }
 0x39a   :  { %5303 = vmatprep.subr.bf16.mxu0 %v8773_v38  ;;  %5795 = vmatprep.subr.bf16.mxu1 %v8776_v39 }
 0x39d   :  { %5304 = vmatpush1.bf16.msra.mxu0 %v8771_v40  ;;  %5796 = vmatpush1.bf16.msra.mxu1 %v8774_v41 }
 0x39e   :  { %5305 = vmatprep.subr.bf16.mxu0 %v8779_v42  ;;  %5797 = vmatprep.subr.bf16.mxu1 %v8782_v43 }
 0x3a1   :  { %5306 = vmatpush1.bf16.msra.mxu0 %v8777_v44  ;;  %5798 = vmatpush1.bf16.msra.mxu1 %v8780_v45 }
 0x3a2   :  { %6212 = vmatprep.subr.bf16.mxu0 %v8785_v47  ;;  %7464 = vmatprep.subr.bf16.mxu1 %v8879_v17  ;;  %v8872_v17 = vld [vmem:[#allocation8 + $0x1d4] ss:$8 sps:$4 sm:$0xff]  }
 0x3a4   :  { %5308 = vmatmul.mubr.bf16.vlgmr.msra.gmra.mrb[0].mxu0 %v192_v48  ;;  %5800 = vmatmul.mubr.bf16.vlgmr.msra.gmra.mrb[0].mxu1 %v192_v48 }
 0x3a5   :  { %6213 = vmatpush1.bf16.msra.mxu0 %v8783_v49  ;;  %7465 = vmatpush3.bf16.msra.mxu1 %v8880_v18  ;;  %v8870_v18 = vld [vmem:[#allocation8 + $0x1d0] ss:$8 sps:$4 sm:$0xff]  }
 0x3a6   :  { %6214 = vmatprep.subr.bf16.mxu0 %v8788_v50  ;;  %7466 = vmatprep.subr.bf16.mxu1 %v8881_v19 }
 0x3a9   :  { %6215 = vmatpush1.bf16.msra.mxu0 %v8786_v51  ;;  %7467 = vmatpush3.bf16.msra.mxu1 %v8882_v20  ;;  %v8875_v20 = vld [vmem:[#allocation8 + $0x1e4] ss:$8 sps:$4 sm:$0xff]  }
 0x3aa   :  { %6216 = vmatprep.subr.bf16.mxu0 %v8791_v52  ;;  %7468 = vmatprep.subr.bf16.mxu1 %v8883_v21  ;;  %v8873_v21 = vld [vmem:[#allocation8 + $0x1e0] ss:$8 sps:$4 sm:$0xff]  }
 0x3ad   :  { %6217 = vmatpush1.bf16.msra.mxu0 %v8789_v53  ;;  %7469 = vmatpush3.bf16.msra.mxu1 %v8884_v22  ;;  %v8831_v53 = vld [vmem:[#allocation8 + $0x100] ss:$8 sps:$4 sm:$0xff]  }
 0x3ae   :  { %6218 = vmatprep.subr.bf16.mxu0 %v8794_v54  ;;  %7470 = vmatprep.subr.bf16.mxu1 %v8885_v23  ;;  %v8878_v23 = vld [vmem:[#allocation8 + $0x1f4] ss:$8 sps:$4 sm:$0xff]  }
 0x3b1   :  { %6219 = vmatpush1.bf16.msra.mxu0 %v8792_v55  ;;  %7471 = vmatpush3.bf16.msra.mxu1 %v8886_v24  ;;  %v8836_v55 = vld [vmem:[#allocation8 + $0x114] ss:$8 sps:$4 sm:$0xff]   ;;  %v8876_v24 = vld [vmem:[#allocation8 + $0x1f0] ss:$8 sps:$4 sm:$0xff]  }
 0x3b2   :  { %6220 = vmatprep.subr.bf16.mxu0 %v8797_v56  ;;  %7472 = vmatprep.subr.bf16.mxu1 %v8887_v25 }
 0x3b5   :  { %6221 = vmatpush1.bf16.msra.mxu0 %v8795_v57  ;;  %7473 = vmatpush3.bf16.msra.mxu1 %v8888_v26  ;;  %v8834_v57 = vld [vmem:[#allocation8 + $0x110] ss:$8 sps:$4 sm:$0xff]  }
 0x3b6   :  { %6222 = vmatprep.subr.bf16.mxu0 %v8800_v58  ;;  %7474 = vmatprep.subr.bf16.mxu1 %v8889_v27  ;;  %v8839_v58 = vld [vmem:[#allocation8 + $0x124] ss:$8 sps:$4 sm:$0xff]   ;;  %v8891_v27 = vld [vmem:[#allocation11 + $0x70] sm:$0xff]  }
 0x3b9   :  { %6223 = vmatpush1.bf16.msra.mxu0 %v8798_v59  ;;  %7475 = vmatpush3.bf16.msra.mxu1 %v8890_v28  ;;  %v8837_v59 = vld [vmem:[#allocation8 + $0x120] ss:$8 sps:$4 sm:$0xff]   ;;  %v8892_v28 = vld [vmem:[#allocation11 + $0x30] sm:$0xff]  }
 0x3ba   :  { %6224 = vmatprep.subr.bf16.mxu0 %v8803_v60  ;;  %v8842_v60 = vld [vmem:[#allocation8 + $0x134] ss:$8 sps:$4 sm:$0xff]   ;;  %7476 = vmatprep.subr.bf16.mxu1 %v8891_v27 }
 0x3bd   :  { %6225 = vmatpush1.bf16.msra.mxu0 %v8801_v61  ;;  %v8840_v61 = vld [vmem:[#allocation8 + $0x130] ss:$8 sps:$4 sm:$0xff]   ;;  %7477 = vmatpush3.bf16.msra.mxu1 %v8892_v28 }
 0x3be   :  { %6226 = vmatprep.subr.bf16.mxu0 %v8806_v62  ;;  %v8845_v62 = vld [vmem:[#allocation8 + $0x144] ss:$8 sps:$4 sm:$0xff]   ;;  %7478 = vmatprep.subr.bf16.mxu1 %v8893_v29 }
 0x3c1   :  { %6227 = vmatpush1.bf16.msra.mxu0 %v8804_v63  ;;  %v8843_v63 = vld [vmem:[#allocation8 + $0x140] ss:$8 sps:$4 sm:$0xff]  }
 0x3c2   :  { %6228 = vmatprep.subr.bf16.mxu0 %v8809_v0  ;;  %v8848_v0 = vld [vmem:[#allocation8 + $0x154] ss:$8 sps:$4 sm:$0xff]  }
 0x3c5   :  { %6229 = vmatpush1.bf16.msra.mxu0 %v8807_v1  ;;  %v8846_v1 = vld [vmem:[#allocation8 + $0x150] ss:$8 sps:$4 sm:$0xff]  }
 0x3c6   :  { %6230 = vmatprep.subr.bf16.mxu0 %v8812_v2  ;;  %v8851_v2 = vld [vmem:[#allocation8 + $0x164] ss:$8 sps:$4 sm:$0xff]  }
 0x3c9   :  { %6231 = vmatpush1.bf16.msra.mxu0 %v8810_v3  ;;  %v8849_v3 = vld [vmem:[#allocation8 + $0x160] ss:$8 sps:$4 sm:$0xff]  }
 0x3ca   :  { %6232 = vmatprep.subr.bf16.mxu0 %v8815_v4  ;;  %v8854_v4 = vld [vmem:[#allocation8 + $0x174] ss:$8 sps:$4 sm:$0xff]  }
 0x3cd   :  { %6233 = vmatpush1.bf16.msra.mxu0 %v8813_v5  ;;  %v8852_v5 = vld [vmem:[#allocation8 + $0x170] ss:$8 sps:$4 sm:$0xff]  }
 0x3ce   :  { %6234 = vmatprep.subr.bf16.mxu0 %v8818_v6  ;;  %v8857_v6 = vld [vmem:[#allocation8 + $0x184] ss:$8 sps:$4 sm:$0xff]  }
 0x3d1   :  { %6235 = vmatpush1.bf16.msra.mxu0 %v8816_v7  ;;  %v8855_v7 = vld [vmem:[#allocation8 + $0x180] ss:$8 sps:$4 sm:$0xff]  }
 0x3d2   :  { %6236 = vmatprep.subr.bf16.mxu0 %v8821_v8  ;;  %v8860_v8 = vld [vmem:[#allocation8 + $0x194] ss:$8 sps:$4 sm:$0xff]  }
 0x3d5   :  { %6237 = vmatpush1.bf16.msra.mxu0 %v8819_v9  ;;  %v8858_v9 = vld [vmem:[#allocation8 + $0x190] ss:$8 sps:$4 sm:$0xff]  }
 0x3d6   :  { %6238 = vmatprep.subr.bf16.mxu0 %v8824_v10  ;;  %v8863_v10 = vld [vmem:[#allocation8 + $0x1a4] ss:$8 sps:$4 sm:$0xff]  }
 0x3d9   :  { %6239 = vmatpush1.bf16.msra.mxu0 %v8822_v11  ;;  %v8861_v11 = vld [vmem:[#allocation8 + $0x1a0] ss:$8 sps:$4 sm:$0xff]  }
 0x3da   :  { %6240 = vmatprep.subr.bf16.mxu0 %v8827_v12  ;;  %v8866_v12 = vld [vmem:[#allocation8 + $0x1b4] ss:$8 sps:$4 sm:$0xff]  }
 0x3dd   :  { %6241 = vmatpush1.bf16.msra.mxu0 %v8825_v13  ;;  %v8864_v13 = vld [vmem:[#allocation8 + $0x1b0] ss:$8 sps:$4 sm:$0xff]  }
 0x3de   :  { %6242 = vmatprep.subr.bf16.mxu0 %v8830_v14  ;;  %v8869_v14 = vld [vmem:[#allocation8 + $0x1c4] ss:$8 sps:$4 sm:$0xff]  }
 0x3e1   :  { %6243 = vmatpush1.bf16.msra.mxu0 %v8828_v15  ;;  %v8867_v15 = vld [vmem:[#allocation8 + $0x1c0] ss:$8 sps:$4 sm:$0xff]  }
 0x3e2   :  { %6253 = vmatprep.subr.bf16.mxu0 %v8833_v16  ;;  %v974_v16 = vsub.s32 2, %v9311_v30  ;;  %v8898_v30 = vld [vmem:[#allocation14 + $0x18] sm:$0xff]  }
 0x3e4   :  { %v975_v19 = vrot.slane %v9314_v32, %v974_v16  ;;  %v8894_v32 = vld [vmem:[#allocation11 + $0x38] sm:$0xff]  }
 0x3e5   :  { %7479 = vmatpush3.bf16.msra.mxu1 %v8894_v32 }
 0x3e6   :  { %7495 = vmatprep.subr.bf16.mxu1 %v9150_v34 }
 0x477   :  { %v5309_v38 = vpop.f32.mrb[0].mxu0  ;;  %v9325_v39 = vpop.f32.mrb[0].mxu1 }
 0x478   :  { %v7515_v40 = vadd.f32 %v5309_v38, %v967_v35  ;;  %v5311_v41 = vpop.f32.mrb[1].mxu0  ;;  %v5803_v42 = vpop.f32.mrb[1].mxu1  ;;  %v7517_v22 = vadd.f32 %v9325_v39, %v975_v19  ;;  %v5880_v35 = vld [vmem:[#allocation10] sm:$0x3] }
 0x479   :  { %v7516_v43 = vadd.f32 %v5311_v41, %v971_v36  ;;  %v7518_v44 = vadd.f32 %v5803_v42, %v979_v37  ;;  %v5313_v45 = vpop.f32.mrb[2].mxu0  ;;  %v5805_v46 = vpop.f32.mrb[2].mxu1  ;;  %v5885_v36 = vrot.slane %v5880_v35, %v966_v31  ;;  %v5889_v37 = vrot.slane %v5880_v35, %v970_v33  ;;  %v8897_v31 = vld [vmem:[#allocation14 + $0x10] sm:$0xff]   ;;  %v8899_v33 = vld [vmem:[#allocation14 + $0x20] sm:$0xff]  }
 0x47a   :  { %v5808_v47 = vmax.f32 %v7515_v40, 0.0  ;;  %v5314_v48 = vpop.f32.mrb[3].mxu0  ;;  %v5806_v49 = vpop.f32.mrb[3].mxu1  ;;  %v5810_v25 = vmax.f32 %v7517_v22, 0.0 }
 0x47b   :  { %v5809_v50 = vmax.f32 %v7516_v43, 0.0  ;;  %v5811_v51 = vmax.f32 %v7518_v44, 0.0  ;;  %v8896_v49 = vld [vmem:[#allocation14 + $0x8] sm:$0xff]  }
 0x47c   :  { %v5812_v54 = vpack.c.bf16 %v5808_v47, %v5808_v47  ;;  %v5814_v26 = vpack.c.bf16 %v5810_v25, %v5810_v25  ;;  %v8895_v47 = vld [vmem:[#allocation14] sm:$0xff]  }
 0x47d   :  { %v5813_v52 = vpack.c.bf16 %v5809_v50, %v5809_v50  ;;  %v5815_v56 = vpack.c.bf16 %v5811_v51, %v5811_v51  ;;  %v8900_v50 = vld [vmem:[#allocation14 + $0x28] sm:$0xff]   ;;  %v8901_v51 = vld [vmem:[#allocation14 + $0x30] sm:$0xff]  }
 0x47f   :  { %6244 = vmatprep.mubr.bf16.mxu0 %v5813_v52  ;;  %v8902_v52 = vld [vmem:[#allocation14 + $0x38] sm:$0xff]  }
 0x480   :  { %6245 = vmatmul.mubr.bf16.vlgmr.msra.gmra.mrb[4].mxu0 %v5812_v54  ;;  %v7438_v54 = vld [vmem:[#allocation13] ss:$0 sm:$0xff] }
 0x481   :  { %6254 = vmatpush1.bf16.msra.mxu0 %v8831_v53  ;;  %6285 = vmatprep.mubr.bf16.mxu0 %v5815_v56 }
 0x482   :  { %6255 = vmatprep.subr.bf16.mxu0 %v8836_v55 }
 0x485   :  { %6256 = vmatpush1.bf16.msra.mxu0 %v8834_v57 }
 0x486   :  { %6257 = vmatprep.subr.bf16.mxu0 %v8839_v58 }
 0x489   :  { %6258 = vmatpush1.bf16.msra.mxu0 %v8837_v59 }
 0x48a   :  { %6259 = vmatprep.subr.bf16.mxu0 %v8842_v60 }
 0x48d   :  { %6260 = vmatpush1.bf16.msra.mxu0 %v8840_v61 }
 0x48e   :  { %6261 = vmatprep.subr.bf16.mxu0 %v8845_v62  ;;  %v7455_v62 = vld [vmem:[#allocation16] ss:$0 sm:$0xff] }
 0x491   :  { %6262 = vmatpush1.bf16.msra.mxu0 %v8843_v63 }
 0x492   :  { %6263 = vmatprep.subr.bf16.mxu0 %v8848_v0 }
 0x495   :  { %6264 = vmatpush1.bf16.msra.mxu0 %v8846_v1 }
 0x496   :  { %6265 = vmatprep.subr.bf16.mxu0 %v8851_v2 }
 0x499   :  { %6266 = vmatpush1.bf16.msra.mxu0 %v8849_v3 }
 0x49a   :  { %6267 = vmatprep.subr.bf16.mxu0 %v8854_v4 }
 0x49d   :  { %6268 = vmatpush1.bf16.msra.mxu0 %v8852_v5 }
 0x49e   :  { %6269 = vmatprep.subr.bf16.mxu0 %v8857_v6 }
 0x4a1   :  { %6270 = vmatpush1.bf16.msra.mxu0 %v8855_v7 }
 0x4a2   :  { %6271 = vmatprep.subr.bf16.mxu0 %v8860_v8 }
 0x4a5   :  { %6272 = vmatpush1.bf16.msra.mxu0 %v8858_v9 }
 0x4a6   :  { %6273 = vmatprep.subr.bf16.mxu0 %v8863_v10 }
 0x4a9   :  { %6274 = vmatpush1.bf16.msra.mxu0 %v8861_v11 }
 0x4aa   :  { %6275 = vmatprep.subr.bf16.mxu0 %v8866_v12 }
 0x4ad   :  { %6276 = vmatpush1.bf16.msra.mxu0 %v8864_v13 }
 0x4ae   :  { %6277 = vmatprep.subr.bf16.mxu0 %v8869_v14 }
 0x4b1   :  { %6278 = vmatpush1.bf16.msra.mxu0 %v8867_v15 }
 0x4b2   :  { %6279 = vmatprep.subr.bf16.mxu0 %v8872_v17 }
 0x4b5   :  { %6280 = vmatpush1.bf16.msra.mxu0 %v8870_v18 }
 0x4b6   :  { %6281 = vmatprep.subr.bf16.mxu0 %v8875_v20 }
 0x4b9   :  { %6282 = vmatpush1.bf16.msra.mxu0 %v8873_v21 }
 0x4ba   :  { %6283 = vmatprep.subr.bf16.mxu0 %v8878_v23 }
 0x4bd   :  { %6284 = vmatpush1.bf16.msra.mxu0 %v8876_v24 }
 0x4c0   :  { %6286 = vmatmul.mubr.bf16.vlgmr.msra.gmra.mrb[4].mxu0 %v5814_v26 }
 0x593   :  { %v6287_v38 = vpop.f32.mrb[4].mxu0 }
 0x594   :  { %v7519_v39 = vadd.f32 %v6287_v38, %v5885_v36  ;;  %v6289_v40 = vpop.f32.mrb[5].mxu0 }
 0x595   :  { %v7520_v41 = vadd.f32 %v6289_v40, %v5889_v37  ;;  %v6291_v42 = vpop.f32.mrb[6].mxu0 }
 0x596   :  { %v6294_v43 = vmax.f32 %v7519_v39, 0.0  ;;  %v6292_v44 = vpop.f32.mrb[7].mxu0 }
 0x597   :  { %v6295_v45 = vmax.f32 %v7520_v41, 0.0 }
 0x598   :  { %v6296_v48 = vpack.c.bf16 %v6294_v43, %v6294_v43 }
 0x599   :  { %v6297_v46 = vpack.c.bf16 %v6295_v45, %v6295_v45 }
 0x59b   :  { %6465 = vmatprep.mubr.bf16.mxu1 %v6297_v46 }
 0x59c   :  { %6466 = vmatmul.mubr.bf16.vlgmr.msra.gmra.mrb[4].mxu1 %v6296_v48 }
 0x59d   :  { %7496 = vmatpush3.bf16.msra.mxu1 %v8895_v47  ;;  %7511 = vmatprep.mubr.msk.bf16.mxu1 %vm9151_vm0, %v9150_v34 }
 0x59e   :  { %7497 = vmatprep.subr.bf16.mxu1 %v9150_v34 }
 0x5a1   :  { %7498 = vmatpush3.bf16.msra.mxu1 %v8896_v49 }
 0x5a2   :  { %7499 = vmatprep.subr.bf16.mxu1 %v9150_v34 }
 0x5a5   :  { %7500 = vmatpush3.bf16.msra.mxu1 %v8897_v31 }
 0x5a6   :  { %7501 = vmatprep.subr.bf16.mxu1 %v9150_v34 }
 0x5a9   :  { %7502 = vmatpush3.bf16.msra.mxu1 %v8898_v30 }
 0x5aa   :  { %7503 = vmatprep.subr.bf16.mxu1 %v9150_v34 }
 0x5ad   :  { %7504 = vmatpush3.bf16.msra.mxu1 %v8899_v33 }
 0x5ae   :  { %7505 = vmatprep.subr.bf16.mxu1 %v9150_v34 }
 0x5b1   :  { %7506 = vmatpush3.bf16.msra.mxu1 %v8900_v50 }
 0x5b2   :  { %7507 = vmatprep.subr.bf16.mxu1 %v9150_v34 }
 0x5b5   :  { %7508 = vmatpush3.bf16.msra.mxu1 %v8901_v51 }
 0x5b6   :  { %7509 = vmatprep.subr.bf16.mxu1 %v9150_v34 }
 0x5b9   :  { %7510 = vmatpush3.bf16.msra.mxu1 %v8902_v52 }
 0x66f   :  { %v7480_v53 = vpop.f32.mrb[4].mxu1 }
 0x670   :  { %v7481_v55 = vpop.f32.mrb[5].mxu1 }
 0x671   :  { %v7482_v56 = vadd.f32 %v7481_v55, %v7480_v53  ;;  %v7483_v57 = vpop.f32.mrb[6].mxu1 }
 0x672   :  { %v7484_v58 = vpop.f32.mrb[7].mxu1 }
 0x673   :  { %v6468_v59 = vadd.f32 %v7482_v56, %v7438_v54 }
 0x675   :  { %v6473_v60 = vmax.f32 %v6468_v59, 0.0 }
 0x677   :  { %v6474_v61 = vpack.c.bf16 %v6473_v60, %v6473_v60 }
 0x679   :  { %7512 = vmatmul.mubr.bf16.vlgmr.msra.gmra.mrb[8].mxu1 %v6474_v61 }
 0x74c   :  { %v6580_v63 = vpop.f32.mrb[8].mxu1 }
 0x74d   :  { %v6581_v0 = vadd.f32 %v7455_v62, %v6580_v63  ;;  %v7513_v1 = vpop.f32.mrb[9].mxu1 }
 0x74e   :  { %v6583_v2 = vpop.f32.mrb[10].mxu1 }
 0x74f   :  { %6586 = vst [vmem:[#allocation17] sm:$0xff] %v6581_v0  ;;  %v7514_v3 = vpop.f32.mrb[11].mxu1 }
 0x750   :  { %9112 = shalt.err (!%p9109_p6)
}
 0x751   :  { %s9113_s7 = scalar_lea.hbm %s9355_s9, 128 }
 0x752   :  { %p9114_p7 = scmp.ne.s32.totalorder %s9355_s9, %s9113_s7  ;;  %p9117_p8 = scmp.lt.u32.totalorder %s9113_s7, %s9355_s9 }
 0x754   :  { %p9119_p9 = pnand %p9117_p8, %p9114_p7 }
 0x756   :  { %9122 = shalt.err (!%p9119_p9)
}
 0x757   :  { %6596 = dma.vmem_to_hbm [thread:$0]  %s6594_s25, 128, %s9355_s9, [#allocation4]  }
 0x758   :  { %9133 = dma.done.wait [#allocation4], 128  }
 0x759   :  { %9134 = vsyncadd [#allocation4], 4294967168 }
 0x75a   :  { %6600 = vsyncpa [#allocation3], 1 }
 0x75b   :  { %6601 = vsyncpa [#allocation6], 1 }
 0x75c   :  { %6602 = vsyncpa [#allocation9], 1 }
 0x75d   :  { %6603 = vsyncpa [#allocation12], 1 }
 0x75e   :  { %6604 = vsyncpa [#allocation15], 1 }
 0x75f   :  { %6605 = vsyncpa [#allocation4], 1 }

</bundles_post_ra>
